<compile_context>
chip_gen: v5e
topology: v5e:2x2
jax: 0.10.0
libtpu: 0.0.40
codegen_flags: <defaults>
</compile_context>

<pallas_src>
import functools

import jax
import jax.numpy as jnp
from jax import lax
from jax.experimental import pallas as pl
from jax.experimental.pallas import tpu as pltpu


def _vecint_fused_kernel(vec_ref, out_ref, src_ref, *, A, Bd, Cd, k, scale):
    """One (batch, step, slab-row-tile) grid point of fused scaling-and-squaring.

    vec_ref : (1, 3A, K) f32  input field, DMA'd once per batch element.
    out_ref : (1, 3A, K) f32  VMEM-resident working field v_s for this batch
                              element; doubles as the HBM output block (written
                              back to HBM once, when the batch index changes).
    src_ref : (3A, K)   bf16  frozen snapshot of v_s, the MXU LHS for this step.

    Row c*A + z holds channel c of slab z; columns index the (Bd, Cd) plane.
    """
    K = Bd * Cd
    s = pl.program_id(1)          # squaring step
    t = pl.program_id(2)          # slab-row tile (k rows per tile)

    fld = out_ref.at[0]           # (3A, K) f32 view of the resident field

    # ---- per-batch / per-step initialisation ---------------------------------
    @pl.when(t == 0)
    def _():
        @pl.when(s == 0)
        def _():
            # v_0 = vec / 2**nsteps, applied in-kernel on the resident block.
            fld[...] = vec_ref[0] * scale
        # Freeze v_s once per step as the bf16 MXU operand (one cast per step,
        # shared by every tile).  The f32 field keeps full precision for the
        # flow / additive terms of v_{s+1} = v_s + warp(v_s, v_s).
        src_ref[...] = fld[...].astype(jnp.bfloat16)

    # ---- quantities shared by all k slab rows of this tile --------------------
    src = src_ref[...]                                              # (3A, K) bf16
    lin = lax.broadcasted_iota(jnp.int32, (1, K), 1).astype(jnp.float32)
    # floor((i+0.5)/Cd) == i // Cd exactly: any VMEM-resident field has < 2**23
    # voxels, so the f32 arithmetic below is exact.
    y_o = jnp.floor((lin + 0.5) / Cd)                               # (1, K)
    x_o = lin - y_o * Cd                                            # (1, K)
    ia = lax.broadcasted_iota(jnp.int32, (A, K), 0).astype(jnp.float32)
    ib = lax.broadcasted_iota(jnp.int32, (Bd, K), 0).astype(jnp.float32)
    ic = lax.broadcasted_iota(jnp.int32, (Cd, K), 0).astype(jnp.float32)

    # ---- one in-plane MXU contraction per slab row (static unroll, k <= 8) ----
    for zr in range(k):
        g = t * k + zr                       # global output slab row
        # v_s at this row's voxels: read BEFORE this row is overwritten (rows of
        # step s are only written at their own iteration, so this is exact f32 v_s).
        fz = fld[pl.ds(0 * A + g, 1), :]                            # (1, K)
        fy = fld[pl.ds(1 * A + g, 1), :]
        fx = fld[pl.ds(2 * A + g, 1), :]

        # sampling positions in voxel units (channel 0 -> slab, 1 -> Bd, 2 -> Cd)
        pz = fz + g.astype(jnp.float32)
        py = fy + y_o
        px = fx + x_o

        # Separable trilinear hat weights; relu(1 - |i - p|) with zero outside
        # the volume reproduces grid_sample('bilinear', 'zeros', align_corners).
        wz = jnp.maximum(0.0, 1.0 - jnp.abs(ia - pz))               # (A, K)  f32
        wy = jnp.maximum(0.0, 1.0 - jnp.abs(ib - py)).astype(jnp.bfloat16)
        wx = jnp.maximum(0.0, 1.0 - jnp.abs(ic - px)).astype(jnp.bfloat16)
        # fused (Bd*Cd, K) in-plane weight tile, bf16 on the MXU
        wyx = (wy[:, None, :] * wx[None, :, :]).reshape(Bd * Cd, K)

        # MXU: contract over the in-plane source voxels, bf16 x bf16 -> f32 acc.
        m = jnp.dot(src, wyx, preferred_element_type=jnp.float32)   # (3A, K) f32
        # VPU: fold the slab-axis hat weights, single fused mul + reduction.
        warped = jnp.sum(m.reshape(3, A, K) * wz[None, :, :], axis=1)   # (3, K)

        # v_{s+1} at this row, written back into the resident field (f32).
        fld[pl.ds(0 * A + g, 1), :] = fz + warped[0:1, :]
        fld[pl.ds(1 * A + g, 1), :] = fy + warped[1:2, :]
        fld[pl.ds(2 * A + g, 1), :] = fx + warped[2:3, :]


def _permute_field(v, perm):
    """Relabel the spatial axes (and matching flow channels) of (N,3,S0,S1,S2)."""
    v = v[:, list(perm)]
    return jnp.transpose(v, (0, 1) + tuple(2 + p for p in perm))


def _vmem_capacity_bytes():
    try:
        cap = int(pltpu.get_tpu_info().vmem_capacity_bytes)
        if cap > 0:
            return cap
    except Exception:
        pass
    return 64 * 1024 * 1024      # conservative default (v7x has the smallest VMEM)


def vecint(vec, nsteps=7):
    """Pallas TPU VecInt.forward for an (N, 3, D, H, W) float32 velocity field."""
    vec = jnp.asarray(vec, jnp.float32)
    N, C, D, H, W = vec.shape
    assert C == 3, "VecInt expects a 3-channel (z, y, x) 3D flow field"
    if nsteps == 0:
        return vec               # scale = 1/2**0 = 1 and no squaring steps

    # Slab axis = largest spatial dim (wrapper-side axis/channel relabeling):
    # raises the MXU LHS row count 3*A and shrinks the (K, K) weight tile.
    spatial = (D, H, W)
    slab = int(max(range(3), key=lambda i: spatial[i]))
    perm = (slab,) + tuple(i for i in range(3) if i != slab)
    inv = tuple(perm.index(i) for i in range(3))
    A, Bd, Cd = (spatial[p] for p in perm)
    K = Bd * Cd

    # --- generation-aware VMEM budgeting (v5e/v6e: 128 MiB, v7x: 64 MiB) -------
    cap = _vmem_capacity_bytes()
    budget = cap - 8 * 1024 * 1024
    field = 3 * A * K * 4
    temps = (4 * K * K                        # bf16 (K,K) weight tile + build temp
             + 2 * field                      # MXU result / z-fold temporaries
             + 8 * (A + Bd + Cd) * K * 4)     # per-axis weights, iotas, row slices
    ws = 4 * field + field // 2 + temps + (2 << 20)   # in(x2) + out(x2) + bf16 mirror
    if ws > budget:
        # TODO(synk): per-step fallback (smaller residency) + chunked in-plane
        # contraction for very large volumes.
        raise NotImplementedError(
            f"VecInt field {(D, H, W)} needs ~{ws >> 20} MiB VMEM "
            f"(> {budget >> 20} MiB available on this generation)")
    vmem_limit = int(min(budget, max(2 * ws, 32 * 1024 * 1024)))

    # Slab rows per grid step: largest divisor of A up to 8 (bounds the static
    # unroll); tiling never breaks the (8,128) rule because all blocks are
    # full-extent in their last two dims.
    k = max(d for d in range(1, min(A, 8) + 1) if A % d == 0)
    grid = (N, nsteps, A // k)
    scale = 1.0 / (2.0 ** nsteps)

    kernel = functools.partial(_vecint_fused_kernel,
                               A=A, Bd=Bd, Cd=Cd, k=k, scale=scale)
    vp = _permute_field(vec, perm).reshape(N, 3 * A, K)

    out = pl.pallas_call(
        kernel,
        out_shape=jax.ShapeDtypeStruct((N, 3 * A, K), jnp.float32),
        grid=grid,
        in_specs=[
            # Whole per-batch field; block index is invariant in (step, tile), so
            # it is DMA'd from HBM exactly once per batch element.
            pl.BlockSpec((1, 3 * A, K), lambda n, s, t: (n, 0, 0)),
        ],
        # The output block IS the VMEM-resident working field for all nsteps of
        # one batch element; HBM sees exactly one write per batch element.
        out_specs=pl.BlockSpec((1, 3 * A, K), lambda n, s, t: (n, 0, 0)),
        scratch_shapes=[pltpu.VMEM((3 * A, K), jnp.bfloat16)],
        compiler_params=pltpu.CompilerParams(
            # Batch axis feeds v7x's two TensorCores (test uses N=2); the step and
            # tile axes carry the sequential dependence of scaling-and-squaring.
            dimension_semantics=("parallel", "arbitrary", "arbitrary"),
            vmem_limit_bytes=vmem_limit),
    )(vp)

    return _permute_field(out.reshape(N, 3, A, Bd, Cd), inv)


# ----------------------------------------------------------------------------------
# Pure-JAX reference (gather-based grid_sample port of SpatialTransformer_block),
# used only to validate the end-to-end channel mapping / interpolation semantics.
# ----------------------------------------------------------------------------------
def _warp_reference(src, flow):
    N, C, D, H, W = src.shape
    gz, gy, gx = jnp.meshgrid(
        jnp.arange(D, dtype=jnp.float32),
        jnp.arange(H, dtype=jnp.float32),
        jnp.arange(W, dtype=jnp.float32),
        indexing="ij")
    pz = gz[None] + flow[:, 0]
    py = gy[None] + flow[:, 1]
    px = gx[None] + flow[:, 2]                    # (N, D, H, W)
    z0, y0, x0 = jnp.floor(pz), jnp.floor(py), jnp.floor(px)
    bidx = jnp.arange(N).reshape(N, 1, 1, 1, 1)
    cidx = jnp.arange(C).reshape(1, C, 1, 1, 1)
    out = jnp.zeros_like(src)
    for dz in (0.0, 1.0):
        for dy in (0.0, 1.0):
            for dx in (0.0, 1.0):
                zc, yc, xc = z0 + dz, y0 + dy, x0 + dx
                w = ((1.0 - jnp.abs(pz - zc)) * (1.0 - jnp.abs(py - yc))
                     * (1.0 - jnp.abs(px - xc)))
                inb = ((zc >= 0) & (zc <= D - 1) & (yc >= 0) & (yc <= H - 1)
                       & (xc >= 0) & (xc <= W - 1))
                w = jnp.where(inb, w, 0.0)
                zi = jnp.clip(zc, 0, D - 1).astype(jnp.int32)
                yi = jnp.clip(yc, 0, H - 1).astype(jnp.int32)
                xi = jnp.clip(xc, 0, W - 1).astype(jnp.int32)
                vals = src[bidx, cidx, zi[:, None], yi[:, None], xi[:, None]]
                out = out + w[:, None] * vals
    return out


def _vecint_reference(vec, nsteps):
    v = vec * (1.0 / 2.0 ** nsteps)
    for _ in range(nsteps):
        v = v + _warp_reference(v, v)
    return v


if __name__ == "__main__":
    key = jax.random.PRNGKey(0)
    N, C, D, H, W = 2, 3, 16, 16, 16
    nsteps = 7
    vec = 2.0 * jax.random.normal(key, (N, C, D, H, W), dtype=jnp.float32)

    run = jax.jit(functools.partial(vecint, nsteps=nsteps))
    out = jax.block_until_ready(run(vec))
    assert out.shape == (N, C, D, H, W)
    assert bool(jnp.all(jnp.isfinite(out)))

    ref = jax.block_until_ready(_vecint_reference(vec, nsteps))
    err = float(jnp.max(jnp.abs(out - ref)))
    # bf16 MXU operands (field snapshot + trilinear weights) leave a few-percent
    # error after 7 squaring steps on O(1..8)-voxel displacements; the field,
    # flow and accumulation stay f32.
    assert bool(jnp.allclose(out, ref, atol=5e-2, rtol=5e-2)), (
        f"mismatch vs grid_sample reference: max abs err = {err}")

    print("KERNEL_OK")
</pallas_src>

<mosaic_0001>
module attributes {stable_mosaic.version = 11 : i64} {
  func.func @_vecint_fused_kernel(%arg0: i32, %arg1: i32, %arg2: i32, %arg3: memref<1x48x256xf32, #tpu.memory_space<vmem>>, %arg4: memref<1x48x256xf32, #tpu.memory_space<vmem>>, %arg5: memref<48x256xbf16, #tpu.memory_space<vmem>>) attributes {dimension_semantics = [#tpu.dimension_semantics<parallel>, #tpu.dimension_semantics<arbitrary>, #tpu.dimension_semantics<arbitrary>], iteration_bounds = array<i64: 2, 7, 2>, scalar_prefetch = 0 : i64, scratch_operands = 1 : i64, tpu.core_type = #tpu.core_type<tc>, window_params = [{transform_indices = @transform_0, window_bounds = array<i64: 1, 48, 256>}, {transform_indices = @transform_1, window_bounds = array<i64: 1, 48, 256>}]} {
    %c0_i32 = arith.constant 0 : i32
    %0 = arith.cmpi eq, %arg2, %c0_i32 : i32
    %1 = arith.extui %0 : i1 to i32
    %c0_i32_0 = arith.constant 0 : i32
    %c0_i32_1 = arith.constant 0 : i32
    %2 = arith.cmpi ne, %1, %c0_i32_1 : i32
    scf.if %2 {
      %c0_i32_315 = arith.constant 0 : i32
      %644 = arith.cmpi eq, %arg1, %c0_i32_315 : i32
      %645 = arith.extui %644 : i1 to i32
      %c0_i32_316 = arith.constant 0 : i32
      %646 = arith.cmpi ne, %645, %c0_i32_316 : i32
      scf.if %646 {
        %c0_321 = arith.constant 0 : index
        %c0_322 = arith.constant 0 : index
        %c0_323 = arith.constant 0 : index
        %652 = vector.load %arg3[%c0_321, %c0_322, %c0_323] : memref<1x48x256xf32, #tpu.memory_space<vmem>>, vector<1x48x256xf32>
        %653 = vector.shape_cast %652 : vector<1x48x256xf32> to vector<48x256xf32>
        %cst_324 = arith.constant 7.812500e-03 : f32
        %654 = vector.broadcast %cst_324 : f32 to vector<48x256xf32>
        %655 = arith.mulf %653, %654 : vector<48x256xf32>
        %656 = arith.index_cast %c0_i32_0 : i32 to index
        %c0_325 = arith.constant 0 : index
        %c0_326 = arith.constant 0 : index
        %657 = vector.load %arg4[%656, %c0_325, %c0_326] : memref<1x48x256xf32, #tpu.memory_space<vmem>>, vector<1x48x256xf32>
        %658 = vector.shape_cast %657 : vector<1x48x256xf32> to vector<48x256xf32>
        %659 = vector.shape_cast %655 : vector<48x256xf32> to vector<1x48x256xf32>
        tpu.vector_store %arg4[%656, %c0_325, %c0_326], %659 {strides = array<i32>} : memref<1x48x256xf32, #tpu.memory_space<vmem>>, vector<1x48x256xf32>,
      } else {
      }
      %647 = arith.index_cast %c0_i32_0 : i32 to index
      %c0_317 = arith.constant 0 : index
      %c0_318 = arith.constant 0 : index
      %648 = vector.load %arg4[%647, %c0_317, %c0_318] : memref<1x48x256xf32, #tpu.memory_space<vmem>>, vector<1x48x256xf32>
      %649 = vector.shape_cast %648 : vector<1x48x256xf32> to vector<48x256xf32>
      %650 = arith.truncf %649 : vector<48x256xf32> to vector<48x256xbf16>
      %c0_319 = arith.constant 0 : index
      %c0_320 = arith.constant 0 : index
      %651 = vector.load %arg5[%c0_319, %c0_320] : memref<48x256xbf16, #tpu.memory_space<vmem>>, vector<48x256xbf16>
      tpu.vector_store %arg5[%c0_319, %c0_320], %650 {strides = array<i32>} : memref<48x256xbf16, #tpu.memory_space<vmem>>, vector<48x256xbf16>,
    } else {
    }
    %c0 = arith.constant 0 : index
    %c0_2 = arith.constant 0 : index
    %3 = vector.load %arg5[%c0, %c0_2] : memref<48x256xbf16, #tpu.memory_space<vmem>>, vector<48x256xbf16>
    %4 = tpu.iota {dimensions = array<i32: 1>} : vector<1x256xi32>
    %5 = arith.sitofp %4 : vector<1x256xi32> to vector<1x256xf32>
    %cst = arith.constant 5.000000e-01 : f32
    %6 = vector.broadcast %cst : f32 to vector<1x256xf32>
    %7 = arith.addf %5, %6 : vector<1x256xf32>
    %cst_3 = arith.constant 1.600000e+01 : f32
    %8 = vector.broadcast %cst_3 : f32 to vector<1x256xf32>
    %9 = arith.divf %7, %8 : vector<1x256xf32>
    %10 = math.floor %9 : vector<1x256xf32>
    %cst_4 = arith.constant 1.600000e+01 : f32
    %11 = vector.broadcast %cst_4 : f32 to vector<1x256xf32>
    %12 = arith.mulf %10, %11 : vector<1x256xf32>
    %13 = arith.subf %5, %12 : vector<1x256xf32>
    %14 = tpu.iota {dimensions = array<i32: 0>} : vector<16x256xi32>
    %15 = arith.sitofp %14 : vector<16x256xi32> to vector<16x256xf32>
    %16 = tpu.iota {dimensions = array<i32: 0>} : vector<16x256xi32>
    %17 = arith.sitofp %16 : vector<16x256xi32> to vector<16x256xf32>
    %18 = tpu.iota {dimensions = array<i32: 0>} : vector<16x256xi32>
    %19 = arith.sitofp %18 : vector<16x256xi32> to vector<16x256xf32>
    %c8_i32 = arith.constant 8 : i32
    %20 = arith.muli %arg2, %c8_i32 : i32
    %c0_i32_5 = arith.constant 0 : i32
    %21 = arith.addi %20, %c0_i32_5 : i32
    %c0_i32_6 = arith.constant 0 : i32
    %22 = arith.addi %c0_i32_6, %21 : i32
    %c0_i32_7 = arith.constant 0 : i32
    %c0_i32_8 = arith.constant 0 : i32
    %c0_i32_9 = arith.constant 0 : i32
    %23 = tpu.memref_slice %arg4[%c0_i32_7, %c0_i32_8, %c0_i32_9] : memref<1x48x256xf32, #tpu.memory_space<vmem>> -> memref<1x48x256xf32, #tpu.memory_space<vmem>>
    %24 = tpu.memref_squeeze %23 : memref<1x48x256xf32, #tpu.memory_space<vmem>> -> memref<48x256xf32, #tpu.memory_space<vmem>>
    %25 = arith.index_cast %22 : i32 to index
    %c0_10 = arith.constant 0 : index
    %26 = vector.load %24[%25, %c0_10] : memref<48x256xf32, #tpu.memory_space<vmem>>, vector<1x256xf32>
    %c16_i32 = arith.constant 16 : i32
    %27 = arith.addi %c16_i32, %21 : i32
    %c0_i32_11 = arith.constant 0 : i32
    %c0_i32_12 = arith.constant 0 : i32
    %c0_i32_13 = arith.constant 0 : i32
    %28 = tpu.memref_slice %arg4[%c0_i32_11, %c0_i32_12, %c0_i32_13] : memref<1x48x256xf32, #tpu.memory_space<vmem>> -> memref<1x48x256xf32, #tpu.memory_space<vmem>>
    %29 = tpu.memref_squeeze %28 : memref<1x48x256xf32, #tpu.memory_space<vmem>> -> memref<48x256xf32, #tpu.memory_space<vmem>>
    %30 = arith.index_cast %27 : i32 to index
    %c0_14 = arith.constant 0 : index
    %31 = vector.load %29[%30, %c0_14] : memref<48x256xf32, #tpu.memory_space<vmem>>, vector<1x256xf32>
    %c32_i32 = arith.constant 32 : i32
    %32 = arith.addi %c32_i32, %21 : i32
    %c0_i32_15 = arith.constant 0 : i32
    %c0_i32_16 = arith.constant 0 : i32
    %c0_i32_17 = arith.constant 0 : i32
    %33 = tpu.memref_slice %arg4[%c0_i32_15, %c0_i32_16, %c0_i32_17] : memref<1x48x256xf32, #tpu.memory_space<vmem>> -> memref<1x48x256xf32, #tpu.memory_space<vmem>>
    %34 = tpu.memref_squeeze %33 : memref<1x48x256xf32, #tpu.memory_space<vmem>> -> memref<48x256xf32, #tpu.memory_space<vmem>>
    %35 = arith.index_cast %32 : i32 to index
    %c0_18 = arith.constant 0 : index
    %36 = vector.load %34[%35, %c0_18] : memref<48x256xf32, #tpu.memory_space<vmem>>, vector<1x256xf32>
    %37 = arith.sitofp %21 : i32 to f32
    %38 = vector.broadcast %37 : f32 to vector<1x256xf32>
    %39 = arith.addf %26, %38 : vector<1x256xf32>
    %40 = arith.addf %31, %10 : vector<1x256xf32>
    %41 = arith.addf %36, %13 : vector<1x256xf32>
    %42 = vector.broadcast %39 : vector<1x256xf32> to vector<16x256xf32>
    %43 = arith.subf %15, %42 : vector<16x256xf32>
    %44 = math.absf %43 : vector<16x256xf32>
    %cst_19 = arith.constant 1.000000e+00 : f32
    %45 = vector.broadcast %cst_19 : f32 to vector<16x256xf32>
    %46 = arith.subf %45, %44 : vector<16x256xf32>
    %cst_20 = arith.constant 0.000000e+00 : f32
    %47 = vector.broadcast %cst_20 : f32 to vector<16x256xf32>
    %48 = arith.maximumf %47, %46 : vector<16x256xf32>
    %49 = vector.broadcast %40 : vector<1x256xf32> to vector<16x256xf32>
    %50 = arith.subf %17, %49 : vector<16x256xf32>
    %51 = math.absf %50 : vector<16x256xf32>
    %cst_21 = arith.constant 1.000000e+00 : f32
    %52 = vector.broadcast %cst_21 : f32 to vector<16x256xf32>
    %53 = arith.subf %52, %51 : vector<16x256xf32>
    %cst_22 = arith.constant 0.000000e+00 : f32
    %54 = vector.broadcast %cst_22 : f32 to vector<16x256xf32>
    %55 = arith.maximumf %54, %53 : vector<16x256xf32>
    %56 = arith.truncf %55 : vector<16x256xf32> to vector<16x256xbf16>
    %57 = vector.broadcast %41 : vector<1x256xf32> to vector<16x256xf32>
    %58 = arith.subf %19, %57 : vector<16x256xf32>
    %59 = math.absf %58 : vector<16x256xf32>
    %cst_23 = arith.constant 1.000000e+00 : f32
    %60 = vector.broadcast %cst_23 : f32 to vector<16x256xf32>
    %61 = arith.subf %60, %59 : vector<16x256xf32>
    %cst_24 = arith.constant 0.000000e+00 : f32
    %62 = vector.broadcast %cst_24 : f32 to vector<16x256xf32>
    %63 = arith.maximumf %62, %61 : vector<16x256xf32>
    %64 = arith.truncf %63 : vector<16x256xf32> to vector<16x256xbf16>
    %65 = vector.shape_cast %56 : vector<16x256xbf16> to vector<16x1x256xbf16>
    %66 = vector.shape_cast %64 : vector<16x256xbf16> to vector<1x16x256xbf16>
    %67 = vector.broadcast %65 : vector<16x1x256xbf16> to vector<16x16x256xbf16>
    %68 = vector.broadcast %66 : vector<1x16x256xbf16> to vector<16x16x256xbf16>
    %69 = arith.mulf %67, %68 : vector<16x16x256xbf16>
    %70 = vector.shape_cast %69 : vector<16x16x256xbf16> to vector<256x256xbf16>
    %cst_25 = arith.constant dense<0.000000e+00> : vector<48x256xf32>
    %71 = tpu.matmul %3, %70, %cst_25 {dimension_numbers = #tpu.dot_dimension_numbers<[1], [0], [0], [1], [0, 0, 1, 1], [], []>} : vector<48x256xbf16>, vector<256x256xbf16>, vector<48x256xf32> -> vector<48x256xf32>
    %72 = vector.shape_cast %71 : vector<48x256xf32> to vector<3x16x256xf32>
    %73 = vector.shape_cast %48 : vector<16x256xf32> to vector<1x16x256xf32>
    %74 = vector.broadcast %73 : vector<1x16x256xf32> to vector<3x16x256xf32>
    %75 = arith.mulf %72, %74 : vector<3x16x256xf32>
    %cst_26 = arith.constant dense<0.000000e+00> : vector<3x256xf32>
    %76 = vector.multi_reduction <add>, %75, %cst_26 [1] : vector<3x16x256xf32> to vector<3x256xf32>
    %77 = vector.extract_strided_slice %76 {offsets = [0, 0], sizes = [1, 256], strides = [1, 1]} : vector<3x256xf32> to vector<1x256xf32>
    %78 = arith.addf %26, %77 : vector<1x256xf32>
    %c0_i32_27 = arith.constant 0 : i32
    %79 = arith.addi %c0_i32_27, %21 : i32
    %c0_i32_28 = arith.constant 0 : i32
    %c0_i32_29 = arith.constant 0 : i32
    %c0_i32_30 = arith.constant 0 : i32
    %80 = tpu.memref_slice %arg4[%c0_i32_28, %c0_i32_29, %c0_i32_30] : memref<1x48x256xf32, #tpu.memory_space<vmem>> -> memref<1x48x256xf32, #tpu.memory_space<vmem>>
    %81 = tpu.memref_squeeze %80 : memref<1x48x256xf32, #tpu.memory_space<vmem>> -> memref<48x256xf32, #tpu.memory_space<vmem>>
    %82 = arith.index_cast %79 : i32 to index
    %c0_31 = arith.constant 0 : index
    %83 = vector.load %81[%82, %c0_31] : memref<48x256xf32, #tpu.memory_space<vmem>>, vector<1x256xf32>
    tpu.vector_store %81[%82, %c0_31], %78 {strides = array<i32>} : memref<48x256xf32, #tpu.memory_space<vmem>>, vector<1x256xf32>,
    %84 = vector.extract_strided_slice %76 {offsets = [1, 0], sizes = [1, 256], strides = [1, 1]} : vector<3x256xf32> to vector<1x256xf32>
    %85 = arith.addf %31, %84 : vector<1x256xf32>
    %c16_i32_32 = arith.constant 16 : i32
    %86 = arith.addi %c16_i32_32, %21 : i32
    %c0_i32_33 = arith.constant 0 : i32
    %c0_i32_34 = arith.constant 0 : i32
    %c0_i32_35 = arith.constant 0 : i32
    %87 = tpu.memref_slice %arg4[%c0_i32_33, %c0_i32_34, %c0_i32_35] : memref<1x48x256xf32, #tpu.memory_space<vmem>> -> memref<1x48x256xf32, #tpu.memory_space<vmem>>
    %88 = tpu.memref_squeeze %87 : memref<1x48x256xf32, #tpu.memory_space<vmem>> -> memref<48x256xf32, #tpu.memory_space<vmem>>
    %89 = arith.index_cast %86 : i32 to index
    %c0_36 = arith.constant 0 : index
    %90 = vector.load %88[%89, %c0_36] : memref<48x256xf32, #tpu.memory_space<vmem>>, vector<1x256xf32>
    tpu.vector_store %88[%89, %c0_36], %85 {strides = array<i32>} : memref<48x256xf32, #tpu.memory_space<vmem>>, vector<1x256xf32>,
    %91 = vector.extract_strided_slice %76 {offsets = [2, 0], sizes = [1, 256], strides = [1, 1]} : vector<3x256xf32> to vector<1x256xf32>
    %92 = arith.addf %36, %91 : vector<1x256xf32>
    %c32_i32_37 = arith.constant 32 : i32
    %93 = arith.addi %c32_i32_37, %21 : i32
    %c0_i32_38 = arith.constant 0 : i32
    %c0_i32_39 = arith.constant 0 : i32
    %c0_i32_40 = arith.constant 0 : i32
    %94 = tpu.memref_slice %arg4[%c0_i32_38, %c0_i32_39, %c0_i32_40] : memref<1x48x256xf32, #tpu.memory_space<vmem>> -> memref<1x48x256xf32, #tpu.memory_space<vmem>>
    %95 = tpu.memref_squeeze %94 : memref<1x48x256xf32, #tpu.memory_space<vmem>> -> memref<48x256xf32, #tpu.memory_space<vmem>>
    %96 = arith.index_cast %93 : i32 to index
    %c0_41 = arith.constant 0 : index
    %97 = vector.load %95[%96, %c0_41] : memref<48x256xf32, #tpu.memory_space<vmem>>, vector<1x256xf32>
    tpu.vector_store %95[%96, %c0_41], %92 {strides = array<i32>} : memref<48x256xf32, #tpu.memory_space<vmem>>, vector<1x256xf32>,
    %c8_i32_42 = arith.constant 8 : i32
    %98 = arith.muli %arg2, %c8_i32_42 : i32
    %c1_i32 = arith.constant 1 : i32
    %99 = arith.addi %98, %c1_i32 : i32
    %c0_i32_43 = arith.constant 0 : i32
    %100 = arith.addi %c0_i32_43, %99 : i32
    %c0_i32_44 = arith.constant 0 : i32
    %c0_i32_45 = arith.constant 0 : i32
    %c0_i32_46 = arith.constant 0 : i32
    %101 = tpu.memref_slice %arg4[%c0_i32_44, %c0_i32_45, %c0_i32_46] : memref<1x48x256xf32, #tpu.memory_space<vmem>> -> memref<1x48x256xf32, #tpu.memory_space<vmem>>
    %102 = tpu.memref_squeeze %101 : memref<1x48x256xf32, #tpu.memory_space<vmem>> -> memref<48x256xf32, #tpu.memory_space<vmem>>
    %103 = arith.index_cast %100 : i32 to index
    %c0_47 = arith.constant 0 : index
    %104 = vector.load %102[%103, %c0_47] : memref<48x256xf32, #tpu.memory_space<vmem>>, vector<1x256xf32>
    %c16_i32_48 = arith.constant 16 : i32
    %105 = arith.addi %c16_i32_48, %99 : i32
    %c0_i32_49 = arith.constant 0 : i32
    %c0_i32_50 = arith.constant 0 : i32
    %c0_i32_51 = arith.constant 0 : i32
    %106 = tpu.memref_slice %arg4[%c0_i32_49, %c0_i32_50, %c0_i32_51] : memref<1x48x256xf32, #tpu.memory_space<vmem>> -> memref<1x48x256xf32, #tpu.memory_space<vmem>>
    %107 = tpu.memref_squeeze %106 : memref<1x48x256xf32, #tpu.memory_space<vmem>> -> memref<48x256xf32, #tpu.memory_space<vmem>>
    %108 = arith.index_cast %105 : i32 to index
    %c0_52 = arith.constant 0 : index
    %109 = vector.load %107[%108, %c0_52] : memref<48x256xf32, #tpu.memory_space<vmem>>, vector<1x256xf32>
    %c32_i32_53 = arith.constant 32 : i32
    %110 = arith.addi %c32_i32_53, %99 : i32
    %c0_i32_54 = arith.constant 0 : i32
    %c0_i32_55 = arith.constant 0 : i32
    %c0_i32_56 = arith.constant 0 : i32
    %111 = tpu.memref_slice %arg4[%c0_i32_54, %c0_i32_55, %c0_i32_56] : memref<1x48x256xf32, #tpu.memory_space<vmem>> -> memref<1x48x256xf32, #tpu.memory_space<vmem>>
    %112 = tpu.memref_squeeze %111 : memref<1x48x256xf32, #tpu.memory_space<vmem>> -> memref<48x256xf32, #tpu.memory_space<vmem>>
    %113 = arith.index_cast %110 : i32 to index
    %c0_57 = arith.constant 0 : index
    %114 = vector.load %112[%113, %c0_57] : memref<48x256xf32, #tpu.memory_space<vmem>>, vector<1x256xf32>
    %115 = arith.sitofp %99 : i32 to f32
    %116 = vector.broadcast %115 : f32 to vector<1x256xf32>
    %117 = arith.addf %104, %116 : vector<1x256xf32>
    %118 = arith.addf %109, %10 : vector<1x256xf32>
    %119 = arith.addf %114, %13 : vector<1x256xf32>
    %120 = vector.broadcast %117 : vector<1x256xf32> to vector<16x256xf32>
    %121 = arith.subf %15, %120 : vector<16x256xf32>
    %122 = math.absf %121 : vector<16x256xf32>
    %cst_58 = arith.constant 1.000000e+00 : f32
    %123 = vector.broadcast %cst_58 : f32 to vector<16x256xf32>
    %124 = arith.subf %123, %122 : vector<16x256xf32>
    %cst_59 = arith.constant 0.000000e+00 : f32
    %125 = vector.broadcast %cst_59 : f32 to vector<16x256xf32>
    %126 = arith.maximumf %125, %124 : vector<16x256xf32>
    %127 = vector.broadcast %118 : vector<1x256xf32> to vector<16x256xf32>
    %128 = arith.subf %17, %127 : vector<16x256xf32>
    %129 = math.absf %128 : vector<16x256xf32>
    %cst_60 = arith.constant 1.000000e+00 : f32
    %130 = vector.broadcast %cst_60 : f32 to vector<16x256xf32>
    %131 = arith.subf %130, %129 : vector<16x256xf32>
    %cst_61 = arith.constant 0.000000e+00 : f32
    %132 = vector.broadcast %cst_61 : f32 to vector<16x256xf32>
    %133 = arith.maximumf %132, %131 : vector<16x256xf32>
    %134 = arith.truncf %133 : vector<16x256xf32> to vector<16x256xbf16>
    %135 = vector.broadcast %119 : vector<1x256xf32> to vector<16x256xf32>
    %136 = arith.subf %19, %135 : vector<16x256xf32>
    %137 = math.absf %136 : vector<16x256xf32>
    %cst_62 = arith.constant 1.000000e+00 : f32
    %138 = vector.broadcast %cst_62 : f32 to vector<16x256xf32>
    %139 = arith.subf %138, %137 : vector<16x256xf32>
    %cst_63 = arith.constant 0.000000e+00 : f32
    %140 = vector.broadcast %cst_63 : f32 to vector<16x256xf32>
    %141 = arith.maximumf %140, %139 : vector<16x256xf32>
    %142 = arith.truncf %141 : vector<16x256xf32> to vector<16x256xbf16>
    %143 = vector.shape_cast %134 : vector<16x256xbf16> to vector<16x1x256xbf16>
    %144 = vector.shape_cast %142 : vector<16x256xbf16> to vector<1x16x256xbf16>
    %145 = vector.broadcast %143 : vector<16x1x256xbf16> to vector<16x16x256xbf16>
    %146 = vector.broadcast %144 : vector<1x16x256xbf16> to vector<16x16x256xbf16>
    %147 = arith.mulf %145, %146 : vector<16x16x256xbf16>
    %148 = vector.shape_cast %147 : vector<16x16x256xbf16> to vector<256x256xbf16>
    %cst_64 = arith.constant dense<0.000000e+00> : vector<48x256xf32>
    %149 = tpu.matmul %3, %148, %cst_64 {dimension_numbers = #tpu.dot_dimension_numbers<[1], [0], [0], [1], [0, 0, 1, 1], [], []>} : vector<48x256xbf16>, vector<256x256xbf16>, vector<48x256xf32> -> vector<48x256xf32>
    %150 = vector.shape_cast %149 : vector<48x256xf32> to vector<3x16x256xf32>
    %151 = vector.shape_cast %126 : vector<16x256xf32> to vector<1x16x256xf32>
    %152 = vector.broadcast %151 : vector<1x16x256xf32> to vector<3x16x256xf32>
    %153 = arith.mulf %150, %152 : vector<3x16x256xf32>
    %cst_65 = arith.constant dense<0.000000e+00> : vector<3x256xf32>
    %154 = vector.multi_reduction <add>, %153, %cst_65 [1] : vector<3x16x256xf32> to vector<3x256xf32>
    %155 = vector.extract_strided_slice %154 {offsets = [0, 0], sizes = [1, 256], strides = [1, 1]} : vector<3x256xf32> to vector<1x256xf32>
    %156 = arith.addf %104, %155 : vector<1x256xf32>
    %c0_i32_66 = arith.constant 0 : i32
    %157 = arith.addi %c0_i32_66, %99 : i32
    %c0_i32_67 = arith.constant 0 : i32
    %c0_i32_68 = arith.constant 0 : i32
    %c0_i32_69 = arith.constant 0 : i32
    %158 = tpu.memref_slice %arg4[%c0_i32_67, %c0_i32_68, %c0_i32_69] : memref<1x48x256xf32, #tpu.memory_space<vmem>> -> memref<1x48x256xf32, #tpu.memory_space<vmem>>
    %159 = tpu.memref_squeeze %158 : memref<1x48x256xf32, #tpu.memory_space<vmem>> -> memref<48x256xf32, #tpu.memory_space<vmem>>
    %160 = arith.index_cast %157 : i32 to index
    %c0_70 = arith.constant 0 : index
    %161 = vector.load %159[%160, %c0_70] : memref<48x256xf32, #tpu.memory_space<vmem>>, vector<1x256xf32>
    tpu.vector_store %159[%160, %c0_70], %156 {strides = array<i32>} : memref<48x256xf32, #tpu.memory_space<vmem>>, vector<1x256xf32>,
    %162 = vector.extract_strided_slice %154 {offsets = [1, 0], sizes = [1, 256], strides = [1, 1]} : vector<3x256xf32> to vector<1x256xf32>
    %163 = arith.addf %109, %162 : vector<1x256xf32>
    %c16_i32_71 = arith.constant 16 : i32
    %164 = arith.addi %c16_i32_71, %99 : i32
    %c0_i32_72 = arith.constant 0 : i32
    %c0_i32_73 = arith.constant 0 : i32
    %c0_i32_74 = arith.constant 0 : i32
    %165 = tpu.memref_slice %arg4[%c0_i32_72, %c0_i32_73, %c0_i32_74] : memref<1x48x256xf32, #tpu.memory_space<vmem>> -> memref<1x48x256xf32, #tpu.memory_space<vmem>>
    %166 = tpu.memref_squeeze %165 : memref<1x48x256xf32, #tpu.memory_space<vmem>> -> memref<48x256xf32, #tpu.memory_space<vmem>>
    %167 = arith.index_cast %164 : i32 to index
    %c0_75 = arith.constant 0 : index
    %168 = vector.load %166[%167, %c0_75] : memref<48x256xf32, #tpu.memory_space<vmem>>, vector<1x256xf32>
    tpu.vector_store %166[%167, %c0_75], %163 {strides = array<i32>} : memref<48x256xf32, #tpu.memory_space<vmem>>, vector<1x256xf32>,
    %169 = vector.extract_strided_slice %154 {offsets = [2, 0], sizes = [1, 256], strides = [1, 1]} : vector<3x256xf32> to vector<1x256xf32>
    %170 = arith.addf %114, %169 : vector<1x256xf32>
    %c32_i32_76 = arith.constant 32 : i32
    %171 = arith.addi %c32_i32_76, %99 : i32
    %c0_i32_77 = arith.constant 0 : i32
    %c0_i32_78 = arith.constant 0 : i32
    %c0_i32_79 = arith.constant 0 : i32
    %172 = tpu.memref_slice %arg4[%c0_i32_77, %c0_i32_78, %c0_i32_79] : memref<1x48x256xf32, #tpu.memory_space<vmem>> -> memref<1x48x256xf32, #tpu.memory_space<vmem>>
    %173 = tpu.memref_squeeze %172 : memref<1x48x256xf32, #tpu.memory_space<vmem>> -> memref<48x256xf32, #tpu.memory_space<vmem>>
    %174 = arith.index_cast %171 : i32 to index
    %c0_80 = arith.constant 0 : index
    %175 = vector.load %173[%174, %c0_80] : memref<48x256xf32, #tpu.memory_space<vmem>>, vector<1x256xf32>
    tpu.vector_store %173[%174, %c0_80], %170 {strides = array<i32>} : memref<48x256xf32, #tpu.memory_space<vmem>>, vector<1x256xf32>,
    %c8_i32_81 = arith.constant 8 : i32
    %176 = arith.muli %arg2, %c8_i32_81 : i32
    %c2_i32 = arith.constant 2 : i32
    %177 = arith.addi %176, %c2_i32 : i32
    %c0_i32_82 = arith.constant 0 : i32
    %178 = arith.addi %c0_i32_82, %177 : i32
    %c0_i32_83 = arith.constant 0 : i32
    %c0_i32_84 = arith.constant 0 : i32
    %c0_i32_85 = arith.constant 0 : i32
    %179 = tpu.memref_slice %arg4[%c0_i32_83, %c0_i32_84, %c0_i32_85] : memref<1x48x256xf32, #tpu.memory_space<vmem>> -> memref<1x48x256xf32, #tpu.memory_space<vmem>>
    %180 = tpu.memref_squeeze %179 : memref<1x48x256xf32, #tpu.memory_space<vmem>> -> memref<48x256xf32, #tpu.memory_space<vmem>>
    %181 = arith.index_cast %178 : i32 to index
    %c0_86 = arith.constant 0 : index
    %182 = vector.load %180[%181, %c0_86] : memref<48x256xf32, #tpu.memory_space<vmem>>, vector<1x256xf32>
    %c16_i32_87 = arith.constant 16 : i32
    %183 = arith.addi %c16_i32_87, %177 : i32
    %c0_i32_88 = arith.constant 0 : i32
    %c0_i32_89 = arith.constant 0 : i32
    %c0_i32_90 = arith.constant 0 : i32
    %184 = tpu.memref_slice %arg4[%c0_i32_88, %c0_i32_89, %c0_i32_90] : memref<1x48x256xf32, #tpu.memory_space<vmem>> -> memref<1x48x256xf32, #tpu.memory_space<vmem>>
    %185 = tpu.memref_squeeze %184 : memref<1x48x256xf32, #tpu.memory_space<vmem>> -> memref<48x256xf32, #tpu.memory_space<vmem>>
    %186 = arith.index_cast %183 : i32 to index
    %c0_91 = arith.constant 0 : index
    %187 = vector.load %185[%186, %c0_91] : memref<48x256xf32, #tpu.memory_space<vmem>>, vector<1x256xf32>
    %c32_i32_92 = arith.constant 32 : i32
    %188 = arith.addi %c32_i32_92, %177 : i32
    %c0_i32_93 = arith.constant 0 : i32
    %c0_i32_94 = arith.constant 0 : i32
    %c0_i32_95 = arith.constant 0 : i32
    %189 = tpu.memref_slice %arg4[%c0_i32_93, %c0_i32_94, %c0_i32_95] : memref<1x48x256xf32, #tpu.memory_space<vmem>> -> memref<1x48x256xf32, #tpu.memory_space<vmem>>
    %190 = tpu.memref_squeeze %189 : memref<1x48x256xf32, #tpu.memory_space<vmem>> -> memref<48x256xf32, #tpu.memory_space<vmem>>
    %191 = arith.index_cast %188 : i32 to index
    %c0_96 = arith.constant 0 : index
    %192 = vector.load %190[%191, %c0_96] : memref<48x256xf32, #tpu.memory_space<vmem>>, vector<1x256xf32>
    %193 = arith.sitofp %177 : i32 to f32
    %194 = vector.broadcast %193 : f32 to vector<1x256xf32>
    %195 = arith.addf %182, %194 : vector<1x256xf32>
    %196 = arith.addf %187, %10 : vector<1x256xf32>
    %197 = arith.addf %192, %13 : vector<1x256xf32>
    %198 = vector.broadcast %195 : vector<1x256xf32> to vector<16x256xf32>
    %199 = arith.subf %15, %198 : vector<16x256xf32>
    %200 = math.absf %199 : vector<16x256xf32>
    %cst_97 = arith.constant 1.000000e+00 : f32
    %201 = vector.broadcast %cst_97 : f32 to vector<16x256xf32>
    %202 = arith.subf %201, %200 : vector<16x256xf32>
    %cst_98 = arith.constant 0.000000e+00 : f32
    %203 = vector.broadcast %cst_98 : f32 to vector<16x256xf32>
    %204 = arith.maximumf %203, %202 : vector<16x256xf32>
    %205 = vector.broadcast %196 : vector<1x256xf32> to vector<16x256xf32>
    %206 = arith.subf %17, %205 : vector<16x256xf32>
    %207 = math.absf %206 : vector<16x256xf32>
    %cst_99 = arith.constant 1.000000e+00 : f32
    %208 = vector.broadcast %cst_99 : f32 to vector<16x256xf32>
    %209 = arith.subf %208, %207 : vector<16x256xf32>
    %cst_100 = arith.constant 0.000000e+00 : f32
    %210 = vector.broadcast %cst_100 : f32 to vector<16x256xf32>
    %211 = arith.maximumf %210, %209 : vector<16x256xf32>
    %212 = arith.truncf %211 : vector<16x256xf32> to vector<16x256xbf16>
    %213 = vector.broadcast %197 : vector<1x256xf32> to vector<16x256xf32>
    %214 = arith.subf %19, %213 : vector<16x256xf32>
    %215 = math.absf %214 : vector<16x256xf32>
    %cst_101 = arith.constant 1.000000e+00 : f32
    %216 = vector.broadcast %cst_101 : f32 to vector<16x256xf32>
    %217 = arith.subf %216, %215 : vector<16x256xf32>
    %cst_102 = arith.constant 0.000000e+00 : f32
    %218 = vector.broadcast %cst_102 : f32 to vector<16x256xf32>
    %219 = arith.maximumf %218, %217 : vector<16x256xf32>
    %220 = arith.truncf %219 : vector<16x256xf32> to vector<16x256xbf16>
    %221 = vector.shape_cast %212 : vector<16x256xbf16> to vector<16x1x256xbf16>
    %222 = vector.shape_cast %220 : vector<16x256xbf16> to vector<1x16x256xbf16>
    %223 = vector.broadcast %221 : vector<16x1x256xbf16> to vector<16x16x256xbf16>
    %224 = vector.broadcast %222 : vector<1x16x256xbf16> to vector<16x16x256xbf16>
    %225 = arith.mulf %223, %224 : vector<16x16x256xbf16>
    %226 = vector.shape_cast %225 : vector<16x16x256xbf16> to vector<256x256xbf16>
    %cst_103 = arith.constant dense<0.000000e+00> : vector<48x256xf32>
    %227 = tpu.matmul %3, %226, %cst_103 {dimension_numbers = #tpu.dot_dimension_numbers<[1], [0], [0], [1], [0, 0, 1, 1], [], []>} : vector<48x256xbf16>, vector<256x256xbf16>, vector<48x256xf32> -> vector<48x256xf32>
    %228 = vector.shape_cast %227 : vector<48x256xf32> to vector<3x16x256xf32>
    %229 = vector.shape_cast %204 : vector<16x256xf32> to vector<1x16x256xf32>
    %230 = vector.broadcast %229 : vector<1x16x256xf32> to vector<3x16x256xf32>
    %231 = arith.mulf %228, %230 : vector<3x16x256xf32>
    %cst_104 = arith.constant dense<0.000000e+00> : vector<3x256xf32>
    %232 = vector.multi_reduction <add>, %231, %cst_104 [1] : vector<3x16x256xf32> to vector<3x256xf32>
    %233 = vector.extract_strided_slice %232 {offsets = [0, 0], sizes = [1, 256], strides = [1, 1]} : vector<3x256xf32> to vector<1x256xf32>
    %234 = arith.addf %182, %233 : vector<1x256xf32>
    %c0_i32_105 = arith.constant 0 : i32
    %235 = arith.addi %c0_i32_105, %177 : i32
    %c0_i32_106 = arith.constant 0 : i32
    %c0_i32_107 = arith.constant 0 : i32
    %c0_i32_108 = arith.constant 0 : i32
    %236 = tpu.memref_slice %arg4[%c0_i32_106, %c0_i32_107, %c0_i32_108] : memref<1x48x256xf32, #tpu.memory_space<vmem>> -> memref<1x48x256xf32, #tpu.memory_space<vmem>>
    %237 = tpu.memref_squeeze %236 : memref<1x48x256xf32, #tpu.memory_space<vmem>> -> memref<48x256xf32, #tpu.memory_space<vmem>>
    %238 = arith.index_cast %235 : i32 to index
    %c0_109 = arith.constant 0 : index
    %239 = vector.load %237[%238, %c0_109] : memref<48x256xf32, #tpu.memory_space<vmem>>, vector<1x256xf32>
    tpu.vector_store %237[%238, %c0_109], %234 {strides = array<i32>} : memref<48x256xf32, #tpu.memory_space<vmem>>, vector<1x256xf32>,
    %240 = vector.extract_strided_slice %232 {offsets = [1, 0], sizes = [1, 256], strides = [1, 1]} : vector<3x256xf32> to vector<1x256xf32>
    %241 = arith.addf %187, %240 : vector<1x256xf32>
    %c16_i32_110 = arith.constant 16 : i32
    %242 = arith.addi %c16_i32_110, %177 : i32
    %c0_i32_111 = arith.constant 0 : i32
    %c0_i32_112 = arith.constant 0 : i32
    %c0_i32_113 = arith.constant 0 : i32
    %243 = tpu.memref_slice %arg4[%c0_i32_111, %c0_i32_112, %c0_i32_113] : memref<1x48x256xf32, #tpu.memory_space<vmem>> -> memref<1x48x256xf32, #tpu.memory_space<vmem>>
    %244 = tpu.memref_squeeze %243 : memref<1x48x256xf32, #tpu.memory_space<vmem>> -> memref<48x256xf32, #tpu.memory_space<vmem>>
    %245 = arith.index_cast %242 : i32 to index
    %c0_114 = arith.constant 0 : index
    %246 = vector.load %244[%245, %c0_114] : memref<48x256xf32, #tpu.memory_space<vmem>>, vector<1x256xf32>
    tpu.vector_store %244[%245, %c0_114], %241 {strides = array<i32>} : memref<48x256xf32, #tpu.memory_space<vmem>>, vector<1x256xf32>,
    %247 = vector.extract_strided_slice %232 {offsets = [2, 0], sizes = [1, 256], strides = [1, 1]} : vector<3x256xf32> to vector<1x256xf32>
    %248 = arith.addf %192, %247 : vector<1x256xf32>
    %c32_i32_115 = arith.constant 32 : i32
    %249 = arith.addi %c32_i32_115, %177 : i32
    %c0_i32_116 = arith.constant 0 : i32
    %c0_i32_117 = arith.constant 0 : i32
    %c0_i32_118 = arith.constant 0 : i32
    %250 = tpu.memref_slice %arg4[%c0_i32_116, %c0_i32_117, %c0_i32_118] : memref<1x48x256xf32, #tpu.memory_space<vmem>> -> memref<1x48x256xf32, #tpu.memory_space<vmem>>
    %251 = tpu.memref_squeeze %250 : memref<1x48x256xf32, #tpu.memory_space<vmem>> -> memref<48x256xf32, #tpu.memory_space<vmem>>
    %252 = arith.index_cast %249 : i32 to index
    %c0_119 = arith.constant 0 : index
    %253 = vector.load %251[%252, %c0_119] : memref<48x256xf32, #tpu.memory_space<vmem>>, vector<1x256xf32>
    tpu.vector_store %251[%252, %c0_119], %248 {strides = array<i32>} : memref<48x256xf32, #tpu.memory_space<vmem>>, vector<1x256xf32>,
    %c8_i32_120 = arith.constant 8 : i32
    %254 = arith.muli %arg2, %c8_i32_120 : i32
    %c3_i32 = arith.constant 3 : i32
    %255 = arith.addi %254, %c3_i32 : i32
    %c0_i32_121 = arith.constant 0 : i32
    %256 = arith.addi %c0_i32_121, %255 : i32
    %c0_i32_122 = arith.constant 0 : i32
    %c0_i32_123 = arith.constant 0 : i32
    %c0_i32_124 = arith.constant 0 : i32
    %257 = tpu.memref_slice %arg4[%c0_i32_122, %c0_i32_123, %c0_i32_124] : memref<1x48x256xf32, #tpu.memory_space<vmem>> -> memref<1x48x256xf32, #tpu.memory_space<vmem>>
    %258 = tpu.memref_squeeze %257 : memref<1x48x256xf32, #tpu.memory_space<vmem>> -> memref<48x256xf32, #tpu.memory_space<vmem>>
    %259 = arith.index_cast %256 : i32 to index
    %c0_125 = arith.constant 0 : index
    %260 = vector.load %258[%259, %c0_125] : memref<48x256xf32, #tpu.memory_space<vmem>>, vector<1x256xf32>
    %c16_i32_126 = arith.constant 16 : i32
    %261 = arith.addi %c16_i32_126, %255 : i32
    %c0_i32_127 = arith.constant 0 : i32
    %c0_i32_128 = arith.constant 0 : i32
    %c0_i32_129 = arith.constant 0 : i32
    %262 = tpu.memref_slice %arg4[%c0_i32_127, %c0_i32_128, %c0_i32_129] : memref<1x48x256xf32, #tpu.memory_space<vmem>> -> memref<1x48x256xf32, #tpu.memory_space<vmem>>
    %263 = tpu.memref_squeeze %262 : memref<1x48x256xf32, #tpu.memory_space<vmem>> -> memref<48x256xf32, #tpu.memory_space<vmem>>
    %264 = arith.index_cast %261 : i32 to index
    %c0_130 = arith.constant 0 : index
    %265 = vector.load %263[%264, %c0_130] : memref<48x256xf32, #tpu.memory_space<vmem>>, vector<1x256xf32>
    %c32_i32_131 = arith.constant 32 : i32
    %266 = arith.addi %c32_i32_131, %255 : i32
    %c0_i32_132 = arith.constant 0 : i32
    %c0_i32_133 = arith.constant 0 : i32
    %c0_i32_134 = arith.constant 0 : i32
    %267 = tpu.memref_slice %arg4[%c0_i32_132, %c0_i32_133, %c0_i32_134] : memref<1x48x256xf32, #tpu.memory_space<vmem>> -> memref<1x48x256xf32, #tpu.memory_space<vmem>>
    %268 = tpu.memref_squeeze %267 : memref<1x48x256xf32, #tpu.memory_space<vmem>> -> memref<48x256xf32, #tpu.memory_space<vmem>>
    %269 = arith.index_cast %266 : i32 to index
    %c0_135 = arith.constant 0 : index
    %270 = vector.load %268[%269, %c0_135] : memref<48x256xf32, #tpu.memory_space<vmem>>, vector<1x256xf32>
    %271 = arith.sitofp %255 : i32 to f32
    %272 = vector.broadcast %271 : f32 to vector<1x256xf32>
    %273 = arith.addf %260, %272 : vector<1x256xf32>
    %274 = arith.addf %265, %10 : vector<1x256xf32>
    %275 = arith.addf %270, %13 : vector<1x256xf32>
    %276 = vector.broadcast %273 : vector<1x256xf32> to vector<16x256xf32>
    %277 = arith.subf %15, %276 : vector<16x256xf32>
    %278 = math.absf %277 : vector<16x256xf32>
    %cst_136 = arith.constant 1.000000e+00 : f32
    %279 = vector.broadcast %cst_136 : f32 to vector<16x256xf32>
    %280 = arith.subf %279, %278 : vector<16x256xf32>
    %cst_137 = arith.constant 0.000000e+00 : f32
    %281 = vector.broadcast %cst_137 : f32 to vector<16x256xf32>
    %282 = arith.maximumf %281, %280 : vector<16x256xf32>
    %283 = vector.broadcast %274 : vector<1x256xf32> to vector<16x256xf32>
    %284 = arith.subf %17, %283 : vector<16x256xf32>
    %285 = math.absf %284 : vector<16x256xf32>
    %cst_138 = arith.constant 1.000000e+00 : f32
    %286 = vector.broadcast %cst_138 : f32 to vector<16x256xf32>
    %287 = arith.subf %286, %285 : vector<16x256xf32>
    %cst_139 = arith.constant 0.000000e+00 : f32
    %288 = vector.broadcast %cst_139 : f32 to vector<16x256xf32>
    %289 = arith.maximumf %288, %287 : vector<16x256xf32>
    %290 = arith.truncf %289 : vector<16x256xf32> to vector<16x256xbf16>
    %291 = vector.broadcast %275 : vector<1x256xf32> to vector<16x256xf32>
    %292 = arith.subf %19, %291 : vector<16x256xf32>
    %293 = math.absf %292 : vector<16x256xf32>
    %cst_140 = arith.constant 1.000000e+00 : f32
    %294 = vector.broadcast %cst_140 : f32 to vector<16x256xf32>
    %295 = arith.subf %294, %293 : vector<16x256xf32>
    %cst_141 = arith.constant 0.000000e+00 : f32
    %296 = vector.broadcast %cst_141 : f32 to vector<16x256xf32>
    %297 = arith.maximumf %296, %295 : vector<16x256xf32>
    %298 = arith.truncf %297 : vector<16x256xf32> to vector<16x256xbf16>
    %299 = vector.shape_cast %290 : vector<16x256xbf16> to vector<16x1x256xbf16>
    %300 = vector.shape_cast %298 : vector<16x256xbf16> to vector<1x16x256xbf16>
    %301 = vector.broadcast %299 : vector<16x1x256xbf16> to vector<16x16x256xbf16>
    %302 = vector.broadcast %300 : vector<1x16x256xbf16> to vector<16x16x256xbf16>
    %303 = arith.mulf %301, %302 : vector<16x16x256xbf16>
    %304 = vector.shape_cast %303 : vector<16x16x256xbf16> to vector<256x256xbf16>
    %cst_142 = arith.constant dense<0.000000e+00> : vector<48x256xf32>
    %305 = tpu.matmul %3, %304, %cst_142 {dimension_numbers = #tpu.dot_dimension_numbers<[1], [0], [0], [1], [0, 0, 1, 1], [], []>} : vector<48x256xbf16>, vector<256x256xbf16>, vector<48x256xf32> -> vector<48x256xf32>
    %306 = vector.shape_cast %305 : vector<48x256xf32> to vector<3x16x256xf32>
    %307 = vector.shape_cast %282 : vector<16x256xf32> to vector<1x16x256xf32>
    %308 = vector.broadcast %307 : vector<1x16x256xf32> to vector<3x16x256xf32>
    %309 = arith.mulf %306, %308 : vector<3x16x256xf32>
    %cst_143 = arith.constant dense<0.000000e+00> : vector<3x256xf32>
    %310 = vector.multi_reduction <add>, %309, %cst_143 [1] : vector<3x16x256xf32> to vector<3x256xf32>
    %311 = vector.extract_strided_slice %310 {offsets = [0, 0], sizes = [1, 256], strides = [1, 1]} : vector<3x256xf32> to vector<1x256xf32>
    %312 = arith.addf %260, %311 : vector<1x256xf32>
    %c0_i32_144 = arith.constant 0 : i32
    %313 = arith.addi %c0_i32_144, %255 : i32
    %c0_i32_145 = arith.constant 0 : i32
    %c0_i32_146 = arith.constant 0 : i32
    %c0_i32_147 = arith.constant 0 : i32
    %314 = tpu.memref_slice %arg4[%c0_i32_145, %c0_i32_146, %c0_i32_147] : memref<1x48x256xf32, #tpu.memory_space<vmem>> -> memref<1x48x256xf32, #tpu.memory_space<vmem>>
    %315 = tpu.memref_squeeze %314 : memref<1x48x256xf32, #tpu.memory_space<vmem>> -> memref<48x256xf32, #tpu.memory_space<vmem>>
    %316 = arith.index_cast %313 : i32 to index
    %c0_148 = arith.constant 0 : index
    %317 = vector.load %315[%316, %c0_148] : memref<48x256xf32, #tpu.memory_space<vmem>>, vector<1x256xf32>
    tpu.vector_store %315[%316, %c0_148], %312 {strides = array<i32>} : memref<48x256xf32, #tpu.memory_space<vmem>>, vector<1x256xf32>,
    %318 = vector.extract_strided_slice %310 {offsets = [1, 0], sizes = [1, 256], strides = [1, 1]} : vector<3x256xf32> to vector<1x256xf32>
    %319 = arith.addf %265, %318 : vector<1x256xf32>
    %c16_i32_149 = arith.constant 16 : i32
    %320 = arith.addi %c16_i32_149, %255 : i32
    %c0_i32_150 = arith.constant 0 : i32
    %c0_i32_151 = arith.constant 0 : i32
    %c0_i32_152 = arith.constant 0 : i32
    %321 = tpu.memref_slice %arg4[%c0_i32_150, %c0_i32_151, %c0_i32_152] : memref<1x48x256xf32, #tpu.memory_space<vmem>> -> memref<1x48x256xf32, #tpu.memory_space<vmem>>
    %322 = tpu.memref_squeeze %321 : memref<1x48x256xf32, #tpu.memory_space<vmem>> -> memref<48x256xf32, #tpu.memory_space<vmem>>
    %323 = arith.index_cast %320 : i32 to index
    %c0_153 = arith.constant 0 : index
    %324 = vector.load %322[%323, %c0_153] : memref<48x256xf32, #tpu.memory_space<vmem>>, vector<1x256xf32>
    tpu.vector_store %322[%323, %c0_153], %319 {strides = array<i32>} : memref<48x256xf32, #tpu.memory_space<vmem>>, vector<1x256xf32>,
    %325 = vector.extract_strided_slice %310 {offsets = [2, 0], sizes = [1, 256], strides = [1, 1]} : vector<3x256xf32> to vector<1x256xf32>
    %326 = arith.addf %270, %325 : vector<1x256xf32>
    %c32_i32_154 = arith.constant 32 : i32
    %327 = arith.addi %c32_i32_154, %255 : i32
    %c0_i32_155 = arith.constant 0 : i32
    %c0_i32_156 = arith.constant 0 : i32
    %c0_i32_157 = arith.constant 0 : i32
    %328 = tpu.memref_slice %arg4[%c0_i32_155, %c0_i32_156, %c0_i32_157] : memref<1x48x256xf32, #tpu.memory_space<vmem>> -> memref<1x48x256xf32, #tpu.memory_space<vmem>>
    %329 = tpu.memref_squeeze %328 : memref<1x48x256xf32, #tpu.memory_space<vmem>> -> memref<48x256xf32, #tpu.memory_space<vmem>>
    %330 = arith.index_cast %327 : i32 to index
    %c0_158 = arith.constant 0 : index
    %331 = vector.load %329[%330, %c0_158] : memref<48x256xf32, #tpu.memory_space<vmem>>, vector<1x256xf32>
    tpu.vector_store %329[%330, %c0_158], %326 {strides = array<i32>} : memref<48x256xf32, #tpu.memory_space<vmem>>, vector<1x256xf32>,
    %c8_i32_159 = arith.constant 8 : i32
    %332 = arith.muli %arg2, %c8_i32_159 : i32
    %c4_i32 = arith.constant 4 : i32
    %333 = arith.addi %332, %c4_i32 : i32
    %c0_i32_160 = arith.constant 0 : i32
    %334 = arith.addi %c0_i32_160, %333 : i32
    %c0_i32_161 = arith.constant 0 : i32
    %c0_i32_162 = arith.constant 0 : i32
    %c0_i32_163 = arith.constant 0 : i32
    %335 = tpu.memref_slice %arg4[%c0_i32_161, %c0_i32_162, %c0_i32_163] : memref<1x48x256xf32, #tpu.memory_space<vmem>> -> memref<1x48x256xf32, #tpu.memory_space<vmem>>
    %336 = tpu.memref_squeeze %335 : memref<1x48x256xf32, #tpu.memory_space<vmem>> -> memref<48x256xf32, #tpu.memory_space<vmem>>
    %337 = arith.index_cast %334 : i32 to index
    %c0_164 = arith.constant 0 : index
    %338 = vector.load %336[%337, %c0_164] : memref<48x256xf32, #tpu.memory_space<vmem>>, vector<1x256xf32>
    %c16_i32_165 = arith.constant 16 : i32
    %339 = arith.addi %c16_i32_165, %333 : i32
    %c0_i32_166 = arith.constant 0 : i32
    %c0_i32_167 = arith.constant 0 : i32
    %c0_i32_168 = arith.constant 0 : i32
    %340 = tpu.memref_slice %arg4[%c0_i32_166, %c0_i32_167, %c0_i32_168] : memref<1x48x256xf32, #tpu.memory_space<vmem>> -> memref<1x48x256xf32, #tpu.memory_space<vmem>>
    %341 = tpu.memref_squeeze %340 : memref<1x48x256xf32, #tpu.memory_space<vmem>> -> memref<48x256xf32, #tpu.memory_space<vmem>>
    %342 = arith.index_cast %339 : i32 to index
    %c0_169 = arith.constant 0 : index
    %343 = vector.load %341[%342, %c0_169] : memref<48x256xf32, #tpu.memory_space<vmem>>, vector<1x256xf32>
    %c32_i32_170 = arith.constant 32 : i32
    %344 = arith.addi %c32_i32_170, %333 : i32
    %c0_i32_171 = arith.constant 0 : i32
    %c0_i32_172 = arith.constant 0 : i32
    %c0_i32_173 = arith.constant 0 : i32
    %345 = tpu.memref_slice %arg4[%c0_i32_171, %c0_i32_172, %c0_i32_173] : memref<1x48x256xf32, #tpu.memory_space<vmem>> -> memref<1x48x256xf32, #tpu.memory_space<vmem>>
    %346 = tpu.memref_squeeze %345 : memref<1x48x256xf32, #tpu.memory_space<vmem>> -> memref<48x256xf32, #tpu.memory_space<vmem>>
    %347 = arith.index_cast %344 : i32 to index
    %c0_174 = arith.constant 0 : index
    %348 = vector.load %346[%347, %c0_174] : memref<48x256xf32, #tpu.memory_space<vmem>>, vector<1x256xf32>
    %349 = arith.sitofp %333 : i32 to f32
    %350 = vector.broadcast %349 : f32 to vector<1x256xf32>
    %351 = arith.addf %338, %350 : vector<1x256xf32>
    %352 = arith.addf %343, %10 : vector<1x256xf32>
    %353 = arith.addf %348, %13 : vector<1x256xf32>
    %354 = vector.broadcast %351 : vector<1x256xf32> to vector<16x256xf32>
    %355 = arith.subf %15, %354 : vector<16x256xf32>
    %356 = math.absf %355 : vector<16x256xf32>
    %cst_175 = arith.constant 1.000000e+00 : f32
    %357 = vector.broadcast %cst_175 : f32 to vector<16x256xf32>
    %358 = arith.subf %357, %356 : vector<16x256xf32>
    %cst_176 = arith.constant 0.000000e+00 : f32
    %359 = vector.broadcast %cst_176 : f32 to vector<16x256xf32>
    %360 = arith.maximumf %359, %358 : vector<16x256xf32>
    %361 = vector.broadcast %352 : vector<1x256xf32> to vector<16x256xf32>
    %362 = arith.subf %17, %361 : vector<16x256xf32>
    %363 = math.absf %362 : vector<16x256xf32>
    %cst_177 = arith.constant 1.000000e+00 : f32
    %364 = vector.broadcast %cst_177 : f32 to vector<16x256xf32>
    %365 = arith.subf %364, %363 : vector<16x256xf32>
    %cst_178 = arith.constant 0.000000e+00 : f32
    %366 = vector.broadcast %cst_178 : f32 to vector<16x256xf32>
    %367 = arith.maximumf %366, %365 : vector<16x256xf32>
    %368 = arith.truncf %367 : vector<16x256xf32> to vector<16x256xbf16>
    %369 = vector.broadcast %353 : vector<1x256xf32> to vector<16x256xf32>
    %370 = arith.subf %19, %369 : vector<16x256xf32>
    %371 = math.absf %370 : vector<16x256xf32>
    %cst_179 = arith.constant 1.000000e+00 : f32
    %372 = vector.broadcast %cst_179 : f32 to vector<16x256xf32>
    %373 = arith.subf %372, %371 : vector<16x256xf32>
    %cst_180 = arith.constant 0.000000e+00 : f32
    %374 = vector.broadcast %cst_180 : f32 to vector<16x256xf32>
    %375 = arith.maximumf %374, %373 : vector<16x256xf32>
    %376 = arith.truncf %375 : vector<16x256xf32> to vector<16x256xbf16>
    %377 = vector.shape_cast %368 : vector<16x256xbf16> to vector<16x1x256xbf16>
    %378 = vector.shape_cast %376 : vector<16x256xbf16> to vector<1x16x256xbf16>
    %379 = vector.broadcast %377 : vector<16x1x256xbf16> to vector<16x16x256xbf16>
    %380 = vector.broadcast %378 : vector<1x16x256xbf16> to vector<16x16x256xbf16>
    %381 = arith.mulf %379, %380 : vector<16x16x256xbf16>
    %382 = vector.shape_cast %381 : vector<16x16x256xbf16> to vector<256x256xbf16>
    %cst_181 = arith.constant dense<0.000000e+00> : vector<48x256xf32>
    %383 = tpu.matmul %3, %382, %cst_181 {dimension_numbers = #tpu.dot_dimension_numbers<[1], [0], [0], [1], [0, 0, 1, 1], [], []>} : vector<48x256xbf16>, vector<256x256xbf16>, vector<48x256xf32> -> vector<48x256xf32>
    %384 = vector.shape_cast %383 : vector<48x256xf32> to vector<3x16x256xf32>
    %385 = vector.shape_cast %360 : vector<16x256xf32> to vector<1x16x256xf32>
    %386 = vector.broadcast %385 : vector<1x16x256xf32> to vector<3x16x256xf32>
    %387 = arith.mulf %384, %386 : vector<3x16x256xf32>
    %cst_182 = arith.constant dense<0.000000e+00> : vector<3x256xf32>
    %388 = vector.multi_reduction <add>, %387, %cst_182 [1] : vector<3x16x256xf32> to vector<3x256xf32>
    %389 = vector.extract_strided_slice %388 {offsets = [0, 0], sizes = [1, 256], strides = [1, 1]} : vector<3x256xf32> to vector<1x256xf32>
    %390 = arith.addf %338, %389 : vector<1x256xf32>
    %c0_i32_183 = arith.constant 0 : i32
    %391 = arith.addi %c0_i32_183, %333 : i32
    %c0_i32_184 = arith.constant 0 : i32
    %c0_i32_185 = arith.constant 0 : i32
    %c0_i32_186 = arith.constant 0 : i32
    %392 = tpu.memref_slice %arg4[%c0_i32_184, %c0_i32_185, %c0_i32_186] : memref<1x48x256xf32, #tpu.memory_space<vmem>> -> memref<1x48x256xf32, #tpu.memory_space<vmem>>
    %393 = tpu.memref_squeeze %392 : memref<1x48x256xf32, #tpu.memory_space<vmem>> -> memref<48x256xf32, #tpu.memory_space<vmem>>
    %394 = arith.index_cast %391 : i32 to index
    %c0_187 = arith.constant 0 : index
    %395 = vector.load %393[%394, %c0_187] : memref<48x256xf32, #tpu.memory_space<vmem>>, vector<1x256xf32>
    tpu.vector_store %393[%394, %c0_187], %390 {strides = array<i32>} : memref<48x256xf32, #tpu.memory_space<vmem>>, vector<1x256xf32>,
    %396 = vector.extract_strided_slice %388 {offsets = [1, 0], sizes = [1, 256], strides = [1, 1]} : vector<3x256xf32> to vector<1x256xf32>
    %397 = arith.addf %343, %396 : vector<1x256xf32>
    %c16_i32_188 = arith.constant 16 : i32
    %398 = arith.addi %c16_i32_188, %333 : i32
    %c0_i32_189 = arith.constant 0 : i32
    %c0_i32_190 = arith.constant 0 : i32
    %c0_i32_191 = arith.constant 0 : i32
    %399 = tpu.memref_slice %arg4[%c0_i32_189, %c0_i32_190, %c0_i32_191] : memref<1x48x256xf32, #tpu.memory_space<vmem>> -> memref<1x48x256xf32, #tpu.memory_space<vmem>>
    %400 = tpu.memref_squeeze %399 : memref<1x48x256xf32, #tpu.memory_space<vmem>> -> memref<48x256xf32, #tpu.memory_space<vmem>>
    %401 = arith.index_cast %398 : i32 to index
    %c0_192 = arith.constant 0 : index
    %402 = vector.load %400[%401, %c0_192] : memref<48x256xf32, #tpu.memory_space<vmem>>, vector<1x256xf32>
    tpu.vector_store %400[%401, %c0_192], %397 {strides = array<i32>} : memref<48x256xf32, #tpu.memory_space<vmem>>, vector<1x256xf32>,
    %403 = vector.extract_strided_slice %388 {offsets = [2, 0], sizes = [1, 256], strides = [1, 1]} : vector<3x256xf32> to vector<1x256xf32>
    %404 = arith.addf %348, %403 : vector<1x256xf32>
    %c32_i32_193 = arith.constant 32 : i32
    %405 = arith.addi %c32_i32_193, %333 : i32
    %c0_i32_194 = arith.constant 0 : i32
    %c0_i32_195 = arith.constant 0 : i32
    %c0_i32_196 = arith.constant 0 : i32
    %406 = tpu.memref_slice %arg4[%c0_i32_194, %c0_i32_195, %c0_i32_196] : memref<1x48x256xf32, #tpu.memory_space<vmem>> -> memref<1x48x256xf32, #tpu.memory_space<vmem>>
    %407 = tpu.memref_squeeze %406 : memref<1x48x256xf32, #tpu.memory_space<vmem>> -> memref<48x256xf32, #tpu.memory_space<vmem>>
    %408 = arith.index_cast %405 : i32 to index
    %c0_197 = arith.constant 0 : index
    %409 = vector.load %407[%408, %c0_197] : memref<48x256xf32, #tpu.memory_space<vmem>>, vector<1x256xf32>
    tpu.vector_store %407[%408, %c0_197], %404 {strides = array<i32>} : memref<48x256xf32, #tpu.memory_space<vmem>>, vector<1x256xf32>,
    %c8_i32_198 = arith.constant 8 : i32
    %410 = arith.muli %arg2, %c8_i32_198 : i32
    %c5_i32 = arith.constant 5 : i32
    %411 = arith.addi %410, %c5_i32 : i32
    %c0_i32_199 = arith.constant 0 : i32
    %412 = arith.addi %c0_i32_199, %411 : i32
    %c0_i32_200 = arith.constant 0 : i32
    %c0_i32_201 = arith.constant 0 : i32
    %c0_i32_202 = arith.constant 0 : i32
    %413 = tpu.memref_slice %arg4[%c0_i32_200, %c0_i32_201, %c0_i32_202] : memref<1x48x256xf32, #tpu.memory_space<vmem>> -> memref<1x48x256xf32, #tpu.memory_space<vmem>>
    %414 = tpu.memref_squeeze %413 : memref<1x48x256xf32, #tpu.memory_space<vmem>> -> memref<48x256xf32, #tpu.memory_space<vmem>>
    %415 = arith.index_cast %412 : i32 to index
    %c0_203 = arith.constant 0 : index
    %416 = vector.load %414[%415, %c0_203] : memref<48x256xf32, #tpu.memory_space<vmem>>, vector<1x256xf32>
    %c16_i32_204 = arith.constant 16 : i32
    %417 = arith.addi %c16_i32_204, %411 : i32
    %c0_i32_205 = arith.constant 0 : i32
    %c0_i32_206 = arith.constant 0 : i32
    %c0_i32_207 = arith.constant 0 : i32
    %418 = tpu.memref_slice %arg4[%c0_i32_205, %c0_i32_206, %c0_i32_207] : memref<1x48x256xf32, #tpu.memory_space<vmem>> -> memref<1x48x256xf32, #tpu.memory_space<vmem>>
    %419 = tpu.memref_squeeze %418 : memref<1x48x256xf32, #tpu.memory_space<vmem>> -> memref<48x256xf32, #tpu.memory_space<vmem>>
    %420 = arith.index_cast %417 : i32 to index
    %c0_208 = arith.constant 0 : index
    %421 = vector.load %419[%420, %c0_208] : memref<48x256xf32, #tpu.memory_space<vmem>>, vector<1x256xf32>
    %c32_i32_209 = arith.constant 32 : i32
    %422 = arith.addi %c32_i32_209, %411 : i32
    %c0_i32_210 = arith.constant 0 : i32
    %c0_i32_211 = arith.constant 0 : i32
    %c0_i32_212 = arith.constant 0 : i32
    %423 = tpu.memref_slice %arg4[%c0_i32_210, %c0_i32_211, %c0_i32_212] : memref<1x48x256xf32, #tpu.memory_space<vmem>> -> memref<1x48x256xf32, #tpu.memory_space<vmem>>
    %424 = tpu.memref_squeeze %423 : memref<1x48x256xf32, #tpu.memory_space<vmem>> -> memref<48x256xf32, #tpu.memory_space<vmem>>
    %425 = arith.index_cast %422 : i32 to index
    %c0_213 = arith.constant 0 : index
    %426 = vector.load %424[%425, %c0_213] : memref<48x256xf32, #tpu.memory_space<vmem>>, vector<1x256xf32>
    %427 = arith.sitofp %411 : i32 to f32
    %428 = vector.broadcast %427 : f32 to vector<1x256xf32>
    %429 = arith.addf %416, %428 : vector<1x256xf32>
    %430 = arith.addf %421, %10 : vector<1x256xf32>
    %431 = arith.addf %426, %13 : vector<1x256xf32>
    %432 = vector.broadcast %429 : vector<1x256xf32> to vector<16x256xf32>
    %433 = arith.subf %15, %432 : vector<16x256xf32>
    %434 = math.absf %433 : vector<16x256xf32>
    %cst_214 = arith.constant 1.000000e+00 : f32
    %435 = vector.broadcast %cst_214 : f32 to vector<16x256xf32>
    %436 = arith.subf %435, %434 : vector<16x256xf32>
    %cst_215 = arith.constant 0.000000e+00 : f32
    %437 = vector.broadcast %cst_215 : f32 to vector<16x256xf32>
    %438 = arith.maximumf %437, %436 : vector<16x256xf32>
    %439 = vector.broadcast %430 : vector<1x256xf32> to vector<16x256xf32>
    %440 = arith.subf %17, %439 : vector<16x256xf32>
    %441 = math.absf %440 : vector<16x256xf32>
    %cst_216 = arith.constant 1.000000e+00 : f32
    %442 = vector.broadcast %cst_216 : f32 to vector<16x256xf32>
    %443 = arith.subf %442, %441 : vector<16x256xf32>
    %cst_217 = arith.constant 0.000000e+00 : f32
    %444 = vector.broadcast %cst_217 : f32 to vector<16x256xf32>
    %445 = arith.maximumf %444, %443 : vector<16x256xf32>
    %446 = arith.truncf %445 : vector<16x256xf32> to vector<16x256xbf16>
    %447 = vector.broadcast %431 : vector<1x256xf32> to vector<16x256xf32>
    %448 = arith.subf %19, %447 : vector<16x256xf32>
    %449 = math.absf %448 : vector<16x256xf32>
    %cst_218 = arith.constant 1.000000e+00 : f32
    %450 = vector.broadcast %cst_218 : f32 to vector<16x256xf32>
    %451 = arith.subf %450, %449 : vector<16x256xf32>
    %cst_219 = arith.constant 0.000000e+00 : f32
    %452 = vector.broadcast %cst_219 : f32 to vector<16x256xf32>
    %453 = arith.maximumf %452, %451 : vector<16x256xf32>
    %454 = arith.truncf %453 : vector<16x256xf32> to vector<16x256xbf16>
    %455 = vector.shape_cast %446 : vector<16x256xbf16> to vector<16x1x256xbf16>
    %456 = vector.shape_cast %454 : vector<16x256xbf16> to vector<1x16x256xbf16>
    %457 = vector.broadcast %455 : vector<16x1x256xbf16> to vector<16x16x256xbf16>
    %458 = vector.broadcast %456 : vector<1x16x256xbf16> to vector<16x16x256xbf16>
    %459 = arith.mulf %457, %458 : vector<16x16x256xbf16>
    %460 = vector.shape_cast %459 : vector<16x16x256xbf16> to vector<256x256xbf16>
    %cst_220 = arith.constant dense<0.000000e+00> : vector<48x256xf32>
    %461 = tpu.matmul %3, %460, %cst_220 {dimension_numbers = #tpu.dot_dimension_numbers<[1], [0], [0], [1], [0, 0, 1, 1], [], []>} : vector<48x256xbf16>, vector<256x256xbf16>, vector<48x256xf32> -> vector<48x256xf32>
    %462 = vector.shape_cast %461 : vector<48x256xf32> to vector<3x16x256xf32>
    %463 = vector.shape_cast %438 : vector<16x256xf32> to vector<1x16x256xf32>
    %464 = vector.broadcast %463 : vector<1x16x256xf32> to vector<3x16x256xf32>
    %465 = arith.mulf %462, %464 : vector<3x16x256xf32>
    %cst_221 = arith.constant dense<0.000000e+00> : vector<3x256xf32>
    %466 = vector.multi_reduction <add>, %465, %cst_221 [1] : vector<3x16x256xf32> to vector<3x256xf32>
    %467 = vector.extract_strided_slice %466 {offsets = [0, 0], sizes = [1, 256], strides = [1, 1]} : vector<3x256xf32> to vector<1x256xf32>
    %468 = arith.addf %416, %467 : vector<1x256xf32>
    %c0_i32_222 = arith.constant 0 : i32
    %469 = arith.addi %c0_i32_222, %411 : i32
    %c0_i32_223 = arith.constant 0 : i32
    %c0_i32_224 = arith.constant 0 : i32
    %c0_i32_225 = arith.constant 0 : i32
    %470 = tpu.memref_slice %arg4[%c0_i32_223, %c0_i32_224, %c0_i32_225] : memref<1x48x256xf32, #tpu.memory_space<vmem>> -> memref<1x48x256xf32, #tpu.memory_space<vmem>>
    %471 = tpu.memref_squeeze %470 : memref<1x48x256xf32, #tpu.memory_space<vmem>> -> memref<48x256xf32, #tpu.memory_space<vmem>>
    %472 = arith.index_cast %469 : i32 to index
    %c0_226 = arith.constant 0 : index
    %473 = vector.load %471[%472, %c0_226] : memref<48x256xf32, #tpu.memory_space<vmem>>, vector<1x256xf32>
    tpu.vector_store %471[%472, %c0_226], %468 {strides = array<i32>} : memref<48x256xf32, #tpu.memory_space<vmem>>, vector<1x256xf32>,
    %474 = vector.extract_strided_slice %466 {offsets = [1, 0], sizes = [1, 256], strides = [1, 1]} : vector<3x256xf32> to vector<1x256xf32>
    %475 = arith.addf %421, %474 : vector<1x256xf32>
    %c16_i32_227 = arith.constant 16 : i32
    %476 = arith.addi %c16_i32_227, %411 : i32
    %c0_i32_228 = arith.constant 0 : i32
    %c0_i32_229 = arith.constant 0 : i32
    %c0_i32_230 = arith.constant 0 : i32
    %477 = tpu.memref_slice %arg4[%c0_i32_228, %c0_i32_229, %c0_i32_230] : memref<1x48x256xf32, #tpu.memory_space<vmem>> -> memref<1x48x256xf32, #tpu.memory_space<vmem>>
    %478 = tpu.memref_squeeze %477 : memref<1x48x256xf32, #tpu.memory_space<vmem>> -> memref<48x256xf32, #tpu.memory_space<vmem>>
    %479 = arith.index_cast %476 : i32 to index
    %c0_231 = arith.constant 0 : index
    %480 = vector.load %478[%479, %c0_231] : memref<48x256xf32, #tpu.memory_space<vmem>>, vector<1x256xf32>
    tpu.vector_store %478[%479, %c0_231], %475 {strides = array<i32>} : memref<48x256xf32, #tpu.memory_space<vmem>>, vector<1x256xf32>,
    %481 = vector.extract_strided_slice %466 {offsets = [2, 0], sizes = [1, 256], strides = [1, 1]} : vector<3x256xf32> to vector<1x256xf32>
    %482 = arith.addf %426, %481 : vector<1x256xf32>
    %c32_i32_232 = arith.constant 32 : i32
    %483 = arith.addi %c32_i32_232, %411 : i32
    %c0_i32_233 = arith.constant 0 : i32
    %c0_i32_234 = arith.constant 0 : i32
    %c0_i32_235 = arith.constant 0 : i32
    %484 = tpu.memref_slice %arg4[%c0_i32_233, %c0_i32_234, %c0_i32_235] : memref<1x48x256xf32, #tpu.memory_space<vmem>> -> memref<1x48x256xf32, #tpu.memory_space<vmem>>
    %485 = tpu.memref_squeeze %484 : memref<1x48x256xf32, #tpu.memory_space<vmem>> -> memref<48x256xf32, #tpu.memory_space<vmem>>
    %486 = arith.index_cast %483 : i32 to index
    %c0_236 = arith.constant 0 : index
    %487 = vector.load %485[%486, %c0_236] : memref<48x256xf32, #tpu.memory_space<vmem>>, vector<1x256xf32>
    tpu.vector_store %485[%486, %c0_236], %482 {strides = array<i32>} : memref<48x256xf32, #tpu.memory_space<vmem>>, vector<1x256xf32>,
    %c8_i32_237 = arith.constant 8 : i32
    %488 = arith.muli %arg2, %c8_i32_237 : i32
    %c6_i32 = arith.constant 6 : i32
    %489 = arith.addi %488, %c6_i32 : i32
    %c0_i32_238 = arith.constant 0 : i32
    %490 = arith.addi %c0_i32_238, %489 : i32
    %c0_i32_239 = arith.constant 0 : i32
    %c0_i32_240 = arith.constant 0 : i32
    %c0_i32_241 = arith.constant 0 : i32
    %491 = tpu.memref_slice %arg4[%c0_i32_239, %c0_i32_240, %c0_i32_241] : memref<1x48x256xf32, #tpu.memory_space<vmem>> -> memref<1x48x256xf32, #tpu.memory_space<vmem>>
    %492 = tpu.memref_squeeze %491 : memref<1x48x256xf32, #tpu.memory_space<vmem>> -> memref<48x256xf32, #tpu.memory_space<vmem>>
    %493 = arith.index_cast %490 : i32 to index
    %c0_242 = arith.constant 0 : index
    %494 = vector.load %492[%493, %c0_242] : memref<48x256xf32, #tpu.memory_space<vmem>>, vector<1x256xf32>
    %c16_i32_243 = arith.constant 16 : i32
    %495 = arith.addi %c16_i32_243, %489 : i32
    %c0_i32_244 = arith.constant 0 : i32
    %c0_i32_245 = arith.constant 0 : i32
    %c0_i32_246 = arith.constant 0 : i32
    %496 = tpu.memref_slice %arg4[%c0_i32_244, %c0_i32_245, %c0_i32_246] : memref<1x48x256xf32, #tpu.memory_space<vmem>> -> memref<1x48x256xf32, #tpu.memory_space<vmem>>
    %497 = tpu.memref_squeeze %496 : memref<1x48x256xf32, #tpu.memory_space<vmem>> -> memref<48x256xf32, #tpu.memory_space<vmem>>
    %498 = arith.index_cast %495 : i32 to index
    %c0_247 = arith.constant 0 : index
    %499 = vector.load %497[%498, %c0_247] : memref<48x256xf32, #tpu.memory_space<vmem>>, vector<1x256xf32>
    %c32_i32_248 = arith.constant 32 : i32
    %500 = arith.addi %c32_i32_248, %489 : i32
    %c0_i32_249 = arith.constant 0 : i32
    %c0_i32_250 = arith.constant 0 : i32
    %c0_i32_251 = arith.constant 0 : i32
    %501 = tpu.memref_slice %arg4[%c0_i32_249, %c0_i32_250, %c0_i32_251] : memref<1x48x256xf32, #tpu.memory_space<vmem>> -> memref<1x48x256xf32, #tpu.memory_space<vmem>>
    %502 = tpu.memref_squeeze %501 : memref<1x48x256xf32, #tpu.memory_space<vmem>> -> memref<48x256xf32, #tpu.memory_space<vmem>>
    %503 = arith.index_cast %500 : i32 to index
    %c0_252 = arith.constant 0 : index
    %504 = vector.load %502[%503, %c0_252] : memref<48x256xf32, #tpu.memory_space<vmem>>, vector<1x256xf32>
    %505 = arith.sitofp %489 : i32 to f32
    %506 = vector.broadcast %505 : f32 to vector<1x256xf32>
    %507 = arith.addf %494, %506 : vector<1x256xf32>
    %508 = arith.addf %499, %10 : vector<1x256xf32>
    %509 = arith.addf %504, %13 : vector<1x256xf32>
    %510 = vector.broadcast %507 : vector<1x256xf32> to vector<16x256xf32>
    %511 = arith.subf %15, %510 : vector<16x256xf32>
    %512 = math.absf %511 : vector<16x256xf32>
    %cst_253 = arith.constant 1.000000e+00 : f32
    %513 = vector.broadcast %cst_253 : f32 to vector<16x256xf32>
    %514 = arith.subf %513, %512 : vector<16x256xf32>
    %cst_254 = arith.constant 0.000000e+00 : f32
    %515 = vector.broadcast %cst_254 : f32 to vector<16x256xf32>
    %516 = arith.maximumf %515, %514 : vector<16x256xf32>
    %517 = vector.broadcast %508 : vector<1x256xf32> to vector<16x256xf32>
    %518 = arith.subf %17, %517 : vector<16x256xf32>
    %519 = math.absf %518 : vector<16x256xf32>
    %cst_255 = arith.constant 1.000000e+00 : f32
    %520 = vector.broadcast %cst_255 : f32 to vector<16x256xf32>
    %521 = arith.subf %520, %519 : vector<16x256xf32>
    %cst_256 = arith.constant 0.000000e+00 : f32
    %522 = vector.broadcast %cst_256 : f32 to vector<16x256xf32>
    %523 = arith.maximumf %522, %521 : vector<16x256xf32>
    %524 = arith.truncf %523 : vector<16x256xf32> to vector<16x256xbf16>
    %525 = vector.broadcast %509 : vector<1x256xf32> to vector<16x256xf32>
    %526 = arith.subf %19, %525 : vector<16x256xf32>
    %527 = math.absf %526 : vector<16x256xf32>
    %cst_257 = arith.constant 1.000000e+00 : f32
    %528 = vector.broadcast %cst_257 : f32 to vector<16x256xf32>
    %529 = arith.subf %528, %527 : vector<16x256xf32>
    %cst_258 = arith.constant 0.000000e+00 : f32
    %530 = vector.broadcast %cst_258 : f32 to vector<16x256xf32>
    %531 = arith.maximumf %530, %529 : vector<16x256xf32>
    %532 = arith.truncf %531 : vector<16x256xf32> to vector<16x256xbf16>
    %533 = vector.shape_cast %524 : vector<16x256xbf16> to vector<16x1x256xbf16>
    %534 = vector.shape_cast %532 : vector<16x256xbf16> to vector<1x16x256xbf16>
    %535 = vector.broadcast %533 : vector<16x1x256xbf16> to vector<16x16x256xbf16>
    %536 = vector.broadcast %534 : vector<1x16x256xbf16> to vector<16x16x256xbf16>
    %537 = arith.mulf %535, %536 : vector<16x16x256xbf16>
    %538 = vector.shape_cast %537 : vector<16x16x256xbf16> to vector<256x256xbf16>
    %cst_259 = arith.constant dense<0.000000e+00> : vector<48x256xf32>
    %539 = tpu.matmul %3, %538, %cst_259 {dimension_numbers = #tpu.dot_dimension_numbers<[1], [0], [0], [1], [0, 0, 1, 1], [], []>} : vector<48x256xbf16>, vector<256x256xbf16>, vector<48x256xf32> -> vector<48x256xf32>
    %540 = vector.shape_cast %539 : vector<48x256xf32> to vector<3x16x256xf32>
    %541 = vector.shape_cast %516 : vector<16x256xf32> to vector<1x16x256xf32>
    %542 = vector.broadcast %541 : vector<1x16x256xf32> to vector<3x16x256xf32>
    %543 = arith.mulf %540, %542 : vector<3x16x256xf32>
    %cst_260 = arith.constant dense<0.000000e+00> : vector<3x256xf32>
    %544 = vector.multi_reduction <add>, %543, %cst_260 [1] : vector<3x16x256xf32> to vector<3x256xf32>
    %545 = vector.extract_strided_slice %544 {offsets = [0, 0], sizes = [1, 256], strides = [1, 1]} : vector<3x256xf32> to vector<1x256xf32>
    %546 = arith.addf %494, %545 : vector<1x256xf32>
    %c0_i32_261 = arith.constant 0 : i32
    %547 = arith.addi %c0_i32_261, %489 : i32
    %c0_i32_262 = arith.constant 0 : i32
    %c0_i32_263 = arith.constant 0 : i32
    %c0_i32_264 = arith.constant 0 : i32
    %548 = tpu.memref_slice %arg4[%c0_i32_262, %c0_i32_263, %c0_i32_264] : memref<1x48x256xf32, #tpu.memory_space<vmem>> -> memref<1x48x256xf32, #tpu.memory_space<vmem>>
    %549 = tpu.memref_squeeze %548 : memref<1x48x256xf32, #tpu.memory_space<vmem>> -> memref<48x256xf32, #tpu.memory_space<vmem>>
    %550 = arith.index_cast %547 : i32 to index
    %c0_265 = arith.constant 0 : index
    %551 = vector.load %549[%550, %c0_265] : memref<48x256xf32, #tpu.memory_space<vmem>>, vector<1x256xf32>
    tpu.vector_store %549[%550, %c0_265], %546 {strides = array<i32>} : memref<48x256xf32, #tpu.memory_space<vmem>>, vector<1x256xf32>,
    %552 = vector.extract_strided_slice %544 {offsets = [1, 0], sizes = [1, 256], strides = [1, 1]} : vector<3x256xf32> to vector<1x256xf32>
    %553 = arith.addf %499, %552 : vector<1x256xf32>
    %c16_i32_266 = arith.constant 16 : i32
    %554 = arith.addi %c16_i32_266, %489 : i32
    %c0_i32_267 = arith.constant 0 : i32
    %c0_i32_268 = arith.constant 0 : i32
    %c0_i32_269 = arith.constant 0 : i32
    %555 = tpu.memref_slice %arg4[%c0_i32_267, %c0_i32_268, %c0_i32_269] : memref<1x48x256xf32, #tpu.memory_space<vmem>> -> memref<1x48x256xf32, #tpu.memory_space<vmem>>
    %556 = tpu.memref_squeeze %555 : memref<1x48x256xf32, #tpu.memory_space<vmem>> -> memref<48x256xf32, #tpu.memory_space<vmem>>
    %557 = arith.index_cast %554 : i32 to index
    %c0_270 = arith.constant 0 : index
    %558 = vector.load %556[%557, %c0_270] : memref<48x256xf32, #tpu.memory_space<vmem>>, vector<1x256xf32>
    tpu.vector_store %556[%557, %c0_270], %553 {strides = array<i32>} : memref<48x256xf32, #tpu.memory_space<vmem>>, vector<1x256xf32>,
    %559 = vector.extract_strided_slice %544 {offsets = [2, 0], sizes = [1, 256], strides = [1, 1]} : vector<3x256xf32> to vector<1x256xf32>
    %560 = arith.addf %504, %559 : vector<1x256xf32>
    %c32_i32_271 = arith.constant 32 : i32
    %561 = arith.addi %c32_i32_271, %489 : i32
    %c0_i32_272 = arith.constant 0 : i32
    %c0_i32_273 = arith.constant 0 : i32
    %c0_i32_274 = arith.constant 0 : i32
    %562 = tpu.memref_slice %arg4[%c0_i32_272, %c0_i32_273, %c0_i32_274] : memref<1x48x256xf32, #tpu.memory_space<vmem>> -> memref<1x48x256xf32, #tpu.memory_space<vmem>>
    %563 = tpu.memref_squeeze %562 : memref<1x48x256xf32, #tpu.memory_space<vmem>> -> memref<48x256xf32, #tpu.memory_space<vmem>>
    %564 = arith.index_cast %561 : i32 to index
    %c0_275 = arith.constant 0 : index
    %565 = vector.load %563[%564, %c0_275] : memref<48x256xf32, #tpu.memory_space<vmem>>, vector<1x256xf32>
    tpu.vector_store %563[%564, %c0_275], %560 {strides = array<i32>} : memref<48x256xf32, #tpu.memory_space<vmem>>, vector<1x256xf32>,
    %c8_i32_276 = arith.constant 8 : i32
    %566 = arith.muli %arg2, %c8_i32_276 : i32
    %c7_i32 = arith.constant 7 : i32
    %567 = arith.addi %566, %c7_i32 : i32
    %c0_i32_277 = arith.constant 0 : i32
    %568 = arith.addi %c0_i32_277, %567 : i32
    %c0_i32_278 = arith.constant 0 : i32
    %c0_i32_279 = arith.constant 0 : i32
    %c0_i32_280 = arith.constant 0 : i32
    %569 = tpu.memref_slice %arg4[%c0_i32_278, %c0_i32_279, %c0_i32_280] : memref<1x48x256xf32, #tpu.memory_space<vmem>> -> memref<1x48x256xf32, #tpu.memory_space<vmem>>
    %570 = tpu.memref_squeeze %569 : memref<1x48x256xf32, #tpu.memory_space<vmem>> -> memref<48x256xf32, #tpu.memory_space<vmem>>
    %571 = arith.index_cast %568 : i32 to index
    %c0_281 = arith.constant 0 : index
    %572 = vector.load %570[%571, %c0_281] : memref<48x256xf32, #tpu.memory_space<vmem>>, vector<1x256xf32>
    %c16_i32_282 = arith.constant 16 : i32
    %573 = arith.addi %c16_i32_282, %567 : i32
    %c0_i32_283 = arith.constant 0 : i32
    %c0_i32_284 = arith.constant 0 : i32
    %c0_i32_285 = arith.constant 0 : i32
    %574 = tpu.memref_slice %arg4[%c0_i32_283, %c0_i32_284, %c0_i32_285] : memref<1x48x256xf32, #tpu.memory_space<vmem>> -> memref<1x48x256xf32, #tpu.memory_space<vmem>>
    %575 = tpu.memref_squeeze %574 : memref<1x48x256xf32, #tpu.memory_space<vmem>> -> memref<48x256xf32, #tpu.memory_space<vmem>>
    %576 = arith.index_cast %573 : i32 to index
    %c0_286 = arith.constant 0 : index
    %577 = vector.load %575[%576, %c0_286] : memref<48x256xf32, #tpu.memory_space<vmem>>, vector<1x256xf32>
    %c32_i32_287 = arith.constant 32 : i32
    %578 = arith.addi %c32_i32_287, %567 : i32
    %c0_i32_288 = arith.constant 0 : i32
    %c0_i32_289 = arith.constant 0 : i32
    %c0_i32_290 = arith.constant 0 : i32
    %579 = tpu.memref_slice %arg4[%c0_i32_288, %c0_i32_289, %c0_i32_290] : memref<1x48x256xf32, #tpu.memory_space<vmem>> -> memref<1x48x256xf32, #tpu.memory_space<vmem>>
    %580 = tpu.memref_squeeze %579 : memref<1x48x256xf32, #tpu.memory_space<vmem>> -> memref<48x256xf32, #tpu.memory_space<vmem>>
    %581 = arith.index_cast %578 : i32 to index
    %c0_291 = arith.constant 0 : index
    %582 = vector.load %580[%581, %c0_291] : memref<48x256xf32, #tpu.memory_space<vmem>>, vector<1x256xf32>
    %583 = arith.sitofp %567 : i32 to f32
    %584 = vector.broadcast %583 : f32 to vector<1x256xf32>
    %585 = arith.addf %572, %584 : vector<1x256xf32>
    %586 = arith.addf %577, %10 : vector<1x256xf32>
    %587 = arith.addf %582, %13 : vector<1x256xf32>
    %588 = vector.broadcast %585 : vector<1x256xf32> to vector<16x256xf32>
    %589 = arith.subf %15, %588 : vector<16x256xf32>
    %590 = math.absf %589 : vector<16x256xf32>
    %cst_292 = arith.constant 1.000000e+00 : f32
    %591 = vector.broadcast %cst_292 : f32 to vector<16x256xf32>
    %592 = arith.subf %591, %590 : vector<16x256xf32>
    %cst_293 = arith.constant 0.000000e+00 : f32
    %593 = vector.broadcast %cst_293 : f32 to vector<16x256xf32>
    %594 = arith.maximumf %593, %592 : vector<16x256xf32>
    %595 = vector.broadcast %586 : vector<1x256xf32> to vector<16x256xf32>
    %596 = arith.subf %17, %595 : vector<16x256xf32>
    %597 = math.absf %596 : vector<16x256xf32>
    %cst_294 = arith.constant 1.000000e+00 : f32
    %598 = vector.broadcast %cst_294 : f32 to vector<16x256xf32>
    %599 = arith.subf %598, %597 : vector<16x256xf32>
    %cst_295 = arith.constant 0.000000e+00 : f32
    %600 = vector.broadcast %cst_295 : f32 to vector<16x256xf32>
    %601 = arith.maximumf %600, %599 : vector<16x256xf32>
    %602 = arith.truncf %601 : vector<16x256xf32> to vector<16x256xbf16>
    %603 = vector.broadcast %587 : vector<1x256xf32> to vector<16x256xf32>
    %604 = arith.subf %19, %603 : vector<16x256xf32>
    %605 = math.absf %604 : vector<16x256xf32>
    %cst_296 = arith.constant 1.000000e+00 : f32
    %606 = vector.broadcast %cst_296 : f32 to vector<16x256xf32>
    %607 = arith.subf %606, %605 : vector<16x256xf32>
    %cst_297 = arith.constant 0.000000e+00 : f32
    %608 = vector.broadcast %cst_297 : f32 to vector<16x256xf32>
    %609 = arith.maximumf %608, %607 : vector<16x256xf32>
    %610 = arith.truncf %609 : vector<16x256xf32> to vector<16x256xbf16>
    %611 = vector.shape_cast %602 : vector<16x256xbf16> to vector<16x1x256xbf16>
    %612 = vector.shape_cast %610 : vector<16x256xbf16> to vector<1x16x256xbf16>
    %613 = vector.broadcast %611 : vector<16x1x256xbf16> to vector<16x16x256xbf16>
    %614 = vector.broadcast %612 : vector<1x16x256xbf16> to vector<16x16x256xbf16>
    %615 = arith.mulf %613, %614 : vector<16x16x256xbf16>
    %616 = vector.shape_cast %615 : vector<16x16x256xbf16> to vector<256x256xbf16>
    %cst_298 = arith.constant dense<0.000000e+00> : vector<48x256xf32>
    %617 = tpu.matmul %3, %616, %cst_298 {dimension_numbers = #tpu.dot_dimension_numbers<[1], [0], [0], [1], [0, 0, 1, 1], [], []>} : vector<48x256xbf16>, vector<256x256xbf16>, vector<48x256xf32> -> vector<48x256xf32>
    %618 = vector.shape_cast %617 : vector<48x256xf32> to vector<3x16x256xf32>
    %619 = vector.shape_cast %594 : vector<16x256xf32> to vector<1x16x256xf32>
    %620 = vector.broadcast %619 : vector<1x16x256xf32> to vector<3x16x256xf32>
    %621 = arith.mulf %618, %620 : vector<3x16x256xf32>
    %cst_299 = arith.constant dense<0.000000e+00> : vector<3x256xf32>
    %622 = vector.multi_reduction <add>, %621, %cst_299 [1] : vector<3x16x256xf32> to vector<3x256xf32>
    %623 = vector.extract_strided_slice %622 {offsets = [0, 0], sizes = [1, 256], strides = [1, 1]} : vector<3x256xf32> to vector<1x256xf32>
    %624 = arith.addf %572, %623 : vector<1x256xf32>
    %c0_i32_300 = arith.constant 0 : i32
    %625 = arith.addi %c0_i32_300, %567 : i32
    %c0_i32_301 = arith.constant 0 : i32
    %c0_i32_302 = arith.constant 0 : i32
    %c0_i32_303 = arith.constant 0 : i32
    %626 = tpu.memref_slice %arg4[%c0_i32_301, %c0_i32_302, %c0_i32_303] : memref<1x48x256xf32, #tpu.memory_space<vmem>> -> memref<1x48x256xf32, #tpu.memory_space<vmem>>
    %627 = tpu.memref_squeeze %626 : memref<1x48x256xf32, #tpu.memory_space<vmem>> -> memref<48x256xf32, #tpu.memory_space<vmem>>
    %628 = arith.index_cast %625 : i32 to index
    %c0_304 = arith.constant 0 : index
    %629 = vector.load %627[%628, %c0_304] : memref<48x256xf32, #tpu.memory_space<vmem>>, vector<1x256xf32>
    tpu.vector_store %627[%628, %c0_304], %624 {strides = array<i32>} : memref<48x256xf32, #tpu.memory_space<vmem>>, vector<1x256xf32>,
    %630 = vector.extract_strided_slice %622 {offsets = [1, 0], sizes = [1, 256], strides = [1, 1]} : vector<3x256xf32> to vector<1x256xf32>
    %631 = arith.addf %577, %630 : vector<1x256xf32>
    %c16_i32_305 = arith.constant 16 : i32
    %632 = arith.addi %c16_i32_305, %567 : i32
    %c0_i32_306 = arith.constant 0 : i32
    %c0_i32_307 = arith.constant 0 : i32
    %c0_i32_308 = arith.constant 0 : i32
    %633 = tpu.memref_slice %arg4[%c0_i32_306, %c0_i32_307, %c0_i32_308] : memref<1x48x256xf32, #tpu.memory_space<vmem>> -> memref<1x48x256xf32, #tpu.memory_space<vmem>>
    %634 = tpu.memref_squeeze %633 : memref<1x48x256xf32, #tpu.memory_space<vmem>> -> memref<48x256xf32, #tpu.memory_space<vmem>>
    %635 = arith.index_cast %632 : i32 to index
    %c0_309 = arith.constant 0 : index
    %636 = vector.load %634[%635, %c0_309] : memref<48x256xf32, #tpu.memory_space<vmem>>, vector<1x256xf32>
    tpu.vector_store %634[%635, %c0_309], %631 {strides = array<i32>} : memref<48x256xf32, #tpu.memory_space<vmem>>, vector<1x256xf32>,
    %637 = vector.extract_strided_slice %622 {offsets = [2, 0], sizes = [1, 256], strides = [1, 1]} : vector<3x256xf32> to vector<1x256xf32>
    %638 = arith.addf %582, %637 : vector<1x256xf32>
    %c32_i32_310 = arith.constant 32 : i32
    %639 = arith.addi %c32_i32_310, %567 : i32
    %c0_i32_311 = arith.constant 0 : i32
    %c0_i32_312 = arith.constant 0 : i32
    %c0_i32_313 = arith.constant 0 : i32
    %640 = tpu.memref_slice %arg4[%c0_i32_311, %c0_i32_312, %c0_i32_313] : memref<1x48x256xf32, #tpu.memory_space<vmem>> -> memref<1x48x256xf32, #tpu.memory_space<vmem>>
    %641 = tpu.memref_squeeze %640 : memref<1x48x256xf32, #tpu.memory_space<vmem>> -> memref<48x256xf32, #tpu.memory_space<vmem>>
    %642 = arith.index_cast %639 : i32 to index
    %c0_314 = arith.constant 0 : index
    %643 = vector.load %641[%642, %c0_314] : memref<48x256xf32, #tpu.memory_space<vmem>>, vector<1x256xf32>
    tpu.vector_store %641[%642, %c0_314], %638 {strides = array<i32>} : memref<48x256xf32, #tpu.memory_space<vmem>>, vector<1x256xf32>,
    return
  }
  func.func @transform_0(%arg0: i32, %arg1: i32, %arg2: i32) -> (i32, i32, i32) {
    %c0_i32 = arith.constant 0 : i32
    %c0_i32_0 = arith.constant 0 : i32
    %c0_i32_1 = arith.constant 0 : i32
    return %arg0, %c0_i32, %c0_i32_0 : i32, i32, i32
  }
  func.func @transform_1(%arg0: i32, %arg1: i32, %arg2: i32) -> (i32, i32, i32) {
    %c0_i32 = arith.constant 0 : i32
    %c0_i32_0 = arith.constant 0 : i32
    %c0_i32_1 = arith.constant 0 : i32
    return %arg0, %c0_i32, %c0_i32_0 : i32, i32, i32
  }
}

</mosaic_0001>

<bundles_post_ra>
// kernel: vecint.1
= control target key start
LH: loop header
LB: loop body
LE: loop exit
PB: predicated region body
PF: predicated region fallthrough
CT: control target
= control target key end

     0   :  { %s7042_s6 = smov 0   ;;  %s7044_s7 = smov 0   ;;  %s8932_s0 = inlined_call_operand.vmem [shape: f32[2,48,256], index: 0, kind: input, shape index: {}]   ;;  %s8933_s1 = inlined_call_operand.vmem [shape: f32[2,48,256], index: 1, kind: output, shape index: {}]  }
   0x1   :  { %s7046_s8 = smov 0   ;;  %s7048_s9 = smov 0  }
   0x2   :  { %s7050_s10 = smov 0   ;;  %s7052_s11 = smov 0  }
   0x3   :  { %s7054_s12 = smov 0  }
   0x4 LB: > { %s23_s13 = sadd.s32 1, %s7017_s9  ;;  %s26_s14 = sadd.s32 1, %s7021_s10  ;;  %s7029_s12 = sphi %s7054_s12, %s11_s12   ;;  %s7025_s11 = sphi %s7052_s11, %s8941_s11   ;;  %s7021_s10 = sphi %s7050_s10, %s8940_s10   ;;  %s7017_s9 = sphi %s7048_s9, %s8939_s9   ;;  %s7013_s8 = sphi %s7046_s8, %s8938_s8   ;;  %s7009_s7 = sphi %s7044_s7, %s8937_s7   ;;  %s7005_s6 = sphi %s7042_s6, %s8936_s6  }
   0x5   : > { %p24_p0 = scmp.ge.s32.totalorder %s23_s13, 2  ;;  %p6741_p1 = scmp.ge.s32.totalorder %s7029_s12, 1 }
   0x6   : > { %p106_p2 = scmp.lt.s32.totalorder %s7029_s12, 29  ;;  %s30_s15 = sadd.s32 1, %s7025_s11 }
   0x7   : > { %s8943_s13 = smov (%p24_p0, %s23_s13), 0  ;;  %s8945_s14 = smov (!%p24_p0, %s26_s14), %s7021_s10 }
   0x8   : > { %p107_p3 = pnand %p6741_p1, %p106_p2  ;;  %p28_p4 = scmp.ge.s32.totalorder %s8945_s14, 7 }
   0x9   : > { %p126_p6 = scmp.lt.s32.totalorder (!%p107_p3), %s7013_s8, 1  ;;  %p6744_p7 = scmp.ne.s32.totalorder (!%p107_p3), %s7005_s6, 0 }
   0xa   : > { %s8947_s14 = smov (%p28_p4, %s8945_s14), 0  ;;  %s8949_s15 = smov (!%p28_p4, %s30_s15), %s7025_s11 }
   0xb   : > { %p32_p5 = scmp.ge.s32.totalorder %s8949_s15, 2  ;;  %110 = sbr.rel (%p107_p3) target bundleno = 2623 (0xa3f), region = 24 }
   0xd   : > { %s8951_s15 = smov (%p32_p5, %s8949_s15), 0 }
  0x10   : > { %s8953_s8 = smov (!%p126_p6, %s7013_s8), 1  ;;  %139 = sbr.rel (%p6744_p7) target bundleno = 51 (0x33), region = 28 }
  0x11   : > { %s6915_s16 = smul.u32 96, %s8953_s8  ;;  %p6745_p8 = scmp.ne.s32.totalorder (!%p6744_p7), %s7009_s7, 0 }
  0x13   : > { %s7089_s19 = scalar_lea.vmem %s8932_s0, %s6915_s16  ;;  %s7094_s22 = scalar_lea.vmem %s8933_s1, %s6915_s16 }
  0x15   : > { %143 = sbr.rel (%p6745_p8) target bundleno = 41 (0x29), region = 32 }
  0x1a   : > { %v144_v0 = vld [vmem:[%s7089_s19] sm:$0xff]  ;;  %v145_v1 = vld [vmem:[%s7089_s19 + $0x8] sm:$0xff]  ;;  %v146_v2 = vld [vmem:[%s7089_s19 + $0x10] sm:$0xff] }
  0x1b   : > { %v156_v3 = vmul.f32 0.0078125, %v144_v0  ;;  %v157_v4 = vmul.f32 0.0078125, %v145_v1  ;;  %v158_v5 = vmul.f32 0.0078125, %v146_v2  ;;  %v147_v6 = vld [vmem:[%s7089_s19 + $0x18] sm:$0xff]  ;;  %v148_v7 = vld [vmem:[%s7089_s19 + $0x20] sm:$0xff]  ;;  %v149_v8 = vld [vmem:[%s7089_s19 + $0x28] sm:$0xff] }
  0x1c   : > { %v159_v9 = vmul.f32 0.0078125, %v147_v6  ;;  %v150_v10 = vld [vmem:[%s7089_s19 + $0x30] sm:$0xff]  ;;  %v160_v11 = vmul.f32 0.0078125, %v148_v7  ;;  %v151_v12 = vld [vmem:[%s7089_s19 + $0x38] sm:$0xff]  ;;  %v161_v13 = vmul.f32 0.0078125, %v149_v8  ;;  %v152_v14 = vld [vmem:[%s7089_s19 + $0x40] sm:$0xff] }
  0x1d   : > { %168 = vst [vmem:[%s7094_s22] sm:$0xff] %v156_v3  ;;  %v162_v15 = vmul.f32 0.0078125, %v150_v10  ;;  %v153_v16 = vld [vmem:[%s7089_s19 + $0x48] sm:$0xff]  ;;  %v163_v17 = vmul.f32 0.0078125, %v151_v12  ;;  %v154_v18 = vld [vmem:[%s7089_s19 + $0x50] sm:$0xff]  ;;  %v164_v19 = vmul.f32 0.0078125, %v152_v14  ;;  %v155_v20 = vld [vmem:[%s7089_s19 + $0x58] sm:$0xff] }
  0x1e   : > { %169 = vst [vmem:[%s7094_s22 + $0x8] sm:$0xff] %v157_v4  ;;  %v165_v21 = vmul.f32 0.0078125, %v153_v16  ;;  %v166_v22 = vmul.f32 0.0078125, %v154_v18  ;;  %v167_v23 = vmul.f32 0.0078125, %v155_v20 }
  0x1f   : > { %170 = vst [vmem:[%s7094_s22 + $0x10] sm:$0xff] %v158_v5 }
  0x20   : > { %171 = vst [vmem:[%s7094_s22 + $0x18] sm:$0xff] %v159_v9 }
  0x21   : > { %172 = vst [vmem:[%s7094_s22 + $0x20] sm:$0xff] %v160_v11 }
  0x22   : > { %173 = vst [vmem:[%s7094_s22 + $0x28] sm:$0xff] %v161_v13 }
  0x23   : > { %174 = vst [vmem:[%s7094_s22 + $0x30] sm:$0xff] %v162_v15 }
  0x24   : > { %175 = vst [vmem:[%s7094_s22 + $0x38] sm:$0xff] %v163_v17 }
  0x25   : > { %176 = vst [vmem:[%s7094_s22 + $0x40] sm:$0xff] %v164_v19 }
  0x26   : > { %177 = vst [vmem:[%s7094_s22 + $0x48] sm:$0xff] %v165_v21 }
  0x27   : > { %178 = vst [vmem:[%s7094_s22 + $0x50] sm:$0xff] %v166_v22 }
  0x28   : > { %179 = vst [vmem:[%s7094_s22 + $0x58] sm:$0xff] %v167_v23 }
  0x29 PF: > { %v180_v24 = vld [vmem:[%s7094_s22] sm:$0xff]  ;;  %v181_v25 = vld [vmem:[%s7094_s22 + $0x8] sm:$0xff]  ;;  %v182_v26 = vld [vmem:[%s7094_s22 + $0x10] sm:$0xff] }
  0x2a   : > { %v192_v27 = vpack.c.bf16 %v181_v25, %v180_v24  ;;  %v183_v28 = vld [vmem:[%s7094_s22 + $0x18] sm:$0xff]  ;;  %v184_v29 = vld [vmem:[%s7094_s22 + $0x20] sm:$0xff]  ;;  %v185_v30 = vld [vmem:[%s7094_s22 + $0x28] sm:$0xff] }
  0x2b   : > { %v193_v31 = vpack.c.bf16 %v183_v28, %v182_v26  ;;  %v194_v32 = vpack.c.bf16 %v185_v30, %v184_v29  ;;  %v186_v33 = vld [vmem:[%s7094_s22 + $0x30] sm:$0xff]  ;;  %v187_v34 = vld [vmem:[%s7094_s22 + $0x38] sm:$0xff] }
  0x2c   : > { %v188_v35 = vld [vmem:[%s7094_s22 + $0x40] sm:$0xff]  ;;  %198 = vst [vmem:[#allocation2] sm:$0xff] %v192_v27  ;;  %v195_v36 = vpack.c.bf16 %v187_v34, %v186_v33 }
  0x2d   : > { %v189_v37 = vld [vmem:[%s7094_s22 + $0x48] sm:$0xff]  ;;  %199 = vst [vmem:[#allocation2 + $0x8] sm:$0xff] %v193_v31 }
  0x2e   : > { %v190_v38 = vld [vmem:[%s7094_s22 + $0x50] sm:$0xff]  ;;  %v196_v40 = vpack.c.bf16 %v189_v37, %v188_v35  ;;  %200 = vst [vmem:[#allocation2 + $0x10] sm:$0xff] %v194_v32 }
  0x2f   : > { %v191_v39 = vld [vmem:[%s7094_s22 + $0x58] sm:$0xff]  ;;  %201 = vst [vmem:[#allocation2 + $0x18] sm:$0xff] %v195_v36 }
  0x30   : > { %v197_v41 = vpack.c.bf16 %v191_v39, %v190_v38  ;;  %202 = vst [vmem:[#allocation2 + $0x20] sm:$0xff] %v196_v40 }
  0x32   : > { %203 = vst [vmem:[#allocation2 + $0x28] sm:$0xff] %v197_v41 }
  0x33 PF: > { %v210_v42 = vlaneseq  ;;  %v7031_v43 = vmov 16.0   ;;  %s7135_s23 = sshll.u32 %s7005_s6, 3  ;;  %vm264_vm1 = vcmask 1040384   ;;  %vm357_vm2 = vcmask 1043459  }
  0x34   : > { %6973 = vrcp.f32 %v7031_v43  ;;  %s244_s24 = sadd.s32 16, %s7135_s23  ;;  %s251_s26 = sadd.s32 32, %s7135_s23  ;;  %vm353_vm3 = vcmask 1042434   ;;  %vm349_vm4 = vcmask 1041409  }
  0x35   : > { %v211_v44 = vand.u32 127, %v210_v42  ;;  %s245_s25 = sshra.s32 %s244_s24, 3  ;;  %v233_v56 = vshrl.u32 %v210_v42, 7  ;;  %s252_s28 = sshra.s32 %s251_s26, 3  ;;  %vm7366_vm5 = vcmp.lt.s32.totalorder %v210_v42, 256 }
  0x36   : > { %s6892_s27 = sshll.u32 %s245_s25, 4  ;;  %s6893_s30 = sshll.u32 %s252_s28, 4 }
  0x37   : > { %v212_v45 = vadd.s32 128, %v211_v44  ;;  %v213_v48 = vcvt.s32.f32 %v211_v44  ;;  %s7141_s29 = scalar_lea.vmem %s7094_s22, %s6892_s27  ;;  %v234_v61 = vadd.s32 8, %v233_v56  ;;  %s7147_s2 = scalar_lea.vmem %s7094_s22, %s6893_s30  ;;  %v7152_v5 = vcvt.s32.f32 %v233_v56 }
  0x38   : > { %v7144_v0 = vld [vmem:[%s7141_s29] ss:$8 sm:$0x3]  ;;  %s238_s3 = sshra.s32 %s7135_s23, 3  ;;  %s258_s5 = scvt.s32.f32 %s7135_s23 }
  0x39   : > { %v214_v49 = vcvt.s32.f32 %v212_v45  ;;  %v215_v52 = vadd.f32 0.5, %v213_v48  ;;  %v7154_v6 = vcvt.s32.f32 %v234_v61  ;;  %v7159_v8 = vld [vmem:[%s7147_s2] ss:$8 sm:$0x3]  ;;  %s6891_s4 = sshll.u32 %s238_s3, 4  ;;  %s1086_s7 = sadd.s32 33, %s7135_s23 }
  0x3a   : > { %v6974_v46 = vpop.eup %6973  ;;  %s7339_s6 = scalar_lea.vmem %s7094_s22, %s6891_s4  ;;  %s1076_s8 = sadd.s32 17, %s7135_s23 }
  0x3b   : > { %v218_v47 = vmul.f32 16.0, %v6974_v46  ;;  %v216_v53 = vadd.f32 0.5, %v214_v49  ;;  %vm222_vm0 = vweird.f32 %v6974_v46  ;;  %s1087_s16 = sshra.s32 %s1086_s7, 3  ;;  %s1077_s17 = sshra.s32 %s1076_s8, 3 }
  0x3c   : > { %s1090_s18 = sand.u32 7, %s1086_s7  ;;  %s6896_s19 = sshll.u32 %s1087_s16, 4 }
  0x3d   : > { %v219_v50 = vsub.f32 1.0, %v218_v47  ;;  %s1080_s20 = sand.u32 7, %s1076_s8  ;;  %s6895_s21 = sshll.u32 %s1077_s17, 4 }
  0x3e   : > { %s1093_s24 = sadd.s32 %s6896_s19, %s1090_s18  ;;  %s1083_s25 = sadd.s32 %s6895_s21, %s1080_s20 }
  0x3f   : > { %v220_v51 = vmul.f32 %v6974_v46, %v219_v50  ;;  %s7392_s26 = scalar_lea.vmem %s7094_s22, %s1093_s24  ;;  %s7395_s27 = scalar_lea.vmem %s7094_s22, %s1083_s25 }
  0x40   : > { %s1066_s28 = sadd.s32 1, %s7135_s23  ;;  %s1866_s7 = sadd.s32 18, %s7135_s23 }
  0x41   : > { %v221_v54 = vadd.f32 %v6974_v46, %v220_v51  ;;  %s1070_s30 = sand.u32 7, %s1066_s28  ;;  %s1096_s4 = scvt.s32.f32 %s1066_s28 }
  0x42   : > { %s1867_s16 = sshra.s32 %s1866_s7, 3  ;;  %s1870_s19 = sand.u32 7, %s1866_s7 }
  0x43   : > { %v223_v55 = vsel %vm222_vm0, %v6974_v46, %v221_v54  ;;  %s6898_s20 = sshll.u32 %s1867_s16, 4 }
  0x44   : > { %v224_v57 = vmul.f32 %v223_v55, %v215_v52  ;;  %v225_v58 = vmul.f32 %v223_v55, %v216_v53  ;;  %s1873_s24 = sadd.s32 %s6898_s20, %s1870_s19 }
  0x46   : > { %v226_v59 = vfloor.f32 %v224_v57  ;;  %v227_v60 = vfloor.f32 %v225_v58 }
  0x48   : > { %v228_v62 = vmul.f32 16.0, %v226_v59  ;;  %v229_v63 = vmul.f32 16.0, %v227_v60  ;;  %v263_v1 = vrot.slane %v227_v60, 7 }
  0x4a   : > { %v230_v2 = vsub.f32 %v213_v48, %v228_v62  ;;  %v231_v3 = vsub.f32 %v214_v49, %v229_v63  ;;  %v7150_v4 = vsel %vm264_vm1, %v226_v59, %v263_v1 }
  0x4b   : > { %v267_v7 = vadd.f32 %v7150_v4, %v7144_v0 }
  0x4c   : > { %v270_v9 = vrot.slane %v231_v3, 7 }
  0x4d   : > { %v296_v10 = vperm.slane %v267_v7, 0  ;;  %v297_v11 = vperm.slane %v267_v7, 1 }
  0x4e   : > { %v7162_v12 = vsel %vm264_vm1, %v230_v2, %v270_v9 }
  0x4f   : > { %v273_v13 = vadd.f32 %v7162_v12, %v7159_v8  ;;  %v300_v14 = vsub.f32 %v7152_v5, %v296_v10  ;;  %v301_v15 = vsub.f32 %v7152_v5, %v297_v11  ;;  %v302_v16 = vsub.f32 %v7154_v6, %v296_v10 }
  0x50   : > { %v303_v17 = vsub.f32 %v7154_v6, %v297_v11 }
  0x51   : > { %v304_v18 = vand.u32 2147483647, %v300_v14  ;;  %v305_v19 = vand.u32 2147483647, %v301_v15  ;;  %v319_v20 = vperm.slane %v273_v13, 0  ;;  %v320_v21 = vperm.slane %v273_v13, 1 }
  0x52   : > { %v306_v22 = vand.u32 2147483647, %v302_v16  ;;  %v307_v23 = vand.u32 2147483647, %v303_v17 }
  0x53   : > { %v308_v24 = vsub.f32 1.0, %v304_v18  ;;  %v309_v25 = vsub.f32 1.0, %v305_v19  ;;  %v323_v26 = vsub.f32 %v7152_v5, %v319_v20  ;;  %v324_v27 = vsub.f32 %v7152_v5, %v320_v21 }
  0x54   : > { %v325_v28 = vsub.f32 %v7154_v6, %v319_v20  ;;  %v326_v29 = vsub.f32 %v7154_v6, %v320_v21  ;;  %v310_v30 = vsub.f32 1.0, %v306_v22  ;;  %v311_v31 = vsub.f32 1.0, %v307_v23 }
  0x55   : > { %v312_v32 = vmax.f32 %v308_v24, 0.0  ;;  %v313_v33 = vmax.f32 %v309_v25, 0.0  ;;  %v327_v34 = vand.u32 2147483647, %v323_v26  ;;  %v328_v35 = vand.u32 2147483647, %v324_v27 }
  0x56   : > { %v329_v36 = vand.u32 2147483647, %v325_v28  ;;  %v330_v37 = vand.u32 2147483647, %v326_v29  ;;  %v314_v38 = vmax.f32 %v310_v30, 0.0  ;;  %v315_v39 = vmax.f32 %v311_v31, 0.0 }
  0x57   : > { %v7174_v40 = vpack.c.bf16 %v313_v33, %v312_v32  ;;  %v331_v41 = vsub.f32 1.0, %v327_v34  ;;  %v332_v43 = vsub.f32 1.0, %v328_v35 }
  0x58   : > { %v333_v44 = vsub.f32 1.0, %v329_v36  ;;  %v334_v45 = vsub.f32 1.0, %v330_v37  ;;  %v7176_v46 = vpack.c.bf16 %v315_v39, %v314_v38 }
  0x59   : > { %v335_v47 = vmax.f32 %v331_v41, 0.0  ;;  %v336_v48 = vmax.f32 %v332_v43, 0.0  ;;  %v7179_v49 = vrot.slane %v7174_v40, 3 }
  0x5a   : > { %v337_v50 = vmax.f32 %v333_v44, 0.0  ;;  %v338_v51 = vmax.f32 %v334_v45, 0.0  ;;  %v7182_v52 = vrot.slane %v7176_v46, 3 }
  0x5b   : > { %v339_v53 = vpack.c.bf16 %v336_v48, %v335_v47  ;;  %v358_v54 = vsel %vm357_vm2, %v7174_v40, %v7179_v49  ;;  %v354_v55 = vsel %vm353_vm3, %v7174_v40, %v7179_v49 }
  0x5c   : > { %v340_v56 = vpack.c.bf16 %v338_v51, %v337_v50  ;;  %v360_v57 = vrot.slane %v358_v54, 3  ;;  %v371_v58 = vsel %vm357_vm2, %v7176_v46, %v7182_v52  ;;  %v356_v59 = vrot.slane %v354_v55, 2 }
  0x5d   : > { %v7193_v60 = vunpack.c.l.bf16 %v339_v53  ;;  %v7195_v61 = vunpack.c.h.bf16 %v339_v53  ;;  %v373_v62 = vrot.slane %v371_v58, 3  ;;  %v368_v63 = vsel %vm353_vm3, %v7176_v46, %v7182_v52 }
  0x5e   : > { %v381_v1 = vunpack.i.h.s16 %v360_v57  ;;  %v7200_v2 = vunpack.c.l.bf16 %v340_v56  ;;  %v7202_v3 = vunpack.c.h.bf16 %v340_v56  ;;  %v6756_v7 = vpack.i.b16 %v360_v57, %v360_v57 }
  0x5f   : > { %v389_v9 = vunpack.i.h.s16 %v373_v62  ;;  %v6760_v10 = vpack.i.b16 %v373_v62, %v373_v62  ;;  %v379_v11 = vunpack.i.h.s16 %v356_v59  ;;  %v7204_v13 = vrot.slane %v368_v63, 2 }
  0x60   : > { %v397_v14 = vpack.i.b16 %v381_v1, %v381_v1  ;;  %v418_v15 = vperm.slane %v6756_v7, 0  ;;  %v419_v16 = vperm.slane %v6756_v7, 1  ;;  %v7206_v17 = vpack.i.b16 %v356_v59, %v356_v59 }
  0x61   : > { %v405_v18 = vpack.i.b16 %v389_v9, %v389_v9  ;;  %v434_v19 = vperm.slane %v6760_v10, 0  ;;  %v435_v20 = vperm.slane %v6760_v10, 1  ;;  %v7208_v21 = vpack.i.b16 %v379_v11, %v379_v11 }
  0x62   : > { %v420_v22 = vperm.slane %v397_v14, 0  ;;  %v421_v23 = vperm.slane %v397_v14, 1  ;;  %v487_v24 = vpack.i.b16 %v418_v15, %v418_v15  ;;  %v491_v25 = vpack.i.b16 %v419_v16, %v419_v16 }
  0x63   : > { %v436_v26 = vperm.slane %v405_v18, 0  ;;  %v437_v27 = vperm.slane %v405_v18, 1  ;;  %v551_v28 = vpack.i.b16 %v434_v19, %v434_v19  ;;  %v555_v29 = vpack.i.b16 %v435_v20, %v435_v20 }
  0x64   : > { %v495_v30 = vpack.i.b16 %v420_v22, %v420_v22  ;;  %v499_v31 = vpack.i.b16 %v421_v23, %v421_v23  ;;  %v489_v32 = vperm.slane %v487_v24, 0  ;;  %v493_v33 = vperm.slane %v491_v25, 0 }
  0x65   : > { %v559_v34 = vpack.i.b16 %v436_v26, %v436_v26  ;;  %v563_v35 = vpack.i.b16 %v437_v27, %v437_v27  ;;  %v553_v36 = vperm.slane %v551_v28, 0  ;;  %v557_v37 = vperm.slane %v555_v29, 0 }
  0x66   : > { %v497_v38 = vperm.slane %v495_v30, 0  ;;  %v501_v39 = vperm.slane %v499_v31, 0  ;;  %v578_v41 = vunpack.c.l.bf16 %v489_v32  ;;  %v579_v43 = vunpack.c.l.bf16 %v493_v33 }
  0x67   : > { %v561_v44 = vperm.slane %v559_v34, 0  ;;  %v565_v45 = vperm.slane %v563_v35, 0  ;;  %v594_v47 = vunpack.c.l.bf16 %v553_v36  ;;  %v595_v48 = vunpack.c.l.bf16 %v557_v37 }
  0x68   : > { %v580_v50 = vunpack.c.l.bf16 %v497_v38  ;;  %v581_v51 = vunpack.c.l.bf16 %v501_v39  ;;  %v626_v53 = vmul.f32 %v7193_v60, %v578_v41  ;;  %v627_v54 = vmul.f32 %v7195_v61, %v579_v43 }
  0x69   : > { %v596_v55 = vunpack.c.l.bf16 %v561_v44  ;;  %v597_v56 = vunpack.c.l.bf16 %v565_v45  ;;  %v628_v57 = vmul.f32 %v7200_v2, %v578_v41  ;;  %v629_v58 = vmul.f32 %v7202_v3, %v579_v43 }
  0x6a   : > { %v630_v59 = vmul.f32 %v7193_v60, %v580_v50  ;;  %v631_v62 = vmul.f32 %v7195_v61, %v581_v51  ;;  %v632_v63 = vmul.f32 %v7200_v2, %v580_v50  ;;  %v633_v1 = vmul.f32 %v7202_v3, %v581_v51 }
  0x6b   : > { %v662_v7 = vmul.f32 %v7193_v60, %v596_v55  ;;  %v663_v9 = vmul.f32 %v7195_v61, %v597_v56  ;;  %v664_v10 = vmul.f32 %v7200_v2, %v596_v55  ;;  %v665_v11 = vmul.f32 %v7202_v3, %v597_v56 }
  0x6c   : > { %v680_v14 = vpack.c.bf16 %v631_v62, %v630_v59  ;;  %v681_v15 = vpack.c.bf16 %v633_v1, %v632_v63  ;;  %v678_v16 = vpack.c.bf16 %v627_v54, %v626_v53  ;;  %v679_v18 = vpack.c.bf16 %v629_v58, %v628_v57 }
  0x6d   : > { %v696_v19 = vpack.c.bf16 %v663_v9, %v662_v7  ;;  %v697_v20 = vpack.c.bf16 %v665_v11, %v664_v10  ;;  %v658_v22 = vmul.f32 %v7193_v60, %v594_v47  ;;  %v659_v23 = vmul.f32 %v7195_v61, %v595_v48 }
  0x6e   : > { %v788_v24 = vunpack.c.l.b16 %v680_v14  ;;  %v790_v25 = vunpack.c.l.b16 %v681_v15  ;;  %v789_v26 = vunpack.c.h.b16 %v680_v14  ;;  %v791_v27 = vunpack.c.h.b16 %v681_v15 }
  0x6f   : > { %v820_v28 = vunpack.c.l.b16 %v696_v19  ;;  %v822_v29 = vunpack.c.l.b16 %v697_v20  ;;  %v821_v30 = vunpack.c.h.b16 %v696_v19  ;;  %v823_v31 = vunpack.c.h.b16 %v697_v20 }
  0x70   : > { %v838_v32 = vpack.c.b16 %v790_v25, %v788_v24  ;;  %v839_v33 = vpack.c.b16 %v791_v27, %v789_v26  ;;  %v784_v34 = vunpack.c.l.b16 %v678_v16  ;;  %v786_v35 = vunpack.c.l.b16 %v679_v18 }
  0x71   : > { %v854_v36 = vpack.c.b16 %v822_v29, %v820_v28  ;;  %v855_v37 = vpack.c.b16 %v823_v31, %v821_v30  ;;  %v660_v38 = vmul.f32 %v7200_v2, %v594_v47  ;;  %v661_v39 = vmul.f32 %v7202_v3, %v595_v48 }
  0x72   : > { %888 = vmatpush.bf16.msra.mxu0 %v838_v32  ;;  %936 = vmatpush.bf16.msra.mxu2 %v839_v33  ;;  %v836_v41 = vpack.c.b16 %v786_v35, %v784_v34  ;;  %v694_v43 = vpack.c.bf16 %v659_v23, %v658_v22  ;;  %v785_v44 = vunpack.c.h.b16 %v678_v16  ;;  %v787_v45 = vunpack.c.h.b16 %v679_v18 }
  0x73   : > { %912 = vmatpush.bf16.msra.mxu1 %v854_v36  ;;  %960 = vmatpush.bf16.msra.mxu3 %v855_v37  ;;  %v695_v50 = vpack.c.bf16 %v661_v39, %v660_v38  ;;  %v416_v51 = vperm.slane %v7208_v21, 0  ;;  %v417_v53 = vperm.slane %v7208_v21, 1  ;;  %v387_v54 = vunpack.i.h.s16 %v7204_v13 }
  0x74   : > { %v816_v55 = vunpack.c.l.b16 %v694_v43  ;;  %v837_v56 = vpack.c.b16 %v787_v45, %v785_v44  ;;  %v817_v47 = vunpack.c.h.b16 %v694_v43  ;;  %v414_v48 = vperm.slane %v7206_v17, 0 }
  0x75   : > { %v818_v57 = vunpack.c.l.b16 %v695_v50  ;;  %v819_v58 = vunpack.c.h.b16 %v695_v50  ;;  %v479_v59 = vpack.i.b16 %v416_v51, %v416_v51  ;;  %v483_v62 = vpack.i.b16 %v417_v53, %v417_v53 }
  0x76   : > { %889 = vmatpush.bf16.msra.mxu0 %v836_v41  ;;  %937 = vmatpush.bf16.msra.mxu2 %v837_v56  ;;  %v403_v63 = vpack.i.b16 %v387_v54, %v387_v54  ;;  %v415_v1 = vperm.slane %v7206_v17, 1  ;;  %v471_v7 = vpack.i.b16 %v414_v48, %v414_v48  ;;  %v6759_v21 = vpack.i.b16 %v7204_v13, %v7204_v13 }
  0x77   : > { %v852_v9 = vpack.c.b16 %v818_v57, %v816_v55  ;;  %v853_v10 = vpack.c.b16 %v819_v58, %v817_v47  ;;  %v481_v11 = vperm.slane %v479_v59, 0  ;;  %v485_v14 = vperm.slane %v483_v62, 0 }
  0x78   : > { %v432_v15 = vperm.slane %v403_v63, 0  ;;  %v433_v16 = vperm.slane %v403_v63, 1  ;;  %v473_v18 = vperm.slane %v471_v7, 0  ;;  %v475_v19 = vpack.i.b16 %v415_v1, %v415_v1 }
  0x79   : > { %913 = vmatpush.bf16.msra.mxu1 %v852_v9  ;;  %961 = vmatpush.bf16.msra.mxu3 %v853_v10  ;;  %v576_v20 = vunpack.c.l.bf16 %v481_v11  ;;  %v577_v22 = vunpack.c.l.bf16 %v485_v14  ;;  %v430_v23 = vperm.slane %v6759_v21, 0  ;;  %v431_v24 = vperm.slane %v6759_v21, 1 }
  0x7a   : > { %v543_v25 = vpack.i.b16 %v432_v15, %v432_v15  ;;  %v547_v17 = vpack.i.b16 %v433_v16, %v433_v16  ;;  %v477_v26 = vperm.slane %v475_v19, 0  ;;  %v574_v27 = vunpack.c.l.bf16 %v473_v18 }
  0x7b   : > { %v622_v13 = vmul.f32 %v7193_v60, %v576_v20  ;;  %v623_v28 = vmul.f32 %v7195_v61, %v577_v22  ;;  %v624_v29 = vmul.f32 %v7200_v2, %v576_v20  ;;  %v625_v30 = vmul.f32 %v7202_v3, %v577_v22 }
  0x7c   : > { %v545_v31 = vperm.slane %v543_v25, 0  ;;  %v549_v32 = vperm.slane %v547_v17, 0  ;;  %v575_v33 = vunpack.c.l.bf16 %v477_v26  ;;  %v618_v34 = vmul.f32 %v7193_v60, %v574_v27 }
  0x7d   : > { %v676_v35 = vpack.c.bf16 %v623_v28, %v622_v13  ;;  %v677_v36 = vpack.c.bf16 %v625_v30, %v624_v29  ;;  %v620_v37 = vmul.f32 %v7200_v2, %v574_v27  ;;  %v535_v38 = vpack.i.b16 %v430_v23, %v430_v23 }
  0x7e   : > { %v592_v39 = vunpack.c.l.bf16 %v545_v31  ;;  %v593_v41 = vunpack.c.l.bf16 %v549_v32  ;;  %v619_v43 = vmul.f32 %v7195_v61, %v575_v33  ;;  %v621_v44 = vmul.f32 %v7202_v3, %v575_v33 }
  0x7f   : > { %v780_v45 = vunpack.c.l.b16 %v676_v35  ;;  %v782_v50 = vunpack.c.l.b16 %v677_v36  ;;  %v781_v51 = vunpack.c.h.b16 %v676_v35  ;;  %v783_v53 = vunpack.c.h.b16 %v677_v36 }
  0x80   : > { %v654_v54 = vmul.f32 %v7193_v60, %v592_v39  ;;  %v655_v55 = vmul.f32 %v7195_v61, %v593_v41  ;;  %v656_v56 = vmul.f32 %v7200_v2, %v592_v39  ;;  %v657_v47 = vmul.f32 %v7202_v3, %v593_v41 }
  0x81   : > { %v834_v48 = vpack.c.b16 %v782_v50, %v780_v45  ;;  %v835_v57 = vpack.c.b16 %v783_v53, %v781_v51  ;;  %v674_v58 = vpack.c.bf16 %v619_v43, %v618_v34  ;;  %v675_v59 = vpack.c.bf16 %v621_v44, %v620_v37 }
  0x82   : > { %v692_v62 = vpack.c.bf16 %v655_v55, %v654_v54  ;;  %v693_v63 = vpack.c.bf16 %v657_v47, %v656_v56  ;;  %v537_v1 = vperm.slane %v535_v38, 0  ;;  %v539_v7 = vpack.i.b16 %v431_v24, %v431_v24 }
  0x83   : > { %890 = vmatpush.bf16.msra.mxu0 %v834_v48  ;;  %938 = vmatpush.bf16.msra.mxu2 %v835_v57  ;;  %v776_v21 = vunpack.c.l.b16 %v674_v58  ;;  %v778_v9 = vunpack.c.l.b16 %v675_v59  ;;  %v777_v10 = vunpack.c.h.b16 %v674_v58  ;;  %v779_v11 = vunpack.c.h.b16 %v675_v59 }
  0x84   : > { %v812_v14 = vunpack.c.l.b16 %v692_v62  ;;  %v814_v15 = vunpack.c.l.b16 %v693_v63  ;;  %v813_v16 = vunpack.c.h.b16 %v692_v62  ;;  %v815_v18 = vunpack.c.h.b16 %v693_v63 }
  0x85   : > { %v832_v19 = vpack.c.b16 %v778_v9, %v776_v21  ;;  %v541_v20 = vperm.slane %v539_v7, 0  ;;  %v590_v22 = vunpack.c.l.bf16 %v537_v1  ;;  %v833_v23 = vpack.c.b16 %v779_v11, %v777_v10 }
  0x86   : > { %v850_v25 = vpack.c.b16 %v814_v15, %v812_v14  ;;  %v851_v17 = vpack.c.b16 %v815_v18, %v813_v16  ;;  %v347_v24 = vsel %vm264_vm1, %v7174_v40, %v7179_v49  ;;  %v350_v28 = vsel %vm349_vm4, %v7174_v40, %v7179_v49 }
  0x87   : > { %891 = vmatpush.bf16.msra.mxu0 %v832_v19  ;;  %v591_v26 = vunpack.c.l.bf16 %v541_v20  ;;  %v650_v27 = vmul.f32 %v7193_v60, %v590_v22  ;;  %v652_v13 = vmul.f32 %v7200_v2, %v590_v22  ;;  %939 = vmatpush.bf16.msra.mxu2 %v833_v23  ;;  %v352_v29 = vrot.slane %v350_v28, 1 }
  0x88   : > { %914 = vmatpush.bf16.msra.mxu1 %v850_v25  ;;  %962 = vmatpush.bf16.msra.mxu3 %v851_v17  ;;  %v365_v30 = vsel %vm349_vm4, %v7176_v46, %v7182_v52  ;;  %v375_v31 = vunpack.i.h.s16 %v347_v24  ;;  %v7259_v32 = vsel %vm264_vm1, %v7176_v46, %v7182_v52  ;;  %v7266_v38 = vpack.i.b16 %v347_v24, %v347_v24 }
  0x89   : > { %v651_v33 = vmul.f32 %v7195_v61, %v591_v26  ;;  %v653_v34 = vmul.f32 %v7202_v3, %v591_v26  ;;  %v367_v35 = vrot.slane %v365_v30, 1  ;;  %v383_v40 = vunpack.i.h.s16 %v7259_v32 }
  0x8a   : > { %v377_v49 = vunpack.i.h.s16 %v352_v29  ;;  %v6754_v36 = vpack.i.b16 %v352_v29, %v352_v29  ;;  %v7264_v37 = vpack.i.b16 %v375_v31, %v375_v31 }
  0x8b   : > { %v690_v39 = vpack.c.bf16 %v651_v33, %v650_v27  ;;  %v691_v41 = vpack.c.bf16 %v653_v34, %v652_v13  ;;  %v385_v43 = vunpack.i.h.s16 %v367_v35  ;;  %v6758_v44 = vpack.i.b16 %v367_v35, %v367_v35 }
  0x8c   : > { %v393_v45 = vpack.i.b16 %v377_v49, %v377_v49  ;;  %v410_v46 = vperm.slane %v6754_v36, 0  ;;  %v411_v52 = vperm.slane %v6754_v36, 1  ;;  %v408_v50 = vperm.slane %v7264_v37, 0 }
  0x8d   : > { %v808_v51 = vunpack.c.l.b16 %v690_v39  ;;  %v810_v53 = vunpack.c.l.b16 %v691_v41  ;;  %v809_v54 = vunpack.c.h.b16 %v690_v39  ;;  %v811_v55 = vunpack.c.h.b16 %v691_v41 }
  0x8e   : > { %v412_v56 = vperm.slane %v393_v45, 0  ;;  %v413_v47 = vperm.slane %v393_v45, 1  ;;  %v401_v48 = vpack.i.b16 %v385_v43, %v385_v43  ;;  %v455_v57 = vpack.i.b16 %v410_v46, %v410_v46 }
  0x8f   : > { %v848_v58 = vpack.c.b16 %v810_v53, %v808_v51  ;;  %v849_v59 = vpack.c.b16 %v811_v55, %v809_v54  ;;  %v459_v62 = vpack.i.b16 %v411_v52, %v411_v52  ;;  %v426_v63 = vperm.slane %v6758_v44, 0 }
  0x90   : > { %v463_v1 = vpack.i.b16 %v412_v56, %v412_v56  ;;  %v467_v7 = vpack.i.b16 %v413_v47, %v413_v47  ;;  %v428_v21 = vperm.slane %v401_v48, 0  ;;  %v429_v9 = vperm.slane %v401_v48, 1 }
  0x91   : > { %915 = vmatpush.bf16.msra.mxu1 %v848_v58  ;;  %963 = vmatpush.bf16.msra.mxu3 %v849_v59  ;;  %v457_v10 = vperm.slane %v455_v57, 0  ;;  %v461_v11 = vperm.slane %v459_v62, 0  ;;  %v427_v14 = vperm.slane %v6758_v44, 1  ;;  %v519_v15 = vpack.i.b16 %v426_v63, %v426_v63 }
  0x92   : > { %v465_v16 = vperm.slane %v463_v1, 0  ;;  %v469_v18 = vperm.slane %v467_v7, 0  ;;  %v527_v19 = vpack.i.b16 %v428_v21, %v428_v21  ;;  %v531_v20 = vpack.i.b16 %v429_v9, %v429_v9 }
  0x93   : > { %v570_v22 = vunpack.c.l.bf16 %v457_v10  ;;  %v571_v23 = vunpack.c.l.bf16 %v461_v11  ;;  %v521_v25 = vperm.slane %v519_v15, 0  ;;  %v523_v17 = vpack.i.b16 %v427_v14, %v427_v14 }
  0x94   : > { %v572_v24 = vunpack.c.l.bf16 %v465_v16  ;;  %v573_v26 = vunpack.c.l.bf16 %v469_v18  ;;  %v529_v27 = vperm.slane %v527_v19, 0  ;;  %v533_v13 = vperm.slane %v531_v20, 0 }
  0x95   : > { %v610_v28 = vmul.f32 %v7193_v60, %v570_v22  ;;  %v611_v29 = vmul.f32 %v7195_v61, %v571_v23  ;;  %v612_v30 = vmul.f32 %v7200_v2, %v570_v22  ;;  %v613_v31 = vmul.f32 %v7202_v3, %v571_v23 }
  0x96   : > { %v614_v33 = vmul.f32 %v7193_v60, %v572_v24  ;;  %v615_v34 = vmul.f32 %v7195_v61, %v573_v26  ;;  %v616_v35 = vmul.f32 %v7200_v2, %v572_v24  ;;  %v617_v49 = vmul.f32 %v7202_v3, %v573_v26 }
  0x97   : > { %v588_v36 = vunpack.c.l.bf16 %v529_v27  ;;  %v589_v39 = vunpack.c.l.bf16 %v533_v13  ;;  %v670_v41 = vpack.c.bf16 %v611_v29, %v610_v28  ;;  %v671_v43 = vpack.c.bf16 %v613_v31, %v612_v30 }
  0x98   : > { %v672_v44 = vpack.c.bf16 %v615_v34, %v614_v33  ;;  %v673_v45 = vpack.c.bf16 %v617_v49, %v616_v35  ;;  %v525_v46 = vperm.slane %v523_v17, 0  ;;  %v586_v52 = vunpack.c.l.bf16 %v521_v25 }
  0x99   : > { %v646_v51 = vmul.f32 %v7193_v60, %v588_v36  ;;  %v647_v53 = vmul.f32 %v7195_v61, %v589_v39  ;;  %v648_v54 = vmul.f32 %v7200_v2, %v588_v36  ;;  %v649_v55 = vmul.f32 %v7202_v3, %v589_v39 }
  0x9a   : > { %v772_v56 = vunpack.c.l.b16 %v672_v44  ;;  %v774_v47 = vunpack.c.l.b16 %v673_v45  ;;  %v773_v48 = vunpack.c.h.b16 %v672_v44  ;;  %v775_v57 = vunpack.c.h.b16 %v673_v45 }
  0x9b   : > { %v688_v58 = vpack.c.bf16 %v647_v53, %v646_v51  ;;  %v689_v59 = vpack.c.bf16 %v649_v55, %v648_v54  ;;  %v768_v62 = vunpack.c.l.b16 %v670_v41  ;;  %v770_v63 = vunpack.c.l.b16 %v671_v43 }
  0x9c   : > { %v830_v1 = vpack.c.b16 %v774_v47, %v772_v56  ;;  %v831_v7 = vpack.c.b16 %v775_v57, %v773_v48  ;;  %v587_v21 = vunpack.c.l.bf16 %v525_v46  ;;  %v642_v9 = vmul.f32 %v7193_v60, %v586_v52 }
  0x9d   : > { %v804_v10 = vunpack.c.l.b16 %v688_v58  ;;  %v806_v11 = vunpack.c.l.b16 %v689_v59  ;;  %v805_v14 = vunpack.c.h.b16 %v688_v58  ;;  %v807_v15 = vunpack.c.h.b16 %v689_v59 }
  0x9e   : > { %892 = vmatpush.bf16.msra.mxu0 %v830_v1  ;;  %940 = vmatpush.bf16.msra.mxu2 %v831_v7  ;;  %v828_v16 = vpack.c.b16 %v770_v63, %v768_v62  ;;  %v643_v18 = vmul.f32 %v7195_v61, %v587_v21  ;;  %v644_v19 = vmul.f32 %v7200_v2, %v586_v52  ;;  %v769_v20 = vunpack.c.h.b16 %v670_v41 }
  0x9f   : > { %v846_v22 = vpack.c.b16 %v806_v11, %v804_v10  ;;  %v847_v23 = vpack.c.b16 %v807_v15, %v805_v14  ;;  %v645_v25 = vmul.f32 %v7202_v3, %v587_v21  ;;  %v771_v17 = vunpack.c.h.b16 %v671_v43 }
  0xa0   : > { %v686_v24 = vpack.c.bf16 %v643_v18, %v642_v9  ;;  %v409_v26 = vperm.slane %v7264_v37, 1  ;;  %v447_v27 = vpack.i.b16 %v408_v50, %v408_v50  ;;  %v399_v13 = vpack.i.b16 %v383_v40, %v383_v40 }
  0xa1   : > { %916 = vmatpush.bf16.msra.mxu1 %v846_v22  ;;  %964 = vmatpush.bf16.msra.mxu3 %v847_v23  ;;  %v687_v28 = vpack.c.bf16 %v645_v25, %v644_v19  ;;  %v829_v29 = vpack.c.b16 %v771_v17, %v769_v20  ;;  %v406_v30 = vperm.slane %v7266_v38, 0  ;;  %v407_v31 = vperm.slane %v7266_v38, 1 }
  0xa2   : > { %893 = vmatpush.bf16.msra.mxu0 %v828_v16  ;;  %v800_v33 = vunpack.c.l.b16 %v686_v24  ;;  %v801_v34 = vunpack.c.h.b16 %v686_v24  ;;  %v449_v35 = vperm.slane %v447_v27, 0  ;;  %v451_v49 = vpack.i.b16 %v409_v26, %v409_v26 }
  0xa3   : > { %v802_v37 = vunpack.c.l.b16 %v687_v28  ;;  %941 = vmatpush.bf16.msra.mxu2 %v829_v29  ;;  %v803_v50 = vunpack.c.h.b16 %v687_v28  ;;  %v424_v36 = vperm.slane %v399_v13, 0  ;;  %v425_v39 = vperm.slane %v399_v13, 1 }
  0xa4   : > { %v453_v41 = vperm.slane %v451_v49, 0  ;;  %v568_v40 = vunpack.c.l.bf16 %v449_v35  ;;  %v439_v43 = vpack.i.b16 %v406_v30, %v406_v30  ;;  %v443_v44 = vpack.i.b16 %v407_v31, %v407_v31 }
  0xa5   : > { %v844_v45 = vpack.c.b16 %v802_v37, %v800_v33  ;;  %v845_v46 = vpack.c.b16 %v803_v50, %v801_v34  ;;  %v511_v52 = vpack.i.b16 %v424_v36, %v424_v36  ;;  %v515_v51 = vpack.i.b16 %v425_v39, %v425_v39 }
  0xa6   : > { %v569_v53 = vunpack.c.l.bf16 %v453_v41  ;;  %v606_v38 = vmul.f32 %v7193_v60, %v568_v40  ;;  %v608_v54 = vmul.f32 %v7200_v2, %v568_v40  ;;  %v441_v55 = vperm.slane %v439_v43, 0 }
  0xa7   : > { %917 = vmatpush.bf16.msra.mxu1 %v844_v45  ;;  %965 = vmatpush.bf16.msra.mxu3 %v845_v46  ;;  %v513_v56 = vperm.slane %v511_v52, 0  ;;  %v517_v47 = vperm.slane %v515_v51, 0  ;;  %v445_v48 = vperm.slane %v443_v44, 0  ;;  %v6757_v57 = vpack.i.b16 %v7259_v32, %v7259_v32  ;;  %v6763_v45 = vld [vmem:[#allocation2] sm:$0xf] }
  0xa8   : > { %v607_v58 = vmul.f32 %v7195_v61, %v569_v53  ;;  %v609_v59 = vmul.f32 %v7202_v3, %v569_v53  ;;  %v566_v62 = vunpack.c.l.bf16 %v441_v55  ;;  %v6886_v46 = vld [vmem:[#allocation2 + $0x4] sm:$0xf0] }
  0xa9   : > { %v584_v63 = vunpack.c.l.bf16 %v513_v56  ;;  %v585_v1 = vunpack.c.l.bf16 %v517_v47  ;;  %v567_v7 = vunpack.c.l.bf16 %v445_v48  ;;  %v422_v21 = vperm.slane %v6757_v57, 0 }
  0xaa   : > { %v668_v9 = vpack.c.bf16 %v607_v58, %v606_v38  ;;  %v669_v10 = vpack.c.bf16 %v609_v59, %v608_v54  ;;  %v602_v11 = vmul.f32 %v7193_v60, %v566_v62  ;;  %v604_v14 = vmul.f32 %v7200_v2, %v566_v62 }
  0xab   : > { %v638_v15 = vmul.f32 %v7193_v60, %v584_v63  ;;  %v639_v16 = vmul.f32 %v7195_v61, %v585_v1  ;;  %v640_v32 = vmul.f32 %v7200_v2, %v584_v63  ;;  %v641_v18 = vmul.f32 %v7202_v3, %v585_v1 }
  0xac   : > { %v764_v19 = vunpack.c.l.b16 %v668_v9  ;;  %v766_v20 = vunpack.c.l.b16 %v669_v10  ;;  %v765_v22 = vunpack.c.h.b16 %v668_v9  ;;  %v767_v23 = vunpack.c.h.b16 %v669_v10 }
  0xad   : > { %v684_v25 = vpack.c.bf16 %v639_v16, %v638_v15  ;;  %v685_v17 = vpack.c.bf16 %v641_v18, %v640_v32  ;;  %v603_v24 = vmul.f32 %v7195_v61, %v567_v7  ;;  %v605_v26 = vmul.f32 %v7202_v3, %v567_v7  ;;  %v6773_v15 = vld [vmem:[#allocation2 + $0x18] sm:$0xf0]  ;;  %v6779_v32 = vld [vmem:[#allocation2 + $0x20] sm:$0xf]  ;;  %v6890_v18 = vld [vmem:[#allocation2 + $0x24] sm:$0xf0] }
  0xae   : > { %v826_v27 = vpack.c.b16 %v766_v20, %v764_v19  ;;  %v827_v13 = vpack.c.b16 %v767_v23, %v765_v22  ;;  %v423_v28 = vperm.slane %v6757_v57, 1  ;;  %v503_v29 = vpack.i.b16 %v422_v21, %v422_v21  ;;  %v6765_v21 = vld [vmem:[#allocation2 + $0x8] sm:$0xf0]  ;;  %v6889_v20 = vld [vmem:[#allocation2 + $0x24] sm:$0xf] }
  0xaf   : > { %v796_v30 = vunpack.c.l.b16 %v684_v25  ;;  %v798_v31 = vunpack.c.l.b16 %v685_v17  ;;  %v797_v33 = vunpack.c.h.b16 %v684_v25  ;;  %v799_v34 = vunpack.c.h.b16 %v685_v17  ;;  %v6781_v22 = vld [vmem:[#allocation2 + $0x28] sm:$0xf0]  ;;  %v7342_v25 = vld [vmem:[%s7339_s6] ss:$8 sm:$0x3] }
  0xb0   : > { %894 = vmatpush.bf16.msra.mxu0 %v826_v27  ;;  %942 = vmatpush.bf16.msra.mxu2 %v827_v13  ;;  %v666_v35 = vpack.c.bf16 %v603_v24, %v602_v11  ;;  %v667_v49 = vpack.c.bf16 %v605_v26, %v604_v14  ;;  %v505_v37 = vperm.slane %v503_v29, 0  ;;  %v507_v50 = vpack.i.b16 %v423_v28, %v423_v28  ;;  %v6887_v14 = vld [vmem:[#allocation2 + $0x14] sm:$0xf] }
  0xb1   : > { %v842_v36 = vpack.c.b16 %v798_v31, %v796_v30  ;;  %v843_v39 = vpack.c.b16 %v799_v34, %v797_v33  ;;  %v7310_v47 = vor.u32 %v6886_v46, %v6763_v45  ;;  %v7324_v16 = vor.u32 %v6887_v14, %v6773_v15 }
  0xb2   : > { %v760_v41 = vunpack.c.l.b16 %v666_v35  ;;  %v762_v40 = vunpack.c.l.b16 %v667_v49  ;;  %v509_v43 = vperm.slane %v507_v50, 0  ;;  %v582_v44 = vunpack.c.l.bf16 %v505_v37 }
  0xb3   : > { %918 = vmatpush.bf16.msra.mxu1 %v842_v36  ;;  %966 = vmatpush.bf16.msra.mxu3 %v843_v39  ;;  %v761_v52 = vunpack.c.h.b16 %v666_v35  ;;  %v763_v51 = vunpack.c.h.b16 %v667_v49  ;;  %v7328_v19 = vor.u32 %v6890_v18, %v6779_v32  ;;  %v7332_v23 = vor.u32 %v6889_v20, %v6781_v22 }
  0xb4   : > { %v824_v53 = vpack.c.b16 %v762_v40, %v760_v41  ;;  %v583_v38 = vunpack.c.l.bf16 %v509_v43  ;;  %v634_v54 = vmul.f32 %v7193_v60, %v582_v44  ;;  %v636_v55 = vmul.f32 %v7200_v2, %v582_v44  ;;  %v6885_v60 = vld [vmem:[#allocation2 + $0x4] sm:$0xf] }
  0xb5   : > { %v825_v56 = vpack.c.b16 %v763_v51, %v761_v52  ;;  %v7316_v10 = vor.u32 %v6885_v60, %v6765_v21  ;;  %v259_v17 = vstv %s258_s5 }
  0xb6   : > { %895 = vmatpush.bf16.msra.mxu0 %v824_v53  ;;  %v635_v48 = vmul.f32 %v7195_v61, %v583_v38  ;;  %v637_v57 = vmul.f32 %v7202_v3, %v583_v38  ;;  %v6771_v61 = vld [vmem:[#allocation2 + $0x10] sm:$0xf]  ;;  %v6888_v3 = vld [vmem:[#allocation2 + $0x14] sm:$0xf0]  ;;  %v260_v24 = vadd.f32 %v259_v17, %v7342_v25 }
  0xb7   : > { %943 = vmatpush.bf16.msra.mxu2 %v825_v56  ;;  %v7320_v11 = vor.u32 %v6888_v3, %v6771_v61 }
  0xb8   : > { %v682_v58 = vpack.c.bf16 %v635_v48, %v634_v54  ;;  %v683_v59 = vpack.c.bf16 %v637_v57, %v636_v55  ;;  %v275_v26 = vperm.slane %v260_v24, 0  ;;  %v276_v30 = vperm.slane %v260_v24, 1 }
  0xb9   : > { %896 = vmatmul.bf16.vlgmr.msra.gmra.mxu0 %v7310_v47 }
  0xba   : > { %v792_v62 = vunpack.c.l.b16 %v682_v58  ;;  %v794_v63 = vunpack.c.l.b16 %v683_v59  ;;  %v793_v1 = vunpack.c.h.b16 %v682_v58  ;;  %v795_v7 = vunpack.c.h.b16 %v683_v59  ;;  %944 = vmatmul.bf16.vlgmr.msra.gmra.mxu2 %v7310_v47 }
  0xbb   : > { %v279_v13 = vsub.f32 %v7152_v5, %v275_v26  ;;  %v281_v28 = vsub.f32 %v7154_v6, %v275_v26  ;;  %v280_v37 = vsub.f32 %v7152_v5, %v276_v30  ;;  %v282_v50 = vsub.f32 %v7154_v6, %v276_v30 }
  0xbc   : > { %v840_v2 = vpack.c.b16 %v794_v63, %v792_v62  ;;  %v841_v9 = vpack.c.b16 %v795_v7, %v793_v1 }
  0xbd   : > { %v283_v29 = vand.u32 2147483647, %v279_v13  ;;  %v285_v33 = vand.u32 2147483647, %v281_v28  ;;  %v284_v40 = vand.u32 2147483647, %v280_v37 }
  0xbe   : > { %919 = vmatpush.bf16.msra.mxu1 %v840_v2  ;;  %967 = vmatpush.bf16.msra.mxu3 %v841_v9  ;;  %v286_v43 = vand.u32 2147483647, %v282_v50 }
  0xbf   : > { %v287_v49 = vsub.f32 1.0, %v283_v29  ;;  %v289_v36 = vsub.f32 1.0, %v285_v33  ;;  %v288_v38 = vsub.f32 1.0, %v284_v40 }
  0xc0   : > { %v290_v55 = vsub.f32 1.0, %v286_v43 }
  0xc1   : > { %920 = vmatmul.bf16.vlgmr.msra.gmra.mxu1 %v7316_v10  ;;  %968 = vmatmul.bf16.vlgmr.msra.gmra.mxu3 %v7316_v10  ;;  %v7349_v39 = vmax.f32 %v287_v49, 0.0  ;;  %v7351_v45 = vmax.f32 %v289_v36, 0.0  ;;  %v7355_v48 = vmax.f32 %v288_v38, 0.0 }
  0xc2   : > { %v7357_v59 = vmax.f32 %v290_v55, 0.0 }
  0xc9   : > { %901 = vmatmul.bf16.gmra.mxu0 %v7320_v11 }
  0xca   : > { %949 = vmatmul.bf16.gmra.mxu2 %v7320_v11 }
  0xd1   : > { %925 = vmatmul.bf16.gmra.mxu1 %v7324_v16  ;;  %973 = vmatmul.bf16.gmra.mxu3 %v7324_v16 }
  0xd9   : > { %906 = vmatmul.bf16.gmra.mxu0 %v7328_v19 }
  0xda   : > { %954 = vmatmul.bf16.gmra.mxu2 %v7328_v19 }
  0xe1   : > { %930 = vmatmul.bf16.gmra.mxu1 %v7332_v23  ;;  %978 = vmatmul.bf16.gmra.mxu3 %v7332_v23 }
 0x136   : > { %v897_v27 = vpop.f32.mrf.mxu0 }
 0x13d   : > { %v945_v31 = vpop.f32.mrf.mxu2 }
 0x13e   : > { %v921_v34 = vpop.f32.mrf.mxu1  ;;  %v899_v35 = vpop.f32.mrf.mxu0 }
 0x13f   : > { %v922_v41 = vadd.f32 %v921_v34, %v897_v27 }
 0x141   : > { %v984_v53 = vmul.f32 %v922_v41, %v7349_v39 }
 0x144   : > { %v969_v44 = vpop.f32.mrf.mxu3 }
 0x145   : > { %v947_v46 = vpop.f32.mrf.mxu2  ;;  %v970_v57 = vadd.f32 %v969_v44, %v945_v31 }
 0x146   : > { %v923_v52 = vpop.f32.mrf.mxu1  ;;  %v902_v51 = vpop.f32.mrf.mxu0 }
 0x147   : > { %v924_v54 = vadd.f32 %v923_v52, %v899_v35  ;;  %v985_v21 = vmul.f32 %v970_v57, %v7355_v48 }
 0x149   : > { %v986_v56 = vmul.f32 %v924_v54, %v7351_v45 }
 0x14b   : > { %v996_v58 = vadd.f32 %v986_v56, %v984_v53 }
 0x14c   : > { %v971_v62 = vpop.f32.mrf.mxu3 }
 0x14d   : > { %v997_v63 = vrot.slane %v996_v58, 4  ;;  %v972_v1 = vadd.f32 %v971_v62, %v947_v46  ;;  %v950_v7 = vpop.f32.mrf.mxu2 }
 0x14e   : > { %v926_v60 = vpop.f32.mrf.mxu1  ;;  %v904_v61 = vpop.f32.mrf.mxu0 }
 0x14f   : > { %v998_v2 = vadd.f32 %v997_v63, %v996_v58  ;;  %v987_v9 = vmul.f32 %v972_v1, %v7357_v59  ;;  %v927_v32 = vadd.f32 %v926_v60, %v902_v51 }
 0x151   : > { %v1003_v3 = vadd.f32 %v987_v9, %v985_v21  ;;  %v999_v14 = vrot.slane %v998_v2, 2  ;;  %v988_v27 = vmul.f32 %v927_v32, %v7349_v39 }
 0x153   : > { %v1004_v15 = vrot.slane %v1003_v3, 4  ;;  %v1000_v22 = vadd.f32 %v999_v14, %v998_v2 }
 0x154   : > { %v974_v18 = vpop.f32.mrf.mxu3 }
 0x155   : > { %v1005_v20 = vadd.f32 %v1004_v15, %v1003_v3  ;;  %v952_v24 = vpop.f32.mrf.mxu2  ;;  %v1001_v30 = vrot.slane %v1000_v22, 1  ;;  %v975_v34 = vadd.f32 %v974_v18, %v950_v7 }
 0x156   : > { %v928_v17 = vpop.f32.mrf.mxu1  ;;  %v907_v31 = vpop.f32.mrf.mxu0 }
 0x157   : > { %v1006_v26 = vrot.slane %v1005_v20, 2  ;;  %v929_v13 = vadd.f32 %v928_v17, %v904_v61  ;;  %v1002_v41 = vadd.f32 %v1001_v30, %v1000_v22  ;;  %v989_v44 = vmul.f32 %v975_v34, %v7355_v48 }
 0x159   : > { %v1007_v28 = vadd.f32 %v1006_v26, %v1005_v20  ;;  %v990_v29 = vmul.f32 %v929_v13, %v7351_v45 }
 0x15b   : > { %v1008_v33 = vrot.slane %v1007_v28, 1  ;;  %v1010_v35 = vadd.f32 %v990_v29, %v988_v27 }
 0x15c   : > { %v976_v49 = vpop.f32.mrf.mxu3 }
 0x15d   : > { %v1009_v37 = vadd.f32 %v1008_v33, %v1007_v28  ;;  %v1011_v50 = vrot.slane %v1010_v35, 4  ;;  %v977_v36 = vadd.f32 %v976_v49, %v952_v24  ;;  %v955_v51 = vpop.f32.mrf.mxu2 }
 0x15e   : > { %v931_v40 = vpop.f32.mrf.mxu1  ;;  %v909_v63 = vpop.f32.mrf.mxu0 }
 0x15f   : > { %v1040_v43 = vrot.slane %v1009_v37, 7  ;;  %v1012_v46 = vadd.f32 %v1011_v50, %v1010_v35  ;;  %v991_v52 = vmul.f32 %v977_v36, %v7357_v59  ;;  %v932_v58 = vadd.f32 %v931_v40, %v907_v31 }
 0x161   : > { %v1041_v38 = vsel %vm264_vm1, %v1002_v41, %v1040_v43  ;;  %v1017_v54 = vadd.f32 %v991_v52, %v989_v44  ;;  %v1013_v56 = vrot.slane %v1012_v46, 2  ;;  %v992_v21 = vmul.f32 %v932_v58, %v7349_v39 }
 0x162   : > { %v1043_v55 = vadd.f32 %v1041_v38, %v7342_v25 }
 0x163   : > { %v1018_v57 = vrot.slane %v1017_v54, 4  ;;  %v1014_v7 = vadd.f32 %v1013_v56, %v1012_v46 }
 0x164   : > { %1048 = vst.msk [vmem:[%s7339_s6] ss:$8 sm:$0x3] %vm7366_vm5, %v1043_v55  ;;  %v979_v62 = vpop.f32.mrf.mxu3  ;;  %s1876_s6 = sadd.s32 34, %s7135_s23 }
 0x165   : > { %v1019_v1 = vadd.f32 %v1018_v57, %v1017_v54  ;;  %v1015_v3 = vrot.slane %v1014_v7, 1  ;;  %v957_v25 = vpop.f32.mrf.mxu2  ;;  %v980_v15 = vadd.f32 %v979_v62, %v955_v51  ;;  %s1877_s8 = sshra.s32 %s1876_s6, 3  ;;  %s1880_s17 = sand.u32 7, %s1876_s6 }
 0x166   : > { %v933_v60 = vpop.f32.mrf.mxu1  ;;  %s6899_s18 = sshll.u32 %s1877_s8, 4  ;;  %s2666_s6 = sadd.s32 35, %s7135_s23 }
 0x167   : > { %v1020_v42 = vrot.slane %v1019_v1, 2  ;;  %v934_v2 = vadd.f32 %v933_v60, %v909_v63  ;;  %v1016_v24 = vadd.f32 %v1015_v3, %v1014_v7  ;;  %v993_v27 = vmul.f32 %v980_v15, %v7355_v48  ;;  %s1883_s21 = sadd.s32 %s6899_s18, %s1880_s17  ;;  %s2667_s8 = sshra.s32 %s2666_s6, 3 }
 0x168   : > { %s7618_s25 = scalar_lea.vmem %s7094_s22, %s1883_s21  ;;  %s2670_s18 = sand.u32 7, %s2666_s6 }
 0x169   : > { %v1021_v9 = vadd.f32 %v1020_v42, %v1019_v1  ;;  %v994_v61 = vmul.f32 %v934_v2, %v7351_v45  ;;  %s6902_s19 = sshll.u32 %s2667_s8, 4 }
 0x16a   : > { %s2673_s21 = sadd.s32 %s6902_s19, %s2670_s18 }
 0x16b   : > { %v1022_v14 = vrot.slane %v1021_v9, 1  ;;  %v1024_v32 = vadd.f32 %v994_v61, %v992_v21 }
 0x16c   : > { %v981_v18 = vpop.f32.mrf.mxu3 }
 0x16d   : > { %v1023_v20 = vadd.f32 %v1022_v14, %v1021_v9  ;;  %v1025_v22 = vrot.slane %v1024_v32, 4  ;;  %v982_v17 = vadd.f32 %v981_v18, %v957_v25 }
 0x16f   : > { %v1052_v26 = vrot.slane %v1023_v20, 7  ;;  %v1026_v39 = vadd.f32 %v1025_v22, %v1024_v32  ;;  %v995_v13 = vmul.f32 %v982_v17, %v7357_v59 }
 0x171   : > { %v1053_v45 = vsel %vm264_vm1, %v1016_v24, %v1052_v26  ;;  %v1031_v28 = vadd.f32 %v995_v13, %v993_v27  ;;  %v1027_v30 = vrot.slane %v1026_v39, 2 }
 0x172   : > { %v1055_v29 = vadd.f32 %v1053_v45, %v7144_v0 }
 0x173   : > { %v1032_v31 = vrot.slane %v1031_v28, 4  ;;  %v1028_v34 = vadd.f32 %v1027_v30, %v1026_v39 }
 0x174   : > { %1056 = vst.msk [vmem:[%s7141_s29] ss:$8 sm:$0x3] %vm7366_vm5, %v1055_v29  ;;  %s1067_s29 = sshra.s32 %s1066_s28, 3 }
 0x175   : > { %v1033_v33 = vadd.f32 %v1032_v31, %v1031_v28  ;;  %v1029_v48 = vrot.slane %v1028_v34, 1 }
 0x177   : > { %v1034_v35 = vrot.slane %v1033_v33, 2  ;;  %v1030_v50 = vadd.f32 %v1029_v48, %v1028_v34 }
 0x179   : > { %v1035_v49 = vadd.f32 %v1034_v35, %v1033_v33 }
 0x17b   : > { %v1036_v37 = vrot.slane %v1035_v49, 1 }
 0x17d   : > { %v1037_v59 = vadd.f32 %v1036_v37, %v1035_v49 }
 0x17f   : > { %v1060_v0 = vrot.slane %v1037_v59, 7 }
 0x181   : > { %v1061_v36 = vsel %vm264_vm1, %v1030_v50, %v1060_v0 }
 0x182   : > { %v1063_v41 = vadd.f32 %v1061_v36, %v7159_v8 }
 0x184   : > { %1064 = vst.msk [vmem:[%s7147_s2] ss:$8 sm:$0x3] %vm7366_vm5, %v1063_v41  ;;  %s6894_s2 = sshll.u32 %s1067_s29, 4 }
 0x185   : > { %s1073_s3 = sadd.s32 %s6894_s2, %s1070_s30 }
 0x186   : > { %s7570_s5 = scalar_lea.vmem %s7094_s22, %s1073_s3 }
 0x18b   : > { %v7398_v40 = vld [vmem:[%s7392_s26] ss:$8 sm:$0x3] }
 0x18c   : > { %v7401_v43 = vld [vmem:[%s7395_s27] ss:$8 sm:$0x3]  ;;  %v1100_v44 = vadd.f32 %v7398_v40, %v7162_v12 }
 0x18d   : > { %v1099_v8 = vadd.f32 %v7401_v43, %v7150_v4 }
 0x18e   : > { %v1146_v51 = vperm.slane %v1100_v44, 0  ;;  %v1147_v38 = vperm.slane %v1100_v44, 1 }
 0x18f   : > { %v1123_v46 = vperm.slane %v1099_v8, 0  ;;  %v1124_v52 = vperm.slane %v1099_v8, 1 }
 0x190   : > { %v1150_v56 = vsub.f32 %v7152_v5, %v1146_v51  ;;  %v1151_v57 = vsub.f32 %v7152_v5, %v1147_v38  ;;  %v1152_v58 = vsub.f32 %v7154_v6, %v1146_v51  ;;  %v1153_v62 = vsub.f32 %v7154_v6, %v1147_v38 }
 0x191   : > { %v1127_v54 = vsub.f32 %v7152_v5, %v1123_v46  ;;  %v1128_v55 = vsub.f32 %v7152_v5, %v1124_v52  ;;  %v1129_v63 = vsub.f32 %v7154_v6, %v1123_v46  ;;  %v1130_v1 = vsub.f32 %v7154_v6, %v1124_v52 }
 0x192   : > { %v1154_v42 = vand.u32 2147483647, %v1150_v56  ;;  %v1155_v21 = vand.u32 2147483647, %v1151_v57  ;;  %v1156_v2 = vand.u32 2147483647, %v1152_v58 }
 0x193   : > { %v1131_v7 = vand.u32 2147483647, %v1127_v54  ;;  %v1132_v60 = vand.u32 2147483647, %v1128_v55  ;;  %v1157_v9 = vand.u32 2147483647, %v1153_v62 }
 0x194   : > { %v1158_v25 = vsub.f32 1.0, %v1154_v42  ;;  %v1133_v14 = vand.u32 2147483647, %v1129_v63  ;;  %v1159_v15 = vsub.f32 1.0, %v1155_v21  ;;  %v1160_v32 = vsub.f32 1.0, %v1156_v2 }
 0x195   : > { %v1135_v61 = vsub.f32 1.0, %v1131_v7  ;;  %v1136_v3 = vsub.f32 1.0, %v1132_v60  ;;  %v1161_v18 = vsub.f32 1.0, %v1157_v9  ;;  %v1134_v20 = vand.u32 2147483647, %v1130_v1 }
 0x196   : > { %v1162_v24 = vmax.f32 %v1158_v25, 0.0  ;;  %v1137_v26 = vsub.f32 1.0, %v1133_v14  ;;  %v1163_v27 = vmax.f32 %v1159_v15, 0.0  ;;  %v1164_v39 = vmax.f32 %v1160_v32, 0.0 }
 0x197   : > { %v1139_v22 = vmax.f32 %v1135_v61, 0.0  ;;  %v1140_v17 = vmax.f32 %v1136_v3, 0.0  ;;  %v1165_v13 = vmax.f32 %v1161_v18, 0.0  ;;  %v1138_v45 = vsub.f32 1.0, %v1134_v20 }
 0x198   : > { %v1141_v29 = vmax.f32 %v1137_v26, 0.0  ;;  %v1166_v31 = vpack.c.bf16 %v1163_v27, %v1162_v24 }
 0x199   : > { %v7415_v28 = vpack.c.bf16 %v1140_v17, %v1139_v22  ;;  %v1142_v30 = vmax.f32 %v1138_v45, 0.0  ;;  %v1167_v33 = vpack.c.bf16 %v1165_v13, %v1164_v39 }
 0x19a   : > { %v7431_v0 = vunpack.c.l.bf16 %v1166_v31  ;;  %v7433_v36 = vunpack.c.h.bf16 %v1166_v31 }
 0x19b   : > { %v7418_v34 = vrot.slane %v7415_v28, 3  ;;  %v7423_v49 = vpack.c.bf16 %v1142_v30, %v1141_v29  ;;  %v7435_v41 = vunpack.c.l.bf16 %v1167_v33  ;;  %v7442_v38 = vunpack.c.h.bf16 %v1167_v33 }
 0x19d   : > { %v1182_v35 = vsel %vm357_vm2, %v7415_v28, %v7418_v34  ;;  %v1179_v48 = vsel %vm353_vm3, %v7415_v28, %v7418_v34  ;;  %v1176_v50 = vsel %vm349_vm4, %v7415_v28, %v7418_v34  ;;  %v7438_v8 = vrot.slane %v7423_v49, 3 }
 0x19e   : > { %v1184_v37 = vrot.slane %v1182_v35, 3  ;;  %v1181_v59 = vrot.slane %v1179_v48, 2  ;;  %v7450_v56 = vrot.slane %v1176_v50, 1 }
 0x19f   : > { %v1195_v54 = vsel %vm357_vm2, %v7423_v49, %v7438_v8  ;;  %v1192_v55 = vsel %vm353_vm3, %v7423_v49, %v7438_v8 }
 0x1a0   : > { %v1205_v44 = vunpack.i.h.s16 %v1184_v37  ;;  %v6794_v46 = vpack.i.b16 %v1184_v37, %v1184_v37  ;;  %v1203_v52 = vunpack.i.h.s16 %v1181_v59  ;;  %v7440_v51 = vpack.i.b16 %v1181_v59, %v1181_v59 }
 0x1a1   : > { %v1197_v58 = vrot.slane %v1195_v54, 3  ;;  %v7454_v7 = vrot.slane %v1192_v55, 2 }
 0x1a2   : > { %v1221_v57 = vpack.i.b16 %v1205_v44, %v1205_v44  ;;  %v1242_v62 = vperm.slane %v6794_v46, 0  ;;  %v1243_v63 = vperm.slane %v6794_v46, 1  ;;  %v7452_v1 = vpack.i.b16 %v1203_v52, %v1203_v52 }
 0x1a3   : > { %v1238_v60 = vperm.slane %v7440_v51, 0  ;;  %v1239_v42 = vperm.slane %v7440_v51, 1  ;;  %v1213_v9 = vunpack.i.h.s16 %v1197_v58  ;;  %v6798_v25 = vpack.i.b16 %v1197_v58, %v1197_v58 }
 0x1a4   : > { %v1244_v21 = vperm.slane %v1221_v57, 0  ;;  %v1245_v2 = vperm.slane %v1221_v57, 1  ;;  %v1311_v61 = vpack.i.b16 %v1242_v62, %v1242_v62  ;;  %v1315_v3 = vpack.i.b16 %v1243_v63, %v1243_v63 }
 0x1a5   : > { %v1240_v14 = vperm.slane %v7452_v1, 0  ;;  %v1241_v15 = vperm.slane %v7452_v1, 1  ;;  %v1229_v20 = vpack.i.b16 %v1213_v9, %v1213_v9  ;;  %v1258_v24 = vperm.slane %v6798_v25, 0 }
 0x1a6   : > { %v1319_v32 = vpack.i.b16 %v1244_v21, %v1244_v21  ;;  %v1323_v18 = vpack.i.b16 %v1245_v2, %v1245_v2  ;;  %v1313_v22 = vperm.slane %v1311_v61, 0  ;;  %v1317_v17 = vperm.slane %v1315_v3, 0 }
 0x1a7   : > { %v1259_v26 = vperm.slane %v6798_v25, 1  ;;  %v7460_v27 = vpack.i.b16 %v1240_v14, %v1240_v14  ;;  %v1260_v45 = vperm.slane %v1229_v20, 0  ;;  %v1261_v29 = vperm.slane %v1229_v20, 1 }
 0x1a8   : > { %v1321_v39 = vperm.slane %v1319_v32, 0  ;;  %v1325_v13 = vperm.slane %v1323_v18, 0  ;;  %v1402_v30 = vunpack.c.l.bf16 %v1313_v22  ;;  %v1403_v31 = vunpack.c.l.bf16 %v1317_v17 }
 0x1a9   : > { %v1375_v33 = vpack.i.b16 %v1258_v24, %v1258_v24  ;;  %v1379_v35 = vpack.i.b16 %v1259_v26, %v1259_v26  ;;  %v1383_v59 = vpack.i.b16 %v1260_v45, %v1260_v45  ;;  %v1387_v50 = vpack.i.b16 %v1261_v29, %v1261_v29 }
 0x1aa   : > { %v1404_v48 = vunpack.c.l.bf16 %v1321_v39  ;;  %v1405_v37 = vunpack.c.l.bf16 %v1325_v13  ;;  %v1450_v44 = vmul.f32 %v7431_v0, %v1402_v30  ;;  %v1451_v46 = vmul.f32 %v7433_v36, %v1403_v31 }
 0x1ab   : > { %v1452_v52 = vmul.f32 %v7435_v41, %v1402_v30  ;;  %v1453_v54 = vmul.f32 %v7442_v38, %v1403_v31  ;;  %v1385_v63 = vperm.slane %v1383_v59, 0  ;;  %v1389_v21 = vperm.slane %v1387_v50, 0 }
 0x1ac   : > { %v1454_v55 = vmul.f32 %v7431_v0, %v1404_v48  ;;  %v1455_v57 = vmul.f32 %v7433_v36, %v1405_v37  ;;  %v1456_v58 = vmul.f32 %v7435_v41, %v1404_v48  ;;  %v1457_v62 = vmul.f32 %v7442_v38, %v1405_v37 }
 0x1ad   : > { %v1502_v2 = vpack.c.bf16 %v1451_v46, %v1450_v44  ;;  %v1503_v9 = vpack.c.bf16 %v1453_v54, %v1452_v52  ;;  %v1377_v25 = vperm.slane %v1375_v33, 0  ;;  %v1381_v14 = vperm.slane %v1379_v35, 0 }
 0x1ae   : > { %v1504_v61 = vpack.c.bf16 %v1455_v57, %v1454_v55  ;;  %v1505_v3 = vpack.c.bf16 %v1457_v62, %v1456_v58  ;;  %v1420_v32 = vunpack.c.l.bf16 %v1385_v63  ;;  %v1421_v18 = vunpack.c.l.bf16 %v1389_v21 }
 0x1af   : > { %v1578_v20 = vunpack.c.l.b16 %v1502_v2  ;;  %v1580_v22 = vunpack.c.l.b16 %v1503_v9  ;;  %v1418_v35 = vunpack.c.l.bf16 %v1377_v25  ;;  %v1419_v50 = vunpack.c.l.bf16 %v1381_v14 }
 0x1b0   : > { %v1582_v17 = vunpack.c.l.b16 %v1504_v61  ;;  %v1584_v24 = vunpack.c.l.b16 %v1505_v3  ;;  %v1583_v26 = vunpack.c.h.b16 %v1504_v61  ;;  %v1585_v39 = vunpack.c.h.b16 %v1505_v3 }
 0x1b1   : > { %v1486_v13 = vmul.f32 %v7431_v0, %v1420_v32  ;;  %v1487_v45 = vmul.f32 %v7433_v36, %v1421_v18  ;;  %v1488_v29 = vmul.f32 %v7435_v41, %v1420_v32  ;;  %v1489_v30 = vmul.f32 %v7442_v38, %v1421_v18 }
 0x1b2   : > { %v1632_v31 = vpack.c.b16 %v1584_v24, %v1582_v17  ;;  %v1633_v48 = vpack.c.b16 %v1585_v39, %v1583_v26  ;;  %v1630_v33 = vpack.c.b16 %v1580_v22, %v1578_v20  ;;  %v1579_v44 = vunpack.c.h.b16 %v1502_v2 }
 0x1b3   : > { %v1520_v37 = vpack.c.bf16 %v1487_v45, %v1486_v13  ;;  %v1521_v59 = vpack.c.bf16 %v1489_v30, %v1488_v29  ;;  %v1482_v46 = vmul.f32 %v7431_v0, %v1418_v35  ;;  %v1484_v52 = vmul.f32 %v7435_v41, %v1418_v35 }
 0x1b4   : > { %1682 = vmatpush.bf16.msrb.mxu0 %v1632_v31  ;;  %1730 = vmatpush.bf16.msrb.mxu2 %v1633_v48  ;;  %v1581_v54 = vunpack.c.h.b16 %v1503_v9  ;;  %v1305_v55 = vperm.slane %v7460_v27, 0  ;;  %v1483_v21 = vmul.f32 %v7433_v36, %v1419_v50  ;;  %v1485_v61 = vmul.f32 %v7442_v38, %v1419_v50 }
 0x1b5   : > { %v1614_v57 = vunpack.c.l.b16 %v1520_v37  ;;  %v1616_v58 = vunpack.c.l.b16 %v1521_v59  ;;  %v1615_v62 = vunpack.c.h.b16 %v1520_v37  ;;  %v1617_v63 = vunpack.c.h.b16 %v1521_v59 }
 0x1b6   : > { %v1631_v3 = vpack.c.b16 %v1581_v54, %v1579_v44  ;;  %v1307_v2 = vpack.i.b16 %v1241_v15, %v1241_v15  ;;  %v1400_v32 = vunpack.c.l.bf16 %v1305_v55  ;;  %v1211_v9 = vunpack.i.h.s16 %v7454_v7 }
 0x1b7   : > { %v1648_v25 = vpack.c.b16 %v1616_v58, %v1614_v57  ;;  %v1649_v14 = vpack.c.b16 %v1617_v63, %v1615_v62  ;;  %v1518_v27 = vpack.c.bf16 %v1483_v21, %v1482_v46  ;;  %v1519_v18 = vpack.c.bf16 %v1485_v61, %v1484_v52 }
 0x1b8   : > { %1683 = vmatpush.bf16.msrb.mxu0 %v1630_v33  ;;  %1731 = vmatpush.bf16.msrb.mxu2 %v1631_v3  ;;  %v1309_v20 = vperm.slane %v1307_v2, 0  ;;  %v1295_v22 = vpack.i.b16 %v1238_v60, %v1238_v60  ;;  %v1446_v1 = vmul.f32 %v7431_v0, %v1400_v32  ;;  %v1448_v15 = vmul.f32 %v7435_v41, %v1400_v32 }
 0x1b9   : > { %1706 = vmatpush.bf16.msrb.mxu1 %v1648_v25  ;;  %1754 = vmatpush.bf16.msrb.mxu3 %v1649_v14  ;;  %v1227_v17 = vpack.i.b16 %v1211_v9, %v1211_v9  ;;  %v1201_v24 = vunpack.i.h.s16 %v7450_v56  ;;  %v1610_v26 = vunpack.c.l.b16 %v1518_v27  ;;  %v1612_v39 = vunpack.c.l.b16 %v1519_v18 }
 0x1ba   : > { %v1611_v13 = vunpack.c.h.b16 %v1518_v27  ;;  %v1613_v45 = vunpack.c.h.b16 %v1519_v18  ;;  %v1401_v29 = vunpack.c.l.bf16 %v1309_v20  ;;  %v1297_v48 = vperm.slane %v1295_v22, 0 }
 0x1bb   : > { %v1256_v30 = vperm.slane %v1227_v17, 0  ;;  %v1257_v31 = vperm.slane %v1227_v17, 1  ;;  %v1646_v33 = vpack.c.b16 %v1612_v39, %v1610_v26  ;;  %v1299_v60 = vpack.i.b16 %v1239_v42, %v1239_v42 }
 0x1bc   : > { %v1647_v35 = vpack.c.b16 %v1613_v45, %v1611_v13  ;;  %v6797_v37 = vpack.i.b16 %v7454_v7, %v7454_v7  ;;  %v1447_v59 = vmul.f32 %v7433_v36, %v1401_v29  ;;  %v1449_v50 = vmul.f32 %v7442_v38, %v1401_v29 }
 0x1bd   : > { %v1367_v44 = vpack.i.b16 %v1256_v30, %v1256_v30  ;;  %v1371_v46 = vpack.i.b16 %v1257_v31, %v1257_v31  ;;  %1707 = vmatpush.bf16.msrb.mxu1 %v1646_v33  ;;  %v1301_v52 = vperm.slane %v1299_v60, 0  ;;  %v1398_v54 = vunpack.c.l.bf16 %v1297_v48 }
 0x1be   : > { %1755 = vmatpush.bf16.msrb.mxu3 %v1647_v35  ;;  %v1254_v55 = vperm.slane %v6797_v37, 0  ;;  %v1255_v57 = vperm.slane %v6797_v37, 1  ;;  %v1500_v58 = vpack.c.bf16 %v1447_v59, %v1446_v1  ;;  %v1501_v62 = vpack.c.bf16 %v1449_v50, %v1448_v15 }
 0x1bf   : > { %v1369_v51 = vperm.slane %v1367_v44, 0  ;;  %v1373_v63 = vperm.slane %v1371_v46, 0  ;;  %v1399_v42 = vunpack.c.l.bf16 %v1301_v52  ;;  %v1442_v21 = vmul.f32 %v7431_v0, %v1398_v54 }
 0x1c0   : > { %v1444_v7 = vmul.f32 %v7435_v41, %v1398_v54  ;;  %v1359_v61 = vpack.i.b16 %v1254_v55, %v1254_v55  ;;  %v1574_v3 = vunpack.c.l.b16 %v1500_v58  ;;  %v1576_v2 = vunpack.c.l.b16 %v1501_v62 }
 0x1c1   : > { %v1416_v25 = vunpack.c.l.bf16 %v1369_v51  ;;  %v1417_v14 = vunpack.c.l.bf16 %v1373_v63  ;;  %v1575_v32 = vunpack.c.h.b16 %v1500_v58  ;;  %v1577_v9 = vunpack.c.h.b16 %v1501_v62 }
 0x1c2   : > { %v1443_v27 = vmul.f32 %v7433_v36, %v1399_v42  ;;  %v1445_v18 = vmul.f32 %v7442_v38, %v1399_v42  ;;  %v1628_v20 = vpack.c.b16 %v1576_v2, %v1574_v3  ;;  %v1361_v29 = vperm.slane %v1359_v61, 0 }
 0x1c3   : > { %v1478_v22 = vmul.f32 %v7431_v0, %v1416_v25  ;;  %v1479_v1 = vmul.f32 %v7433_v36, %v1417_v14  ;;  %v1480_v15 = vmul.f32 %v7435_v41, %v1416_v25  ;;  %v1481_v17 = vmul.f32 %v7442_v38, %v1417_v14 }
 0x1c4   : > { %v1629_v26 = vpack.c.b16 %v1577_v9, %v1575_v32  ;;  %v1498_v39 = vpack.c.bf16 %v1443_v27, %v1442_v21  ;;  %v1499_v13 = vpack.c.bf16 %v1445_v18, %v1444_v7  ;;  %1684 = vmatpush.bf16.msrb.mxu0 %v1628_v20  ;;  %v1363_v30 = vpack.i.b16 %v1255_v57, %v1255_v57 }
 0x1c5   : > { %v1516_v45 = vpack.c.bf16 %v1479_v1, %v1478_v22  ;;  %v1217_v31 = vpack.i.b16 %v1201_v24, %v1201_v24  ;;  %v1517_v48 = vpack.c.bf16 %v1481_v17, %v1480_v15  ;;  %v1414_v44 = vunpack.c.l.bf16 %v1361_v29 }
 0x1c6   : > { %1732 = vmatpush.bf16.msrb.mxu2 %v1629_v26  ;;  %v1570_v33 = vunpack.c.l.b16 %v1498_v39  ;;  %v1572_v35 = vunpack.c.l.b16 %v1499_v13  ;;  %v1571_v60 = vunpack.c.h.b16 %v1498_v39  ;;  %v1365_v50 = vperm.slane %v1363_v30, 0 }
 0x1c7   : > { %v1606_v37 = vunpack.c.l.b16 %v1516_v45  ;;  %v1607_v59 = vunpack.c.h.b16 %v1516_v45  ;;  %v1608_v46 = vunpack.c.l.b16 %v1517_v48  ;;  %v1609_v52 = vunpack.c.h.b16 %v1517_v48 }
 0x1c8   : > { %v1626_v54 = vpack.c.b16 %v1572_v35, %v1570_v33  ;;  %v1573_v55 = vunpack.c.h.b16 %v1499_v13  ;;  %v1415_v58 = vunpack.c.l.bf16 %v1365_v50  ;;  %v1474_v62 = vmul.f32 %v7431_v0, %v1414_v44 }
 0x1c9   : > { %v1476_v51 = vmul.f32 %v7435_v41, %v1414_v44  ;;  %v1236_v57 = vperm.slane %v1217_v31, 0  ;;  %v1644_v24 = vpack.c.b16 %v1608_v46, %v1606_v37  ;;  %v1645_v63 = vpack.c.b16 %v1609_v52, %v1607_v59 }
 0x1ca   : > { %1685 = vmatpush.bf16.msrb.mxu0 %v1626_v54  ;;  %v1627_v42 = vpack.c.b16 %v1573_v55, %v1571_v60  ;;  %v1237_v21 = vperm.slane %v1217_v31, 1  ;;  %v1475_v7 = vmul.f32 %v7433_v36, %v1415_v58  ;;  %v1477_v61 = vmul.f32 %v7442_v38, %v1415_v58 }
 0x1cb   : > { %v1287_v3 = vpack.i.b16 %v1236_v57, %v1236_v57  ;;  %v1189_v2 = vsel %vm349_vm4, %v7423_v49, %v7438_v8  ;;  %1708 = vmatpush.bf16.msrb.mxu1 %v1644_v24  ;;  %1756 = vmatpush.bf16.msrb.mxu3 %v1645_v63  ;;  %v6792_v32 = vpack.i.b16 %v7450_v56, %v7450_v56 }
 0x1cc   : > { %v1291_v25 = vpack.i.b16 %v1237_v21, %v1237_v21  ;;  %v1191_v14 = vrot.slane %v1189_v2, 1  ;;  %v7516_v9 = vsel %vm264_vm1, %v7415_v28, %v7418_v34  ;;  %v1514_v27 = vpack.c.bf16 %v1475_v7, %v1474_v62  ;;  %1733 = vmatpush.bf16.msrb.mxu2 %v1627_v42 }
 0x1cd   : > { %v1515_v18 = vpack.c.bf16 %v1477_v61, %v1476_v51  ;;  %v1289_v20 = vperm.slane %v1287_v3, 0  ;;  %v1199_v22 = vunpack.i.h.s16 %v7516_v9  ;;  %v1234_v17 = vperm.slane %v6792_v32, 0 }
 0x1ce   : > { %v1293_v1 = vperm.slane %v1291_v25, 0  ;;  %v1209_v15 = vunpack.i.h.s16 %v1191_v14  ;;  %v1235_v26 = vperm.slane %v6792_v32, 1  ;;  %v1602_v39 = vunpack.c.l.b16 %v1514_v27 }
 0x1cf   : > { %v1604_v13 = vunpack.c.l.b16 %v1515_v18  ;;  %v1603_v45 = vunpack.c.h.b16 %v1514_v27  ;;  %v1605_v29 = vunpack.c.h.b16 %v1515_v18  ;;  %v1396_v56 = vunpack.c.l.bf16 %v1289_v20 }
 0x1d0   : > { %v1397_v30 = vunpack.c.l.bf16 %v1293_v1  ;;  %v1225_v31 = vpack.i.b16 %v1209_v15, %v1209_v15  ;;  %v1279_v48 = vpack.i.b16 %v1234_v17, %v1234_v17  ;;  %v1283_v33 = vpack.i.b16 %v1235_v26, %v1235_v26 }
 0x1d1   : > { %v1642_v28 = vpack.c.b16 %v1604_v13, %v1602_v39  ;;  %v1643_v34 = vpack.c.b16 %v1605_v29, %v1603_v45  ;;  %v6796_v35 = vpack.i.b16 %v1191_v14, %v1191_v14  ;;  %v1438_v60 = vmul.f32 %v7431_v0, %v1396_v56 }
 0x1d2   : > { %v1439_v37 = vmul.f32 %v7433_v36, %v1397_v30  ;;  %v1440_v59 = vmul.f32 %v7435_v41, %v1396_v56  ;;  %v1441_v50 = vmul.f32 %v7442_v38, %v1397_v30  ;;  %v1252_v44 = vperm.slane %v1225_v31, 0 }
 0x1d3   : > { %1709 = vmatpush.bf16.msrb.mxu1 %v1642_v28  ;;  %1757 = vmatpush.bf16.msrb.mxu3 %v1643_v34  ;;  %v1253_v46 = vperm.slane %v1225_v31, 1  ;;  %v1281_v52 = vperm.slane %v1279_v48, 0  ;;  %v1285_v54 = vperm.slane %v1283_v33, 0  ;;  %v1250_v62 = vperm.slane %v6796_v35, 0 }
 0x1d4   : > { %v1496_v55 = vpack.c.bf16 %v1439_v37, %v1438_v60  ;;  %v1497_v58 = vpack.c.bf16 %v1441_v50, %v1440_v59  ;;  %v1251_v51 = vperm.slane %v6796_v35, 1  ;;  %v1351_v57 = vpack.i.b16 %v1252_v44, %v1252_v44 }
 0x1d5   : > { %v1355_v24 = vpack.i.b16 %v1253_v46, %v1253_v46  ;;  %v1394_v63 = vunpack.c.l.bf16 %v1281_v52  ;;  %v1395_v42 = vunpack.c.l.bf16 %v1285_v54  ;;  %v1343_v39 = vpack.i.b16 %v1250_v62, %v1250_v62 }
 0x1d6   : > { %v1566_v21 = vunpack.c.l.b16 %v1496_v55  ;;  %v1568_v7 = vunpack.c.l.b16 %v1497_v58  ;;  %v1567_v61 = vunpack.c.h.b16 %v1496_v55  ;;  %v1569_v3 = vunpack.c.h.b16 %v1497_v58 }
 0x1d7   : > { %v1353_v2 = vperm.slane %v1351_v57, 0  ;;  %v1357_v25 = vperm.slane %v1355_v24, 0  ;;  %v1434_v14 = vmul.f32 %v7431_v0, %v1394_v63  ;;  %v1435_v32 = vmul.f32 %v7433_v36, %v1395_v42 }
 0x1d8   : > { %v1624_v27 = vpack.c.b16 %v1568_v7, %v1566_v21  ;;  %v1625_v18 = vpack.c.b16 %v1569_v3, %v1567_v61  ;;  %v1436_v20 = vmul.f32 %v7435_v41, %v1394_v63  ;;  %v1437_v1 = vmul.f32 %v7442_v38, %v1395_v42 }
 0x1d9   : > { %v1412_v15 = vunpack.c.l.bf16 %v1353_v2  ;;  %v1413_v17 = vunpack.c.l.bf16 %v1357_v25  ;;  %v1494_v26 = vpack.c.bf16 %v1435_v32, %v1434_v14  ;;  %v1347_v45 = vpack.i.b16 %v1251_v51, %v1251_v51 }
 0x1da   : > { %1686 = vmatpush.bf16.msrb.mxu0 %v1624_v27  ;;  %1734 = vmatpush.bf16.msrb.mxu2 %v1625_v18  ;;  %v1495_v13 = vpack.c.bf16 %v1437_v1, %v1436_v20  ;;  %v1215_v29 = vpack.i.b16 %v1199_v22, %v1199_v22  ;;  %v1345_v33 = vperm.slane %v1343_v39, 0  ;;  %v1187_v14 = vsel %vm264_vm1, %v7423_v49, %v7438_v8 }
 0x1db   : > { %v1470_v56 = vmul.f32 %v7431_v0, %v1412_v15  ;;  %v1471_v30 = vmul.f32 %v7433_v36, %v1413_v17  ;;  %v1472_v31 = vmul.f32 %v7435_v41, %v1412_v15  ;;  %v1473_v48 = vmul.f32 %v7442_v38, %v1413_v17 }
 0x1dc   : > { %v1562_v28 = vunpack.c.l.b16 %v1494_v26  ;;  %v1564_v34 = vunpack.c.l.b16 %v1495_v13  ;;  %v1349_v35 = vperm.slane %v1347_v45, 0  ;;  %v1563_v59 = vunpack.c.h.b16 %v1494_v26 }
 0x1dd   : > { %v1512_v60 = vpack.c.bf16 %v1471_v30, %v1470_v56  ;;  %v1513_v37 = vpack.c.bf16 %v1473_v48, %v1472_v31  ;;  %v1565_v50 = vunpack.c.h.b16 %v1495_v13  ;;  %v1410_v46 = vunpack.c.l.bf16 %v1345_v33 }
 0x1de   : > { %v1622_v44 = vpack.c.b16 %v1564_v34, %v1562_v28  ;;  %v1411_v52 = vunpack.c.l.bf16 %v1349_v35  ;;  %v1232_v22 = vperm.slane %v1215_v29, 0  ;;  %v1233_v61 = vperm.slane %v1215_v29, 1 }
 0x1df   : > { %v1598_v54 = vunpack.c.l.b16 %v1512_v60  ;;  %v1600_v55 = vunpack.c.l.b16 %v1513_v37  ;;  %v1599_v58 = vunpack.c.h.b16 %v1512_v60  ;;  %v1601_v62 = vunpack.c.h.b16 %v1513_v37 }
 0x1e0   : > { %1687 = vmatpush.bf16.msrb.mxu0 %v1622_v44  ;;  %v1466_v51 = vmul.f32 %v7431_v0, %v1410_v46  ;;  %v1467_v57 = vmul.f32 %v7433_v36, %v1411_v52  ;;  %v1468_v24 = vmul.f32 %v7435_v41, %v1410_v46  ;;  %v1469_v63 = vmul.f32 %v7442_v38, %v1411_v52 }
 0x1e1   : > { %v1640_v42 = vpack.c.b16 %v1600_v55, %v1598_v54  ;;  %v1641_v21 = vpack.c.b16 %v1601_v62, %v1599_v58  ;;  %v1623_v7 = vpack.c.b16 %v1565_v50, %v1563_v59  ;;  %v1271_v25 = vpack.i.b16 %v1232_v22, %v1232_v22 }
 0x1e2   : > { %v1510_v3 = vpack.c.bf16 %v1467_v57, %v1466_v51  ;;  %v1511_v2 = vpack.c.bf16 %v1469_v63, %v1468_v24  ;;  %v1275_v32 = vpack.i.b16 %v1233_v61, %v1233_v61  ;;  %v1207_v27 = vunpack.i.h.s16 %v1187_v14 }
 0x1e3   : > { %1710 = vmatpush.bf16.msrb.mxu1 %v1640_v42  ;;  %1758 = vmatpush.bf16.msrb.mxu3 %v1641_v21  ;;  %v6791_v18 = vpack.i.b16 %v7516_v9, %v7516_v9  ;;  %v6795_v20 = vpack.i.b16 %v1187_v14, %v1187_v14  ;;  %v1273_v39 = vperm.slane %v1271_v25, 0 }
 0x1e4   : > { %v1594_v1 = vunpack.c.l.b16 %v1510_v3  ;;  %v1596_v15 = vunpack.c.l.b16 %v1511_v2  ;;  %1735 = vmatpush.bf16.msrb.mxu2 %v1623_v7  ;;  %v1595_v17 = vunpack.c.h.b16 %v1510_v3  ;;  %v1597_v26 = vunpack.c.h.b16 %v1511_v2 }
 0x1e5   : > { %v1277_v13 = vperm.slane %v1275_v32, 0  ;;  %v1223_v45 = vpack.i.b16 %v1207_v27, %v1207_v27  ;;  %v1230_v29 = vperm.slane %v6791_v18, 0  ;;  %v1231_v49 = vperm.slane %v6791_v18, 1 }
 0x1e6   : > { %v1638_v56 = vpack.c.b16 %v1596_v15, %v1594_v1  ;;  %v1639_v30 = vpack.c.b16 %v1597_v26, %v1595_v17  ;;  %v1246_v8 = vperm.slane %v6795_v20, 0  ;;  %v1392_v31 = vunpack.c.l.bf16 %v1273_v39 }
 0x1e7   : > { %v1393_v48 = vunpack.c.l.bf16 %v1277_v13  ;;  %v1248_v28 = vperm.slane %v1223_v45, 0  ;;  %v1249_v34 = vperm.slane %v1223_v45, 1  ;;  %v1263_v9 = vpack.i.b16 %v1230_v29, %v1230_v29 }
 0x1e8   : > { %1711 = vmatpush.bf16.msrb.mxu1 %v1638_v56  ;;  %1759 = vmatpush.bf16.msrb.mxu3 %v1639_v30  ;;  %v1267_v33 = vpack.i.b16 %v1231_v49, %v1231_v49  ;;  %v1247_v35 = vperm.slane %v6795_v20, 1  ;;  %v1327_v60 = vpack.i.b16 %v1246_v8, %v1246_v8  ;;  %v1430_v37 = vmul.f32 %v7431_v0, %v1392_v31 }
 0x1e9   : > { %v1431_v59 = vmul.f32 %v7433_v36, %v1393_v48  ;;  %v1432_v50 = vmul.f32 %v7435_v41, %v1392_v31  ;;  %v1433_v44 = vmul.f32 %v7442_v38, %v1393_v48  ;;  %v1335_v46 = vpack.i.b16 %v1248_v28, %v1248_v28 }
 0x1ea   : > { %v1339_v52 = vpack.i.b16 %v1249_v34, %v1249_v34  ;;  %v1265_v22 = vperm.slane %v1263_v9, 0  ;;  %v1269_v54 = vperm.slane %v1267_v33, 0  ;;  %v1329_v62 = vperm.slane %v1327_v60, 0 }
 0x1eb   : > { %v1492_v55 = vpack.c.bf16 %v1431_v59, %v1430_v37  ;;  %v1493_v58 = vpack.c.bf16 %v1433_v44, %v1432_v50  ;;  %v1331_v51 = vpack.i.b16 %v1247_v35, %v1247_v35  ;;  %v1337_v57 = vperm.slane %v1335_v46, 0 }
 0x1ec   : > { %v1341_v24 = vperm.slane %v1339_v52, 0  ;;  %v1390_v63 = vunpack.c.l.bf16 %v1265_v22  ;;  %v1391_v42 = vunpack.c.l.bf16 %v1269_v54  ;;  %v1406_v56 = vunpack.c.l.bf16 %v1329_v62 }
 0x1ed   : > { %v1558_v21 = vunpack.c.l.b16 %v1492_v55  ;;  %v1560_v7 = vunpack.c.l.b16 %v1493_v58  ;;  %v1559_v61 = vunpack.c.h.b16 %v1492_v55  ;;  %v1561_v3 = vunpack.c.h.b16 %v1493_v58 }
 0x1ee   : > { %v1408_v2 = vunpack.c.l.bf16 %v1337_v57  ;;  %v1409_v25 = vunpack.c.l.bf16 %v1341_v24  ;;  %v1426_v14 = vmul.f32 %v7431_v0, %v1390_v63  ;;  %v1427_v32 = vmul.f32 %v7433_v36, %v1391_v42 }
 0x1ef   : > { %v1620_v27 = vpack.c.b16 %v1560_v7, %v1558_v21  ;;  %v1621_v18 = vpack.c.b16 %v1561_v3, %v1559_v61  ;;  %v1428_v20 = vmul.f32 %v7435_v41, %v1390_v63  ;;  %v1429_v1 = vmul.f32 %v7442_v38, %v1391_v42 }
 0x1f0   : > { %v1462_v15 = vmul.f32 %v7431_v0, %v1408_v2  ;;  %v1463_v17 = vmul.f32 %v7433_v36, %v1409_v25  ;;  %v1464_v26 = vmul.f32 %v7435_v41, %v1408_v2  ;;  %v1465_v39 = vmul.f32 %v7442_v38, %v1409_v25 }
 0x1f1   : > { %1688 = vmatpush.bf16.msrb.mxu0 %v1620_v27  ;;  %1736 = vmatpush.bf16.msrb.mxu2 %v1621_v18  ;;  %v1490_v13 = vpack.c.bf16 %v1427_v32, %v1426_v14  ;;  %v1491_v45 = vpack.c.bf16 %v1429_v1, %v1428_v20  ;;  %v1333_v29 = vperm.slane %v1331_v51, 0  ;;  %v1458_v28 = vmul.f32 %v7431_v0, %v1406_v56 }
 0x1f2   : > { %v1508_v30 = vpack.c.bf16 %v1463_v17, %v1462_v15  ;;  %v1509_v49 = vpack.c.bf16 %v1465_v39, %v1464_v26  ;;  %v1460_v59 = vmul.f32 %v7435_v41, %v1406_v56  ;;  %v1097_v24 = vstv %s1096_s4 }
 0x1f3   : > { %v1554_v8 = vunpack.c.l.b16 %v1490_v13  ;;  %v1556_v31 = vunpack.c.l.b16 %v1491_v45  ;;  %v1407_v48 = vunpack.c.l.bf16 %v1333_v29  ;;  %v1555_v52 = vunpack.c.h.b16 %v1490_v13 }
 0x1f4   : > { %v1590_v34 = vunpack.c.l.b16 %v1508_v30  ;;  %v1592_v9 = vunpack.c.l.b16 %v1509_v49  ;;  %v1591_v33 = vunpack.c.h.b16 %v1508_v30  ;;  %v1593_v35 = vunpack.c.h.b16 %v1509_v49 }
 0x1f5   : > { %v1618_v60 = vpack.c.b16 %v1556_v31, %v1554_v8  ;;  %v1459_v37 = vmul.f32 %v7433_v36, %v1407_v48  ;;  %v1461_v50 = vmul.f32 %v7442_v38, %v1407_v48  ;;  %v1557_v22 = vunpack.c.h.b16 %v1491_v45  ;;  %v7573_v38 = vld [vmem:[%s7570_s5] ss:$8 sm:$0x3] }
 0x1f6   : > { %v1636_v44 = vpack.c.b16 %v1592_v9, %v1590_v34  ;;  %v1637_v46 = vpack.c.b16 %v1593_v35, %v1591_v33  ;;  %v1098_v63 = vadd.f32 %v1097_v24, %v7573_v38 }
 0x1f7   : > { %1689 = vmatpush.bf16.msrb.mxu0 %v1618_v60  ;;  %v1506_v54 = vpack.c.bf16 %v1459_v37, %v1458_v28  ;;  %v1507_v55 = vpack.c.bf16 %v1461_v50, %v1460_v59  ;;  %v1619_v0 = vpack.c.b16 %v1557_v22, %v1555_v52 }
 0x1f8   : > { %1712 = vmatpush.bf16.msrb.mxu1 %v1636_v44  ;;  %1760 = vmatpush.bf16.msrb.mxu3 %v1637_v46  ;;  %v1102_v42 = vperm.slane %v1098_v63, 0  ;;  %v1103_v3 = vperm.slane %v1098_v63, 1 }
 0x1f9   : > { %v1586_v58 = vunpack.c.l.b16 %v1506_v54  ;;  %v1588_v62 = vunpack.c.l.b16 %v1507_v55  ;;  %v1587_v51 = vunpack.c.h.b16 %v1506_v54  ;;  %v1589_v57 = vunpack.c.h.b16 %v1507_v55  ;;  %1737 = vmatpush.bf16.msrb.mxu2 %v1619_v0 }
 0x1fa   : > { %1690 = vmatmul.bf16.vlgmr.msrb.gmra.mxu0 %v7310_v47  ;;  %v1106_v7 = vsub.f32 %v7152_v5, %v1102_v42  ;;  %v1108_v61 = vsub.f32 %v7154_v6, %v1102_v42  ;;  %v1107_v27 = vsub.f32 %v7152_v5, %v1103_v3  ;;  %v1109_v18 = vsub.f32 %v7154_v6, %v1103_v3 }
 0x1fb   : > { %v1634_v36 = vpack.c.b16 %v1588_v62, %v1586_v58  ;;  %v1635_v41 = vpack.c.b16 %v1589_v57, %v1587_v51 }
 0x1fc   : > { %1738 = vmatmul.bf16.vlgmr.msrb.gmra.mxu2 %v7310_v47  ;;  %v1110_v25 = vand.u32 2147483647, %v1106_v7  ;;  %v1112_v14 = vand.u32 2147483647, %v1108_v61  ;;  %v1111_v39 = vand.u32 2147483647, %v1107_v27 }
 0x1fd   : > { %1713 = vmatpush.bf16.msrb.mxu1 %v1634_v36  ;;  %1761 = vmatpush.bf16.msrb.mxu3 %v1635_v41  ;;  %v1113_v13 = vand.u32 2147483647, %v1109_v18 }
 0x1fe   : > { %v1114_v1 = vsub.f32 1.0, %v1110_v25  ;;  %v1116_v15 = vsub.f32 1.0, %v1112_v14  ;;  %v1115_v31 = vsub.f32 1.0, %v1111_v39 }
 0x1ff   : > { %v1117_v28 = vsub.f32 1.0, %v1113_v13 }
 0x200   : > { %1714 = vmatmul.bf16.vlgmr.msrb.gmra.mxu1 %v7316_v10  ;;  %1762 = vmatmul.bf16.vlgmr.msrb.gmra.mxu3 %v7316_v10  ;;  %v7580_v29 = vmax.f32 %v1114_v1, 0.0  ;;  %v7582_v56 = vmax.f32 %v1116_v15, 0.0  ;;  %v7586_v60 = vmax.f32 %v1115_v31, 0.0 }
 0x201   : > { %v7588_v59 = vmax.f32 %v1117_v28, 0.0 }
 0x20a   : > { %1695 = vmatmul.bf16.gmra.mxu0 %v7320_v11 }
 0x20c   : > { %1743 = vmatmul.bf16.gmra.mxu2 %v7320_v11 }
 0x210   : > { %1719 = vmatmul.bf16.gmra.mxu1 %v7324_v16  ;;  %1767 = vmatmul.bf16.gmra.mxu3 %v7324_v16 }
 0x21a   : > { %1700 = vmatmul.bf16.gmra.mxu0 %v7328_v19 }
 0x21c   : > { %1748 = vmatmul.bf16.gmra.mxu2 %v7328_v19 }
 0x220   : > { %1724 = vmatmul.bf16.gmra.mxu1 %v7332_v23  ;;  %1772 = vmatmul.bf16.gmra.mxu3 %v7332_v23 }
 0x277   : > { %v1691_v21 = vpop.f32.mrf.mxu0 }
 0x27d   : > { %v1715_v2 = vpop.f32.mrf.mxu1 }
 0x27e   : > { %v1716_v26 = vadd.f32 %v1715_v2, %v1691_v21 }
 0x27f   : > { %v1693_v32 = vpop.f32.mrf.mxu0  ;;  %v1739_v20 = vpop.f32.mrf.mxu2 }
 0x280   : > { %v1778_v8 = vmul.f32 %v1716_v26, %v7580_v29 }
 0x283   : > { %v1763_v17 = vpop.f32.mrf.mxu3 }
 0x284   : > { %v1764_v9 = vadd.f32 %v1763_v17, %v1739_v20 }
 0x285   : > { %v1717_v45 = vpop.f32.mrf.mxu1 }
 0x286   : > { %v1718_v30 = vadd.f32 %v1717_v45, %v1693_v32  ;;  %v1779_v46 = vmul.f32 %v1764_v9, %v7586_v60 }
 0x287   : > { %v1696_v49 = vpop.f32.mrf.mxu0  ;;  %v1741_v34 = vpop.f32.mrf.mxu2 }
 0x288   : > { %v1780_v48 = vmul.f32 %v1718_v30, %v7582_v56 }
 0x28a   : > { %v1790_v33 = vadd.f32 %v1780_v48, %v1778_v8 }
 0x28b   : > { %v1765_v35 = vpop.f32.mrf.mxu3 }
 0x28c   : > { %v1791_v37 = vrot.slane %v1790_v33, 4  ;;  %v1766_v50 = vadd.f32 %v1765_v35, %v1741_v34 }
 0x28d   : > { %v1720_v44 = vpop.f32.mrf.mxu1 }
 0x28e   : > { %v1792_v52 = vadd.f32 %v1791_v37, %v1790_v33  ;;  %v1781_v22 = vmul.f32 %v1766_v50, %v7588_v59  ;;  %v1721_v36 = vadd.f32 %v1720_v44, %v1696_v49 }
 0x28f   : > { %v1698_v54 = vpop.f32.mrf.mxu0  ;;  %v1744_v58 = vpop.f32.mrf.mxu2 }
 0x290   : > { %v1797_v55 = vadd.f32 %v1781_v22, %v1779_v46  ;;  %v1793_v0 = vrot.slane %v1792_v52, 2  ;;  %v1782_v7 = vmul.f32 %v1721_v36, %v7580_v29 }
 0x292   : > { %v1798_v62 = vrot.slane %v1797_v55, 4  ;;  %v1794_v41 = vadd.f32 %v1793_v0, %v1792_v52 }
 0x293   : > { %v1768_v51 = vpop.f32.mrf.mxu3 }
 0x294   : > { %v1799_v57 = vadd.f32 %v1798_v62, %v1797_v55  ;;  %v1795_v3 = vrot.slane %v1794_v41, 1  ;;  %v1769_v32 = vadd.f32 %v1768_v51, %v1744_v58 }
 0x295   : > { %v1722_v24 = vpop.f32.mrf.mxu1 }
 0x296   : > { %v1800_v63 = vrot.slane %v1799_v57, 2  ;;  %v1723_v42 = vadd.f32 %v1722_v24, %v1698_v54  ;;  %v1796_v17 = vadd.f32 %v1795_v3, %v1794_v41  ;;  %v1783_v13 = vmul.f32 %v1769_v32, %v7586_v60 }
 0x297   : > { %v1746_v2 = vpop.f32.mrf.mxu2  ;;  %v1701_v25 = vpop.f32.mrf.mxu0 }
 0x298   : > { %v1801_v21 = vadd.f32 %v1800_v63, %v1799_v57  ;;  %v1784_v61 = vmul.f32 %v1723_v42, %v7582_v56 }
 0x29a   : > { %v1802_v14 = vrot.slane %v1801_v21, 1  ;;  %v1804_v27 = vadd.f32 %v1784_v61, %v1782_v7 }
 0x29b   : > { %v1770_v18 = vpop.f32.mrf.mxu3 }
 0x29c   : > { %v1803_v20 = vadd.f32 %v1802_v14, %v1801_v21  ;;  %v1805_v1 = vrot.slane %v1804_v27, 4  ;;  %v1771_v15 = vadd.f32 %v1770_v18, %v1746_v2 }
 0x29d   : > { %v1725_v26 = vpop.f32.mrf.mxu1 }
 0x29e   : > { %v1834_v39 = vrot.slane %v1803_v20, 7  ;;  %v1806_v45 = vadd.f32 %v1805_v1, %v1804_v27  ;;  %v1785_v30 = vmul.f32 %v1771_v15, %v7588_v59  ;;  %v1726_v37 = vadd.f32 %v1725_v26, %v1701_v25 }
 0x29f   : > { %v1749_v28 = vpop.f32.mrf.mxu2  ;;  %v1703_v33 = vpop.f32.mrf.mxu0 }
 0x2a0   : > { %v1835_v49 = vsel %vm264_vm1, %v1796_v17, %v1834_v39  ;;  %v1811_v8 = vadd.f32 %v1785_v30, %v1783_v13  ;;  %v1807_v48 = vrot.slane %v1806_v45, 2  ;;  %v1786_v54 = vmul.f32 %v1726_v37, %v7580_v29 }
 0x2a1   : > { %v1837_v31 = vadd.f32 %v1835_v49, %v7573_v38 }
 0x2a2   : > { %v1812_v34 = vrot.slane %v1811_v8, 4  ;;  %v1808_v50 = vadd.f32 %v1807_v48, %v1806_v45 }
 0x2a3   : > { %1838 = vst.msk [vmem:[%s7570_s5] ss:$8 sm:$0x3] %vm7366_vm5, %v1837_v31  ;;  %v1773_v9 = vpop.f32.mrf.mxu3  ;;  %s2656_s5 = sadd.s32 19, %s7135_s23 }
 0x2a4   : > { %v1813_v35 = vadd.f32 %v1812_v34, %v1811_v8  ;;  %v1809_v38 = vrot.slane %v1808_v50, 1  ;;  %v1774_v62 = vadd.f32 %v1773_v9, %v1749_v28  ;;  %s2657_s7 = sshra.s32 %s2656_s5, 3  ;;  %s2660_s16 = sand.u32 7, %s2656_s5 }
 0x2a5   : > { %v1727_v44 = vpop.f32.mrf.mxu1  ;;  %s6901_s17 = sshll.u32 %s2657_s7, 4  ;;  %s3456_s5 = sadd.s32 36, %s7135_s23 }
 0x2a6   : > { %v1814_v46 = vrot.slane %v1813_v35, 2  ;;  %v1728_v52 = vadd.f32 %v1727_v44, %v1703_v33  ;;  %v1810_v63 = vadd.f32 %v1809_v38, %v1808_v50  ;;  %v1787_v21 = vmul.f32 %v1774_v62, %v7586_v60  ;;  %s2663_s20 = sadd.s32 %s6901_s17, %s2660_s16  ;;  %s3457_s7 = sshra.s32 %s3456_s5, 3 }
 0x2a7   : > { %v1751_v0 = vpop.f32.mrf.mxu2  ;;  %s3460_s17 = sand.u32 7, %s3456_s5  ;;  %s6905_s18 = sshll.u32 %s3457_s7, 4 }
 0x2a8   : > { %v1815_v22 = vadd.f32 %v1814_v46, %v1813_v35  ;;  %v1788_v55 = vmul.f32 %v1728_v52, %v7582_v56 }
 0x2aa   : > { %v1816_v58 = vrot.slane %v1815_v22, 1  ;;  %v1818_v51 = vadd.f32 %v1788_v55, %v1786_v54 }
 0x2ab   : > { %v1775_v57 = vpop.f32.mrf.mxu3 }
 0x2ac   : > { %v1817_v36 = vadd.f32 %v1816_v58, %v1815_v22  ;;  %v1819_v41 = vrot.slane %v1818_v51, 4  ;;  %v1776_v24 = vadd.f32 %v1775_v57, %v1751_v0 }
 0x2ae   : > { %v1842_v42 = vrot.slane %v1817_v36, 7  ;;  %v1820_v7 = vadd.f32 %v1819_v41, %v1818_v51  ;;  %v1789_v29 = vmul.f32 %v1776_v24, %v7588_v59 }
 0x2b0   : > { %v1843_v56 = vsel %vm264_vm1, %v1810_v63, %v1842_v42  ;;  %v1825_v61 = vadd.f32 %v1789_v29, %v1787_v21  ;;  %v1821_v2 = vrot.slane %v1820_v7, 2 }
 0x2b1   : > { %v1845_v3 = vadd.f32 %v1843_v56, %v7401_v43 }
 0x2b2   : > { %v1826_v25 = vrot.slane %v1825_v61, 4  ;;  %v1822_v32 = vadd.f32 %v1821_v2, %v1820_v7 }
 0x2b3   : > { %1846 = vst.msk [vmem:[%s7395_s27] ss:$8 sm:$0x3] %vm7366_vm5, %v1845_v3  ;;  %s7621_s27 = scalar_lea.vmem %s7094_s22, %s1873_s24  ;;  %s7834_s24 = scalar_lea.vmem %s7094_s22, %s2663_s20 }
 0x2b4   : > { %v1827_v14 = vadd.f32 %v1826_v25, %v1825_v61  ;;  %v1823_v60 = vrot.slane %v1822_v32, 1  ;;  %s3463_s20 = sadd.s32 %s6905_s18, %s3460_s17 }
 0x2b6   : > { %v1828_v27 = vrot.slane %v1827_v14, 2  ;;  %v1824_v1 = vadd.f32 %v1823_v60, %v1822_v32 }
 0x2b8   : > { %v1829_v18 = vadd.f32 %v1828_v27, %v1827_v14 }
 0x2ba   : > { %v1830_v20 = vrot.slane %v1829_v18, 1 }
 0x2bc   : > { %v1831_v59 = vadd.f32 %v1830_v20, %v1829_v18 }
 0x2be   : > { %v1850_v43 = vrot.slane %v1831_v59, 7 }
 0x2c0   : > { %v1851_v15 = vsel %vm264_vm1, %v1824_v1, %v1850_v43 }
 0x2c1   : > { %v1853_v17 = vadd.f32 %v1851_v15, %v7398_v40 }
 0x2c3   : > { %1854 = vst.msk [vmem:[%s7392_s26] ss:$8 sm:$0x3] %vm7366_vm5, %v1853_v17  ;;  %s1856_s26 = sadd.s32 2, %s7135_s23 }
 0x2c4   : > { %s1857_s28 = sshra.s32 %s1856_s26, 3  ;;  %s1860_s29 = sand.u32 7, %s1856_s26 }
 0x2c5   : > { %s6897_s30 = sshll.u32 %s1857_s28, 4  ;;  %s1886_s3 = scvt.s32.f32 %s1856_s26 }
 0x2c6   : > { %s1863_s2 = sadd.s32 %s6897_s30, %s1860_s29 }
 0x2c7   : > { %s7786_s4 = scalar_lea.vmem %s7094_s22, %s1863_s2 }
 0x2ca   : > { %v7624_v26 = vld [vmem:[%s7618_s25] ss:$8 sm:$0x3] }
 0x2cb   : > { %v7627_v39 = vld [vmem:[%s7621_s27] ss:$8 sm:$0x3]  ;;  %v1890_v13 = vadd.f32 %v7624_v26, %v7162_v12 }
 0x2cc   : > { %v1889_v40 = vadd.f32 %v7627_v39, %v7150_v4 }
 0x2cd   : > { %v1936_v49 = vperm.slane %v1890_v13, 0  ;;  %v1937_v8 = vperm.slane %v1890_v13, 1 }
 0x2ce   : > { %v1913_v45 = vperm.slane %v1889_v40, 0  ;;  %v1914_v30 = vperm.slane %v1889_v40, 1 }
 0x2cf   : > { %v1940_v28 = vsub.f32 %v7152_v5, %v1936_v49  ;;  %v1941_v34 = vsub.f32 %v7152_v5, %v1937_v8  ;;  %v1942_v9 = vsub.f32 %v7154_v6, %v1936_v49  ;;  %v1943_v33 = vsub.f32 %v7154_v6, %v1937_v8 }
 0x2d0   : > { %v1917_v31 = vsub.f32 %v7152_v5, %v1913_v45  ;;  %v1918_v48 = vsub.f32 %v7152_v5, %v1914_v30  ;;  %v1919_v22 = vsub.f32 %v7154_v6, %v1913_v45  ;;  %v1920_v0 = vsub.f32 %v7154_v6, %v1914_v30 }
 0x2d1   : > { %v1944_v50 = vand.u32 2147483647, %v1940_v28  ;;  %v1945_v44 = vand.u32 2147483647, %v1941_v34  ;;  %v1946_v46 = vand.u32 2147483647, %v1942_v9 }
 0x2d2   : > { %v1921_v35 = vand.u32 2147483647, %v1917_v31  ;;  %v1922_v37 = vand.u32 2147483647, %v1918_v48  ;;  %v1947_v52 = vand.u32 2147483647, %v1943_v33 }
 0x2d3   : > { %v1948_v38 = vsub.f32 1.0, %v1944_v50  ;;  %v1949_v58 = vsub.f32 1.0, %v1945_v44  ;;  %v1950_v62 = vsub.f32 1.0, %v1946_v46  ;;  %v1923_v51 = vand.u32 2147483647, %v1919_v22 }
 0x2d4   : > { %v1925_v54 = vsub.f32 1.0, %v1921_v35  ;;  %v1926_v55 = vsub.f32 1.0, %v1922_v37  ;;  %v1951_v41 = vsub.f32 1.0, %v1947_v52  ;;  %v1924_v24 = vand.u32 2147483647, %v1920_v0 }
 0x2d5   : > { %v1927_v63 = vsub.f32 1.0, %v1923_v51  ;;  %v1952_v21 = vmax.f32 %v1948_v38, 0.0  ;;  %v1953_v7 = vmax.f32 %v1949_v58, 0.0  ;;  %v1954_v61 = vmax.f32 %v1950_v62, 0.0 }
 0x2d6   : > { %v1929_v57 = vmax.f32 %v1925_v54, 0.0  ;;  %v1930_v36 = vmax.f32 %v1926_v55, 0.0  ;;  %v1928_v29 = vsub.f32 1.0, %v1924_v24  ;;  %v1955_v3 = vmax.f32 %v1951_v41, 0.0 }
 0x2d7   : > { %v1931_v56 = vmax.f32 %v1927_v63, 0.0  ;;  %v1956_v14 = vpack.c.bf16 %v1953_v7, %v1952_v21 }
 0x2d8   : > { %v7641_v42 = vpack.c.bf16 %v1930_v36, %v1929_v57  ;;  %v1932_v25 = vmax.f32 %v1928_v29, 0.0  ;;  %v1957_v20 = vpack.c.bf16 %v1955_v3, %v1954_v61 }
 0x2d9   : > { %v7659_v17 = vunpack.c.l.bf16 %v1956_v14  ;;  %v7665_v31 = vunpack.c.h.bf16 %v1956_v14 }
 0x2da   : > { %v7644_v2 = vrot.slane %v7641_v42, 3  ;;  %v7649_v27 = vpack.c.bf16 %v1932_v25, %v1931_v56  ;;  %v7667_v48 = vunpack.c.l.bf16 %v1957_v20  ;;  %v7669_v28 = vunpack.c.h.bf16 %v1957_v20 }
 0x2dc   : > { %v1972_v32 = vsel %vm357_vm2, %v7641_v42, %v7644_v2  ;;  %v1969_v60 = vsel %vm353_vm3, %v7641_v42, %v7644_v2  ;;  %v7655_v59 = vrot.slane %v7649_v27, 3 }
 0x2dd   : > { %v1974_v18 = vrot.slane %v1972_v32, 3  ;;  %v7657_v1 = vrot.slane %v1969_v60, 2 }
 0x2de   : > { %v1985_v40 = vsel %vm357_vm2, %v7649_v27, %v7655_v59 }
 0x2df   : > { %v1995_v43 = vunpack.i.h.s16 %v1974_v18  ;;  %v6808_v15 = vpack.i.b16 %v1974_v18, %v1974_v18  ;;  %v1993_v13 = vunpack.i.h.s16 %v7657_v1  ;;  %v1987_v30 = vrot.slane %v1985_v40, 3 }
 0x2e1   : > { %v2011_v45 = vpack.i.b16 %v1995_v43, %v1995_v43  ;;  %v2032_v49 = vperm.slane %v6808_v15, 0  ;;  %v2033_v8 = vperm.slane %v6808_v15, 1  ;;  %v7671_v34 = vpack.i.b16 %v1993_v13, %v1993_v13 }
 0x2e2   : > { %v2003_v35 = vunpack.i.h.s16 %v1987_v30  ;;  %v6812_v44 = vpack.i.b16 %v1987_v30, %v1987_v30 }
 0x2e3   : > { %v2034_v9 = vperm.slane %v2011_v45, 0  ;;  %v2035_v33 = vperm.slane %v2011_v45, 1  ;;  %v2101_v37 = vpack.i.b16 %v2032_v49, %v2032_v49  ;;  %v2105_v50 = vpack.i.b16 %v2033_v8, %v2033_v8 }
 0x2e4   : > { %v2030_v46 = vperm.slane %v7671_v34, 0  ;;  %v2031_v52 = vperm.slane %v7671_v34, 1  ;;  %v2019_v55 = vpack.i.b16 %v2003_v35, %v2003_v35  ;;  %v2048_v58 = vperm.slane %v6812_v44, 0 }
 0x2e5   : > { %v2109_v22 = vpack.i.b16 %v2034_v9, %v2034_v9  ;;  %v2113_v54 = vpack.i.b16 %v2035_v33, %v2035_v33  ;;  %v2103_v38 = vperm.slane %v2101_v37, 0  ;;  %v2107_v0 = vperm.slane %v2105_v50, 0 }
 0x2e6   : > { %v2049_v62 = vperm.slane %v6812_v44, 1  ;;  %v7675_v51 = vpack.i.b16 %v2030_v46, %v2030_v46  ;;  %v2050_v41 = vperm.slane %v2019_v55, 0  ;;  %v2051_v24 = vperm.slane %v2019_v55, 1 }
 0x2e7   : > { %v2111_v57 = vperm.slane %v2109_v22, 0  ;;  %v2115_v36 = vperm.slane %v2113_v54, 0  ;;  %v2192_v63 = vunpack.c.l.bf16 %v2103_v38  ;;  %v2193_v21 = vunpack.c.l.bf16 %v2107_v0 }
 0x2e8   : > { %v2165_v7 = vpack.i.b16 %v2048_v58, %v2048_v58  ;;  %v2169_v29 = vpack.i.b16 %v2049_v62, %v2049_v62  ;;  %v2173_v3 = vpack.i.b16 %v2050_v41, %v2050_v41  ;;  %v2177_v25 = vpack.i.b16 %v2051_v24, %v2051_v24 }
 0x2e9   : > { %v2194_v56 = vunpack.c.l.bf16 %v2111_v57  ;;  %v2195_v61 = vunpack.c.l.bf16 %v2115_v36  ;;  %v2240_v14 = vmul.f32 %v7659_v17, %v2192_v63  ;;  %v2241_v32 = vmul.f32 %v7665_v31, %v2193_v21 }
 0x2ea   : > { %v2242_v18 = vmul.f32 %v7667_v48, %v2192_v63  ;;  %v2243_v60 = vmul.f32 %v7669_v28, %v2193_v21  ;;  %v2175_v13 = vperm.slane %v2173_v3, 0  ;;  %v2179_v45 = vperm.slane %v2177_v25, 0 }
 0x2eb   : > { %v2244_v20 = vmul.f32 %v7659_v17, %v2194_v56  ;;  %v2245_v43 = vmul.f32 %v7665_v31, %v2195_v61  ;;  %v2246_v15 = vmul.f32 %v7667_v48, %v2194_v56  ;;  %v2247_v40 = vmul.f32 %v7669_v28, %v2195_v61 }
 0x2ec   : > { %v2292_v30 = vpack.c.bf16 %v2241_v32, %v2240_v14  ;;  %v2293_v49 = vpack.c.bf16 %v2243_v60, %v2242_v18  ;;  %v2167_v33 = vperm.slane %v2165_v7, 0  ;;  %v2171_v35 = vperm.slane %v2169_v29, 0 }
 0x2ed   : > { %v2294_v8 = vpack.c.bf16 %v2245_v43, %v2244_v20  ;;  %v2295_v9 = vpack.c.bf16 %v2247_v40, %v2246_v15  ;;  %v2210_v37 = vunpack.c.l.bf16 %v2175_v13  ;;  %v2211_v50 = vunpack.c.l.bf16 %v2179_v45 }
 0x2ee   : > { %v2368_v44 = vunpack.c.l.b16 %v2292_v30  ;;  %v2370_v46 = vunpack.c.l.b16 %v2293_v49  ;;  %v2208_v63 = vunpack.c.l.bf16 %v2167_v33  ;;  %v2209_v29 = vunpack.c.l.bf16 %v2171_v35 }
 0x2ef   : > { %v2372_v22 = vunpack.c.l.b16 %v2294_v8  ;;  %v2374_v54 = vunpack.c.l.b16 %v2295_v9  ;;  %v2373_v55 = vunpack.c.h.b16 %v2294_v8  ;;  %v2375_v38 = vunpack.c.h.b16 %v2295_v9 }
 0x2f0   : > { %v2276_v0 = vmul.f32 %v7659_v17, %v2210_v37  ;;  %v2277_v58 = vmul.f32 %v7665_v31, %v2211_v50  ;;  %v2278_v62 = vmul.f32 %v7667_v48, %v2210_v37  ;;  %v2279_v57 = vmul.f32 %v7669_v28, %v2211_v50 }
 0x2f1   : > { %v2422_v36 = vpack.c.b16 %v2374_v54, %v2372_v22  ;;  %v2423_v41 = vpack.c.b16 %v2375_v38, %v2373_v55  ;;  %v2420_v24 = vpack.c.b16 %v2370_v46, %v2368_v44  ;;  %v2369_v56 = vunpack.c.h.b16 %v2292_v30 }
 0x2f2   : > { %v2310_v21 = vpack.c.bf16 %v2277_v58, %v2276_v0  ;;  %v2311_v7 = vpack.c.bf16 %v2279_v57, %v2278_v62  ;;  %v2272_v61 = vmul.f32 %v7659_v17, %v2208_v63  ;;  %v2274_v3 = vmul.f32 %v7667_v48, %v2208_v63 }
 0x2f3   : > { %2472 = vmatpush.bf16.msra.mxu0 %v2422_v36  ;;  %2520 = vmatpush.bf16.msra.mxu2 %v2423_v41  ;;  %v2371_v25 = vunpack.c.h.b16 %v2293_v49  ;;  %v2095_v14 = vperm.slane %v7675_v51, 0  ;;  %v2273_v43 = vmul.f32 %v7665_v31, %v2209_v29  ;;  %v2275_v15 = vmul.f32 %v7669_v28, %v2209_v29 }
 0x2f4   : > { %v2404_v32 = vunpack.c.l.b16 %v2310_v21  ;;  %v2406_v18 = vunpack.c.l.b16 %v2311_v7  ;;  %v2405_v60 = vunpack.c.h.b16 %v2310_v21  ;;  %v2407_v20 = vunpack.c.h.b16 %v2311_v7 }
 0x2f5   : > { %v2421_v40 = vpack.c.b16 %v2371_v25, %v2369_v56  ;;  %v2097_v13 = vpack.i.b16 %v2031_v52, %v2031_v52  ;;  %v2190_v8 = vunpack.c.l.bf16 %v2095_v14  ;;  %v1982_v51 = vsel %vm353_vm3, %v7649_v27, %v7655_v59 }
 0x2f6   : > { %v2438_v45 = vpack.c.b16 %v2406_v18, %v2404_v32  ;;  %v2439_v30 = vpack.c.b16 %v2407_v20, %v2405_v60  ;;  %v2308_v49 = vpack.c.bf16 %v2273_v43, %v2272_v61  ;;  %v2309_v9 = vpack.c.bf16 %v2275_v15, %v2274_v3 }
 0x2f7   : > { %2473 = vmatpush.bf16.msra.mxu0 %v2420_v24  ;;  %2521 = vmatpush.bf16.msra.mxu2 %v2421_v40  ;;  %v2099_v33 = vperm.slane %v2097_v13, 0  ;;  %v1984_v35 = vrot.slane %v1982_v51, 2  ;;  %v2236_v37 = vmul.f32 %v7659_v17, %v2190_v8  ;;  %v2238_v34 = vmul.f32 %v7667_v48, %v2190_v8 }
 0x2f8   : > { %2496 = vmatpush.bf16.msra.mxu1 %v2438_v45  ;;  %2544 = vmatpush.bf16.msra.mxu3 %v2439_v30  ;;  %v6807_v52 = vpack.i.b16 %v7657_v1, %v7657_v1  ;;  %v2400_v50 = vunpack.c.l.b16 %v2308_v49  ;;  %v2402_v44 = vunpack.c.l.b16 %v2309_v9  ;;  %v2401_v46 = vunpack.c.h.b16 %v2308_v49 }
 0x2f9   : > { %v2403_v22 = vunpack.c.h.b16 %v2309_v9  ;;  %v2191_v54 = vunpack.c.l.bf16 %v2099_v33  ;;  %v2001_v55 = vunpack.i.h.s16 %v1984_v35  ;;  %v6811_v57 = vpack.i.b16 %v1984_v35, %v1984_v35 }
 0x2fa   : > { %v2028_v38 = vperm.slane %v6807_v52, 0  ;;  %v2029_v0 = vperm.slane %v6807_v52, 1  ;;  %v2436_v58 = vpack.c.b16 %v2402_v44, %v2400_v50  ;;  %v1966_v36 = vsel %vm349_vm4, %v7641_v42, %v7644_v2 }
 0x2fb   : > { %v2437_v62 = vpack.c.b16 %v2403_v22, %v2401_v46  ;;  %v2237_v41 = vmul.f32 %v7665_v31, %v2191_v54  ;;  %v2239_v24 = vmul.f32 %v7669_v28, %v2191_v54  ;;  %v2017_v1 = vpack.i.b16 %v2001_v55, %v2001_v55 }
 0x2fc   : > { %v2085_v63 = vpack.i.b16 %v2028_v38, %v2028_v38  ;;  %2497 = vmatpush.bf16.msra.mxu1 %v2436_v58  ;;  %v2089_v21 = vpack.i.b16 %v2029_v0, %v2029_v0  ;;  %v2044_v7 = vperm.slane %v6811_v57, 0  ;;  %v2045_v29 = vperm.slane %v6811_v57, 1 }
 0x2fd   : > { %2545 = vmatpush.bf16.msra.mxu3 %v2437_v62  ;;  %v7709_v56 = vrot.slane %v1966_v36, 1  ;;  %v2290_v61 = vpack.c.bf16 %v2237_v41, %v2236_v37  ;;  %v2291_v3 = vpack.c.bf16 %v2239_v24, %v2238_v34  ;;  %v2046_v25 = vperm.slane %v2017_v1, 0 }
 0x2fe   : > { %v2047_v14 = vperm.slane %v2017_v1, 1  ;;  %v2087_v32 = vperm.slane %v2085_v63, 0  ;;  %v2091_v18 = vperm.slane %v2089_v21, 0  ;;  %v2149_v60 = vpack.i.b16 %v2044_v7, %v2044_v7 }
 0x2ff   : > { %v2153_v20 = vpack.i.b16 %v2045_v29, %v2045_v29  ;;  %v2364_v43 = vunpack.c.l.b16 %v2290_v61  ;;  %v2366_v15 = vunpack.c.l.b16 %v2291_v3  ;;  %v2157_v40 = vpack.i.b16 %v2046_v25, %v2046_v25 }
 0x300   : > { %v2161_v13 = vpack.i.b16 %v2047_v14, %v2047_v14  ;;  %v2365_v45 = vunpack.c.h.b16 %v2290_v61  ;;  %v2367_v30 = vunpack.c.h.b16 %v2291_v3  ;;  %v2188_v8 = vunpack.c.l.bf16 %v2087_v32 }
 0x301   : > { %v2189_v51 = vunpack.c.l.bf16 %v2091_v18  ;;  %v2418_v49 = vpack.c.b16 %v2366_v15, %v2364_v43  ;;  %v2159_v9 = vperm.slane %v2157_v40, 0  ;;  %v2151_v35 = vperm.slane %v2149_v60, 0 }
 0x302   : > { %v2163_v33 = vperm.slane %v2161_v13, 0  ;;  %v2419_v37 = vpack.c.b16 %v2367_v30, %v2365_v45  ;;  %v2232_v34 = vmul.f32 %v7659_v17, %v2188_v8  ;;  %v2234_v50 = vmul.f32 %v7667_v48, %v2188_v8 }
 0x303   : > { %v2233_v52 = vmul.f32 %v7665_v31, %v2189_v51  ;;  %2474 = vmatpush.bf16.msra.mxu0 %v2418_v49  ;;  %v2206_v44 = vunpack.c.l.bf16 %v2159_v9  ;;  %v2235_v22 = vmul.f32 %v7669_v28, %v2189_v51  ;;  %v2155_v54 = vperm.slane %v2153_v20, 0 }
 0x304   : > { %v2207_v46 = vunpack.c.l.bf16 %v2163_v33  ;;  %2522 = vmatpush.bf16.msra.mxu2 %v2419_v37  ;;  %v2204_v38 = vunpack.c.l.bf16 %v2151_v35  ;;  %v1991_v0 = vunpack.i.h.s16 %v7709_v56  ;;  %v1979_v58 = vsel %vm349_vm4, %v7649_v27, %v7655_v59 }
 0x305   : > { %v2288_v55 = vpack.c.bf16 %v2233_v52, %v2232_v34  ;;  %v2268_v62 = vmul.f32 %v7659_v17, %v2206_v44  ;;  %v2270_v36 = vmul.f32 %v7667_v48, %v2206_v44  ;;  %v2289_v24 = vpack.c.bf16 %v2235_v22, %v2234_v50 }
 0x306   : > { %v2269_v57 = vmul.f32 %v7665_v31, %v2207_v46  ;;  %v2271_v41 = vmul.f32 %v7669_v28, %v2207_v46  ;;  %v2205_v63 = vunpack.c.l.bf16 %v2155_v54  ;;  %v2264_v21 = vmul.f32 %v7659_v17, %v2204_v38 }
 0x307   : > { %v2360_v1 = vunpack.c.l.b16 %v2288_v55  ;;  %v2266_v61 = vmul.f32 %v7667_v48, %v2204_v38  ;;  %v2361_v3 = vunpack.c.h.b16 %v2288_v55  ;;  %v2362_v25 = vunpack.c.l.b16 %v2289_v24 }
 0x308   : > { %v2306_v7 = vpack.c.bf16 %v2269_v57, %v2268_v62  ;;  %v2307_v29 = vpack.c.bf16 %v2271_v41, %v2270_v36  ;;  %v2265_v14 = vmul.f32 %v7665_v31, %v2205_v63  ;;  %v2267_v32 = vmul.f32 %v7669_v28, %v2205_v63 }
 0x309   : > { %v2363_v18 = vunpack.c.h.b16 %v2289_v24  ;;  %v2416_v40 = vpack.c.b16 %v2362_v25, %v2360_v1  ;;  %v2007_v49 = vpack.i.b16 %v1991_v0, %v1991_v0  ;;  %v1981_v9 = vrot.slane %v1979_v58, 1 }
 0x30a   : > { %v2396_v60 = vunpack.c.l.b16 %v2306_v7  ;;  %v2398_v20 = vunpack.c.l.b16 %v2307_v29  ;;  %v2397_v43 = vunpack.c.h.b16 %v2306_v7  ;;  %v2399_v15 = vunpack.c.h.b16 %v2307_v29 }
 0x30b   : > { %v2304_v13 = vpack.c.bf16 %v2265_v14, %v2264_v21  ;;  %v2305_v45 = vpack.c.bf16 %v2267_v32, %v2266_v61  ;;  %v2417_v30 = vpack.c.b16 %v2363_v18, %v2361_v3  ;;  %2475 = vmatpush.bf16.msra.mxu0 %v2416_v40  ;;  %v2026_v52 = vperm.slane %v2007_v49, 0 }
 0x30c   : > { %v2434_v8 = vpack.c.b16 %v2398_v20, %v2396_v60  ;;  %v2435_v51 = vpack.c.b16 %v2399_v15, %v2397_v43  ;;  %v2027_v50 = vperm.slane %v2007_v49, 1  ;;  %v1999_v44 = vunpack.i.h.s16 %v1981_v9 }
 0x30d   : > { %v2392_v33 = vunpack.c.l.b16 %v2304_v13  ;;  %v2394_v35 = vunpack.c.l.b16 %v2305_v45  ;;  %2523 = vmatpush.bf16.msra.mxu2 %v2417_v30  ;;  %v2393_v37 = vunpack.c.h.b16 %v2304_v13  ;;  %v2395_v34 = vunpack.c.h.b16 %v2305_v45 }
 0x30e   : > { %2498 = vmatpush.bf16.msra.mxu1 %v2434_v8  ;;  %2546 = vmatpush.bf16.msra.mxu3 %v2435_v51  ;;  %v6806_v46 = vpack.i.b16 %v7709_v56, %v7709_v56  ;;  %v6810_v55 = vpack.i.b16 %v1981_v9, %v1981_v9  ;;  %v7732_v38 = vsel %vm264_vm1, %v7641_v42, %v7644_v2 }
 0x30f   : > { %v2432_v22 = vpack.c.b16 %v2394_v35, %v2392_v33  ;;  %v2433_v54 = vpack.c.b16 %v2395_v34, %v2393_v37  ;;  %v2077_v0 = vpack.i.b16 %v2026_v52, %v2026_v52  ;;  %v2081_v58 = vpack.i.b16 %v2027_v50, %v2027_v50 }
 0x310   : > { %v2015_v62 = vpack.i.b16 %v1999_v44, %v1999_v44  ;;  %v2024_v57 = vperm.slane %v6806_v46, 0  ;;  %v2025_v36 = vperm.slane %v6806_v46, 1  ;;  %v2040_v41 = vperm.slane %v6810_v55, 0 }
 0x311   : > { %v2041_v24 = vperm.slane %v6810_v55, 1  ;;  %v2079_v1 = vperm.slane %v2077_v0, 0  ;;  %v2083_v63 = vperm.slane %v2081_v58, 0 }
 0x312   : > { %2499 = vmatpush.bf16.msra.mxu1 %v2432_v22  ;;  %2547 = vmatpush.bf16.msra.mxu3 %v2433_v54  ;;  %v2042_v56 = vperm.slane %v2015_v62, 0  ;;  %v2043_v21 = vperm.slane %v2015_v62, 1  ;;  %v2069_v7 = vpack.i.b16 %v2024_v57, %v2024_v57  ;;  %v2073_v29 = vpack.i.b16 %v2025_v36, %v2025_v36 }
 0x313   : > { %v2133_v61 = vpack.i.b16 %v2040_v41, %v2040_v41  ;;  %v2137_v3 = vpack.i.b16 %v2041_v24, %v2041_v24  ;;  %v2186_v25 = vunpack.c.l.bf16 %v2079_v1  ;;  %v2187_v42 = vunpack.c.l.bf16 %v2083_v63 }
 0x314   : > { %v2141_v2 = vpack.i.b16 %v2042_v56, %v2042_v56  ;;  %v2145_v14 = vpack.i.b16 %v2043_v21, %v2043_v21  ;;  %v2071_v32 = vperm.slane %v2069_v7, 0  ;;  %v2075_v18 = vperm.slane %v2073_v29, 0 }
 0x315   : > { %v2135_v60 = vperm.slane %v2133_v61, 0  ;;  %v2139_v20 = vperm.slane %v2137_v3, 0  ;;  %v2228_v43 = vmul.f32 %v7659_v17, %v2186_v25  ;;  %v2229_v15 = vmul.f32 %v7665_v31, %v2187_v42 }
 0x316   : > { %v2230_v40 = vmul.f32 %v7667_v48, %v2186_v25  ;;  %v2231_v13 = vmul.f32 %v7669_v28, %v2187_v42  ;;  %v2143_v45 = vperm.slane %v2141_v2, 0  ;;  %v2147_v30 = vperm.slane %v2145_v14, 0 }
 0x317   : > { %v2184_v8 = vunpack.c.l.bf16 %v2071_v32  ;;  %v2185_v51 = vunpack.c.l.bf16 %v2075_v18  ;;  %v2286_v49 = vpack.c.bf16 %v2229_v15, %v2228_v43  ;;  %v2200_v33 = vunpack.c.l.bf16 %v2135_v60 }
 0x318   : > { %v2287_v9 = vpack.c.bf16 %v2231_v13, %v2230_v40  ;;  %v2201_v35 = vunpack.c.l.bf16 %v2139_v20  ;;  %v2202_v37 = vunpack.c.l.bf16 %v2143_v45  ;;  %v2203_v34 = vunpack.c.l.bf16 %v2147_v30 }
 0x319   : > { %v2224_v52 = vmul.f32 %v7659_v17, %v2184_v8  ;;  %v2225_v50 = vmul.f32 %v7665_v31, %v2185_v51  ;;  %v2356_v44 = vunpack.c.l.b16 %v2286_v49  ;;  %v2357_v22 = vunpack.c.h.b16 %v2286_v49 }
 0x31a   : > { %v2358_v46 = vunpack.c.l.b16 %v2287_v9  ;;  %v2359_v54 = vunpack.c.h.b16 %v2287_v9  ;;  %v2260_v55 = vmul.f32 %v7659_v17, %v2202_v37  ;;  %v2261_v0 = vmul.f32 %v7665_v31, %v2203_v34 }
 0x31b   : > { %v2262_v58 = vmul.f32 %v7667_v48, %v2202_v37  ;;  %v2263_v62 = vmul.f32 %v7669_v28, %v2203_v34  ;;  %v2226_v41 = vmul.f32 %v7667_v48, %v2184_v8  ;;  %v2227_v24 = vmul.f32 %v7669_v28, %v2185_v51 }
 0x31c   : > { %v2414_v57 = vpack.c.b16 %v2358_v46, %v2356_v44  ;;  %v2415_v36 = vpack.c.b16 %v2359_v54, %v2357_v22  ;;  %v2302_v1 = vpack.c.bf16 %v2261_v0, %v2260_v55  ;;  %v2284_v56 = vpack.c.bf16 %v2225_v50, %v2224_v52 }
 0x31d   : > { %v2303_v63 = vpack.c.bf16 %v2263_v62, %v2262_v58  ;;  %v2256_v21 = vmul.f32 %v7659_v17, %v2200_v33  ;;  %v2285_v7 = vpack.c.bf16 %v2227_v24, %v2226_v41  ;;  %v2257_v29 = vmul.f32 %v7665_v31, %v2201_v35 }
 0x31e   : > { %2476 = vmatpush.bf16.msra.mxu0 %v2414_v57  ;;  %2524 = vmatpush.bf16.msra.mxu2 %v2415_v36  ;;  %v2258_v61 = vmul.f32 %v7667_v48, %v2200_v33  ;;  %v1989_v3 = vunpack.i.h.s16 %v7732_v38  ;;  %v2388_v25 = vunpack.c.l.b16 %v2302_v1  ;;  %v2389_v2 = vunpack.c.h.b16 %v2302_v1 }
 0x31f   : > { %v2390_v42 = vunpack.c.l.b16 %v2303_v63  ;;  %v2391_v14 = vunpack.c.h.b16 %v2303_v63  ;;  %v2352_v32 = vunpack.c.l.b16 %v2284_v56  ;;  %v2354_v18 = vunpack.c.l.b16 %v2285_v7 }
 0x320   : > { %v2259_v60 = vmul.f32 %v7669_v28, %v2201_v35  ;;  %v2300_v20 = vpack.c.bf16 %v2257_v29, %v2256_v21  ;;  %v2353_v40 = vunpack.c.h.b16 %v2284_v56  ;;  %v2355_v13 = vunpack.c.h.b16 %v2285_v7 }
 0x321   : > { %v2430_v43 = vpack.c.b16 %v2390_v42, %v2388_v25  ;;  %v2431_v15 = vpack.c.b16 %v2391_v14, %v2389_v2  ;;  %v2412_v45 = vpack.c.b16 %v2354_v18, %v2352_v32  ;;  %v2005_v9 = vpack.i.b16 %v1989_v3, %v1989_v3 }
 0x322   : > { %v2301_v30 = vpack.c.bf16 %v2259_v60, %v2258_v61  ;;  %v2384_v8 = vunpack.c.l.b16 %v2300_v20  ;;  %v2385_v51 = vunpack.c.h.b16 %v2300_v20  ;;  %v2413_v49 = vpack.c.b16 %v2355_v13, %v2353_v40 }
 0x323   : > { %2500 = vmatpush.bf16.msra.mxu1 %v2430_v43  ;;  %2548 = vmatpush.bf16.msra.mxu3 %v2431_v15  ;;  %v1977_v33 = vsel %vm264_vm1, %v7649_v27, %v7655_v59  ;;  %v6805_v52 = vpack.i.b16 %v7732_v38, %v7732_v38  ;;  %v2022_v50 = vperm.slane %v2005_v9, 0  ;;  %v2023_v44 = vperm.slane %v2005_v9, 1 }
 0x324   : > { %2477 = vmatpush.bf16.msra.mxu0 %v2412_v45  ;;  %v2386_v37 = vunpack.c.l.b16 %v2301_v30  ;;  %v2387_v35 = vunpack.c.h.b16 %v2301_v30  ;;  %v1997_v34 = vunpack.i.h.s16 %v1977_v33  ;;  %2525 = vmatpush.bf16.msra.mxu2 %v2413_v49  ;;  %v6809_v46 = vpack.i.b16 %v1977_v33, %v1977_v33 }
 0x325   : > { %v2020_v0 = vperm.slane %v6805_v52, 0  ;;  %v2061_v58 = vpack.i.b16 %v2022_v50, %v2022_v50  ;;  %v2065_v62 = vpack.i.b16 %v2023_v44, %v2023_v44  ;;  %v2021_v57 = vperm.slane %v6805_v52, 1 }
 0x326   : > { %v2428_v22 = vpack.c.b16 %v2386_v37, %v2384_v8  ;;  %v2429_v54 = vpack.c.b16 %v2387_v35, %v2385_v51  ;;  %v2013_v55 = vpack.i.b16 %v1997_v34, %v1997_v34  ;;  %v2036_v36 = vperm.slane %v6809_v46, 0 }
 0x327   : > { %v2053_v41 = vpack.i.b16 %v2020_v0, %v2020_v0  ;;  %v2037_v24 = vperm.slane %v6809_v46, 1  ;;  %v2063_v1 = vperm.slane %v2061_v58, 0  ;;  %v2067_v38 = vperm.slane %v2065_v62, 0 }
 0x328   : > { %2501 = vmatpush.bf16.msra.mxu1 %v2428_v22  ;;  %2549 = vmatpush.bf16.msra.mxu3 %v2429_v54  ;;  %v2038_v27 = vperm.slane %v2013_v55, 0  ;;  %v2039_v59 = vperm.slane %v2013_v55, 1  ;;  %v2057_v63 = vpack.i.b16 %v2021_v57, %v2021_v57  ;;  %v2117_v56 = vpack.i.b16 %v2036_v36, %v2036_v36 }
 0x329   : > { %v2055_v29 = vperm.slane %v2053_v41, 0  ;;  %v2121_v61 = vpack.i.b16 %v2037_v24, %v2037_v24  ;;  %v2182_v3 = vunpack.c.l.bf16 %v2063_v1  ;;  %v2183_v25 = vunpack.c.l.bf16 %v2067_v38 }
 0x32a   : > { %v2125_v21 = vpack.i.b16 %v2038_v27, %v2038_v27  ;;  %v2129_v7 = vpack.i.b16 %v2039_v59, %v2039_v59  ;;  %v2059_v42 = vperm.slane %v2057_v63, 0  ;;  %v2119_v2 = vperm.slane %v2117_v56, 0 }
 0x32b   : > { %v2180_v18 = vunpack.c.l.bf16 %v2055_v29  ;;  %v2123_v60 = vperm.slane %v2121_v61, 0  ;;  %v2220_v20 = vmul.f32 %v7659_v17, %v2182_v3  ;;  %v2221_v43 = vmul.f32 %v7665_v31, %v2183_v25 }
 0x32c   : > { %v2127_v14 = vperm.slane %v2125_v21, 0  ;;  %v2131_v32 = vperm.slane %v2129_v7, 0  ;;  %v2222_v15 = vmul.f32 %v7667_v48, %v2182_v3  ;;  %v2223_v40 = vmul.f32 %v7669_v28, %v2183_v25 }
 0x32d   : > { %v2181_v30 = vunpack.c.l.bf16 %v2059_v42  ;;  %v2216_v8 = vmul.f32 %v7659_v17, %v2180_v18  ;;  %v2282_v51 = vpack.c.bf16 %v2221_v43, %v2220_v20  ;;  %v2218_v9 = vmul.f32 %v7667_v48, %v2180_v18 }
 0x32e   : > { %v2198_v13 = vunpack.c.l.bf16 %v2127_v14  ;;  %v2199_v45 = vunpack.c.l.bf16 %v2131_v32  ;;  %v2283_v49 = vpack.c.bf16 %v2223_v40, %v2222_v15  ;;  %v2196_v33 = vunpack.c.l.bf16 %v2119_v2 }
 0x32f   : > { %v2348_v50 = vunpack.c.l.b16 %v2282_v51  ;;  %v2349_v46 = vunpack.c.h.b16 %v2282_v51  ;;  %v2217_v0 = vmul.f32 %v7665_v31, %v2181_v30  ;;  %v2219_v58 = vmul.f32 %v7669_v28, %v2181_v30 }
 0x330   : > { %v2252_v37 = vmul.f32 %v7659_v17, %v2198_v13  ;;  %v2253_v35 = vmul.f32 %v7665_v31, %v2199_v45  ;;  %v2254_v34 = vmul.f32 %v7667_v48, %v2198_v13  ;;  %v2255_v52 = vmul.f32 %v7669_v28, %v2199_v45 }
 0x331   : > { %v2350_v44 = vunpack.c.l.b16 %v2283_v49  ;;  %v2351_v22 = vunpack.c.h.b16 %v2283_v49  ;;  %v2197_v36 = vunpack.c.l.bf16 %v2123_v60  ;;  %v2248_v27 = vmul.f32 %v7659_v17, %v2196_v33 }
 0x332   : > { %v2298_v54 = vpack.c.bf16 %v2253_v35, %v2252_v37  ;;  %v2299_v55 = vpack.c.bf16 %v2255_v52, %v2254_v34  ;;  %v2280_v38 = vpack.c.bf16 %v2217_v0, %v2216_v8  ;;  %v2281_v63 = vpack.c.bf16 %v2219_v58, %v2218_v9 }
 0x333   : > { %v2410_v62 = vpack.c.b16 %v2350_v44, %v2348_v50  ;;  %v2411_v57 = vpack.c.b16 %v2351_v22, %v2349_v46  ;;  %v2249_v56 = vmul.f32 %v7665_v31, %v2197_v36  ;;  %v2250_v29 = vmul.f32 %v7667_v48, %v2196_v33 }
 0x334   : > { %v2380_v59 = vunpack.c.l.b16 %v2298_v54  ;;  %v2382_v41 = vunpack.c.l.b16 %v2299_v55  ;;  %v2381_v24 = vunpack.c.h.b16 %v2298_v54  ;;  %v2383_v1 = vunpack.c.h.b16 %v2299_v55 }
 0x335   : > { %2478 = vmatpush.bf16.msra.mxu0 %v2410_v62  ;;  %2526 = vmatpush.bf16.msra.mxu2 %v2411_v57  ;;  %v2251_v61 = vmul.f32 %v7669_v28, %v2197_v36  ;;  %v2344_v3 = vunpack.c.l.b16 %v2280_v38  ;;  %v2346_v25 = vunpack.c.l.b16 %v2281_v63  ;;  %v2296_v42 = vpack.c.bf16 %v2249_v56, %v2248_v27  ;;  %v7789_v28 = vld [vmem:[%s7786_s4] ss:$8 sm:$0x3] }
 0x336   : > { %v2426_v21 = vpack.c.b16 %v2382_v41, %v2380_v59  ;;  %v2427_v7 = vpack.c.b16 %v2383_v1, %v2381_v24  ;;  %v2345_v17 = vunpack.c.h.b16 %v2280_v38  ;;  %v2347_v14 = vunpack.c.h.b16 %v2281_v63 }
 0x337   : > { %v2297_v2 = vpack.c.bf16 %v2251_v61, %v2250_v29  ;;  %v2408_v32 = vpack.c.b16 %v2346_v25, %v2344_v3  ;;  %v2376_v18 = vunpack.c.l.b16 %v2296_v42  ;;  %v2377_v60 = vunpack.c.h.b16 %v2296_v42 }
 0x338   : > { %2502 = vmatpush.bf16.msra.mxu1 %v2426_v21  ;;  %2550 = vmatpush.bf16.msra.mxu3 %v2427_v7  ;;  %v2409_v43 = vpack.c.b16 %v2347_v14, %v2345_v17  ;;  %v1887_v40 = vstv %s1886_s3 }
 0x339   : > { %v2378_v20 = vunpack.c.l.b16 %v2297_v2  ;;  %v2379_v31 = vunpack.c.h.b16 %v2297_v2  ;;  %2479 = vmatpush.bf16.msra.mxu0 %v2408_v32  ;;  %v1888_v13 = vadd.f32 %v1887_v40, %v7789_v28 }
 0x33a   : > { %2527 = vmatpush.bf16.msra.mxu2 %v2409_v43 }
 0x33b   : > { %v2424_v15 = vpack.c.b16 %v2378_v20, %v2376_v18  ;;  %v2425_v48 = vpack.c.b16 %v2379_v31, %v2377_v60  ;;  %v1892_v45 = vperm.slane %v1888_v13, 0  ;;  %v1893_v49 = vperm.slane %v1888_v13, 1 }
 0x33c   : > { %2480 = vmatmul.bf16.vlgmr.msra.gmra.mxu0 %v7310_v47 }
 0x33d   : > { %2503 = vmatpush.bf16.msra.mxu1 %v2424_v15  ;;  %2551 = vmatpush.bf16.msra.mxu3 %v2425_v48  ;;  %v1896_v30 = vsub.f32 %v7152_v5, %v1892_v45  ;;  %v1898_v8 = vsub.f32 %v7154_v6, %v1892_v45  ;;  %v1897_v35 = vsub.f32 %v7152_v5, %v1893_v49 }
 0x33e   : > { %2528 = vmatmul.bf16.vlgmr.msra.gmra.mxu2 %v7310_v47  ;;  %v1899_v34 = vsub.f32 %v7154_v6, %v1893_v49 }
 0x33f   : > { %v1900_v33 = vand.u32 2147483647, %v1896_v30  ;;  %v1902_v37 = vand.u32 2147483647, %v1898_v8  ;;  %v1901_v55 = vand.u32 2147483647, %v1897_v35 }
 0x340   : > { %2504 = vmatmul.bf16.vlgmr.msra.gmra.mxu1 %v7316_v10  ;;  %2552 = vmatmul.bf16.vlgmr.msra.gmra.mxu3 %v7316_v10  ;;  %v1903_v0 = vand.u32 2147483647, %v1899_v34 }
 0x341   : > { %v1904_v50 = vsub.f32 1.0, %v1900_v33  ;;  %v1906_v44 = vsub.f32 1.0, %v1902_v37  ;;  %v1905_v59 = vsub.f32 1.0, %v1901_v55 }
 0x342   : > { %v1907_v24 = vsub.f32 1.0, %v1903_v0 }
 0x343   : > { %v7796_v62 = vmax.f32 %v1904_v50, 0.0  ;;  %v7798_v57 = vmax.f32 %v1906_v44, 0.0  ;;  %v7802_v7 = vmax.f32 %v1905_v59, 0.0 }
 0x344   : > { %v7804_v61 = vmax.f32 %v1907_v24, 0.0 }
 0x34c   : > { %2485 = vmatmul.bf16.gmra.mxu0 %v7320_v11 }
 0x34e   : > { %2533 = vmatmul.bf16.gmra.mxu2 %v7320_v11 }
 0x350   : > { %2509 = vmatmul.bf16.gmra.mxu1 %v7324_v16  ;;  %2557 = vmatmul.bf16.gmra.mxu3 %v7324_v16 }
 0x35c   : > { %2490 = vmatmul.bf16.gmra.mxu0 %v7328_v19 }
 0x35e   : > { %2538 = vmatmul.bf16.gmra.mxu2 %v7328_v19 }
 0x360   : > { %2514 = vmatmul.bf16.gmra.mxu1 %v7332_v23  ;;  %2562 = vmatmul.bf16.gmra.mxu3 %v7332_v23 }
 0x3b9   : > { %v2481_v51 = vpop.f32.mrf.mxu0 }
 0x3bd   : > { %v2505_v9 = vpop.f32.mrf.mxu1 }
 0x3be   : > { %v2506_v54 = vadd.f32 %v2505_v9, %v2481_v51 }
 0x3c0   : > { %v2568_v27 = vmul.f32 %v2506_v54, %v7796_v62 }
 0x3c1   : > { %v2529_v52 = vpop.f32.mrf.mxu2  ;;  %v2483_v22 = vpop.f32.mrf.mxu0 }
 0x3c3   : > { %v2553_v46 = vpop.f32.mrf.mxu3 }
 0x3c4   : > { %v2554_v38 = vadd.f32 %v2553_v46, %v2529_v52 }
 0x3c5   : > { %v2507_v58 = vpop.f32.mrf.mxu1 }
 0x3c6   : > { %v2508_v36 = vadd.f32 %v2507_v58, %v2483_v22  ;;  %v2569_v42 = vmul.f32 %v2554_v38, %v7802_v7 }
 0x3c8   : > { %v2570_v41 = vmul.f32 %v2508_v36, %v7798_v57 }
 0x3c9   : > { %v2531_v1 = vpop.f32.mrf.mxu2  ;;  %v2486_v21 = vpop.f32.mrf.mxu0 }
 0x3ca   : > { %v2580_v63 = vadd.f32 %v2570_v41, %v2568_v27 }
 0x3cb   : > { %v2555_v56 = vpop.f32.mrf.mxu3 }
 0x3cc   : > { %v2581_v29 = vrot.slane %v2580_v63, 4  ;;  %v2556_v3 = vadd.f32 %v2555_v56, %v2531_v1 }
 0x3cd   : > { %v2510_v25 = vpop.f32.mrf.mxu1 }
 0x3ce   : > { %v2582_v17 = vadd.f32 %v2581_v29, %v2580_v63  ;;  %v2571_v2 = vmul.f32 %v2556_v3, %v7804_v61  ;;  %v2511_v15 = vadd.f32 %v2510_v25, %v2486_v21 }
 0x3d0   : > { %v2587_v14 = vadd.f32 %v2571_v2, %v2569_v42  ;;  %v2583_v32 = vrot.slane %v2582_v17, 2  ;;  %v2572_v8 = vmul.f32 %v2511_v15, %v7796_v62 }
 0x3d1   : > { %v2534_v18 = vpop.f32.mrf.mxu2  ;;  %v2488_v43 = vpop.f32.mrf.mxu0 }
 0x3d2   : > { %v2588_v60 = vrot.slane %v2587_v14, 4  ;;  %v2584_v48 = vadd.f32 %v2583_v32, %v2582_v17 }
 0x3d3   : > { %v2558_v20 = vpop.f32.mrf.mxu3 }
 0x3d4   : > { %v2589_v31 = vadd.f32 %v2588_v60, %v2587_v14  ;;  %v2585_v49 = vrot.slane %v2584_v48, 1  ;;  %v2559_v37 = vadd.f32 %v2558_v20, %v2534_v18 }
 0x3d5   : > { %v2512_v40 = vpop.f32.mrf.mxu1 }
 0x3d6   : > { %v2590_v13 = vrot.slane %v2589_v31, 2  ;;  %v2513_v45 = vadd.f32 %v2512_v40, %v2488_v43  ;;  %v2586_v22 = vadd.f32 %v2585_v49, %v2584_v48  ;;  %v2573_v0 = vmul.f32 %v2559_v37, %v7802_v7 }
 0x3d8   : > { %v2591_v30 = vadd.f32 %v2590_v13, %v2589_v31  ;;  %v2574_v51 = vmul.f32 %v2513_v45, %v7798_v57 }
 0x3d9   : > { %v2536_v9 = vpop.f32.mrf.mxu2  ;;  %v2491_v52 = vpop.f32.mrf.mxu0 }
 0x3da   : > { %v2592_v33 = vrot.slane %v2591_v30, 1  ;;  %v2594_v35 = vadd.f32 %v2574_v51, %v2572_v8 }
 0x3db   : > { %v2560_v34 = vpop.f32.mrf.mxu3 }
 0x3dc   : > { %v2593_v50 = vadd.f32 %v2592_v33, %v2591_v30  ;;  %v2595_v44 = vrot.slane %v2594_v35, 4  ;;  %v2561_v46 = vadd.f32 %v2560_v34, %v2536_v9 }
 0x3dd   : > { %v2515_v54 = vpop.f32.mrf.mxu1 }
 0x3de   : > { %v2624_v55 = vrot.slane %v2593_v50, 7  ;;  %v2596_v58 = vadd.f32 %v2595_v44, %v2594_v35  ;;  %v2575_v36 = vmul.f32 %v2561_v46, %v7804_v61  ;;  %v2516_v29 = vadd.f32 %v2515_v54, %v2491_v52 }
 0x3e0   : > { %v2625_v27 = vsel %vm264_vm1, %v2586_v22, %v2624_v55  ;;  %v2601_v59 = vadd.f32 %v2575_v36, %v2573_v0  ;;  %v2597_v24 = vrot.slane %v2596_v58, 2  ;;  %v2576_v14 = vmul.f32 %v2516_v29, %v7796_v62 }
 0x3e1   : > { %v2627_v41 = vadd.f32 %v2625_v27, %v7789_v28  ;;  %v2539_v1 = vpop.f32.mrf.mxu2  ;;  %v2493_v56 = vpop.f32.mrf.mxu0 }
 0x3e2   : > { %v2602_v38 = vrot.slane %v2601_v59, 4  ;;  %v2598_v3 = vadd.f32 %v2597_v24, %v2596_v58 }
 0x3e3   : > { %2628 = vst.msk [vmem:[%s7786_s4] ss:$8 sm:$0x3] %vm7366_vm5, %v2627_v41  ;;  %v2563_v63 = vpop.f32.mrf.mxu3  ;;  %s3446_s4 = sadd.s32 20, %s7135_s23 }
 0x3e4   : > { %v2603_v21 = vadd.f32 %v2602_v38, %v2601_v59  ;;  %v2599_v28 = vrot.slane %v2598_v3, 1  ;;  %v2564_v20 = vadd.f32 %v2563_v63, %v2539_v1  ;;  %s3447_s6 = sshra.s32 %s3446_s4, 3  ;;  %s3450_s8 = sand.u32 7, %s3446_s4 }
 0x3e5   : > { %v2517_v25 = vpop.f32.mrf.mxu1  ;;  %s6904_s16 = sshll.u32 %s3447_s6, 4  ;;  %s4246_s4 = sadd.s32 37, %s7135_s23 }
 0x3e6   : > { %v2604_v42 = vrot.slane %v2603_v21, 2  ;;  %v2518_v17 = vadd.f32 %v2517_v25, %v2493_v56  ;;  %v2600_v13 = vadd.f32 %v2599_v28, %v2598_v3  ;;  %v2577_v30 = vmul.f32 %v2564_v20, %v7802_v7  ;;  %s3453_s19 = sadd.s32 %s6904_s16, %s3450_s8  ;;  %s4247_s6 = sshra.s32 %s4246_s4, 3 }
 0x3e7   : > { %s4250_s16 = sand.u32 7, %s4246_s4  ;;  %s6908_s17 = sshll.u32 %s4247_s6, 4 }
 0x3e8   : > { %v2605_v2 = vadd.f32 %v2604_v42, %v2603_v21  ;;  %v2578_v32 = vmul.f32 %v2518_v17, %v7798_v57 }
 0x3e9   : > { %v2541_v18 = vpop.f32.mrf.mxu2 }
 0x3ea   : > { %v2606_v60 = vrot.slane %v2605_v2, 1  ;;  %v2608_v43 = vadd.f32 %v2578_v32, %v2576_v14 }
 0x3eb   : > { %v2565_v31 = vpop.f32.mrf.mxu3 }
 0x3ec   : > { %v2607_v15 = vadd.f32 %v2606_v60, %v2605_v2  ;;  %v2609_v48 = vrot.slane %v2608_v43, 4  ;;  %v2566_v40 = vadd.f32 %v2565_v31, %v2541_v18 }
 0x3ee   : > { %v2632_v45 = vrot.slane %v2607_v15, 7  ;;  %v2610_v8 = vadd.f32 %v2609_v48, %v2608_v43  ;;  %v2579_v62 = vmul.f32 %v2566_v40, %v7804_v61 }
 0x3f0   : > { %v2633_v57 = vsel %vm264_vm1, %v2600_v13, %v2632_v45  ;;  %v2615_v51 = vadd.f32 %v2579_v62, %v2577_v30  ;;  %v2611_v9 = vrot.slane %v2610_v8, 2 }
 0x3f1   : > { %v2635_v49 = vadd.f32 %v2633_v57, %v7627_v39 }
 0x3f2   : > { %v2616_v33 = vrot.slane %v2615_v51, 4  ;;  %v2612_v35 = vadd.f32 %v2611_v9, %v2610_v8 }
 0x3f3   : > { %2636 = vst.msk [vmem:[%s7621_s27] ss:$8 sm:$0x3] %vm7366_vm5, %v2635_v49  ;;  %s7837_s27 = scalar_lea.vmem %s7094_s22, %s2673_s21  ;;  %s8050_s21 = scalar_lea.vmem %s7094_s22, %s3453_s19 }
 0x3f4   : > { %v2617_v37 = vadd.f32 %v2616_v33, %v2615_v51  ;;  %v2613_v7 = vrot.slane %v2612_v35, 1  ;;  %s4253_s19 = sadd.s32 %s6908_s17, %s4250_s16 }
 0x3f6   : > { %v2618_v34 = vrot.slane %v2617_v37, 2  ;;  %v2614_v44 = vadd.f32 %v2613_v7, %v2612_v35 }
 0x3f8   : > { %v2619_v52 = vadd.f32 %v2618_v34, %v2617_v37 }
 0x3fa   : > { %v2620_v50 = vrot.slane %v2619_v52, 1 }
 0x3fc   : > { %v2621_v61 = vadd.f32 %v2620_v50, %v2619_v52 }
 0x3fe   : > { %v2640_v39 = vrot.slane %v2621_v61, 7 }
 0x400   : > { %v2641_v46 = vsel %vm264_vm1, %v2614_v44, %v2640_v39 }
 0x401   : > { %v2643_v22 = vadd.f32 %v2641_v46, %v7624_v26 }
 0x403   : > { %2644 = vst.msk [vmem:[%s7618_s25] ss:$8 sm:$0x3] %vm7366_vm5, %v2643_v22  ;;  %s2646_s25 = sadd.s32 3, %s7135_s23 }
 0x404   : > { %s2647_s26 = sshra.s32 %s2646_s25, 3  ;;  %s2650_s28 = sand.u32 7, %s2646_s25 }
 0x405   : > { %s6900_s29 = sshll.u32 %s2647_s26, 4  ;;  %s2676_s2 = scvt.s32.f32 %s2646_s25 }
 0x406   : > { %s2653_s30 = sadd.s32 %s6900_s29, %s2650_s28 }
 0x407   : > { %s8002_s3 = scalar_lea.vmem %s7094_s22, %s2653_s30 }
 0x40a   : > { %v7840_v54 = vld [vmem:[%s7834_s24] ss:$8 sm:$0x3] }
 0x40b   : > { %v7843_v55 = vld [vmem:[%s7837_s27] ss:$8 sm:$0x3]  ;;  %v2679_v26 = vadd.f32 %v7840_v54, %v7150_v4 }
 0x40c   : > { %v2680_v0 = vadd.f32 %v7843_v55, %v7162_v12 }
 0x40d   : > { %v2703_v58 = vperm.slane %v2679_v26, 0  ;;  %v2704_v36 = vperm.slane %v2679_v26, 1 }
 0x40e   : > { %v2726_v27 = vperm.slane %v2680_v0, 0  ;;  %v2727_v59 = vperm.slane %v2680_v0, 1 }
 0x40f   : > { %v2707_v41 = vsub.f32 %v7152_v5, %v2703_v58  ;;  %v2708_v24 = vsub.f32 %v7152_v5, %v2704_v36  ;;  %v2709_v2 = vsub.f32 %v7154_v6, %v2703_v58  ;;  %v2710_v18 = vsub.f32 %v7154_v6, %v2704_v36 }
 0x410   : > { %v2730_v1 = vsub.f32 %v7152_v5, %v2726_v27  ;;  %v2731_v38 = vsub.f32 %v7152_v5, %v2727_v59  ;;  %v2732_v63 = vsub.f32 %v7154_v6, %v2726_v27  ;;  %v2733_v56 = vsub.f32 %v7154_v6, %v2727_v59 }
 0x411   : > { %v2711_v21 = vand.u32 2147483647, %v2707_v41  ;;  %v2712_v29 = vand.u32 2147483647, %v2708_v24  ;;  %v2713_v43 = vand.u32 2147483647, %v2709_v2 }
 0x412   : > { %v2734_v3 = vand.u32 2147483647, %v2730_v1  ;;  %v2735_v25 = vand.u32 2147483647, %v2731_v38  ;;  %v2736_v42 = vand.u32 2147483647, %v2732_v63 }
 0x413   : > { %v2737_v17 = vand.u32 2147483647, %v2733_v56  ;;  %v2715_v14 = vsub.f32 1.0, %v2711_v21  ;;  %v2716_v32 = vsub.f32 1.0, %v2712_v29  ;;  %v2714_v40 = vand.u32 2147483647, %v2710_v18 }
 0x414   : > { %v2738_v28 = vsub.f32 1.0, %v2734_v3  ;;  %v2739_v60 = vsub.f32 1.0, %v2735_v25  ;;  %v2740_v20 = vsub.f32 1.0, %v2736_v42  ;;  %v2717_v13 = vsub.f32 1.0, %v2713_v43 }
 0x415   : > { %v2719_v31 = vmax.f32 %v2715_v14, 0.0  ;;  %v2720_v15 = vmax.f32 %v2716_v32, 0.0  ;;  %v2741_v48 = vsub.f32 1.0, %v2737_v17  ;;  %v2718_v62 = vsub.f32 1.0, %v2714_v40 }
 0x416   : > { %v2742_v30 = vmax.f32 %v2738_v28, 0.0  ;;  %v2743_v8 = vmax.f32 %v2739_v60, 0.0  ;;  %v2721_v57 = vmax.f32 %v2717_v13, 0.0  ;;  %v2744_v51 = vmax.f32 %v2740_v20, 0.0 }
 0x417   : > { %v7857_v45 = vpack.c.bf16 %v2720_v15, %v2719_v31  ;;  %v2745_v49 = vmax.f32 %v2741_v48, 0.0  ;;  %v2722_v33 = vmax.f32 %v2718_v62, 0.0 }
 0x418   : > { %v2746_v37 = vpack.c.bf16 %v2743_v8, %v2742_v30 }
 0x419   : > { %v7860_v9 = vrot.slane %v7857_v45, 3  ;;  %v7865_v34 = vpack.c.bf16 %v2722_v33, %v2721_v57  ;;  %v2747_v50 = vpack.c.bf16 %v2745_v49, %v2744_v51 }
 0x41a   : > { %v7875_v22 = vunpack.c.l.bf16 %v2746_v37  ;;  %v7881_v41 = vunpack.c.h.bf16 %v2746_v37 }
 0x41b   : > { %v2762_v35 = vsel %vm357_vm2, %v7857_v45, %v7860_v9  ;;  %v2759_v7 = vsel %vm353_vm3, %v7857_v45, %v7860_v9  ;;  %v7871_v61 = vrot.slane %v7865_v34, 3  ;;  %v7883_v24 = vunpack.c.l.bf16 %v2747_v50 }
 0x41c   : > { %v2764_v52 = vrot.slane %v2762_v35, 3  ;;  %v7873_v44 = vrot.slane %v2759_v7, 2  ;;  %v7885_v1 = vunpack.c.h.bf16 %v2747_v50 }
 0x41d   : > { %v2775_v26 = vsel %vm357_vm2, %v7865_v34, %v7871_v61 }
 0x41e   : > { %v2785_v39 = vunpack.i.h.s16 %v2764_v52  ;;  %v6822_v46 = vpack.i.b16 %v2764_v52, %v2764_v52  ;;  %v2783_v0 = vunpack.i.h.s16 %v7873_v44  ;;  %v2777_v36 = vrot.slane %v2775_v26, 3 }
 0x420   : > { %v2801_v58 = vpack.i.b16 %v2785_v39, %v2785_v39  ;;  %v2822_v27 = vperm.slane %v6822_v46, 0  ;;  %v2823_v59 = vperm.slane %v6822_v46, 1  ;;  %v7887_v38 = vpack.i.b16 %v2783_v0, %v2783_v0 }
 0x421   : > { %v2793_v21 = vunpack.i.h.s16 %v2777_v36  ;;  %v6826_v25 = vpack.i.b16 %v2777_v36, %v2777_v36 }
 0x422   : > { %v2824_v63 = vperm.slane %v2801_v58, 0  ;;  %v2825_v56 = vperm.slane %v2801_v58, 1  ;;  %v2891_v29 = vpack.i.b16 %v2822_v27, %v2822_v27  ;;  %v2895_v3 = vpack.i.b16 %v2823_v59, %v2823_v59 }
 0x423   : > { %v2820_v42 = vperm.slane %v7887_v38, 0  ;;  %v2821_v17 = vperm.slane %v7887_v38, 1  ;;  %v2809_v32 = vpack.i.b16 %v2793_v21, %v2793_v21  ;;  %v2838_v60 = vperm.slane %v6826_v25, 0 }
 0x424   : > { %v2899_v2 = vpack.i.b16 %v2824_v63, %v2824_v63  ;;  %v2903_v14 = vpack.i.b16 %v2825_v56, %v2825_v56  ;;  %v2893_v28 = vperm.slane %v2891_v29, 0  ;;  %v2897_v18 = vperm.slane %v2895_v3, 0 }
 0x425   : > { %v2839_v20 = vperm.slane %v6826_v25, 1  ;;  %v7891_v43 = vpack.i.b16 %v2820_v42, %v2820_v42  ;;  %v2840_v48 = vperm.slane %v2809_v32, 0  ;;  %v2841_v40 = vperm.slane %v2809_v32, 1 }
 0x426   : > { %v2901_v31 = vperm.slane %v2899_v2, 0  ;;  %v2905_v15 = vperm.slane %v2903_v14, 0  ;;  %v2982_v13 = vunpack.c.l.bf16 %v2893_v28  ;;  %v2983_v30 = vunpack.c.l.bf16 %v2897_v18 }
 0x427   : > { %v2955_v8 = vpack.i.b16 %v2838_v60, %v2838_v60  ;;  %v2959_v62 = vpack.i.b16 %v2839_v20, %v2839_v20  ;;  %v2963_v49 = vpack.i.b16 %v2840_v48, %v2840_v48  ;;  %v2967_v33 = vpack.i.b16 %v2841_v40, %v2841_v40 }
 0x428   : > { %v2984_v57 = vunpack.c.l.bf16 %v2901_v31  ;;  %v2985_v51 = vunpack.c.l.bf16 %v2905_v15  ;;  %v3030_v37 = vmul.f32 %v7875_v22, %v2982_v13  ;;  %v3031_v35 = vmul.f32 %v7881_v41, %v2983_v30 }
 0x429   : > { %v3032_v52 = vmul.f32 %v7883_v24, %v2982_v13  ;;  %v3033_v7 = vmul.f32 %v7885_v1, %v2983_v30  ;;  %v2965_v0 = vperm.slane %v2963_v49, 0  ;;  %v2969_v58 = vperm.slane %v2967_v33, 0 }
 0x42a   : > { %v3034_v50 = vmul.f32 %v7875_v22, %v2984_v57  ;;  %v3035_v39 = vmul.f32 %v7881_v41, %v2985_v51  ;;  %v3036_v46 = vmul.f32 %v7883_v24, %v2984_v57  ;;  %v3037_v26 = vmul.f32 %v7885_v1, %v2985_v51 }
 0x42b   : > { %v3082_v36 = vpack.c.bf16 %v3031_v35, %v3030_v37  ;;  %v3083_v27 = vpack.c.bf16 %v3033_v7, %v3032_v52  ;;  %v2957_v56 = vperm.slane %v2955_v8, 0  ;;  %v2961_v21 = vperm.slane %v2959_v62, 0 }
 0x42c   : > { %v3084_v59 = vpack.c.bf16 %v3035_v39, %v3034_v50  ;;  %v3085_v63 = vpack.c.bf16 %v3037_v26, %v3036_v46  ;;  %v3000_v29 = vunpack.c.l.bf16 %v2965_v0  ;;  %v3001_v3 = vunpack.c.l.bf16 %v2969_v58 }
 0x42d   : > { %v3158_v25 = vunpack.c.l.b16 %v3082_v36  ;;  %v3160_v42 = vunpack.c.l.b16 %v3083_v27  ;;  %v2998_v13 = vunpack.c.l.bf16 %v2957_v56  ;;  %v2999_v62 = vunpack.c.l.bf16 %v2961_v21 }
 0x42e   : > { %v3162_v2 = vunpack.c.l.b16 %v3084_v59  ;;  %v3164_v14 = vunpack.c.l.b16 %v3085_v63  ;;  %v3163_v32 = vunpack.c.h.b16 %v3084_v59  ;;  %v3165_v28 = vunpack.c.h.b16 %v3085_v63 }
 0x42f   : > { %v3066_v18 = vmul.f32 %v7875_v22, %v3000_v29  ;;  %v3067_v60 = vmul.f32 %v7881_v41, %v3001_v3  ;;  %v3068_v20 = vmul.f32 %v7883_v24, %v3000_v29  ;;  %v3069_v31 = vmul.f32 %v7885_v1, %v3001_v3 }
 0x430   : > { %v3212_v15 = vpack.c.b16 %v3164_v14, %v3162_v2  ;;  %v3213_v48 = vpack.c.b16 %v3165_v28, %v3163_v32  ;;  %v3210_v40 = vpack.c.b16 %v3160_v42, %v3158_v25  ;;  %v3159_v57 = vunpack.c.h.b16 %v3082_v36 }
 0x431   : > { %v3100_v30 = vpack.c.bf16 %v3067_v60, %v3066_v18  ;;  %v3101_v8 = vpack.c.bf16 %v3069_v31, %v3068_v20  ;;  %v3062_v51 = vmul.f32 %v7875_v22, %v2998_v13  ;;  %v3064_v49 = vmul.f32 %v7883_v24, %v2998_v13 }
 0x432   : > { %3262 = vmatpush.bf16.msrb.mxu0 %v3212_v15  ;;  %3310 = vmatpush.bf16.msrb.mxu2 %v3213_v48  ;;  %v3161_v33 = vunpack.c.h.b16 %v3083_v27  ;;  %v2885_v37 = vperm.slane %v7891_v43, 0  ;;  %v3063_v39 = vmul.f32 %v7881_v41, %v2999_v62  ;;  %v3065_v46 = vmul.f32 %v7885_v1, %v2999_v62 }
 0x433   : > { %v3194_v35 = vunpack.c.l.b16 %v3100_v30  ;;  %v3196_v52 = vunpack.c.l.b16 %v3101_v8  ;;  %v3195_v7 = vunpack.c.h.b16 %v3100_v30  ;;  %v3197_v50 = vunpack.c.h.b16 %v3101_v8 }
 0x434   : > { %v3211_v26 = vpack.c.b16 %v3161_v33, %v3159_v57  ;;  %v2887_v0 = vpack.i.b16 %v2821_v17, %v2821_v17  ;;  %v2980_v59 = vunpack.c.l.bf16 %v2885_v37  ;;  %v2772_v43 = vsel %vm353_vm3, %v7865_v34, %v7871_v61 }
 0x435   : > { %v3228_v58 = vpack.c.b16 %v3196_v52, %v3194_v35  ;;  %v3229_v36 = vpack.c.b16 %v3197_v50, %v3195_v7  ;;  %v3098_v27 = vpack.c.bf16 %v3063_v39, %v3062_v51  ;;  %v3099_v63 = vpack.c.bf16 %v3065_v46, %v3064_v49 }
 0x436   : > { %3263 = vmatpush.bf16.msrb.mxu0 %v3210_v40  ;;  %3311 = vmatpush.bf16.msrb.mxu2 %v3211_v26  ;;  %v2889_v56 = vperm.slane %v2887_v0, 0  ;;  %v2774_v21 = vrot.slane %v2772_v43, 2  ;;  %v3026_v29 = vmul.f32 %v7875_v22, %v2980_v59  ;;  %v3028_v38 = vmul.f32 %v7883_v24, %v2980_v59 }
 0x437   : > { %3286 = vmatpush.bf16.msrb.mxu1 %v3228_v58  ;;  %3334 = vmatpush.bf16.msrb.mxu3 %v3229_v36  ;;  %v6821_v17 = vpack.i.b16 %v7873_v44, %v7873_v44  ;;  %v3190_v3 = vunpack.c.l.b16 %v3098_v27  ;;  %v3192_v25 = vunpack.c.l.b16 %v3099_v63  ;;  %v3191_v42 = vunpack.c.h.b16 %v3098_v27 }
 0x438   : > { %v3193_v2 = vunpack.c.h.b16 %v3099_v63  ;;  %v2981_v14 = vunpack.c.l.bf16 %v2889_v56  ;;  %v2791_v32 = vunpack.i.h.s16 %v2774_v21  ;;  %v6825_v31 = vpack.i.b16 %v2774_v21, %v2774_v21 }
 0x439   : > { %v2818_v28 = vperm.slane %v6821_v17, 0  ;;  %v2819_v18 = vperm.slane %v6821_v17, 1  ;;  %v3226_v60 = vpack.c.b16 %v3192_v25, %v3190_v3  ;;  %v2756_v15 = vsel %vm349_vm4, %v7857_v45, %v7860_v9 }
 0x43a   : > { %v3227_v20 = vpack.c.b16 %v3193_v2, %v3191_v42  ;;  %v3027_v48 = vmul.f32 %v7881_v41, %v2981_v14  ;;  %v3029_v40 = vmul.f32 %v7885_v1, %v2981_v14  ;;  %v2807_v44 = vpack.i.b16 %v2791_v32, %v2791_v32 }
 0x43b   : > { %v2875_v13 = vpack.i.b16 %v2818_v28, %v2818_v28  ;;  %3287 = vmatpush.bf16.msrb.mxu1 %v3226_v60  ;;  %v2879_v30 = vpack.i.b16 %v2819_v18, %v2819_v18  ;;  %v2834_v8 = vperm.slane %v6825_v31, 0  ;;  %v2835_v62 = vperm.slane %v6825_v31, 1 }
 0x43c   : > { %3335 = vmatpush.bf16.msrb.mxu3 %v3227_v20  ;;  %v7925_v57 = vrot.slane %v2756_v15, 1  ;;  %v3080_v51 = vpack.c.bf16 %v3027_v48, %v3026_v29  ;;  %v3081_v49 = vpack.c.bf16 %v3029_v40, %v3028_v38  ;;  %v2836_v33 = vperm.slane %v2807_v44, 0 }
 0x43d   : > { %v2837_v37 = vperm.slane %v2807_v44, 1  ;;  %v2877_v35 = vperm.slane %v2875_v13, 0  ;;  %v2881_v52 = vperm.slane %v2879_v30, 0  ;;  %v2939_v7 = vpack.i.b16 %v2834_v8, %v2834_v8 }
 0x43e   : > { %v2943_v50 = vpack.i.b16 %v2835_v62, %v2835_v62  ;;  %v3154_v39 = vunpack.c.l.b16 %v3080_v51  ;;  %v3156_v46 = vunpack.c.l.b16 %v3081_v49  ;;  %v2947_v26 = vpack.i.b16 %v2836_v33, %v2836_v33 }
 0x43f   : > { %v2951_v0 = vpack.i.b16 %v2837_v37, %v2837_v37  ;;  %v3155_v58 = vunpack.c.h.b16 %v3080_v51  ;;  %v3157_v36 = vunpack.c.h.b16 %v3081_v49  ;;  %v2978_v59 = vunpack.c.l.bf16 %v2877_v35 }
 0x440   : > { %v2979_v43 = vunpack.c.l.bf16 %v2881_v52  ;;  %v3208_v27 = vpack.c.b16 %v3156_v46, %v3154_v39  ;;  %v2949_v63 = vperm.slane %v2947_v26, 0  ;;  %v2941_v21 = vperm.slane %v2939_v7, 0 }
 0x441   : > { %v2953_v56 = vperm.slane %v2951_v0, 0  ;;  %v3209_v29 = vpack.c.b16 %v3157_v36, %v3155_v58  ;;  %v3022_v38 = vmul.f32 %v7875_v22, %v2978_v59  ;;  %v3024_v3 = vmul.f32 %v7883_v24, %v2978_v59 }
 0x442   : > { %v3023_v17 = vmul.f32 %v7881_v41, %v2979_v43  ;;  %3264 = vmatpush.bf16.msrb.mxu0 %v3208_v27  ;;  %v2996_v25 = vunpack.c.l.bf16 %v2949_v63  ;;  %v3025_v2 = vmul.f32 %v7885_v1, %v2979_v43  ;;  %v2945_v14 = vperm.slane %v2943_v50, 0 }
 0x443   : > { %v2997_v42 = vunpack.c.l.bf16 %v2953_v56  ;;  %3312 = vmatpush.bf16.msrb.mxu2 %v3209_v29  ;;  %v2994_v28 = vunpack.c.l.bf16 %v2941_v21  ;;  %v2781_v18 = vunpack.i.h.s16 %v7925_v57  ;;  %v2769_v60 = vsel %vm349_vm4, %v7865_v34, %v7871_v61 }
 0x444   : > { %v3078_v32 = vpack.c.bf16 %v3023_v17, %v3022_v38  ;;  %v3058_v20 = vmul.f32 %v7875_v22, %v2996_v25  ;;  %v3060_v15 = vmul.f32 %v7883_v24, %v2996_v25  ;;  %v3079_v40 = vpack.c.bf16 %v3025_v2, %v3024_v3 }
 0x445   : > { %v3059_v31 = vmul.f32 %v7881_v41, %v2997_v42  ;;  %v3061_v48 = vmul.f32 %v7885_v1, %v2997_v42  ;;  %v2995_v13 = vunpack.c.l.bf16 %v2945_v14  ;;  %v3054_v30 = vmul.f32 %v7875_v22, %v2994_v28 }
 0x446   : > { %v3150_v44 = vunpack.c.l.b16 %v3078_v32  ;;  %v3056_v51 = vmul.f32 %v7883_v24, %v2994_v28  ;;  %v3151_v49 = vunpack.c.h.b16 %v3078_v32  ;;  %v3152_v33 = vunpack.c.l.b16 %v3079_v40 }
 0x447   : > { %v3096_v8 = vpack.c.bf16 %v3059_v31, %v3058_v20  ;;  %v3097_v62 = vpack.c.bf16 %v3061_v48, %v3060_v15  ;;  %v3055_v37 = vmul.f32 %v7881_v41, %v2995_v13  ;;  %v3057_v35 = vmul.f32 %v7885_v1, %v2995_v13 }
 0x448   : > { %v3153_v52 = vunpack.c.h.b16 %v3079_v40  ;;  %v3206_v26 = vpack.c.b16 %v3152_v33, %v3150_v44  ;;  %v2797_v27 = vpack.i.b16 %v2781_v18, %v2781_v18  ;;  %v2771_v63 = vrot.slane %v2769_v60, 1 }
 0x449   : > { %v3186_v7 = vunpack.c.l.b16 %v3096_v8  ;;  %v3188_v50 = vunpack.c.l.b16 %v3097_v62  ;;  %v3187_v39 = vunpack.c.h.b16 %v3096_v8  ;;  %v3189_v46 = vunpack.c.h.b16 %v3097_v62 }
 0x44a   : > { %v3094_v0 = vpack.c.bf16 %v3055_v37, %v3054_v30  ;;  %v3095_v58 = vpack.c.bf16 %v3057_v35, %v3056_v51  ;;  %v3207_v36 = vpack.c.b16 %v3153_v52, %v3151_v49  ;;  %3265 = vmatpush.bf16.msrb.mxu0 %v3206_v26  ;;  %v2816_v17 = vperm.slane %v2797_v27, 0 }
 0x44b   : > { %v3224_v59 = vpack.c.b16 %v3188_v50, %v3186_v7  ;;  %v3225_v43 = vpack.c.b16 %v3189_v46, %v3187_v39  ;;  %v2817_v3 = vperm.slane %v2797_v27, 1  ;;  %v2789_v25 = vunpack.i.h.s16 %v2771_v63 }
 0x44c   : > { %v3182_v56 = vunpack.c.l.b16 %v3094_v0  ;;  %v3184_v21 = vunpack.c.l.b16 %v3095_v58  ;;  %3313 = vmatpush.bf16.msrb.mxu2 %v3207_v36  ;;  %v3183_v29 = vunpack.c.h.b16 %v3094_v0  ;;  %v3185_v38 = vunpack.c.h.b16 %v3095_v58 }
 0x44d   : > { %3288 = vmatpush.bf16.msrb.mxu1 %v3224_v59  ;;  %3336 = vmatpush.bf16.msrb.mxu3 %v3225_v43  ;;  %v6820_v42 = vpack.i.b16 %v7925_v57, %v7925_v57  ;;  %v6824_v32 = vpack.i.b16 %v2771_v63, %v2771_v63  ;;  %v7948_v28 = vsel %vm264_vm1, %v7857_v45, %v7860_v9 }
 0x44e   : > { %v3222_v2 = vpack.c.b16 %v3184_v21, %v3182_v56  ;;  %v3223_v14 = vpack.c.b16 %v3185_v38, %v3183_v29  ;;  %v2867_v18 = vpack.i.b16 %v2816_v17, %v2816_v17  ;;  %v2871_v60 = vpack.i.b16 %v2817_v3, %v2817_v3 }
 0x44f   : > { %v2805_v20 = vpack.i.b16 %v2789_v25, %v2789_v25  ;;  %v2814_v31 = vperm.slane %v6820_v42, 0  ;;  %v2815_v15 = vperm.slane %v6820_v42, 1  ;;  %v2830_v48 = vperm.slane %v6824_v32, 0 }
 0x450   : > { %v2831_v40 = vperm.slane %v6824_v32, 1  ;;  %v2869_v44 = vperm.slane %v2867_v18, 0  ;;  %v2873_v13 = vperm.slane %v2871_v60, 0 }
 0x451   : > { %3289 = vmatpush.bf16.msrb.mxu1 %v3222_v2  ;;  %3337 = vmatpush.bf16.msrb.mxu3 %v3223_v14  ;;  %v2832_v57 = vperm.slane %v2805_v20, 0  ;;  %v2833_v30 = vperm.slane %v2805_v20, 1  ;;  %v2859_v8 = vpack.i.b16 %v2814_v31, %v2814_v31  ;;  %v2863_v62 = vpack.i.b16 %v2815_v15, %v2815_v15 }
 0x452   : > { %v2923_v51 = vpack.i.b16 %v2830_v48, %v2830_v48  ;;  %v2927_v49 = vpack.i.b16 %v2831_v40, %v2831_v40  ;;  %v2976_v33 = vunpack.c.l.bf16 %v2869_v44  ;;  %v2977_v45 = vunpack.c.l.bf16 %v2873_v13 }
 0x453   : > { %v2931_v9 = vpack.i.b16 %v2832_v57, %v2832_v57  ;;  %v2935_v37 = vpack.i.b16 %v2833_v30, %v2833_v30  ;;  %v2861_v35 = vperm.slane %v2859_v8, 0  ;;  %v2865_v52 = vperm.slane %v2863_v62, 0 }
 0x454   : > { %v2925_v7 = vperm.slane %v2923_v51, 0  ;;  %v2929_v50 = vperm.slane %v2927_v49, 0  ;;  %v3018_v39 = vmul.f32 %v7875_v22, %v2976_v33  ;;  %v3019_v46 = vmul.f32 %v7881_v41, %v2977_v45 }
 0x455   : > { %v3020_v26 = vmul.f32 %v7883_v24, %v2976_v33  ;;  %v3021_v0 = vmul.f32 %v7885_v1, %v2977_v45  ;;  %v2933_v58 = vperm.slane %v2931_v9, 0  ;;  %v2937_v36 = vperm.slane %v2935_v37, 0 }
 0x456   : > { %v2974_v59 = vunpack.c.l.bf16 %v2861_v35  ;;  %v2975_v43 = vunpack.c.l.bf16 %v2865_v52  ;;  %v3076_v27 = vpack.c.bf16 %v3019_v46, %v3018_v39  ;;  %v2990_v56 = vunpack.c.l.bf16 %v2925_v7 }
 0x457   : > { %v3077_v63 = vpack.c.bf16 %v3021_v0, %v3020_v26  ;;  %v2991_v21 = vunpack.c.l.bf16 %v2929_v50  ;;  %v2992_v29 = vunpack.c.l.bf16 %v2933_v58  ;;  %v2993_v38 = vunpack.c.l.bf16 %v2937_v36 }
 0x458   : > { %v3014_v17 = vmul.f32 %v7875_v22, %v2974_v59  ;;  %v3015_v3 = vmul.f32 %v7881_v41, %v2975_v43  ;;  %v3146_v25 = vunpack.c.l.b16 %v3076_v27  ;;  %v3147_v2 = vunpack.c.h.b16 %v3076_v27 }
 0x459   : > { %v3148_v42 = vunpack.c.l.b16 %v3077_v63  ;;  %v3149_v14 = vunpack.c.h.b16 %v3077_v63  ;;  %v3050_v32 = vmul.f32 %v7875_v22, %v2992_v29  ;;  %v3051_v18 = vmul.f32 %v7881_v41, %v2993_v38 }
 0x45a   : > { %v3052_v60 = vmul.f32 %v7883_v24, %v2992_v29  ;;  %v3053_v20 = vmul.f32 %v7885_v1, %v2993_v38  ;;  %v3016_v48 = vmul.f32 %v7883_v24, %v2974_v59  ;;  %v3017_v40 = vmul.f32 %v7885_v1, %v2975_v43 }
 0x45b   : > { %v3204_v31 = vpack.c.b16 %v3148_v42, %v3146_v25  ;;  %v3205_v15 = vpack.c.b16 %v3149_v14, %v3147_v2  ;;  %v3092_v44 = vpack.c.bf16 %v3051_v18, %v3050_v32  ;;  %v3074_v57 = vpack.c.bf16 %v3015_v3, %v3014_v17 }
 0x45c   : > { %v3093_v13 = vpack.c.bf16 %v3053_v20, %v3052_v60  ;;  %v3046_v30 = vmul.f32 %v7875_v22, %v2990_v56  ;;  %v3075_v8 = vpack.c.bf16 %v3017_v40, %v3016_v48  ;;  %v3047_v62 = vmul.f32 %v7881_v41, %v2991_v21 }
 0x45d   : > { %3266 = vmatpush.bf16.msrb.mxu0 %v3204_v31  ;;  %3314 = vmatpush.bf16.msrb.mxu2 %v3205_v15  ;;  %v3048_v51 = vmul.f32 %v7883_v24, %v2990_v56  ;;  %v2779_v49 = vunpack.i.h.s16 %v7948_v28  ;;  %v3178_v33 = vunpack.c.l.b16 %v3092_v44  ;;  %v3179_v9 = vunpack.c.h.b16 %v3092_v44 }
 0x45e   : > { %v3180_v45 = vunpack.c.l.b16 %v3093_v13  ;;  %v3181_v37 = vunpack.c.h.b16 %v3093_v13  ;;  %v3142_v35 = vunpack.c.l.b16 %v3074_v57  ;;  %v3144_v52 = vunpack.c.l.b16 %v3075_v8 }
 0x45f   : > { %v3049_v7 = vmul.f32 %v7885_v1, %v2991_v21  ;;  %v3090_v50 = vpack.c.bf16 %v3047_v62, %v3046_v30  ;;  %v3143_v26 = vunpack.c.h.b16 %v3074_v57  ;;  %v3145_v0 = vunpack.c.h.b16 %v3075_v8 }
 0x460   : > { %v3220_v39 = vpack.c.b16 %v3180_v45, %v3178_v33  ;;  %v3221_v46 = vpack.c.b16 %v3181_v37, %v3179_v9  ;;  %v3202_v58 = vpack.c.b16 %v3144_v52, %v3142_v35  ;;  %v2795_v63 = vpack.i.b16 %v2779_v49, %v2779_v49 }
 0x461   : > { %v3091_v36 = vpack.c.bf16 %v3049_v7, %v3048_v51  ;;  %v3174_v59 = vunpack.c.l.b16 %v3090_v50  ;;  %v3175_v43 = vunpack.c.h.b16 %v3090_v50  ;;  %v3203_v27 = vpack.c.b16 %v3145_v0, %v3143_v26 }
 0x462   : > { %3290 = vmatpush.bf16.msrb.mxu1 %v3220_v39  ;;  %3338 = vmatpush.bf16.msrb.mxu3 %v3221_v46  ;;  %v2767_v56 = vsel %vm264_vm1, %v7865_v34, %v7871_v61  ;;  %v6819_v17 = vpack.i.b16 %v7948_v28, %v7948_v28  ;;  %v2812_v3 = vperm.slane %v2795_v63, 0  ;;  %v2813_v25 = vperm.slane %v2795_v63, 1 }
 0x463   : > { %3267 = vmatpush.bf16.msrb.mxu0 %v3202_v58  ;;  %v3176_v29 = vunpack.c.l.b16 %v3091_v36  ;;  %v3177_v21 = vunpack.c.h.b16 %v3091_v36  ;;  %v2787_v38 = vunpack.i.h.s16 %v2767_v56  ;;  %3315 = vmatpush.bf16.msrb.mxu2 %v3203_v27  ;;  %v6823_v42 = vpack.i.b16 %v2767_v56, %v2767_v56 }
 0x464   : > { %v2810_v18 = vperm.slane %v6819_v17, 0  ;;  %v2851_v60 = vpack.i.b16 %v2812_v3, %v2812_v3  ;;  %v2855_v20 = vpack.i.b16 %v2813_v25, %v2813_v25  ;;  %v2811_v31 = vperm.slane %v6819_v17, 1 }
 0x465   : > { %v3218_v2 = vpack.c.b16 %v3176_v29, %v3174_v59  ;;  %v3219_v14 = vpack.c.b16 %v3177_v21, %v3175_v43  ;;  %v2803_v32 = vpack.i.b16 %v2787_v38, %v2787_v38  ;;  %v2826_v15 = vperm.slane %v6823_v42, 0 }
 0x466   : > { %v2843_v48 = vpack.i.b16 %v2810_v18, %v2810_v18  ;;  %v2827_v40 = vperm.slane %v6823_v42, 1  ;;  %v2853_v44 = vperm.slane %v2851_v60, 0  ;;  %v2857_v28 = vperm.slane %v2855_v20, 0 }
 0x467   : > { %3291 = vmatpush.bf16.msrb.mxu1 %v3218_v2  ;;  %3339 = vmatpush.bf16.msrb.mxu3 %v3219_v14  ;;  %v2828_v34 = vperm.slane %v2803_v32, 0  ;;  %v2829_v61 = vperm.slane %v2803_v32, 1  ;;  %v2847_v13 = vpack.i.b16 %v2811_v31, %v2811_v31  ;;  %v2907_v57 = vpack.i.b16 %v2826_v15, %v2826_v15 }
 0x468   : > { %v2845_v62 = vperm.slane %v2843_v48, 0  ;;  %v2911_v51 = vpack.i.b16 %v2827_v40, %v2827_v40  ;;  %v2972_v49 = vunpack.c.l.bf16 %v2853_v44  ;;  %v2973_v33 = vunpack.c.l.bf16 %v2857_v28 }
 0x469   : > { %v2915_v30 = vpack.i.b16 %v2828_v34, %v2828_v34  ;;  %v2919_v8 = vpack.i.b16 %v2829_v61, %v2829_v61  ;;  %v2849_v45 = vperm.slane %v2847_v13, 0  ;;  %v2909_v9 = vperm.slane %v2907_v57, 0 }
 0x46a   : > { %v2970_v52 = vunpack.c.l.bf16 %v2845_v62  ;;  %v2913_v7 = vperm.slane %v2911_v51, 0  ;;  %v3010_v50 = vmul.f32 %v7875_v22, %v2972_v49  ;;  %v3011_v39 = vmul.f32 %v7881_v41, %v2973_v33 }
 0x46b   : > { %v2917_v37 = vperm.slane %v2915_v30, 0  ;;  %v2921_v35 = vperm.slane %v2919_v8, 0  ;;  %v3012_v46 = vmul.f32 %v7883_v24, %v2972_v49  ;;  %v3013_v26 = vmul.f32 %v7885_v1, %v2973_v33 }
 0x46c   : > { %v2971_v36 = vunpack.c.l.bf16 %v2849_v45  ;;  %v3006_v59 = vmul.f32 %v7875_v22, %v2970_v52  ;;  %v3072_v43 = vpack.c.bf16 %v3011_v39, %v3010_v50  ;;  %v3008_v63 = vmul.f32 %v7883_v24, %v2970_v52 }
 0x46d   : > { %v2988_v0 = vunpack.c.l.bf16 %v2917_v37  ;;  %v2989_v58 = vunpack.c.l.bf16 %v2921_v35  ;;  %v3073_v27 = vpack.c.bf16 %v3013_v26, %v3012_v46  ;;  %v2986_v56 = vunpack.c.l.bf16 %v2909_v9 }
 0x46e   : > { %v3138_v3 = vunpack.c.l.b16 %v3072_v43  ;;  %v3139_v42 = vunpack.c.h.b16 %v3072_v43  ;;  %v3007_v18 = vmul.f32 %v7881_v41, %v2971_v36  ;;  %v3009_v60 = vmul.f32 %v7885_v1, %v2971_v36 }
 0x46f   : > { %v3042_v29 = vmul.f32 %v7875_v22, %v2988_v0  ;;  %v3043_v21 = vmul.f32 %v7881_v41, %v2989_v58  ;;  %v3044_v38 = vmul.f32 %v7883_v24, %v2988_v0  ;;  %v3045_v17 = vmul.f32 %v7885_v1, %v2989_v58 }
 0x470   : > { %v3140_v25 = vunpack.c.l.b16 %v3073_v27  ;;  %v3141_v2 = vunpack.c.h.b16 %v3073_v27  ;;  %v2987_v15 = vunpack.c.l.bf16 %v2913_v7  ;;  %v3038_v34 = vmul.f32 %v7875_v22, %v2986_v56 }
 0x471   : > { %v3088_v14 = vpack.c.bf16 %v3043_v21, %v3042_v29  ;;  %v3089_v32 = vpack.c.bf16 %v3045_v17, %v3044_v38  ;;  %v3070_v28 = vpack.c.bf16 %v3007_v18, %v3006_v59  ;;  %v3071_v13 = vpack.c.bf16 %v3009_v60, %v3008_v63 }
 0x472   : > { %v3200_v20 = vpack.c.b16 %v3140_v25, %v3138_v3  ;;  %v3201_v31 = vpack.c.b16 %v3141_v2, %v3139_v42  ;;  %v3039_v57 = vmul.f32 %v7881_v41, %v2987_v15  ;;  %v3040_v62 = vmul.f32 %v7883_v24, %v2986_v56 }
 0x473   : > { %v3170_v61 = vunpack.c.l.b16 %v3088_v14  ;;  %v3172_v48 = vunpack.c.l.b16 %v3089_v32  ;;  %v3171_v40 = vunpack.c.h.b16 %v3088_v14  ;;  %v3173_v44 = vunpack.c.h.b16 %v3089_v32 }
 0x474   : > { %3268 = vmatpush.bf16.msrb.mxu0 %v3200_v20  ;;  %3316 = vmatpush.bf16.msrb.mxu2 %v3201_v31  ;;  %v3041_v51 = vmul.f32 %v7885_v1, %v2987_v15  ;;  %v3134_v49 = vunpack.c.l.b16 %v3070_v28  ;;  %v3136_v33 = vunpack.c.l.b16 %v3071_v13  ;;  %v3086_v45 = vpack.c.bf16 %v3039_v57, %v3038_v34  ;;  %v8005_v1 = vld [vmem:[%s8002_s3] ss:$8 sm:$0x3] }
 0x475   : > { %v3216_v30 = vpack.c.b16 %v3172_v48, %v3170_v61  ;;  %v3217_v8 = vpack.c.b16 %v3173_v44, %v3171_v40  ;;  %v3135_v22 = vunpack.c.h.b16 %v3070_v28  ;;  %v3137_v37 = vunpack.c.h.b16 %v3071_v13 }
 0x476   : > { %v3087_v9 = vpack.c.bf16 %v3041_v51, %v3040_v62  ;;  %v3198_v35 = vpack.c.b16 %v3136_v33, %v3134_v49  ;;  %v3166_v52 = vunpack.c.l.b16 %v3086_v45  ;;  %v3167_v7 = vunpack.c.h.b16 %v3086_v45 }
 0x477   : > { %3292 = vmatpush.bf16.msrb.mxu1 %v3216_v30  ;;  %3340 = vmatpush.bf16.msrb.mxu3 %v3217_v8  ;;  %v3199_v39 = vpack.c.b16 %v3137_v37, %v3135_v22  ;;  %v2677_v26 = vstv %s2676_s2 }
 0x478   : > { %v3168_v50 = vunpack.c.l.b16 %v3087_v9  ;;  %v3169_v41 = vunpack.c.h.b16 %v3087_v9  ;;  %3269 = vmatpush.bf16.msrb.mxu0 %v3198_v35  ;;  %v2678_v0 = vadd.f32 %v2677_v26, %v8005_v1 }
 0x479   : > { %3317 = vmatpush.bf16.msrb.mxu2 %v3199_v39 }
 0x47a   : > { %v3214_v46 = vpack.c.b16 %v3168_v50, %v3166_v52  ;;  %v3215_v24 = vpack.c.b16 %v3169_v41, %v3167_v7  ;;  %v2682_v58 = vperm.slane %v2678_v0, 0  ;;  %v2683_v27 = vperm.slane %v2678_v0, 1 }
 0x47b   : > { %3270 = vmatmul.bf16.vlgmr.msrb.gmra.mxu0 %v7310_v47 }
 0x47c   : > { %3293 = vmatpush.bf16.msrb.mxu1 %v3214_v46  ;;  %3341 = vmatpush.bf16.msrb.mxu3 %v3215_v24  ;;  %v2686_v36 = vsub.f32 %v7152_v5, %v2682_v58  ;;  %v2688_v59 = vsub.f32 %v7154_v6, %v2682_v58  ;;  %v2687_v21 = vsub.f32 %v7152_v5, %v2683_v27 }
 0x47d   : > { %3318 = vmatmul.bf16.vlgmr.msrb.gmra.mxu2 %v7310_v47  ;;  %v2689_v38 = vsub.f32 %v7154_v6, %v2683_v27 }
 0x47e   : > { %v2690_v56 = vand.u32 2147483647, %v2686_v36  ;;  %v2692_v29 = vand.u32 2147483647, %v2688_v59  ;;  %v2691_v32 = vand.u32 2147483647, %v2687_v21 }
 0x47f   : > { %3294 = vmatmul.bf16.vlgmr.msrb.gmra.mxu1 %v7316_v10  ;;  %3342 = vmatmul.bf16.vlgmr.msrb.gmra.mxu3 %v7316_v10  ;;  %v2693_v18 = vand.u32 2147483647, %v2689_v38 }
 0x480   : > { %v2694_v3 = vsub.f32 1.0, %v2690_v56  ;;  %v2696_v25 = vsub.f32 1.0, %v2692_v29  ;;  %v2695_v61 = vsub.f32 1.0, %v2691_v32 }
 0x481   : > { %v2697_v40 = vsub.f32 1.0, %v2693_v18 }
 0x482   : > { %v8012_v20 = vmax.f32 %v2694_v3, 0.0  ;;  %v8014_v31 = vmax.f32 %v2696_v25, 0.0  ;;  %v8018_v8 = vmax.f32 %v2695_v61, 0.0 }
 0x483   : > { %v8020_v51 = vmax.f32 %v2697_v40, 0.0 }
 0x48b   : > { %3275 = vmatmul.bf16.gmra.mxu0 %v7320_v11 }
 0x48d   : > { %3323 = vmatmul.bf16.gmra.mxu2 %v7320_v11 }
 0x48f   : > { %3299 = vmatmul.bf16.gmra.mxu1 %v7324_v16  ;;  %3347 = vmatmul.bf16.gmra.mxu3 %v7324_v16 }
 0x49b   : > { %3280 = vmatmul.bf16.gmra.mxu0 %v7328_v19 }
 0x49d   : > { %3328 = vmatmul.bf16.gmra.mxu2 %v7328_v19 }
 0x49f   : > { %3304 = vmatmul.bf16.gmra.mxu1 %v7332_v23  ;;  %3352 = vmatmul.bf16.gmra.mxu3 %v7332_v23 }
 0x4f8   : > { %v3271_v43 = vpop.f32.mrf.mxu0 }
 0x4fc   : > { %v3295_v63 = vpop.f32.mrf.mxu1 }
 0x4fd   : > { %v3296_v14 = vadd.f32 %v3295_v63, %v3271_v43 }
 0x4ff   : > { %v3358_v34 = vmul.f32 %v3296_v14, %v8012_v20 }
 0x500   : > { %v3319_v17 = vpop.f32.mrf.mxu2  ;;  %v3273_v2 = vpop.f32.mrf.mxu0 }
 0x502   : > { %v3343_v42 = vpop.f32.mrf.mxu3 }
 0x503   : > { %v3344_v28 = vadd.f32 %v3343_v42, %v3319_v17 }
 0x504   : > { %v3297_v60 = vpop.f32.mrf.mxu1 }
 0x505   : > { %v3298_v15 = vadd.f32 %v3297_v60, %v3273_v2  ;;  %v3359_v45 = vmul.f32 %v3344_v28, %v8018_v8 }
 0x507   : > { %v3360_v48 = vmul.f32 %v3298_v15, %v8014_v31 }
 0x508   : > { %v3321_v44 = vpop.f32.mrf.mxu2  ;;  %v3276_v30 = vpop.f32.mrf.mxu0 }
 0x509   : > { %v3370_v13 = vadd.f32 %v3360_v48, %v3358_v34 }
 0x50a   : > { %v3345_v57 = vpop.f32.mrf.mxu3 }
 0x50b   : > { %v3371_v62 = vrot.slane %v3370_v13, 4  ;;  %v3346_v49 = vadd.f32 %v3345_v57, %v3321_v44 }
 0x50c   : > { %v3300_v33 = vpop.f32.mrf.mxu1 }
 0x50d   : > { %v3372_v22 = vadd.f32 %v3371_v62, %v3370_v13  ;;  %v3361_v9 = vmul.f32 %v3346_v49, %v8020_v51  ;;  %v3301_v46 = vadd.f32 %v3300_v33, %v3276_v30 }
 0x50f   : > { %v3377_v37 = vadd.f32 %v3361_v9, %v3359_v45  ;;  %v3373_v35 = vrot.slane %v3372_v22, 2  ;;  %v3362_v59 = vmul.f32 %v3301_v46, %v8012_v20 }
 0x510   : > { %v3324_v52 = vpop.f32.mrf.mxu2  ;;  %v3278_v39 = vpop.f32.mrf.mxu0 }
 0x511   : > { %v3378_v7 = vrot.slane %v3377_v37, 4  ;;  %v3374_v24 = vadd.f32 %v3373_v35, %v3372_v22 }
 0x512   : > { %v3348_v50 = vpop.f32.mrf.mxu3 }
 0x513   : > { %v3379_v41 = vadd.f32 %v3378_v7, %v3377_v37  ;;  %v3375_v27 = vrot.slane %v3374_v24, 1  ;;  %v3349_v29 = vadd.f32 %v3348_v50, %v3324_v52 }
 0x514   : > { %v3302_v26 = vpop.f32.mrf.mxu1 }
 0x515   : > { %v3380_v0 = vrot.slane %v3379_v41, 2  ;;  %v3303_v58 = vadd.f32 %v3302_v26, %v3278_v39  ;;  %v3376_v2 = vadd.f32 %v3375_v27, %v3374_v24  ;;  %v3363_v18 = vmul.f32 %v3349_v29, %v8018_v8 }
 0x517   : > { %v3381_v36 = vadd.f32 %v3380_v0, %v3379_v41  ;;  %v3364_v43 = vmul.f32 %v3303_v58, %v8014_v31 }
 0x518   : > { %v3326_v63 = vpop.f32.mrf.mxu2  ;;  %v3281_v17 = vpop.f32.mrf.mxu0 }
 0x519   : > { %v3382_v56 = vrot.slane %v3381_v36, 1  ;;  %v3384_v21 = vadd.f32 %v3364_v43, %v3362_v59 }
 0x51a   : > { %v3350_v38 = vpop.f32.mrf.mxu3 }
 0x51b   : > { %v3383_v3 = vadd.f32 %v3382_v56, %v3381_v36  ;;  %v3385_v25 = vrot.slane %v3384_v21, 4  ;;  %v3351_v42 = vadd.f32 %v3350_v38, %v3326_v63 }
 0x51c   : > { %v3305_v14 = vpop.f32.mrf.mxu1 }
 0x51d   : > { %v3414_v32 = vrot.slane %v3383_v3, 7  ;;  %v3386_v60 = vadd.f32 %v3385_v25, %v3384_v21  ;;  %v3365_v15 = vmul.f32 %v3351_v42, %v8020_v51  ;;  %v3306_v62 = vadd.f32 %v3305_v14, %v3281_v17 }
 0x51f   : > { %v3415_v34 = vsel %vm264_vm1, %v3376_v2, %v3414_v32  ;;  %v3391_v61 = vadd.f32 %v3365_v15, %v3363_v18  ;;  %v3387_v40 = vrot.slane %v3386_v60, 2  ;;  %v3366_v37 = vmul.f32 %v3306_v62, %v8012_v20 }
 0x520   : > { %v3417_v48 = vadd.f32 %v3415_v34, %v8005_v1  ;;  %v3329_v44 = vpop.f32.mrf.mxu2  ;;  %v3283_v57 = vpop.f32.mrf.mxu0 }
 0x521   : > { %v3392_v28 = vrot.slane %v3391_v61, 4  ;;  %v3388_v49 = vadd.f32 %v3387_v40, %v3386_v60 }
 0x522   : > { %3418 = vst.msk [vmem:[%s8002_s3] ss:$8 sm:$0x3] %vm7366_vm5, %v3417_v48  ;;  %v3353_v13 = vpop.f32.mrf.mxu3  ;;  %s4236_s3 = sadd.s32 21, %s7135_s23 }
 0x523   : > { %v3393_v30 = vadd.f32 %v3392_v28, %v3391_v61  ;;  %v3389_v1 = vrot.slane %v3388_v49, 1  ;;  %v3354_v50 = vadd.f32 %v3353_v13, %v3329_v44  ;;  %s4237_s5 = sshra.s32 %s4236_s3, 3  ;;  %s4240_s7 = sand.u32 7, %s4236_s3 }
 0x524   : > { %v3307_v33 = vpop.f32.mrf.mxu1  ;;  %s6907_s8 = sshll.u32 %s4237_s5, 4  ;;  %s5036_s3 = sadd.s32 38, %s7135_s23 }
 0x525   : > { %v3394_v45 = vrot.slane %v3393_v30, 2  ;;  %v3308_v22 = vadd.f32 %v3307_v33, %v3283_v57  ;;  %v3390_v0 = vadd.f32 %v3389_v1, %v3388_v49  ;;  %v3367_v36 = vmul.f32 %v3354_v50, %v8018_v8  ;;  %s4243_s18 = sadd.s32 %s6907_s8, %s4240_s7  ;;  %s5037_s5 = sshra.s32 %s5036_s3, 3 }
 0x526   : > { %s5040_s8 = sand.u32 7, %s5036_s3  ;;  %s6911_s16 = sshll.u32 %s5037_s5, 4 }
 0x527   : > { %v3395_v9 = vadd.f32 %v3394_v45, %v3393_v30  ;;  %v3368_v35 = vmul.f32 %v3308_v22, %v8014_v31 }
 0x528   : > { %v3331_v52 = vpop.f32.mrf.mxu2 }
 0x529   : > { %v3396_v7 = vrot.slane %v3395_v9, 1  ;;  %v3398_v39 = vadd.f32 %v3368_v35, %v3366_v37 }
 0x52a   : > { %v3355_v41 = vpop.f32.mrf.mxu3 }
 0x52b   : > { %v3397_v46 = vadd.f32 %v3396_v7, %v3395_v9  ;;  %v3399_v24 = vrot.slane %v3398_v39, 4  ;;  %v3356_v26 = vadd.f32 %v3355_v41, %v3331_v52 }
 0x52d   : > { %v3422_v58 = vrot.slane %v3397_v46, 7  ;;  %v3400_v59 = vadd.f32 %v3399_v24, %v3398_v39  ;;  %v3369_v20 = vmul.f32 %v3356_v26, %v8020_v51 }
 0x52f   : > { %v3423_v31 = vsel %vm264_vm1, %v3390_v0, %v3422_v58  ;;  %v3405_v43 = vadd.f32 %v3369_v20, %v3367_v36  ;;  %v3401_v63 = vrot.slane %v3400_v59, 2 }
 0x530   : > { %v3425_v27 = vadd.f32 %v3423_v31, %v7840_v54 }
 0x531   : > { %v3406_v56 = vrot.slane %v3405_v43, 4  ;;  %v3402_v21 = vadd.f32 %v3401_v63, %v3400_v59 }
 0x532   : > { %3426 = vst.msk [vmem:[%s7834_s24] ss:$8 sm:$0x3] %vm7366_vm5, %v3425_v27  ;;  %s8053_s24 = scalar_lea.vmem %s7094_s22, %s3463_s20  ;;  %s8266_s20 = scalar_lea.vmem %s7094_s22, %s4243_s18 }
 0x533   : > { %v3407_v29 = vadd.f32 %v3406_v56, %v3405_v43  ;;  %v3403_v8 = vrot.slane %v3402_v21, 1  ;;  %s5043_s18 = sadd.s32 %s6911_s16, %s5040_s8 }
 0x535   : > { %v3408_v38 = vrot.slane %v3407_v29, 2  ;;  %v3404_v25 = vadd.f32 %v3403_v8, %v3402_v21 }
 0x537   : > { %v3409_v17 = vadd.f32 %v3408_v38, %v3407_v29 }
 0x539   : > { %v3410_v3 = vrot.slane %v3409_v17, 1 }
 0x53b   : > { %v3411_v51 = vadd.f32 %v3410_v3, %v3409_v17 }
 0x53d   : > { %v3430_v54 = vrot.slane %v3411_v51, 7 }
 0x53f   : > { %v3431_v42 = vsel %vm264_vm1, %v3404_v25, %v3430_v54 }
 0x540   : > { %v3433_v2 = vadd.f32 %v3431_v42, %v7843_v55 }
 0x542   : > { %3434 = vst.msk [vmem:[%s7837_s27] ss:$8 sm:$0x3] %vm7366_vm5, %v3433_v2  ;;  %s3436_s27 = sadd.s32 4, %s7135_s23 }
 0x543   : > { %s3437_s25 = sshra.s32 %s3436_s27, 3  ;;  %s3440_s26 = sand.u32 7, %s3436_s27 }
 0x544   : > { %s6903_s28 = sshll.u32 %s3437_s25, 4  ;;  %s3466_s30 = scvt.s32.f32 %s3436_s27 }
 0x545   : > { %s3443_s29 = sadd.s32 %s6903_s28, %s3440_s26 }
 0x546   : > { %s8218_s2 = scalar_lea.vmem %s7094_s22, %s3443_s29 }
 0x549   : > { %v8056_v14 = vld [vmem:[%s8050_s21] ss:$8 sm:$0x3] }
 0x54a   : > { %v8059_v32 = vld [vmem:[%s8053_s24] ss:$8 sm:$0x3]  ;;  %v3469_v55 = vadd.f32 %v8056_v14, %v7150_v4 }
 0x54b   : > { %v3470_v18 = vadd.f32 %v8059_v32, %v7162_v12 }
 0x54c   : > { %v3493_v60 = vperm.slane %v3469_v55, 0  ;;  %v3494_v15 = vperm.slane %v3469_v55, 1 }
 0x54d   : > { %v3516_v34 = vperm.slane %v3470_v18, 0  ;;  %v3517_v61 = vperm.slane %v3470_v18, 1 }
 0x54e   : > { %v3497_v48 = vsub.f32 %v7152_v5, %v3493_v60  ;;  %v3498_v40 = vsub.f32 %v7152_v5, %v3494_v15  ;;  %v3499_v9 = vsub.f32 %v7154_v6, %v3493_v60  ;;  %v3500_v52 = vsub.f32 %v7154_v6, %v3494_v15 }
 0x54f   : > { %v3520_v44 = vsub.f32 %v7152_v5, %v3516_v34  ;;  %v3521_v28 = vsub.f32 %v7152_v5, %v3517_v61  ;;  %v3522_v13 = vsub.f32 %v7154_v6, %v3516_v34  ;;  %v3523_v57 = vsub.f32 %v7154_v6, %v3517_v61 }
 0x550   : > { %v3501_v30 = vand.u32 2147483647, %v3497_v48  ;;  %v3502_v62 = vand.u32 2147483647, %v3498_v40  ;;  %v3503_v39 = vand.u32 2147483647, %v3499_v9 }
 0x551   : > { %v3524_v49 = vand.u32 2147483647, %v3520_v44  ;;  %v3525_v33 = vand.u32 2147483647, %v3521_v28  ;;  %v3526_v45 = vand.u32 2147483647, %v3522_v13 }
 0x552   : > { %v3527_v22 = vand.u32 2147483647, %v3523_v57  ;;  %v3505_v37 = vsub.f32 1.0, %v3501_v30  ;;  %v3506_v35 = vsub.f32 1.0, %v3502_v62  ;;  %v3504_v26 = vand.u32 2147483647, %v3500_v52 }
 0x553   : > { %v3528_v1 = vsub.f32 1.0, %v3524_v49  ;;  %v3529_v7 = vsub.f32 1.0, %v3525_v33  ;;  %v3530_v50 = vsub.f32 1.0, %v3526_v45  ;;  %v3507_v0 = vsub.f32 1.0, %v3503_v39 }
 0x554   : > { %v3509_v41 = vmax.f32 %v3505_v37, 0.0  ;;  %v3510_v46 = vmax.f32 %v3506_v35, 0.0  ;;  %v3531_v24 = vsub.f32 1.0, %v3527_v22  ;;  %v3508_v20 = vsub.f32 1.0, %v3504_v26 }
 0x555   : > { %v3532_v36 = vmax.f32 %v3528_v1, 0.0  ;;  %v3533_v59 = vmax.f32 %v3529_v7, 0.0  ;;  %v3511_v31 = vmax.f32 %v3507_v0, 0.0  ;;  %v3534_v43 = vmax.f32 %v3530_v50, 0.0 }
 0x556   : > { %v8073_v58 = vpack.c.bf16 %v3510_v46, %v3509_v41  ;;  %v3535_v27 = vmax.f32 %v3531_v24, 0.0  ;;  %v3512_v56 = vmax.f32 %v3508_v20, 0.0 }
 0x557   : > { %v3536_v29 = vpack.c.bf16 %v3533_v59, %v3532_v36 }
 0x558   : > { %v8076_v63 = vrot.slane %v8073_v58, 3  ;;  %v8081_v38 = vpack.c.bf16 %v3512_v56, %v3511_v31  ;;  %v3537_v3 = vpack.c.bf16 %v3535_v27, %v3534_v43 }
 0x559   : > { %v8091_v2 = vunpack.c.l.bf16 %v3536_v29  ;;  %v8097_v48 = vunpack.c.h.bf16 %v3536_v29 }
 0x55a   : > { %v3552_v21 = vsel %vm357_vm2, %v8073_v58, %v8076_v63  ;;  %v3549_v8 = vsel %vm353_vm3, %v8073_v58, %v8076_v63  ;;  %v8087_v51 = vrot.slane %v8081_v38, 3  ;;  %v8099_v40 = vunpack.c.l.bf16 %v3537_v3 }
 0x55b   : > { %v3554_v17 = vrot.slane %v3552_v21, 3  ;;  %v8089_v25 = vrot.slane %v3549_v8, 2  ;;  %v8101_v44 = vunpack.c.h.bf16 %v3537_v3 }
 0x55c   : > { %v3565_v55 = vsel %vm357_vm2, %v8081_v38, %v8087_v51 }
 0x55d   : > { %v3575_v54 = vunpack.i.h.s16 %v3554_v17  ;;  %v6836_v42 = vpack.i.b16 %v3554_v17, %v3554_v17  ;;  %v3573_v18 = vunpack.i.h.s16 %v8089_v25  ;;  %v3567_v15 = vrot.slane %v3565_v55, 3 }
 0x55f   : > { %v3591_v60 = vpack.i.b16 %v3575_v54, %v3575_v54  ;;  %v3612_v34 = vperm.slane %v6836_v42, 0  ;;  %v3613_v61 = vperm.slane %v6836_v42, 1  ;;  %v8103_v28 = vpack.i.b16 %v3573_v18, %v3573_v18 }
 0x560   : > { %v3583_v30 = vunpack.i.h.s16 %v3567_v15  ;;  %v6840_v33 = vpack.i.b16 %v3567_v15, %v3567_v15 }
 0x561   : > { %v3614_v13 = vperm.slane %v3591_v60, 0  ;;  %v3615_v57 = vperm.slane %v3591_v60, 1  ;;  %v3681_v62 = vpack.i.b16 %v3612_v34, %v3612_v34  ;;  %v3685_v49 = vpack.i.b16 %v3613_v61, %v3613_v61 }
 0x562   : > { %v3610_v45 = vperm.slane %v8103_v28, 0  ;;  %v3611_v22 = vperm.slane %v8103_v28, 1  ;;  %v3599_v35 = vpack.i.b16 %v3583_v30, %v3583_v30  ;;  %v3628_v7 = vperm.slane %v6840_v33, 0 }
 0x563   : > { %v3689_v9 = vpack.i.b16 %v3614_v13, %v3614_v13  ;;  %v3693_v37 = vpack.i.b16 %v3615_v57, %v3615_v57  ;;  %v3683_v1 = vperm.slane %v3681_v62, 0  ;;  %v3687_v52 = vperm.slane %v3685_v49, 0 }
 0x564   : > { %v3629_v50 = vperm.slane %v6840_v33, 1  ;;  %v8107_v39 = vpack.i.b16 %v3610_v45, %v3610_v45  ;;  %v3630_v24 = vperm.slane %v3599_v35, 0  ;;  %v3631_v26 = vperm.slane %v3599_v35, 1 }
 0x565   : > { %v3691_v41 = vperm.slane %v3689_v9, 0  ;;  %v3695_v46 = vperm.slane %v3693_v37, 0  ;;  %v3772_v0 = vunpack.c.l.bf16 %v3683_v1  ;;  %v3773_v36 = vunpack.c.l.bf16 %v3687_v52 }
 0x566   : > { %v3745_v59 = vpack.i.b16 %v3628_v7, %v3628_v7  ;;  %v3749_v20 = vpack.i.b16 %v3629_v50, %v3629_v50  ;;  %v3753_v27 = vpack.i.b16 %v3630_v24, %v3630_v24  ;;  %v3757_v56 = vpack.i.b16 %v3631_v26, %v3631_v26 }
 0x567   : > { %v3774_v31 = vunpack.c.l.bf16 %v3691_v41  ;;  %v3775_v43 = vunpack.c.l.bf16 %v3695_v46  ;;  %v3820_v29 = vmul.f32 %v8091_v2, %v3772_v0  ;;  %v3821_v21 = vmul.f32 %v8097_v48, %v3773_v36 }
 0x568   : > { %v3822_v17 = vmul.f32 %v8099_v40, %v3772_v0  ;;  %v3823_v8 = vmul.f32 %v8101_v44, %v3773_v36  ;;  %v3755_v18 = vperm.slane %v3753_v27, 0  ;;  %v3759_v60 = vperm.slane %v3757_v56, 0 }
 0x569   : > { %v3824_v3 = vmul.f32 %v8091_v2, %v3774_v31  ;;  %v3825_v54 = vmul.f32 %v8097_v48, %v3775_v43  ;;  %v3826_v42 = vmul.f32 %v8099_v40, %v3774_v31  ;;  %v3827_v55 = vmul.f32 %v8101_v44, %v3775_v43 }
 0x56a   : > { %v3872_v15 = vpack.c.bf16 %v3821_v21, %v3820_v29  ;;  %v3873_v34 = vpack.c.bf16 %v3823_v8, %v3822_v17  ;;  %v3747_v57 = vperm.slane %v3745_v59, 0  ;;  %v3751_v30 = vperm.slane %v3749_v20, 0 }
 0x56b   : > { %v3874_v61 = vpack.c.bf16 %v3825_v54, %v3824_v3  ;;  %v3875_v13 = vpack.c.bf16 %v3827_v55, %v3826_v42  ;;  %v3790_v62 = vunpack.c.l.bf16 %v3755_v18  ;;  %v3791_v49 = vunpack.c.l.bf16 %v3759_v60 }
 0x56c   : > { %v3948_v33 = vunpack.c.l.b16 %v3872_v15  ;;  %v3950_v45 = vunpack.c.l.b16 %v3873_v34  ;;  %v3788_v0 = vunpack.c.l.bf16 %v3747_v57  ;;  %v3789_v20 = vunpack.c.l.bf16 %v3751_v30 }
 0x56d   : > { %v3952_v9 = vunpack.c.l.b16 %v3874_v61  ;;  %v3954_v37 = vunpack.c.l.b16 %v3875_v13  ;;  %v3953_v35 = vunpack.c.h.b16 %v3874_v61  ;;  %v3955_v1 = vunpack.c.h.b16 %v3875_v13 }
 0x56e   : > { %v3856_v52 = vmul.f32 %v8091_v2, %v3790_v62  ;;  %v3857_v7 = vmul.f32 %v8097_v48, %v3791_v49  ;;  %v3858_v50 = vmul.f32 %v8099_v40, %v3790_v62  ;;  %v3859_v41 = vmul.f32 %v8101_v44, %v3791_v49 }
 0x56f   : > { %v4002_v46 = vpack.c.b16 %v3954_v37, %v3952_v9  ;;  %v4003_v24 = vpack.c.b16 %v3955_v1, %v3953_v35  ;;  %v4000_v26 = vpack.c.b16 %v3950_v45, %v3948_v33  ;;  %v3949_v31 = vunpack.c.h.b16 %v3872_v15 }
 0x570   : > { %v3890_v36 = vpack.c.bf16 %v3857_v7, %v3856_v52  ;;  %v3891_v59 = vpack.c.bf16 %v3859_v41, %v3858_v50  ;;  %v3852_v43 = vmul.f32 %v8091_v2, %v3788_v0  ;;  %v3854_v27 = vmul.f32 %v8099_v40, %v3788_v0 }
 0x571   : > { %4052 = vmatpush.bf16.msra.mxu0 %v4002_v46  ;;  %4100 = vmatpush.bf16.msra.mxu2 %v4003_v24  ;;  %v3951_v56 = vunpack.c.h.b16 %v3873_v34  ;;  %v3675_v29 = vperm.slane %v8107_v39, 0  ;;  %v3853_v54 = vmul.f32 %v8097_v48, %v3789_v20  ;;  %v3855_v42 = vmul.f32 %v8101_v44, %v3789_v20 }
 0x572   : > { %v3984_v21 = vunpack.c.l.b16 %v3890_v36  ;;  %v3986_v17 = vunpack.c.l.b16 %v3891_v59  ;;  %v3985_v8 = vunpack.c.h.b16 %v3890_v36  ;;  %v3987_v3 = vunpack.c.h.b16 %v3891_v59 }
 0x573   : > { %v4001_v55 = vpack.c.b16 %v3951_v56, %v3949_v31  ;;  %v3677_v18 = vpack.i.b16 %v3611_v22, %v3611_v22  ;;  %v3770_v61 = vunpack.c.l.bf16 %v3675_v29  ;;  %v3562_v39 = vsel %vm353_vm3, %v8081_v38, %v8087_v51 }
 0x574   : > { %v4018_v60 = vpack.c.b16 %v3986_v17, %v3984_v21  ;;  %v4019_v15 = vpack.c.b16 %v3987_v3, %v3985_v8  ;;  %v3888_v34 = vpack.c.bf16 %v3853_v54, %v3852_v43  ;;  %v3889_v13 = vpack.c.bf16 %v3855_v42, %v3854_v27 }
 0x575   : > { %4053 = vmatpush.bf16.msra.mxu0 %v4000_v26  ;;  %4101 = vmatpush.bf16.msra.mxu2 %v4001_v55  ;;  %v3679_v57 = vperm.slane %v3677_v18, 0  ;;  %v3564_v30 = vrot.slane %v3562_v39, 2  ;;  %v3816_v62 = vmul.f32 %v8091_v2, %v3770_v61  ;;  %v3818_v28 = vmul.f32 %v8099_v40, %v3770_v61 }
 0x576   : > { %4076 = vmatpush.bf16.msra.mxu1 %v4018_v60  ;;  %4124 = vmatpush.bf16.msra.mxu3 %v4019_v15  ;;  %v6835_v22 = vpack.i.b16 %v8089_v25, %v8089_v25  ;;  %v3980_v49 = vunpack.c.l.b16 %v3888_v34  ;;  %v3982_v33 = vunpack.c.l.b16 %v3889_v13  ;;  %v3981_v45 = vunpack.c.h.b16 %v3888_v34 }
 0x577   : > { %v3983_v9 = vunpack.c.h.b16 %v3889_v13  ;;  %v3771_v37 = vunpack.c.l.bf16 %v3679_v57  ;;  %v3581_v35 = vunpack.i.h.s16 %v3564_v30  ;;  %v6839_v41 = vpack.i.b16 %v3564_v30, %v3564_v30 }
 0x578   : > { %v3608_v1 = vperm.slane %v6835_v22, 0  ;;  %v3609_v52 = vperm.slane %v6835_v22, 1  ;;  %v4016_v7 = vpack.c.b16 %v3982_v33, %v3980_v49  ;;  %v3546_v46 = vsel %vm349_vm4, %v8073_v58, %v8076_v63 }
 0x579   : > { %v4017_v50 = vpack.c.b16 %v3983_v9, %v3981_v45  ;;  %v3817_v24 = vmul.f32 %v8097_v48, %v3771_v37  ;;  %v3819_v26 = vmul.f32 %v8101_v44, %v3771_v37  ;;  %v3597_v25 = vpack.i.b16 %v3581_v35, %v3581_v35 }
 0x57a   : > { %v3665_v0 = vpack.i.b16 %v3608_v1, %v3608_v1  ;;  %4077 = vmatpush.bf16.msra.mxu1 %v4016_v7  ;;  %v3669_v36 = vpack.i.b16 %v3609_v52, %v3609_v52  ;;  %v3624_v59 = vperm.slane %v6839_v41, 0  ;;  %v3625_v20 = vperm.slane %v6839_v41, 1 }
 0x57b   : > { %4125 = vmatpush.bf16.msra.mxu3 %v4017_v50  ;;  %v8141_v31 = vrot.slane %v3546_v46, 1  ;;  %v3870_v43 = vpack.c.bf16 %v3817_v24, %v3816_v62  ;;  %v3871_v27 = vpack.c.bf16 %v3819_v26, %v3818_v28  ;;  %v3626_v56 = vperm.slane %v3597_v25, 0 }
 0x57c   : > { %v3627_v29 = vperm.slane %v3597_v25, 1  ;;  %v3667_v21 = vperm.slane %v3665_v0, 0  ;;  %v3671_v17 = vperm.slane %v3669_v36, 0  ;;  %v3729_v8 = vpack.i.b16 %v3624_v59, %v3624_v59 }
 0x57d   : > { %v3733_v3 = vpack.i.b16 %v3625_v20, %v3625_v20  ;;  %v3944_v54 = vunpack.c.l.b16 %v3870_v43  ;;  %v3946_v42 = vunpack.c.l.b16 %v3871_v27  ;;  %v3737_v55 = vpack.i.b16 %v3626_v56, %v3626_v56 }
 0x57e   : > { %v3741_v18 = vpack.i.b16 %v3627_v29, %v3627_v29  ;;  %v3945_v60 = vunpack.c.h.b16 %v3870_v43  ;;  %v3947_v15 = vunpack.c.h.b16 %v3871_v27  ;;  %v3768_v61 = vunpack.c.l.bf16 %v3667_v21 }
 0x57f   : > { %v3769_v39 = vunpack.c.l.bf16 %v3671_v17  ;;  %v3998_v34 = vpack.c.b16 %v3946_v42, %v3944_v54  ;;  %v3739_v13 = vperm.slane %v3737_v55, 0  ;;  %v3731_v30 = vperm.slane %v3729_v8, 0 }
 0x580   : > { %v3743_v57 = vperm.slane %v3741_v18, 0  ;;  %v3999_v62 = vpack.c.b16 %v3947_v15, %v3945_v60  ;;  %v3812_v28 = vmul.f32 %v8091_v2, %v3768_v61  ;;  %v3814_v49 = vmul.f32 %v8099_v40, %v3768_v61 }
 0x581   : > { %v3813_v22 = vmul.f32 %v8097_v48, %v3769_v39  ;;  %4054 = vmatpush.bf16.msra.mxu0 %v3998_v34  ;;  %v3786_v33 = vunpack.c.l.bf16 %v3739_v13  ;;  %v3815_v9 = vmul.f32 %v8101_v44, %v3769_v39  ;;  %v3735_v37 = vperm.slane %v3733_v3, 0 }
 0x582   : > { %v3787_v45 = vunpack.c.l.bf16 %v3743_v57  ;;  %4102 = vmatpush.bf16.msra.mxu2 %v3999_v62  ;;  %v3784_v1 = vunpack.c.l.bf16 %v3731_v30  ;;  %v3571_v52 = vunpack.i.h.s16 %v8141_v31  ;;  %v3559_v7 = vsel %vm349_vm4, %v8081_v38, %v8087_v51 }
 0x583   : > { %v3868_v35 = vpack.c.bf16 %v3813_v22, %v3812_v28  ;;  %v3848_v50 = vmul.f32 %v8091_v2, %v3786_v33  ;;  %v3850_v46 = vmul.f32 %v8099_v40, %v3786_v33  ;;  %v3869_v26 = vpack.c.bf16 %v3815_v9, %v3814_v49 }
 0x584   : > { %v3849_v41 = vmul.f32 %v8097_v48, %v3787_v45  ;;  %v3851_v24 = vmul.f32 %v8101_v44, %v3787_v45  ;;  %v3785_v0 = vunpack.c.l.bf16 %v3735_v37  ;;  %v3844_v36 = vmul.f32 %v8091_v2, %v3784_v1 }
 0x585   : > { %v3940_v25 = vunpack.c.l.b16 %v3868_v35  ;;  %v3846_v43 = vmul.f32 %v8099_v40, %v3784_v1  ;;  %v3941_v27 = vunpack.c.h.b16 %v3868_v35  ;;  %v3942_v56 = vunpack.c.l.b16 %v3869_v26 }
 0x586   : > { %v3886_v59 = vpack.c.bf16 %v3849_v41, %v3848_v50  ;;  %v3887_v20 = vpack.c.bf16 %v3851_v24, %v3850_v46  ;;  %v3845_v29 = vmul.f32 %v8097_v48, %v3785_v0  ;;  %v3847_v21 = vmul.f32 %v8101_v44, %v3785_v0 }
 0x587   : > { %v3943_v17 = vunpack.c.h.b16 %v3869_v26  ;;  %v3996_v55 = vpack.c.b16 %v3942_v56, %v3940_v25  ;;  %v3587_v34 = vpack.i.b16 %v3571_v52, %v3571_v52  ;;  %v3561_v13 = vrot.slane %v3559_v7, 1 }
 0x588   : > { %v3976_v8 = vunpack.c.l.b16 %v3886_v59  ;;  %v3978_v3 = vunpack.c.l.b16 %v3887_v20  ;;  %v3977_v54 = vunpack.c.h.b16 %v3886_v59  ;;  %v3979_v42 = vunpack.c.h.b16 %v3887_v20 }
 0x589   : > { %v3884_v18 = vpack.c.bf16 %v3845_v29, %v3844_v36  ;;  %v3885_v60 = vpack.c.bf16 %v3847_v21, %v3846_v43  ;;  %v3997_v15 = vpack.c.b16 %v3943_v17, %v3941_v27  ;;  %4055 = vmatpush.bf16.msra.mxu0 %v3996_v55  ;;  %v3606_v22 = vperm.slane %v3587_v34, 0 }
 0x58a   : > { %v4014_v61 = vpack.c.b16 %v3978_v3, %v3976_v8  ;;  %v4015_v39 = vpack.c.b16 %v3979_v42, %v3977_v54  ;;  %v3607_v49 = vperm.slane %v3587_v34, 1  ;;  %v3579_v33 = vunpack.i.h.s16 %v3561_v13 }
 0x58b   : > { %v3972_v57 = vunpack.c.l.b16 %v3884_v18  ;;  %v3974_v30 = vunpack.c.l.b16 %v3885_v60  ;;  %4103 = vmatpush.bf16.msra.mxu2 %v3997_v15  ;;  %v3973_v62 = vunpack.c.h.b16 %v3884_v18  ;;  %v3975_v28 = vunpack.c.h.b16 %v3885_v60 }
 0x58c   : > { %4078 = vmatpush.bf16.msra.mxu1 %v4014_v61  ;;  %4126 = vmatpush.bf16.msra.mxu3 %v4015_v39  ;;  %v6834_v45 = vpack.i.b16 %v8141_v31, %v8141_v31  ;;  %v6838_v35 = vpack.i.b16 %v3561_v13, %v3561_v13  ;;  %v8164_v1 = vsel %vm264_vm1, %v8073_v58, %v8076_v63 }
 0x58d   : > { %v4012_v9 = vpack.c.b16 %v3974_v30, %v3972_v57  ;;  %v4013_v37 = vpack.c.b16 %v3975_v28, %v3973_v62  ;;  %v3657_v52 = vpack.i.b16 %v3606_v22, %v3606_v22  ;;  %v3661_v7 = vpack.i.b16 %v3607_v49, %v3607_v49 }
 0x58e   : > { %v3595_v50 = vpack.i.b16 %v3579_v33, %v3579_v33  ;;  %v3604_v41 = vperm.slane %v6834_v45, 0  ;;  %v3605_v46 = vperm.slane %v6834_v45, 1  ;;  %v3620_v24 = vperm.slane %v6838_v35, 0 }
 0x58f   : > { %v3621_v26 = vperm.slane %v6838_v35, 1  ;;  %v3659_v25 = vperm.slane %v3657_v52, 0  ;;  %v3663_v0 = vperm.slane %v3661_v7, 0 }
 0x590   : > { %4079 = vmatpush.bf16.msra.mxu1 %v4012_v9  ;;  %4127 = vmatpush.bf16.msra.mxu3 %v4013_v37  ;;  %v3622_v31 = vperm.slane %v3595_v50, 0  ;;  %v3623_v36 = vperm.slane %v3595_v50, 1  ;;  %v3649_v59 = vpack.i.b16 %v3604_v41, %v3604_v41  ;;  %v3653_v20 = vpack.i.b16 %v3605_v46, %v3605_v46 }
 0x591   : > { %v3713_v43 = vpack.i.b16 %v3620_v24, %v3620_v24  ;;  %v3717_v27 = vpack.i.b16 %v3621_v26, %v3621_v26  ;;  %v3766_v56 = vunpack.c.l.bf16 %v3659_v25  ;;  %v3767_v58 = vunpack.c.l.bf16 %v3663_v0 }
 0x592   : > { %v3721_v63 = vpack.i.b16 %v3622_v31, %v3622_v31  ;;  %v3725_v29 = vpack.i.b16 %v3623_v36, %v3623_v36  ;;  %v3651_v21 = vperm.slane %v3649_v59, 0  ;;  %v3655_v17 = vperm.slane %v3653_v20, 0 }
 0x593   : > { %v3715_v8 = vperm.slane %v3713_v43, 0  ;;  %v3719_v3 = vperm.slane %v3717_v27, 0  ;;  %v3808_v54 = vmul.f32 %v8091_v2, %v3766_v56  ;;  %v3809_v42 = vmul.f32 %v8097_v48, %v3767_v58 }
 0x594   : > { %v3810_v55 = vmul.f32 %v8099_v40, %v3766_v56  ;;  %v3811_v18 = vmul.f32 %v8101_v44, %v3767_v58  ;;  %v3723_v60 = vperm.slane %v3721_v63, 0  ;;  %v3727_v15 = vperm.slane %v3725_v29, 0 }
 0x595   : > { %v3764_v61 = vunpack.c.l.bf16 %v3651_v21  ;;  %v3765_v39 = vunpack.c.l.bf16 %v3655_v17  ;;  %v3866_v34 = vpack.c.bf16 %v3809_v42, %v3808_v54  ;;  %v3780_v57 = vunpack.c.l.bf16 %v3715_v8 }
 0x596   : > { %v3867_v13 = vpack.c.bf16 %v3811_v18, %v3810_v55  ;;  %v3781_v30 = vunpack.c.l.bf16 %v3719_v3  ;;  %v3782_v62 = vunpack.c.l.bf16 %v3723_v60  ;;  %v3783_v28 = vunpack.c.l.bf16 %v3727_v15 }
 0x597   : > { %v3804_v22 = vmul.f32 %v8091_v2, %v3764_v61  ;;  %v3805_v49 = vmul.f32 %v8097_v48, %v3765_v39  ;;  %v3936_v33 = vunpack.c.l.b16 %v3866_v34  ;;  %v3937_v9 = vunpack.c.h.b16 %v3866_v34 }
 0x598   : > { %v3938_v45 = vunpack.c.l.b16 %v3867_v13  ;;  %v3939_v37 = vunpack.c.h.b16 %v3867_v13  ;;  %v3840_v35 = vmul.f32 %v8091_v2, %v3782_v62  ;;  %v3841_v52 = vmul.f32 %v8097_v48, %v3783_v28 }
 0x599   : > { %v3842_v7 = vmul.f32 %v8099_v40, %v3782_v62  ;;  %v3843_v50 = vmul.f32 %v8101_v44, %v3783_v28  ;;  %v3806_v24 = vmul.f32 %v8099_v40, %v3764_v61  ;;  %v3807_v26 = vmul.f32 %v8101_v44, %v3765_v39 }
 0x59a   : > { %v3994_v41 = vpack.c.b16 %v3938_v45, %v3936_v33  ;;  %v3995_v46 = vpack.c.b16 %v3939_v37, %v3937_v9  ;;  %v3882_v25 = vpack.c.bf16 %v3841_v52, %v3840_v35  ;;  %v3864_v31 = vpack.c.bf16 %v3805_v49, %v3804_v22 }
 0x59b   : > { %v3883_v0 = vpack.c.bf16 %v3843_v50, %v3842_v7  ;;  %v3836_v36 = vmul.f32 %v8091_v2, %v3780_v57  ;;  %v3865_v59 = vpack.c.bf16 %v3807_v26, %v3806_v24  ;;  %v3837_v20 = vmul.f32 %v8097_v48, %v3781_v30 }
 0x59c   : > { %4056 = vmatpush.bf16.msra.mxu0 %v3994_v41  ;;  %4104 = vmatpush.bf16.msra.mxu2 %v3995_v46  ;;  %v3838_v43 = vmul.f32 %v8099_v40, %v3780_v57  ;;  %v3569_v27 = vunpack.i.h.s16 %v8164_v1  ;;  %v3968_v56 = vunpack.c.l.b16 %v3882_v25  ;;  %v3969_v63 = vunpack.c.h.b16 %v3882_v25 }
 0x59d   : > { %v3970_v58 = vunpack.c.l.b16 %v3883_v0  ;;  %v3971_v29 = vunpack.c.h.b16 %v3883_v0  ;;  %v3932_v21 = vunpack.c.l.b16 %v3864_v31  ;;  %v3934_v17 = vunpack.c.l.b16 %v3865_v59 }
 0x59e   : > { %v3839_v8 = vmul.f32 %v8101_v44, %v3781_v30  ;;  %v3880_v3 = vpack.c.bf16 %v3837_v20, %v3836_v36  ;;  %v3933_v55 = vunpack.c.h.b16 %v3864_v31  ;;  %v3935_v18 = vunpack.c.h.b16 %v3865_v59 }
 0x59f   : > { %v4010_v54 = vpack.c.b16 %v3970_v58, %v3968_v56  ;;  %v4011_v42 = vpack.c.b16 %v3971_v29, %v3969_v63  ;;  %v3992_v60 = vpack.c.b16 %v3934_v17, %v3932_v21  ;;  %v3585_v13 = vpack.i.b16 %v3569_v27, %v3569_v27 }
 0x5a0   : > { %v3881_v15 = vpack.c.bf16 %v3839_v8, %v3838_v43  ;;  %v3964_v61 = vunpack.c.l.b16 %v3880_v3  ;;  %v3965_v39 = vunpack.c.h.b16 %v3880_v3  ;;  %v3993_v34 = vpack.c.b16 %v3935_v18, %v3933_v55 }
 0x5a1   : > { %4080 = vmatpush.bf16.msra.mxu1 %v4010_v54  ;;  %4128 = vmatpush.bf16.msra.mxu3 %v4011_v42  ;;  %v3557_v57 = vsel %vm264_vm1, %v8081_v38, %v8087_v51  ;;  %v6833_v22 = vpack.i.b16 %v8164_v1, %v8164_v1  ;;  %v3602_v49 = vperm.slane %v3585_v13, 0  ;;  %v3603_v33 = vperm.slane %v3585_v13, 1 }
 0x5a2   : > { %4057 = vmatpush.bf16.msra.mxu0 %v3992_v60  ;;  %v3966_v62 = vunpack.c.l.b16 %v3881_v15  ;;  %v3967_v30 = vunpack.c.h.b16 %v3881_v15  ;;  %v3577_v28 = vunpack.i.h.s16 %v3557_v57  ;;  %4105 = vmatpush.bf16.msra.mxu2 %v3993_v34  ;;  %v6837_v45 = vpack.i.b16 %v3557_v57, %v3557_v57 }
 0x5a3   : > { %v3600_v52 = vperm.slane %v6833_v22, 0  ;;  %v3641_v7 = vpack.i.b16 %v3602_v49, %v3602_v49  ;;  %v3645_v50 = vpack.i.b16 %v3603_v33, %v3603_v33  ;;  %v3601_v41 = vperm.slane %v6833_v22, 1 }
 0x5a4   : > { %v4008_v9 = vpack.c.b16 %v3966_v62, %v3964_v61  ;;  %v4009_v37 = vpack.c.b16 %v3967_v30, %v3965_v39  ;;  %v3593_v35 = vpack.i.b16 %v3577_v28, %v3577_v28  ;;  %v3616_v46 = vperm.slane %v6837_v45, 0 }
 0x5a5   : > { %v3633_v24 = vpack.i.b16 %v3600_v52, %v3600_v52  ;;  %v3617_v26 = vperm.slane %v6837_v45, 1  ;;  %v3643_v25 = vperm.slane %v3641_v7, 0  ;;  %v3647_v1 = vperm.slane %v3645_v50, 0 }
 0x5a6   : > { %4081 = vmatpush.bf16.msra.mxu1 %v4008_v9  ;;  %4129 = vmatpush.bf16.msra.mxu3 %v4009_v37  ;;  %v3618_v38 = vperm.slane %v3593_v35, 0  ;;  %v3619_v51 = vperm.slane %v3593_v35, 1  ;;  %v3637_v0 = vpack.i.b16 %v3601_v41, %v3601_v41  ;;  %v3697_v31 = vpack.i.b16 %v3616_v46, %v3616_v46 }
 0x5a7   : > { %v3635_v20 = vperm.slane %v3633_v24, 0  ;;  %v3701_v43 = vpack.i.b16 %v3617_v26, %v3617_v26  ;;  %v3762_v27 = vunpack.c.l.bf16 %v3643_v25  ;;  %v3763_v56 = vunpack.c.l.bf16 %v3647_v1 }
 0x5a8   : > { %v3705_v36 = vpack.i.b16 %v3618_v38, %v3618_v38  ;;  %v3709_v59 = vpack.i.b16 %v3619_v51, %v3619_v51  ;;  %v3639_v58 = vperm.slane %v3637_v0, 0  ;;  %v3699_v63 = vperm.slane %v3697_v31, 0 }
 0x5a9   : > { %v3760_v17 = vunpack.c.l.bf16 %v3635_v20  ;;  %v3703_v8 = vperm.slane %v3701_v43, 0  ;;  %v3800_v3 = vmul.f32 %v8091_v2, %v3762_v27  ;;  %v3801_v54 = vmul.f32 %v8097_v48, %v3763_v56 }
 0x5aa   : > { %v3707_v29 = vperm.slane %v3705_v36, 0  ;;  %v3711_v21 = vperm.slane %v3709_v59, 0  ;;  %v3802_v42 = vmul.f32 %v8099_v40, %v3762_v27  ;;  %v3803_v55 = vmul.f32 %v8101_v44, %v3763_v56 }
 0x5ab   : > { %v3761_v15 = vunpack.c.l.bf16 %v3639_v58  ;;  %v3796_v61 = vmul.f32 %v8091_v2, %v3760_v17  ;;  %v3862_v39 = vpack.c.bf16 %v3801_v54, %v3800_v3  ;;  %v3798_v13 = vmul.f32 %v8099_v40, %v3760_v17 }
 0x5ac   : > { %v3778_v18 = vunpack.c.l.bf16 %v3707_v29  ;;  %v3779_v60 = vunpack.c.l.bf16 %v3711_v21  ;;  %v3863_v34 = vpack.c.bf16 %v3803_v55, %v3802_v42  ;;  %v3776_v57 = vunpack.c.l.bf16 %v3699_v63 }
 0x5ad   : > { %v3928_v49 = vunpack.c.l.b16 %v3862_v39  ;;  %v3929_v45 = vunpack.c.h.b16 %v3862_v39  ;;  %v3797_v52 = vmul.f32 %v8097_v48, %v3761_v15  ;;  %v3799_v7 = vmul.f32 %v8101_v44, %v3761_v15 }
 0x5ae   : > { %v3832_v62 = vmul.f32 %v8091_v2, %v3778_v18  ;;  %v3833_v30 = vmul.f32 %v8097_v48, %v3779_v60  ;;  %v3834_v28 = vmul.f32 %v8099_v40, %v3778_v18  ;;  %v3835_v22 = vmul.f32 %v8101_v44, %v3779_v60 }
 0x5af   : > { %v3930_v33 = vunpack.c.l.b16 %v3863_v34  ;;  %v3931_v9 = vunpack.c.h.b16 %v3863_v34  ;;  %v3777_v46 = vunpack.c.l.bf16 %v3703_v8  ;;  %v3828_v38 = vmul.f32 %v8091_v2, %v3776_v57 }
 0x5b0   : > { %v3878_v37 = vpack.c.bf16 %v3833_v30, %v3832_v62  ;;  %v3879_v35 = vpack.c.bf16 %v3835_v22, %v3834_v28  ;;  %v3860_v1 = vpack.c.bf16 %v3797_v52, %v3796_v61  ;;  %v3861_v0 = vpack.c.bf16 %v3799_v7, %v3798_v13 }
 0x5b1   : > { %v3990_v50 = vpack.c.b16 %v3930_v33, %v3928_v49  ;;  %v3991_v41 = vpack.c.b16 %v3931_v9, %v3929_v45  ;;  %v3829_v31 = vmul.f32 %v8097_v48, %v3777_v46  ;;  %v3830_v20 = vmul.f32 %v8099_v40, %v3776_v57 }
 0x5b2   : > { %v3960_v51 = vunpack.c.l.b16 %v3878_v37  ;;  %v3962_v24 = vunpack.c.l.b16 %v3879_v35  ;;  %v3961_v26 = vunpack.c.h.b16 %v3878_v37  ;;  %v3963_v25 = vunpack.c.h.b16 %v3879_v35 }
 0x5b3   : > { %4058 = vmatpush.bf16.msra.mxu0 %v3990_v50  ;;  %4106 = vmatpush.bf16.msra.mxu2 %v3991_v41  ;;  %v3831_v43 = vmul.f32 %v8101_v44, %v3777_v46  ;;  %v3924_v27 = vunpack.c.l.b16 %v3860_v1  ;;  %v3926_v56 = vunpack.c.l.b16 %v3861_v0  ;;  %v3876_v58 = vpack.c.bf16 %v3829_v31, %v3828_v38  ;;  %v8221_v44 = vld [vmem:[%s8218_s2] ss:$8 sm:$0x3] }
 0x5b4   : > { %v4006_v36 = vpack.c.b16 %v3962_v24, %v3960_v51  ;;  %v4007_v59 = vpack.c.b16 %v3963_v25, %v3961_v26  ;;  %v3925_v2 = vunpack.c.h.b16 %v3860_v1  ;;  %v3927_v29 = vunpack.c.h.b16 %v3861_v0 }
 0x5b5   : > { %v3877_v63 = vpack.c.bf16 %v3831_v43, %v3830_v20  ;;  %v3988_v21 = vpack.c.b16 %v3926_v56, %v3924_v27  ;;  %v3956_v17 = vunpack.c.l.b16 %v3876_v58  ;;  %v3957_v8 = vunpack.c.h.b16 %v3876_v58 }
 0x5b6   : > { %4082 = vmatpush.bf16.msra.mxu1 %v4006_v36  ;;  %4130 = vmatpush.bf16.msra.mxu3 %v4007_v59  ;;  %v3989_v54 = vpack.c.b16 %v3927_v29, %v3925_v2  ;;  %v3467_v55 = vstv %s3466_s30 }
 0x5b7   : > { %v3958_v3 = vunpack.c.l.b16 %v3877_v63  ;;  %v3959_v48 = vunpack.c.h.b16 %v3877_v63  ;;  %4059 = vmatpush.bf16.msra.mxu0 %v3988_v21  ;;  %v3468_v18 = vadd.f32 %v3467_v55, %v8221_v44 }
 0x5b8   : > { %4107 = vmatpush.bf16.msra.mxu2 %v3989_v54 }
 0x5b9   : > { %v4004_v42 = vpack.c.b16 %v3958_v3, %v3956_v17  ;;  %v4005_v40 = vpack.c.b16 %v3959_v48, %v3957_v8  ;;  %v3472_v60 = vperm.slane %v3468_v18, 0  ;;  %v3473_v34 = vperm.slane %v3468_v18, 1 }
 0x5ba   : > { %4060 = vmatmul.bf16.vlgmr.msra.gmra.mxu0 %v7310_v47 }
 0x5bb   : > { %4083 = vmatpush.bf16.msra.mxu1 %v4004_v42  ;;  %4131 = vmatpush.bf16.msra.mxu3 %v4005_v40  ;;  %v3476_v15 = vsub.f32 %v7152_v5, %v3472_v60  ;;  %v3478_v61 = vsub.f32 %v7154_v6, %v3472_v60  ;;  %v3477_v30 = vsub.f32 %v7152_v5, %v3473_v34 }
 0x5bc   : > { %4108 = vmatmul.bf16.vlgmr.msra.gmra.mxu2 %v7310_v47  ;;  %v3479_v28 = vsub.f32 %v7154_v6, %v3473_v34 }
 0x5bd   : > { %v3480_v57 = vand.u32 2147483647, %v3476_v15  ;;  %v3482_v62 = vand.u32 2147483647, %v3478_v61  ;;  %v3481_v35 = vand.u32 2147483647, %v3477_v30 }
 0x5be   : > { %4084 = vmatmul.bf16.vlgmr.msra.gmra.mxu1 %v7316_v10  ;;  %4132 = vmatmul.bf16.vlgmr.msra.gmra.mxu3 %v7316_v10  ;;  %v3483_v52 = vand.u32 2147483647, %v3479_v28 }
 0x5bf   : > { %v3484_v49 = vsub.f32 1.0, %v3480_v57  ;;  %v3486_v33 = vsub.f32 1.0, %v3482_v62  ;;  %v3485_v51 = vsub.f32 1.0, %v3481_v35 }
 0x5c0   : > { %v3487_v26 = vsub.f32 1.0, %v3483_v52 }
 0x5c1   : > { %v8228_v50 = vmax.f32 %v3484_v49, 0.0  ;;  %v8230_v41 = vmax.f32 %v3486_v33, 0.0  ;;  %v8234_v59 = vmax.f32 %v3485_v51, 0.0 }
 0x5c2   : > { %v8236_v43 = vmax.f32 %v3487_v26, 0.0 }
 0x5ca   : > { %4065 = vmatmul.bf16.gmra.mxu0 %v7320_v11 }
 0x5cc   : > { %4113 = vmatmul.bf16.gmra.mxu2 %v7320_v11 }
 0x5ce   : > { %4089 = vmatmul.bf16.gmra.mxu1 %v7324_v16  ;;  %4137 = vmatmul.bf16.gmra.mxu3 %v7324_v16 }
 0x5da   : > { %4070 = vmatmul.bf16.gmra.mxu0 %v7328_v19 }
 0x5dc   : > { %4118 = vmatmul.bf16.gmra.mxu2 %v7328_v19 }
 0x5de   : > { %4094 = vmatmul.bf16.gmra.mxu1 %v7332_v23  ;;  %4142 = vmatmul.bf16.gmra.mxu3 %v7332_v23 }
 0x637   : > { %v4061_v39 = vpop.f32.mrf.mxu0 }
 0x63b   : > { %v4085_v13 = vpop.f32.mrf.mxu1 }
 0x63c   : > { %v4086_v37 = vadd.f32 %v4085_v13, %v4061_v39 }
 0x63e   : > { %v4148_v38 = vmul.f32 %v4086_v37, %v8228_v50 }
 0x63f   : > { %v4109_v22 = vpop.f32.mrf.mxu2  ;;  %v4063_v9 = vpop.f32.mrf.mxu0 }
 0x641   : > { %v4133_v45 = vpop.f32.mrf.mxu3 }
 0x642   : > { %v4134_v1 = vadd.f32 %v4133_v45, %v4109_v22 }
 0x643   : > { %v4087_v7 = vpop.f32.mrf.mxu1 }
 0x644   : > { %v4088_v46 = vadd.f32 %v4087_v7, %v4063_v9  ;;  %v4149_v58 = vmul.f32 %v4134_v1, %v8234_v59 }
 0x646   : > { %v4150_v24 = vmul.f32 %v4088_v46, %v8230_v41 }
 0x647   : > { %v4111_v25 = vpop.f32.mrf.mxu2  ;;  %v4066_v36 = vpop.f32.mrf.mxu0 }
 0x648   : > { %v4160_v0 = vadd.f32 %v4150_v24, %v4148_v38 }
 0x649   : > { %v4135_v31 = vpop.f32.mrf.mxu3 }
 0x64a   : > { %v4161_v20 = vrot.slane %v4160_v0, 4  ;;  %v4136_v27 = vadd.f32 %v4135_v31, %v4111_v25 }
 0x64b   : > { %v4090_v56 = vpop.f32.mrf.mxu1 }
 0x64c   : > { %v4162_v2 = vadd.f32 %v4161_v20, %v4160_v0  ;;  %v4151_v63 = vmul.f32 %v4136_v27, %v8236_v43  ;;  %v4091_v42 = vadd.f32 %v4090_v56, %v4066_v36 }
 0x64e   : > { %v4167_v29 = vadd.f32 %v4151_v63, %v4149_v58  ;;  %v4163_v21 = vrot.slane %v4162_v2, 2  ;;  %v4152_v61 = vmul.f32 %v4091_v42, %v8228_v50 }
 0x64f   : > { %v4114_v17 = vpop.f32.mrf.mxu2  ;;  %v4068_v54 = vpop.f32.mrf.mxu0 }
 0x650   : > { %v4168_v8 = vrot.slane %v4167_v29, 4  ;;  %v4164_v40 = vadd.f32 %v4163_v21, %v4162_v2 }
 0x651   : > { %v4138_v3 = vpop.f32.mrf.mxu3 }
 0x652   : > { %v4169_v48 = vadd.f32 %v4168_v8, %v4167_v29  ;;  %v4165_v34 = vrot.slane %v4164_v40, 1  ;;  %v4139_v62 = vadd.f32 %v4138_v3, %v4114_v17 }
 0x653   : > { %v4092_v55 = vpop.f32.mrf.mxu1 }
 0x654   : > { %v4170_v18 = vrot.slane %v4169_v48, 2  ;;  %v4093_v60 = vadd.f32 %v4092_v55, %v4068_v54  ;;  %v4166_v9 = vadd.f32 %v4165_v34, %v4164_v40  ;;  %v4153_v52 = vmul.f32 %v4139_v62, %v8234_v59 }
 0x656   : > { %v4171_v15 = vadd.f32 %v4170_v18, %v4169_v48  ;;  %v4154_v39 = vmul.f32 %v4093_v60, %v8230_v41 }
 0x657   : > { %v4116_v13 = vpop.f32.mrf.mxu2  ;;  %v4071_v22 = vpop.f32.mrf.mxu0 }
 0x658   : > { %v4172_v57 = vrot.slane %v4171_v15, 1  ;;  %v4174_v30 = vadd.f32 %v4154_v39, %v4152_v61 }
 0x659   : > { %v4140_v28 = vpop.f32.mrf.mxu3 }
 0x65a   : > { %v4173_v49 = vadd.f32 %v4172_v57, %v4171_v15  ;;  %v4175_v33 = vrot.slane %v4174_v30, 4  ;;  %v4141_v45 = vadd.f32 %v4140_v28, %v4116_v13 }
 0x65b   : > { %v4095_v37 = vpop.f32.mrf.mxu1 }
 0x65c   : > { %v4204_v35 = vrot.slane %v4173_v49, 7  ;;  %v4176_v7 = vadd.f32 %v4175_v33, %v4174_v30  ;;  %v4155_v46 = vmul.f32 %v4141_v45, %v8236_v43  ;;  %v4096_v20 = vadd.f32 %v4095_v37, %v4071_v22 }
 0x65e   : > { %v4205_v38 = vsel %vm264_vm1, %v4166_v9, %v4204_v35  ;;  %v4181_v51 = vadd.f32 %v4155_v46, %v4153_v52  ;;  %v4177_v26 = vrot.slane %v4176_v7, 2  ;;  %v4156_v29 = vmul.f32 %v4096_v20, %v8228_v50 }
 0x65f   : > { %v4207_v24 = vadd.f32 %v4205_v38, %v8221_v44  ;;  %v4119_v25 = vpop.f32.mrf.mxu2  ;;  %v4073_v31 = vpop.f32.mrf.mxu0 }
 0x660   : > { %v4182_v1 = vrot.slane %v4181_v51, 4  ;;  %v4178_v27 = vadd.f32 %v4177_v26, %v4176_v7 }
 0x661   : > { %4208 = vst.msk [vmem:[%s8218_s2] ss:$8 sm:$0x3] %vm7366_vm5, %v4207_v24  ;;  %v4143_v0 = vpop.f32.mrf.mxu3  ;;  %s5026_s2 = sadd.s32 22, %s7135_s23 }
 0x662   : > { %v4183_v36 = vadd.f32 %v4182_v1, %v4181_v51  ;;  %v4179_v44 = vrot.slane %v4178_v27, 1  ;;  %v4144_v3 = vadd.f32 %v4143_v0, %v4119_v25  ;;  %s5027_s4 = sshra.s32 %s5026_s2, 3  ;;  %s5030_s6 = sand.u32 7, %s5026_s2 }
 0x663   : > { %v4097_v56 = vpop.f32.mrf.mxu1  ;;  %s6910_s7 = sshll.u32 %s5027_s4, 4  ;;  %s5826_s2 = sadd.s32 39, %s7135_s23 }
 0x664   : > { %v4184_v58 = vrot.slane %v4183_v36, 2  ;;  %v4098_v2 = vadd.f32 %v4097_v56, %v4073_v31  ;;  %v4180_v18 = vadd.f32 %v4179_v44, %v4178_v27  ;;  %v4157_v15 = vmul.f32 %v4144_v3, %v8234_v59  ;;  %s5033_s17 = sadd.s32 %s6910_s7, %s5030_s6  ;;  %s5827_s4 = sshra.s32 %s5826_s2, 3 }
 0x665   : > { %s5830_s7 = sand.u32 7, %s5826_s2  ;;  %s6914_s8 = sshll.u32 %s5827_s4, 4 }
 0x666   : > { %v4185_v63 = vadd.f32 %v4184_v58, %v4183_v36  ;;  %v4158_v21 = vmul.f32 %v4098_v2, %v8230_v41 }
 0x667   : > { %v4121_v17 = vpop.f32.mrf.mxu2 }
 0x668   : > { %v4186_v8 = vrot.slane %v4185_v63, 1  ;;  %v4188_v54 = vadd.f32 %v4158_v21, %v4156_v29 }
 0x669   : > { %v4145_v48 = vpop.f32.mrf.mxu3 }
 0x66a   : > { %v4187_v42 = vadd.f32 %v4186_v8, %v4185_v63  ;;  %v4189_v40 = vrot.slane %v4188_v54, 4  ;;  %v4146_v55 = vadd.f32 %v4145_v48, %v4121_v17 }
 0x66c   : > { %v4212_v60 = vrot.slane %v4187_v42, 7  ;;  %v4190_v61 = vadd.f32 %v4189_v40, %v4188_v54  ;;  %v4159_v50 = vmul.f32 %v4146_v55, %v8236_v43 }
 0x66e   : > { %v4213_v41 = vsel %vm264_vm1, %v4180_v18, %v4212_v60  ;;  %v4195_v39 = vadd.f32 %v4159_v50, %v4157_v15  ;;  %v4191_v13 = vrot.slane %v4190_v61, 2 }
 0x66f   : > { %v4215_v34 = vadd.f32 %v4213_v41, %v8056_v14 }
 0x670   : > { %v4196_v57 = vrot.slane %v4195_v39, 4  ;;  %v4192_v30 = vadd.f32 %v4191_v13, %v4190_v61 }
 0x671   : > { %4216 = vst.msk [vmem:[%s8050_s21] ss:$8 sm:$0x3] %vm7366_vm5, %v4215_v34  ;;  %s8269_s21 = scalar_lea.vmem %s7094_s22, %s4253_s19  ;;  %s8482_s19 = scalar_lea.vmem %s7094_s22, %s5033_s17 }
 0x672   : > { %v4197_v62 = vadd.f32 %v4196_v57, %v4195_v39  ;;  %v4193_v59 = vrot.slane %v4192_v30, 1  ;;  %s5833_s17 = sadd.s32 %s6914_s8, %s5830_s7 }
 0x674   : > { %v4198_v28 = vrot.slane %v4197_v62, 2  ;;  %v4194_v33 = vadd.f32 %v4193_v59, %v4192_v30 }
 0x676   : > { %v4199_v22 = vadd.f32 %v4198_v28, %v4197_v62 }
 0x678   : > { %v4200_v49 = vrot.slane %v4199_v22, 1 }
 0x67a   : > { %v4201_v43 = vadd.f32 %v4200_v49, %v4199_v22 }
 0x67c   : > { %v4220_v14 = vrot.slane %v4201_v43, 7 }
 0x67e   : > { %v4221_v45 = vsel %vm264_vm1, %v4194_v33, %v4220_v14 }
 0x67f   : > { %v4223_v9 = vadd.f32 %v4221_v45, %v8059_v32 }
 0x681   : > { %4224 = vst.msk [vmem:[%s8053_s24] ss:$8 sm:$0x3] %vm7366_vm5, %v4223_v9  ;;  %s4226_s24 = sadd.s32 5, %s7135_s23 }
 0x682   : > { %s4227_s27 = sshra.s32 %s4226_s24, 3  ;;  %s4230_s25 = sand.u32 7, %s4226_s24 }
 0x683   : > { %s6906_s26 = sshll.u32 %s4227_s27, 4  ;;  %s4256_s29 = scvt.s32.f32 %s4226_s24 }
 0x684   : > { %s4233_s28 = sadd.s32 %s6906_s26, %s4230_s25 }
 0x685   : > { %s8434_s30 = scalar_lea.vmem %s7094_s22, %s4233_s28 }
 0x688   : > { %v8272_v37 = vld [vmem:[%s8266_s20] ss:$8 sm:$0x3] }
 0x689   : > { %v8275_v35 = vld [vmem:[%s8269_s21] ss:$8 sm:$0x3]  ;;  %v4259_v32 = vadd.f32 %v8272_v37, %v7150_v4 }
 0x68a   : > { %v4260_v52 = vadd.f32 %v8275_v35, %v7162_v12 }
 0x68b   : > { %v4283_v7 = vperm.slane %v4259_v32, 0  ;;  %v4284_v46 = vperm.slane %v4259_v32, 1 }
 0x68c   : > { %v4306_v38 = vperm.slane %v4260_v52, 0  ;;  %v4307_v51 = vperm.slane %v4260_v52, 1 }
 0x68d   : > { %v4287_v24 = vsub.f32 %v7152_v5, %v4283_v7  ;;  %v4288_v26 = vsub.f32 %v7152_v5, %v4284_v46  ;;  %v4289_v63 = vsub.f32 %v7154_v6, %v4283_v7  ;;  %v4290_v17 = vsub.f32 %v7154_v6, %v4284_v46 }
 0x68e   : > { %v4310_v25 = vsub.f32 %v7152_v5, %v4306_v38  ;;  %v4311_v1 = vsub.f32 %v7152_v5, %v4307_v51  ;;  %v4312_v0 = vsub.f32 %v7154_v6, %v4306_v38  ;;  %v4313_v31 = vsub.f32 %v7154_v6, %v4307_v51 }
 0x68f   : > { %v4291_v36 = vand.u32 2147483647, %v4287_v24  ;;  %v4292_v20 = vand.u32 2147483647, %v4288_v26  ;;  %v4293_v54 = vand.u32 2147483647, %v4289_v63 }
 0x690   : > { %v4314_v27 = vand.u32 2147483647, %v4310_v25  ;;  %v4315_v56 = vand.u32 2147483647, %v4311_v1  ;;  %v4316_v58 = vand.u32 2147483647, %v4312_v0 }
 0x691   : > { %v4317_v2 = vand.u32 2147483647, %v4313_v31  ;;  %v4295_v29 = vsub.f32 1.0, %v4291_v36  ;;  %v4296_v21 = vsub.f32 1.0, %v4292_v20  ;;  %v4294_v55 = vand.u32 2147483647, %v4290_v17 }
 0x692   : > { %v4318_v44 = vsub.f32 1.0, %v4314_v27  ;;  %v4319_v8 = vsub.f32 1.0, %v4315_v56  ;;  %v4320_v3 = vsub.f32 1.0, %v4316_v58  ;;  %v4297_v18 = vsub.f32 1.0, %v4293_v54 }
 0x693   : > { %v4299_v48 = vmax.f32 %v4295_v29, 0.0  ;;  %v4300_v42 = vmax.f32 %v4296_v21, 0.0  ;;  %v4321_v40 = vsub.f32 1.0, %v4317_v2  ;;  %v4298_v50 = vsub.f32 1.0, %v4294_v55 }
 0x694   : > { %v4322_v15 = vmax.f32 %v4318_v44, 0.0  ;;  %v4323_v61 = vmax.f32 %v4319_v8, 0.0  ;;  %v4301_v41 = vmax.f32 %v4297_v18, 0.0  ;;  %v4324_v39 = vmax.f32 %v4320_v3, 0.0 }
 0x695   : > { %v8289_v60 = vpack.c.bf16 %v4300_v42, %v4299_v48  ;;  %v4325_v34 = vmax.f32 %v4321_v40, 0.0  ;;  %v4302_v57 = vmax.f32 %v4298_v50, 0.0 }
 0x696   : > { %v4326_v62 = vpack.c.bf16 %v4323_v61, %v4322_v15 }
 0x697   : > { %v8292_v13 = vrot.slane %v8289_v60, 3  ;;  %v8297_v28 = vpack.c.bf16 %v4302_v57, %v4301_v41  ;;  %v4327_v49 = vpack.c.bf16 %v4325_v34, %v4324_v39 }
 0x698   : > { %v8307_v9 = vunpack.c.l.bf16 %v4326_v62  ;;  %v8313_v24 = vunpack.c.h.bf16 %v4326_v62 }
 0x699   : > { %v4342_v30 = vsel %vm357_vm2, %v8289_v60, %v8292_v13  ;;  %v4339_v59 = vsel %vm353_vm3, %v8289_v60, %v8292_v13  ;;  %v8303_v43 = vrot.slane %v8297_v28, 3  ;;  %v8315_v26 = vunpack.c.l.bf16 %v4327_v49 }
 0x69a   : > { %v4344_v22 = vrot.slane %v4342_v30, 3  ;;  %v8305_v33 = vrot.slane %v4339_v59, 2  ;;  %v8317_v25 = vunpack.c.h.bf16 %v4327_v49 }
 0x69b   : > { %v4355_v32 = vsel %vm357_vm2, %v8297_v28, %v8303_v43 }
 0x69c   : > { %v4365_v14 = vunpack.i.h.s16 %v4344_v22  ;;  %v6850_v45 = vpack.i.b16 %v4344_v22, %v4344_v22  ;;  %v4363_v52 = vunpack.i.h.s16 %v8305_v33  ;;  %v4357_v46 = vrot.slane %v4355_v32, 3 }
 0x69e   : > { %v4381_v7 = vpack.i.b16 %v4365_v14, %v4365_v14  ;;  %v4402_v38 = vperm.slane %v6850_v45, 0  ;;  %v4403_v51 = vperm.slane %v6850_v45, 1  ;;  %v8319_v1 = vpack.i.b16 %v4363_v52, %v4363_v52 }
 0x69f   : > { %v4373_v36 = vunpack.i.h.s16 %v4357_v46  ;;  %v6854_v56 = vpack.i.b16 %v4357_v46, %v4357_v46 }
 0x6a0   : > { %v4404_v0 = vperm.slane %v4381_v7, 0  ;;  %v4405_v31 = vperm.slane %v4381_v7, 1  ;;  %v4471_v20 = vpack.i.b16 %v4402_v38, %v4402_v38  ;;  %v4475_v27 = vpack.i.b16 %v4403_v51, %v4403_v51 }
 0x6a1   : > { %v4400_v58 = vperm.slane %v8319_v1, 0  ;;  %v4401_v2 = vperm.slane %v8319_v1, 1  ;;  %v4389_v21 = vpack.i.b16 %v4373_v36, %v4373_v36  ;;  %v4418_v8 = vperm.slane %v6854_v56, 0 }
 0x6a2   : > { %v4479_v63 = vpack.i.b16 %v4404_v0, %v4404_v0  ;;  %v4483_v29 = vpack.i.b16 %v4405_v31, %v4405_v31  ;;  %v4473_v44 = vperm.slane %v4471_v20, 0  ;;  %v4477_v17 = vperm.slane %v4475_v27, 0 }
 0x6a3   : > { %v4419_v3 = vperm.slane %v6854_v56, 1  ;;  %v8323_v54 = vpack.i.b16 %v4400_v58, %v4400_v58  ;;  %v4420_v40 = vperm.slane %v4389_v21, 0  ;;  %v4421_v55 = vperm.slane %v4389_v21, 1 }
 0x6a4   : > { %v4481_v48 = vperm.slane %v4479_v63, 0  ;;  %v4485_v42 = vperm.slane %v4483_v29, 0  ;;  %v4562_v18 = vunpack.c.l.bf16 %v4473_v44  ;;  %v4563_v15 = vunpack.c.l.bf16 %v4477_v17 }
 0x6a5   : > { %v4535_v61 = vpack.i.b16 %v4418_v8, %v4418_v8  ;;  %v4539_v50 = vpack.i.b16 %v4419_v3, %v4419_v3  ;;  %v4543_v34 = vpack.i.b16 %v4420_v40, %v4420_v40  ;;  %v4547_v57 = vpack.i.b16 %v4421_v55, %v4421_v55 }
 0x6a6   : > { %v4564_v41 = vunpack.c.l.bf16 %v4481_v48  ;;  %v4565_v39 = vunpack.c.l.bf16 %v4485_v42  ;;  %v4610_v62 = vmul.f32 %v8307_v9, %v4562_v18  ;;  %v4611_v30 = vmul.f32 %v8313_v24, %v4563_v15 }
 0x6a7   : > { %v4612_v22 = vmul.f32 %v8315_v26, %v4562_v18  ;;  %v4613_v59 = vmul.f32 %v8317_v25, %v4563_v15  ;;  %v4545_v52 = vperm.slane %v4543_v34, 0  ;;  %v4549_v7 = vperm.slane %v4547_v57, 0 }
 0x6a8   : > { %v4614_v49 = vmul.f32 %v8307_v9, %v4564_v41  ;;  %v4615_v14 = vmul.f32 %v8313_v24, %v4565_v39  ;;  %v4616_v45 = vmul.f32 %v8315_v26, %v4564_v41  ;;  %v4617_v32 = vmul.f32 %v8317_v25, %v4565_v39 }
 0x6a9   : > { %v4662_v46 = vpack.c.bf16 %v4611_v30, %v4610_v62  ;;  %v4663_v38 = vpack.c.bf16 %v4613_v59, %v4612_v22  ;;  %v4537_v31 = vperm.slane %v4535_v61, 0  ;;  %v4541_v36 = vperm.slane %v4539_v50, 0 }
 0x6aa   : > { %v4664_v51 = vpack.c.bf16 %v4615_v14, %v4614_v49  ;;  %v4665_v0 = vpack.c.bf16 %v4617_v32, %v4616_v45  ;;  %v4580_v20 = vunpack.c.l.bf16 %v4545_v52  ;;  %v4581_v27 = vunpack.c.l.bf16 %v4549_v7 }
 0x6ab   : > { %v4738_v56 = vunpack.c.l.b16 %v4662_v46  ;;  %v4740_v58 = vunpack.c.l.b16 %v4663_v38  ;;  %v4578_v18 = vunpack.c.l.bf16 %v4537_v31  ;;  %v4579_v50 = vunpack.c.l.bf16 %v4541_v36 }
 0x6ac   : > { %v4742_v63 = vunpack.c.l.b16 %v4664_v51  ;;  %v4744_v29 = vunpack.c.l.b16 %v4665_v0  ;;  %v4743_v21 = vunpack.c.h.b16 %v4664_v51  ;;  %v4745_v44 = vunpack.c.h.b16 %v4665_v0 }
 0x6ad   : > { %v4646_v17 = vmul.f32 %v8307_v9, %v4580_v20  ;;  %v4647_v8 = vmul.f32 %v8313_v24, %v4581_v27  ;;  %v4648_v3 = vmul.f32 %v8315_v26, %v4580_v20  ;;  %v4649_v48 = vmul.f32 %v8317_v25, %v4581_v27 }
 0x6ae   : > { %v4792_v42 = vpack.c.b16 %v4744_v29, %v4742_v63  ;;  %v4793_v40 = vpack.c.b16 %v4745_v44, %v4743_v21  ;;  %v4790_v55 = vpack.c.b16 %v4740_v58, %v4738_v56  ;;  %v4739_v41 = vunpack.c.h.b16 %v4662_v46 }
 0x6af   : > { %v4680_v15 = vpack.c.bf16 %v4647_v8, %v4646_v17  ;;  %v4681_v61 = vpack.c.bf16 %v4649_v48, %v4648_v3  ;;  %v4642_v39 = vmul.f32 %v8307_v9, %v4578_v18  ;;  %v4644_v34 = vmul.f32 %v8315_v26, %v4578_v18 }
 0x6b0   : > { %4842 = vmatpush.bf16.msrb.mxu0 %v4792_v42  ;;  %4890 = vmatpush.bf16.msrb.mxu2 %v4793_v40  ;;  %v4741_v57 = vunpack.c.h.b16 %v4663_v38  ;;  %v4465_v62 = vperm.slane %v8323_v54, 0  ;;  %v4643_v14 = vmul.f32 %v8313_v24, %v4579_v50  ;;  %v4645_v45 = vmul.f32 %v8317_v25, %v4579_v50 }
 0x6b1   : > { %v4774_v30 = vunpack.c.l.b16 %v4680_v15  ;;  %v4776_v22 = vunpack.c.l.b16 %v4681_v61  ;;  %v4775_v59 = vunpack.c.h.b16 %v4680_v15  ;;  %v4777_v49 = vunpack.c.h.b16 %v4681_v61 }
 0x6b2   : > { %v4791_v32 = vpack.c.b16 %v4741_v57, %v4739_v41  ;;  %v4467_v52 = vpack.i.b16 %v4401_v2, %v4401_v2  ;;  %v4560_v51 = vunpack.c.l.bf16 %v4465_v62  ;;  %v4352_v54 = vsel %vm353_vm3, %v8297_v28, %v8303_v43 }
 0x6b3   : > { %v4808_v7 = vpack.c.b16 %v4776_v22, %v4774_v30  ;;  %v4809_v46 = vpack.c.b16 %v4777_v49, %v4775_v59  ;;  %v4678_v38 = vpack.c.bf16 %v4643_v14, %v4642_v39  ;;  %v4679_v0 = vpack.c.bf16 %v4645_v45, %v4644_v34 }
 0x6b4   : > { %4843 = vmatpush.bf16.msrb.mxu0 %v4790_v55  ;;  %4891 = vmatpush.bf16.msrb.mxu2 %v4791_v32  ;;  %v4469_v31 = vperm.slane %v4467_v52, 0  ;;  %v4354_v36 = vrot.slane %v4352_v54, 2  ;;  %v4606_v20 = vmul.f32 %v8307_v9, %v4560_v51  ;;  %v4608_v1 = vmul.f32 %v8315_v26, %v4560_v51 }
 0x6b5   : > { %4866 = vmatpush.bf16.msrb.mxu1 %v4808_v7  ;;  %4914 = vmatpush.bf16.msrb.mxu3 %v4809_v46  ;;  %v6849_v2 = vpack.i.b16 %v8305_v33, %v8305_v33  ;;  %v4770_v27 = vunpack.c.l.b16 %v4678_v38  ;;  %v4772_v56 = vunpack.c.l.b16 %v4679_v0  ;;  %v4771_v58 = vunpack.c.h.b16 %v4678_v38 }
 0x6b6   : > { %v4773_v63 = vunpack.c.h.b16 %v4679_v0  ;;  %v4561_v29 = vunpack.c.l.bf16 %v4469_v31  ;;  %v4371_v21 = vunpack.i.h.s16 %v4354_v36  ;;  %v6853_v48 = vpack.i.b16 %v4354_v36, %v4354_v36 }
 0x6b7   : > { %v4398_v44 = vperm.slane %v6849_v2, 0  ;;  %v4399_v17 = vperm.slane %v6849_v2, 1  ;;  %v4806_v8 = vpack.c.b16 %v4772_v56, %v4770_v27  ;;  %v4336_v42 = vsel %vm349_vm4, %v8289_v60, %v8292_v13 }
 0x6b8   : > { %v4807_v3 = vpack.c.b16 %v4773_v63, %v4771_v58  ;;  %v4607_v40 = vmul.f32 %v8313_v24, %v4561_v29  ;;  %v4609_v55 = vmul.f32 %v8317_v25, %v4561_v29  ;;  %v4387_v33 = vpack.i.b16 %v4371_v21, %v4371_v21 }
 0x6b9   : > { %v4455_v18 = vpack.i.b16 %v4398_v44, %v4398_v44  ;;  %4867 = vmatpush.bf16.msrb.mxu1 %v4806_v8  ;;  %v4459_v15 = vpack.i.b16 %v4399_v17, %v4399_v17  ;;  %v4414_v61 = vperm.slane %v6853_v48, 0  ;;  %v4415_v50 = vperm.slane %v6853_v48, 1 }
 0x6ba   : > { %4915 = vmatpush.bf16.msrb.mxu3 %v4807_v3  ;;  %v8357_v41 = vrot.slane %v4336_v42, 1  ;;  %v4660_v39 = vpack.c.bf16 %v4607_v40, %v4606_v20  ;;  %v4661_v34 = vpack.c.bf16 %v4609_v55, %v4608_v1  ;;  %v4416_v57 = vperm.slane %v4387_v33, 0 }
 0x6bb   : > { %v4417_v62 = vperm.slane %v4387_v33, 1  ;;  %v4457_v30 = vperm.slane %v4455_v18, 0  ;;  %v4461_v22 = vperm.slane %v4459_v15, 0  ;;  %v4519_v59 = vpack.i.b16 %v4414_v61, %v4414_v61 }
 0x6bc   : > { %v4523_v49 = vpack.i.b16 %v4415_v50, %v4415_v50  ;;  %v4734_v14 = vunpack.c.l.b16 %v4660_v39  ;;  %v4736_v45 = vunpack.c.l.b16 %v4661_v34  ;;  %v4527_v32 = vpack.i.b16 %v4416_v57, %v4416_v57 }
 0x6bd   : > { %v4531_v52 = vpack.i.b16 %v4417_v62, %v4417_v62  ;;  %v4735_v7 = vunpack.c.h.b16 %v4660_v39  ;;  %v4737_v46 = vunpack.c.h.b16 %v4661_v34  ;;  %v4558_v51 = vunpack.c.l.bf16 %v4457_v30 }
 0x6be   : > { %v4559_v54 = vunpack.c.l.bf16 %v4461_v22  ;;  %v4788_v38 = vpack.c.b16 %v4736_v45, %v4734_v14  ;;  %v4529_v0 = vperm.slane %v4527_v32, 0  ;;  %v4521_v36 = vperm.slane %v4519_v59, 0 }
 0x6bf   : > { %v4533_v31 = vperm.slane %v4531_v52, 0  ;;  %v4789_v20 = vpack.c.b16 %v4737_v46, %v4735_v7  ;;  %v4602_v1 = vmul.f32 %v8307_v9, %v4558_v51  ;;  %v4604_v27 = vmul.f32 %v8315_v26, %v4558_v51 }
 0x6c0   : > { %v4603_v2 = vmul.f32 %v8313_v24, %v4559_v54  ;;  %4844 = vmatpush.bf16.msrb.mxu0 %v4788_v38  ;;  %v4576_v56 = vunpack.c.l.bf16 %v4529_v0  ;;  %v4605_v63 = vmul.f32 %v8317_v25, %v4559_v54  ;;  %v4525_v29 = vperm.slane %v4523_v49, 0 }
 0x6c1   : > { %v4577_v58 = vunpack.c.l.bf16 %v4533_v31  ;;  %4892 = vmatpush.bf16.msrb.mxu2 %v4789_v20  ;;  %v4574_v44 = vunpack.c.l.bf16 %v4521_v36  ;;  %v4361_v17 = vunpack.i.h.s16 %v8357_v41  ;;  %v4349_v8 = vsel %vm349_vm4, %v8297_v28, %v8303_v43 }
 0x6c2   : > { %v4658_v21 = vpack.c.bf16 %v4603_v2, %v4602_v1  ;;  %v4638_v3 = vmul.f32 %v8307_v9, %v4576_v56  ;;  %v4640_v42 = vmul.f32 %v8315_v26, %v4576_v56  ;;  %v4659_v55 = vpack.c.bf16 %v4605_v63, %v4604_v27 }
 0x6c3   : > { %v4639_v48 = vmul.f32 %v8313_v24, %v4577_v58  ;;  %v4641_v40 = vmul.f32 %v8317_v25, %v4577_v58  ;;  %v4575_v18 = vunpack.c.l.bf16 %v4525_v29  ;;  %v4634_v15 = vmul.f32 %v8307_v9, %v4574_v44 }
 0x6c4   : > { %v4730_v33 = vunpack.c.l.b16 %v4658_v21  ;;  %v4636_v39 = vmul.f32 %v8315_v26, %v4574_v44  ;;  %v4731_v34 = vunpack.c.h.b16 %v4658_v21  ;;  %v4732_v57 = vunpack.c.l.b16 %v4659_v55 }
 0x6c5   : > { %v4676_v61 = vpack.c.bf16 %v4639_v48, %v4638_v3  ;;  %v4677_v50 = vpack.c.bf16 %v4641_v40, %v4640_v42  ;;  %v4635_v62 = vmul.f32 %v8313_v24, %v4575_v18  ;;  %v4637_v30 = vmul.f32 %v8317_v25, %v4575_v18 }
 0x6c6   : > { %v4733_v22 = vunpack.c.h.b16 %v4659_v55  ;;  %v4786_v32 = vpack.c.b16 %v4732_v57, %v4730_v33  ;;  %v4377_v38 = vpack.i.b16 %v4361_v17, %v4361_v17  ;;  %v4351_v0 = vrot.slane %v4349_v8, 1 }
 0x6c7   : > { %v4766_v59 = vunpack.c.l.b16 %v4676_v61  ;;  %v4768_v49 = vunpack.c.l.b16 %v4677_v50  ;;  %v4767_v14 = vunpack.c.h.b16 %v4676_v61  ;;  %v4769_v45 = vunpack.c.h.b16 %v4677_v50 }
 0x6c8   : > { %v4674_v52 = vpack.c.bf16 %v4635_v62, %v4634_v15  ;;  %v4675_v7 = vpack.c.bf16 %v4637_v30, %v4636_v39  ;;  %v4787_v46 = vpack.c.b16 %v4733_v22, %v4731_v34  ;;  %4845 = vmatpush.bf16.msrb.mxu0 %v4786_v32  ;;  %v4396_v2 = vperm.slane %v4377_v38, 0 }
 0x6c9   : > { %v4804_v51 = vpack.c.b16 %v4768_v49, %v4766_v59  ;;  %v4805_v54 = vpack.c.b16 %v4769_v45, %v4767_v14  ;;  %v4397_v27 = vperm.slane %v4377_v38, 1  ;;  %v4369_v56 = vunpack.i.h.s16 %v4351_v0 }
 0x6ca   : > { %v4762_v31 = vunpack.c.l.b16 %v4674_v52  ;;  %v4764_v36 = vunpack.c.l.b16 %v4675_v7  ;;  %4893 = vmatpush.bf16.msrb.mxu2 %v4787_v46  ;;  %v4763_v20 = vunpack.c.h.b16 %v4674_v52  ;;  %v4765_v1 = vunpack.c.h.b16 %v4675_v7 }
 0x6cb   : > { %4868 = vmatpush.bf16.msrb.mxu1 %v4804_v51  ;;  %4916 = vmatpush.bf16.msrb.mxu3 %v4805_v54  ;;  %v6848_v58 = vpack.i.b16 %v8357_v41, %v8357_v41  ;;  %v6852_v21 = vpack.i.b16 %v4351_v0, %v4351_v0  ;;  %v8380_v44 = vsel %vm264_vm1, %v8289_v60, %v8292_v13 }
 0x6cc   : > { %v4802_v63 = vpack.c.b16 %v4764_v36, %v4762_v31  ;;  %v4803_v29 = vpack.c.b16 %v4765_v1, %v4763_v20  ;;  %v4447_v17 = vpack.i.b16 %v4396_v2, %v4396_v2  ;;  %v4451_v8 = vpack.i.b16 %v4397_v27, %v4397_v27 }
 0x6cd   : > { %v4385_v3 = vpack.i.b16 %v4369_v56, %v4369_v56  ;;  %v4394_v48 = vperm.slane %v6848_v58, 0  ;;  %v4395_v42 = vperm.slane %v6848_v58, 1  ;;  %v4410_v40 = vperm.slane %v6852_v21, 0 }
 0x6ce   : > { %v4411_v55 = vperm.slane %v6852_v21, 1  ;;  %v4449_v33 = vperm.slane %v4447_v17, 0  ;;  %v4453_v18 = vperm.slane %v4451_v8, 0 }
 0x6cf   : > { %4869 = vmatpush.bf16.msrb.mxu1 %v4802_v63  ;;  %4917 = vmatpush.bf16.msrb.mxu3 %v4803_v29  ;;  %v4412_v41 = vperm.slane %v4385_v3, 0  ;;  %v4413_v15 = vperm.slane %v4385_v3, 1  ;;  %v4439_v61 = vpack.i.b16 %v4394_v48, %v4394_v48  ;;  %v4443_v50 = vpack.i.b16 %v4395_v42, %v4395_v42 }
 0x6d0   : > { %v4503_v39 = vpack.i.b16 %v4410_v40, %v4410_v40  ;;  %v4507_v34 = vpack.i.b16 %v4411_v55, %v4411_v55  ;;  %v4556_v57 = vunpack.c.l.bf16 %v4449_v33  ;;  %v4557_v60 = vunpack.c.l.bf16 %v4453_v18 }
 0x6d1   : > { %v4511_v13 = vpack.i.b16 %v4412_v41, %v4412_v41  ;;  %v4515_v62 = vpack.i.b16 %v4413_v15, %v4413_v15  ;;  %v4441_v30 = vperm.slane %v4439_v61, 0  ;;  %v4445_v22 = vperm.slane %v4443_v50, 0 }
 0x6d2   : > { %v4505_v59 = vperm.slane %v4503_v39, 0  ;;  %v4509_v49 = vperm.slane %v4507_v34, 0  ;;  %v4598_v14 = vmul.f32 %v8307_v9, %v4556_v57  ;;  %v4599_v45 = vmul.f32 %v8313_v24, %v4557_v60 }
 0x6d3   : > { %v4600_v32 = vmul.f32 %v8315_v26, %v4556_v57  ;;  %v4601_v52 = vmul.f32 %v8317_v25, %v4557_v60  ;;  %v4513_v7 = vperm.slane %v4511_v13, 0  ;;  %v4517_v46 = vperm.slane %v4515_v62, 0 }
 0x6d4   : > { %v4554_v51 = vunpack.c.l.bf16 %v4441_v30  ;;  %v4555_v54 = vunpack.c.l.bf16 %v4445_v22  ;;  %v4656_v38 = vpack.c.bf16 %v4599_v45, %v4598_v14  ;;  %v4570_v31 = vunpack.c.l.bf16 %v4505_v59 }
 0x6d5   : > { %v4657_v0 = vpack.c.bf16 %v4601_v52, %v4600_v32  ;;  %v4571_v36 = vunpack.c.l.bf16 %v4509_v49  ;;  %v4572_v20 = vunpack.c.l.bf16 %v4513_v7  ;;  %v4573_v1 = vunpack.c.l.bf16 %v4517_v46 }
 0x6d6   : > { %v4594_v2 = vmul.f32 %v8307_v9, %v4554_v51  ;;  %v4595_v27 = vmul.f32 %v8313_v24, %v4555_v54  ;;  %v4726_v56 = vunpack.c.l.b16 %v4656_v38  ;;  %v4727_v63 = vunpack.c.h.b16 %v4656_v38 }
 0x6d7   : > { %v4728_v58 = vunpack.c.l.b16 %v4657_v0  ;;  %v4729_v29 = vunpack.c.h.b16 %v4657_v0  ;;  %v4630_v21 = vmul.f32 %v8307_v9, %v4572_v20  ;;  %v4631_v17 = vmul.f32 %v8313_v24, %v4573_v1 }
 0x6d8   : > { %v4632_v8 = vmul.f32 %v8315_v26, %v4572_v20  ;;  %v4633_v3 = vmul.f32 %v8317_v25, %v4573_v1  ;;  %v4596_v40 = vmul.f32 %v8315_v26, %v4554_v51  ;;  %v4597_v55 = vmul.f32 %v8317_v25, %v4555_v54 }
 0x6d9   : > { %v4784_v48 = vpack.c.b16 %v4728_v58, %v4726_v56  ;;  %v4785_v42 = vpack.c.b16 %v4729_v29, %v4727_v63  ;;  %v4672_v33 = vpack.c.bf16 %v4631_v17, %v4630_v21  ;;  %v4654_v41 = vpack.c.bf16 %v4595_v27, %v4594_v2 }
 0x6da   : > { %v4673_v18 = vpack.c.bf16 %v4633_v3, %v4632_v8  ;;  %v4626_v15 = vmul.f32 %v8307_v9, %v4570_v31  ;;  %v4655_v61 = vpack.c.bf16 %v4597_v55, %v4596_v40  ;;  %v4627_v50 = vmul.f32 %v8313_v24, %v4571_v36 }
 0x6db   : > { %4846 = vmatpush.bf16.msrb.mxu0 %v4784_v48  ;;  %4894 = vmatpush.bf16.msrb.mxu2 %v4785_v42  ;;  %v4628_v39 = vmul.f32 %v8315_v26, %v4570_v31  ;;  %v4359_v34 = vunpack.i.h.s16 %v8380_v44  ;;  %v4758_v57 = vunpack.c.l.b16 %v4672_v33  ;;  %v4759_v13 = vunpack.c.h.b16 %v4672_v33 }
 0x6dc   : > { %v4760_v60 = vunpack.c.l.b16 %v4673_v18  ;;  %v4761_v62 = vunpack.c.h.b16 %v4673_v18  ;;  %v4722_v30 = vunpack.c.l.b16 %v4654_v41  ;;  %v4724_v22 = vunpack.c.l.b16 %v4655_v61 }
 0x6dd   : > { %v4629_v59 = vmul.f32 %v8317_v25, %v4571_v36  ;;  %v4670_v49 = vpack.c.bf16 %v4627_v50, %v4626_v15  ;;  %v4723_v32 = vunpack.c.h.b16 %v4654_v41  ;;  %v4725_v52 = vunpack.c.h.b16 %v4655_v61 }
 0x6de   : > { %v4800_v14 = vpack.c.b16 %v4760_v60, %v4758_v57  ;;  %v4801_v45 = vpack.c.b16 %v4761_v62, %v4759_v13  ;;  %v4782_v7 = vpack.c.b16 %v4724_v22, %v4722_v30  ;;  %v4375_v0 = vpack.i.b16 %v4359_v34, %v4359_v34 }
 0x6df   : > { %v4671_v46 = vpack.c.bf16 %v4629_v59, %v4628_v39  ;;  %v4754_v51 = vunpack.c.l.b16 %v4670_v49  ;;  %v4755_v54 = vunpack.c.h.b16 %v4670_v49  ;;  %v4783_v38 = vpack.c.b16 %v4725_v52, %v4723_v32 }
 0x6e0   : > { %4870 = vmatpush.bf16.msrb.mxu1 %v4800_v14  ;;  %4918 = vmatpush.bf16.msrb.mxu3 %v4801_v45  ;;  %v4347_v31 = vsel %vm264_vm1, %v8297_v28, %v8303_v43  ;;  %v6847_v2 = vpack.i.b16 %v8380_v44, %v8380_v44  ;;  %v4392_v27 = vperm.slane %v4375_v0, 0  ;;  %v4393_v56 = vperm.slane %v4375_v0, 1 }
 0x6e1   : > { %4847 = vmatpush.bf16.msrb.mxu0 %v4782_v7  ;;  %v4756_v20 = vunpack.c.l.b16 %v4671_v46  ;;  %v4757_v36 = vunpack.c.h.b16 %v4671_v46  ;;  %v4367_v1 = vunpack.i.h.s16 %v4347_v31  ;;  %4895 = vmatpush.bf16.msrb.mxu2 %v4783_v38  ;;  %v6851_v58 = vpack.i.b16 %v4347_v31, %v4347_v31 }
 0x6e2   : > { %v4390_v17 = vperm.slane %v6847_v2, 0  ;;  %v4431_v8 = vpack.i.b16 %v4392_v27, %v4392_v27  ;;  %v4435_v3 = vpack.i.b16 %v4393_v56, %v4393_v56  ;;  %v4391_v48 = vperm.slane %v6847_v2, 1 }
 0x6e3   : > { %v4798_v63 = vpack.c.b16 %v4756_v20, %v4754_v51  ;;  %v4799_v29 = vpack.c.b16 %v4757_v36, %v4755_v54  ;;  %v4383_v21 = vpack.i.b16 %v4367_v1, %v4367_v1  ;;  %v4406_v42 = vperm.slane %v6851_v58, 0 }
 0x6e4   : > { %v4423_v40 = vpack.i.b16 %v4390_v17, %v4390_v17  ;;  %v4407_v55 = vperm.slane %v6851_v58, 1  ;;  %v4433_v33 = vperm.slane %v4431_v8, 0  ;;  %v4437_v44 = vperm.slane %v4435_v3, 0 }
 0x6e5   : > { %4871 = vmatpush.bf16.msrb.mxu1 %v4798_v63  ;;  %4919 = vmatpush.bf16.msrb.mxu3 %v4799_v29  ;;  %v4408_v28 = vperm.slane %v4383_v21, 0  ;;  %v4409_v43 = vperm.slane %v4383_v21, 1  ;;  %v4427_v18 = vpack.i.b16 %v4391_v48, %v4391_v48  ;;  %v4487_v41 = vpack.i.b16 %v4406_v42, %v4406_v42 }
 0x6e6   : > { %v4425_v50 = vperm.slane %v4423_v40, 0  ;;  %v4491_v39 = vpack.i.b16 %v4407_v55, %v4407_v55  ;;  %v4552_v34 = vunpack.c.l.bf16 %v4433_v33  ;;  %v4553_v57 = vunpack.c.l.bf16 %v4437_v44 }
 0x6e7   : > { %v4495_v15 = vpack.i.b16 %v4408_v28, %v4408_v28  ;;  %v4499_v61 = vpack.i.b16 %v4409_v43, %v4409_v43  ;;  %v4429_v60 = vperm.slane %v4427_v18, 0  ;;  %v4489_v13 = vperm.slane %v4487_v41, 0 }
 0x6e8   : > { %v4550_v22 = vunpack.c.l.bf16 %v4425_v50  ;;  %v4493_v59 = vperm.slane %v4491_v39, 0  ;;  %v4590_v49 = vmul.f32 %v8307_v9, %v4552_v34  ;;  %v4591_v14 = vmul.f32 %v8313_v24, %v4553_v57 }
 0x6e9   : > { %v4497_v62 = vperm.slane %v4495_v15, 0  ;;  %v4501_v30 = vperm.slane %v4499_v61, 0  ;;  %v4592_v45 = vmul.f32 %v8315_v26, %v4552_v34  ;;  %v4593_v32 = vmul.f32 %v8317_v25, %v4553_v57 }
 0x6ea   : > { %v4551_v46 = vunpack.c.l.bf16 %v4429_v60  ;;  %v4586_v51 = vmul.f32 %v8307_v9, %v4550_v22  ;;  %v4652_v54 = vpack.c.bf16 %v4591_v14, %v4590_v49  ;;  %v4588_v0 = vmul.f32 %v8315_v26, %v4550_v22 }
 0x6eb   : > { %v4568_v52 = vunpack.c.l.bf16 %v4497_v62  ;;  %v4569_v7 = vunpack.c.l.bf16 %v4501_v30  ;;  %v4653_v38 = vpack.c.bf16 %v4593_v32, %v4592_v45  ;;  %v4566_v31 = vunpack.c.l.bf16 %v4489_v13 }
 0x6ec   : > { %v4718_v27 = vunpack.c.l.b16 %v4652_v54  ;;  %v4719_v58 = vunpack.c.h.b16 %v4652_v54  ;;  %v4587_v17 = vmul.f32 %v8313_v24, %v4551_v46  ;;  %v4589_v8 = vmul.f32 %v8317_v25, %v4551_v46 }
 0x6ed   : > { %v4622_v20 = vmul.f32 %v8307_v9, %v4568_v52  ;;  %v4623_v36 = vmul.f32 %v8313_v24, %v4569_v7  ;;  %v4624_v1 = vmul.f32 %v8315_v26, %v4568_v52  ;;  %v4625_v2 = vmul.f32 %v8317_v25, %v4569_v7 }
 0x6ee   : > { %v4720_v56 = vunpack.c.l.b16 %v4653_v38  ;;  %v4721_v63 = vunpack.c.h.b16 %v4653_v38  ;;  %v4567_v42 = vunpack.c.l.bf16 %v4493_v59  ;;  %v4618_v28 = vmul.f32 %v8307_v9, %v4566_v31 }
 0x6ef   : > { %v4668_v29 = vpack.c.bf16 %v4623_v36, %v4622_v20  ;;  %v4669_v21 = vpack.c.bf16 %v4625_v2, %v4624_v1  ;;  %v4650_v44 = vpack.c.bf16 %v4587_v17, %v4586_v51  ;;  %v4651_v18 = vpack.c.bf16 %v4589_v8, %v4588_v0 }
 0x6f0   : > { %v4780_v3 = vpack.c.b16 %v4720_v56, %v4718_v27  ;;  %v4781_v48 = vpack.c.b16 %v4721_v63, %v4719_v58  ;;  %v4619_v41 = vmul.f32 %v8313_v24, %v4567_v42  ;;  %v4620_v50 = vmul.f32 %v8315_v26, %v4566_v31 }
 0x6f1   : > { %v4750_v43 = vunpack.c.l.b16 %v4668_v29  ;;  %v4752_v40 = vunpack.c.l.b16 %v4669_v21  ;;  %v4751_v55 = vunpack.c.h.b16 %v4668_v29  ;;  %v4753_v33 = vunpack.c.h.b16 %v4669_v21 }
 0x6f2   : > { %4848 = vmatpush.bf16.msrb.mxu0 %v4780_v3  ;;  %4896 = vmatpush.bf16.msrb.mxu2 %v4781_v48  ;;  %v4621_v39 = vmul.f32 %v8317_v25, %v4567_v42  ;;  %v4714_v34 = vunpack.c.l.b16 %v4650_v44  ;;  %v4716_v57 = vunpack.c.l.b16 %v4651_v18  ;;  %v4666_v60 = vpack.c.bf16 %v4619_v41, %v4618_v28  ;;  %v8437_v25 = vld [vmem:[%s8434_s30] ss:$8 sm:$0x3] }
 0x6f3   : > { %v4796_v15 = vpack.c.b16 %v4752_v40, %v4750_v43  ;;  %v4797_v61 = vpack.c.b16 %v4753_v33, %v4751_v55  ;;  %v4715_v9 = vunpack.c.h.b16 %v4650_v44  ;;  %v4717_v62 = vunpack.c.h.b16 %v4651_v18 }
 0x6f4   : > { %v4667_v13 = vpack.c.bf16 %v4621_v39, %v4620_v50  ;;  %v4778_v30 = vpack.c.b16 %v4716_v57, %v4714_v34  ;;  %v4746_v22 = vunpack.c.l.b16 %v4666_v60  ;;  %v4747_v59 = vunpack.c.h.b16 %v4666_v60 }
 0x6f5   : > { %4872 = vmatpush.bf16.msrb.mxu1 %v4796_v15  ;;  %4920 = vmatpush.bf16.msrb.mxu3 %v4797_v61  ;;  %v4779_v14 = vpack.c.b16 %v4717_v62, %v4715_v9  ;;  %v4257_v32 = vstv %s4256_s29 }
 0x6f6   : > { %v4748_v49 = vunpack.c.l.b16 %v4667_v13  ;;  %v4749_v24 = vunpack.c.h.b16 %v4667_v13  ;;  %4849 = vmatpush.bf16.msrb.mxu0 %v4778_v30  ;;  %v4258_v52 = vadd.f32 %v4257_v32, %v8437_v25 }
 0x6f7   : > { %4897 = vmatpush.bf16.msrb.mxu2 %v4779_v14 }
 0x6f8   : > { %v4794_v45 = vpack.c.b16 %v4748_v49, %v4746_v22  ;;  %v4795_v26 = vpack.c.b16 %v4749_v24, %v4747_v59  ;;  %v4262_v7 = vperm.slane %v4258_v52, 0  ;;  %v4263_v38 = vperm.slane %v4258_v52, 1 }
 0x6f9   : > { %4850 = vmatmul.bf16.vlgmr.msrb.gmra.mxu0 %v7310_v47 }
 0x6fa   : > { %4873 = vmatpush.bf16.msrb.mxu1 %v4794_v45  ;;  %4921 = vmatpush.bf16.msrb.mxu3 %v4795_v26  ;;  %v4266_v46 = vsub.f32 %v7152_v5, %v4262_v7  ;;  %v4268_v51 = vsub.f32 %v7154_v6, %v4262_v7  ;;  %v4267_v36 = vsub.f32 %v7152_v5, %v4263_v38 }
 0x6fb   : > { %4898 = vmatmul.bf16.vlgmr.msrb.gmra.mxu2 %v7310_v47  ;;  %v4269_v1 = vsub.f32 %v7154_v6, %v4263_v38 }
 0x6fc   : > { %v4270_v31 = vand.u32 2147483647, %v4266_v46  ;;  %v4272_v20 = vand.u32 2147483647, %v4268_v51  ;;  %v4271_v21 = vand.u32 2147483647, %v4267_v36 }
 0x6fd   : > { %4874 = vmatmul.bf16.vlgmr.msrb.gmra.mxu1 %v7316_v10  ;;  %4922 = vmatmul.bf16.vlgmr.msrb.gmra.mxu3 %v7316_v10  ;;  %v4273_v17 = vand.u32 2147483647, %v4269_v1 }
 0x6fe   : > { %v4274_v27 = vsub.f32 1.0, %v4270_v31  ;;  %v4276_v56 = vsub.f32 1.0, %v4272_v20  ;;  %v4275_v43 = vsub.f32 1.0, %v4271_v21 }
 0x6ff   : > { %v4277_v55 = vsub.f32 1.0, %v4273_v17 }
 0x700   : > { %v8444_v3 = vmax.f32 %v4274_v27, 0.0  ;;  %v8446_v48 = vmax.f32 %v4276_v56, 0.0  ;;  %v8450_v61 = vmax.f32 %v4275_v43, 0.0 }
 0x701   : > { %v8452_v39 = vmax.f32 %v4277_v55, 0.0 }
 0x709   : > { %4855 = vmatmul.bf16.gmra.mxu0 %v7320_v11 }
 0x70b   : > { %4903 = vmatmul.bf16.gmra.mxu2 %v7320_v11 }
 0x70d   : > { %4879 = vmatmul.bf16.gmra.mxu1 %v7324_v16  ;;  %4927 = vmatmul.bf16.gmra.mxu3 %v7324_v16 }
 0x719   : > { %4860 = vmatmul.bf16.gmra.mxu0 %v7328_v19 }
 0x71b   : > { %4908 = vmatmul.bf16.gmra.mxu2 %v7328_v19 }
 0x71d   : > { %4884 = vmatmul.bf16.gmra.mxu1 %v7332_v23  ;;  %4932 = vmatmul.bf16.gmra.mxu3 %v7332_v23 }
 0x776   : > { %v4851_v54 = vpop.f32.mrf.mxu0 }
 0x77a   : > { %v4875_v0 = vpop.f32.mrf.mxu1 }
 0x77b   : > { %v4876_v29 = vadd.f32 %v4875_v0, %v4851_v54 }
 0x77d   : > { %v4938_v28 = vmul.f32 %v4876_v29, %v8444_v3 }
 0x77e   : > { %v4899_v2 = vpop.f32.mrf.mxu2  ;;  %v4853_v63 = vpop.f32.mrf.mxu0 }
 0x780   : > { %v4923_v58 = vpop.f32.mrf.mxu3 }
 0x781   : > { %v4924_v44 = vadd.f32 %v4923_v58, %v4899_v2 }
 0x782   : > { %v4877_v8 = vpop.f32.mrf.mxu1 }
 0x783   : > { %v4878_v42 = vadd.f32 %v4877_v8, %v4853_v63  ;;  %v4939_v60 = vmul.f32 %v4924_v44, %v8450_v61 }
 0x785   : > { %v4940_v40 = vmul.f32 %v4878_v42, %v8446_v48 }
 0x786   : > { %v4901_v33 = vpop.f32.mrf.mxu2  ;;  %v4856_v15 = vpop.f32.mrf.mxu0 }
 0x787   : > { %v4950_v18 = vadd.f32 %v4940_v40, %v4938_v28 }
 0x788   : > { %v4925_v41 = vpop.f32.mrf.mxu3 }
 0x789   : > { %v4951_v50 = vrot.slane %v4950_v18, 4  ;;  %v4926_v34 = vadd.f32 %v4925_v41, %v4901_v33 }
 0x78a   : > { %v4880_v57 = vpop.f32.mrf.mxu1 }
 0x78b   : > { %v4952_v9 = vadd.f32 %v4951_v50, %v4950_v18  ;;  %v4941_v13 = vmul.f32 %v4926_v34, %v8452_v39  ;;  %v4881_v45 = vadd.f32 %v4880_v57, %v4856_v15 }
 0x78d   : > { %v4957_v62 = vadd.f32 %v4941_v13, %v4939_v60  ;;  %v4953_v30 = vrot.slane %v4952_v9, 2  ;;  %v4942_v51 = vmul.f32 %v4881_v45, %v8444_v3 }
 0x78e   : > { %v4904_v22 = vpop.f32.mrf.mxu2  ;;  %v4858_v14 = vpop.f32.mrf.mxu0 }
 0x78f   : > { %v4958_v59 = vrot.slane %v4957_v62, 4  ;;  %v4954_v26 = vadd.f32 %v4953_v30, %v4952_v9 }
 0x790   : > { %v4928_v49 = vpop.f32.mrf.mxu3 }
 0x791   : > { %v4959_v24 = vadd.f32 %v4958_v59, %v4957_v62  ;;  %v4955_v38 = vrot.slane %v4954_v26, 1  ;;  %v4929_v20 = vadd.f32 %v4928_v49, %v4904_v22 }
 0x792   : > { %v4882_v32 = vpop.f32.mrf.mxu1 }
 0x793   : > { %v4960_v52 = vrot.slane %v4959_v24, 2  ;;  %v4883_v7 = vadd.f32 %v4882_v32, %v4858_v14  ;;  %v4956_v63 = vadd.f32 %v4955_v38, %v4954_v26  ;;  %v4943_v17 = vmul.f32 %v4929_v20, %v8450_v61 }
 0x795   : > { %v4961_v46 = vadd.f32 %v4960_v52, %v4959_v24  ;;  %v4944_v54 = vmul.f32 %v4883_v7, %v8446_v48 }
 0x796   : > { %v4906_v0 = vpop.f32.mrf.mxu2  ;;  %v4861_v2 = vpop.f32.mrf.mxu0 }
 0x797   : > { %v4962_v31 = vrot.slane %v4961_v46, 1  ;;  %v4964_v36 = vadd.f32 %v4944_v54, %v4942_v51 }
 0x798   : > { %v4930_v1 = vpop.f32.mrf.mxu3 }
 0x799   : > { %v4963_v27 = vadd.f32 %v4962_v31, %v4961_v46  ;;  %v4965_v56 = vrot.slane %v4964_v36, 4  ;;  %v4931_v58 = vadd.f32 %v4930_v1, %v4906_v0 }
 0x79a   : > { %v4885_v29 = vpop.f32.mrf.mxu1 }
 0x79b   : > { %v4994_v21 = vrot.slane %v4963_v27, 7  ;;  %v4966_v8 = vadd.f32 %v4965_v56, %v4964_v36  ;;  %v4945_v42 = vmul.f32 %v4931_v58, %v8452_v39  ;;  %v4886_v50 = vadd.f32 %v4885_v29, %v4861_v2 }
 0x79d   : > { %v4995_v28 = vsel %vm264_vm1, %v4956_v63, %v4994_v21  ;;  %v4971_v43 = vadd.f32 %v4945_v42, %v4943_v17  ;;  %v4967_v55 = vrot.slane %v4966_v8, 2  ;;  %v4946_v62 = vmul.f32 %v4886_v50, %v8444_v3 }
 0x79e   : > { %v4997_v40 = vadd.f32 %v4995_v28, %v8437_v25  ;;  %v4909_v33 = vpop.f32.mrf.mxu2  ;;  %v4863_v41 = vpop.f32.mrf.mxu0 }
 0x79f   : > { %v4972_v44 = vrot.slane %v4971_v43, 4  ;;  %v4968_v34 = vadd.f32 %v4967_v55, %v4966_v8 }
 0x7a0   : > { %4998 = vst.msk [vmem:[%s8434_s30] ss:$8 sm:$0x3] %vm7366_vm5, %v4997_v40  ;;  %v4933_v18 = vpop.f32.mrf.mxu3  ;;  %s5816_s30 = sadd.s32 23, %s7135_s23 }
 0x7a1   : > { %v4973_v15 = vadd.f32 %v4972_v44, %v4971_v43  ;;  %v4969_v25 = vrot.slane %v4968_v34, 1  ;;  %v4934_v49 = vadd.f32 %v4933_v18, %v4909_v33  ;;  %s5817_s3 = sshra.s32 %s5816_s30, 3  ;;  %s5820_s5 = sand.u32 7, %s5816_s30 }
 0x7a2   : > { %v4887_v57 = vpop.f32.mrf.mxu1  ;;  %s6913_s6 = sshll.u32 %s5817_s3, 4 }
 0x7a3   : > { %v4974_v60 = vrot.slane %v4973_v15, 2  ;;  %v4888_v9 = vadd.f32 %v4887_v57, %v4863_v41  ;;  %v4970_v52 = vadd.f32 %v4969_v25, %v4968_v34  ;;  %v4947_v46 = vmul.f32 %v4934_v49, %v8450_v61  ;;  %s5823_s16 = sadd.s32 %s6913_s6, %s5820_s5 }
 0x7a5   : > { %v4975_v13 = vadd.f32 %v4974_v60, %v4973_v15  ;;  %v4948_v30 = vmul.f32 %v4888_v9, %v8446_v48 }
 0x7a6   : > { %v4911_v22 = vpop.f32.mrf.mxu2 }
 0x7a7   : > { %v4976_v59 = vrot.slane %v4975_v13, 1  ;;  %v4978_v14 = vadd.f32 %v4948_v30, %v4946_v62 }
 0x7a8   : > { %v4935_v24 = vpop.f32.mrf.mxu3 }
 0x7a9   : > { %v4977_v45 = vadd.f32 %v4976_v59, %v4975_v13  ;;  %v4979_v26 = vrot.slane %v4978_v14, 4  ;;  %v4936_v32 = vadd.f32 %v4935_v24, %v4911_v22 }
 0x7ab   : > { %v5002_v7 = vrot.slane %v4977_v45, 7  ;;  %v4980_v51 = vadd.f32 %v4979_v26, %v4978_v14  ;;  %v4949_v3 = vmul.f32 %v4936_v32, %v8452_v39 }
 0x7ad   : > { %v5003_v48 = vsel %vm264_vm1, %v4970_v52, %v5002_v7  ;;  %v4985_v54 = vadd.f32 %v4949_v3, %v4947_v46  ;;  %v4981_v0 = vrot.slane %v4980_v51, 2 }
 0x7ae   : > { %v5005_v38 = vadd.f32 %v5003_v48, %v8272_v37 }
 0x7af   : > { %v4986_v31 = vrot.slane %v4985_v54, 4  ;;  %v4982_v36 = vadd.f32 %v4981_v0, %v4980_v51 }
 0x7b0   : > { %5006 = vst.msk [vmem:[%s8266_s20] ss:$8 sm:$0x3] %vm7366_vm5, %v5005_v38  ;;  %s8485_s20 = scalar_lea.vmem %s7094_s22, %s5043_s18  ;;  %s8698_s18 = scalar_lea.vmem %s7094_s22, %s5823_s16 }
 0x7b1   : > { %v4987_v20 = vadd.f32 %v4986_v31, %v4985_v54  ;;  %v4983_v61 = vrot.slane %v4982_v36, 1 }
 0x7b3   : > { %v4988_v1 = vrot.slane %v4987_v20, 2  ;;  %v4984_v56 = vadd.f32 %v4983_v61, %v4982_v36 }
 0x7b5   : > { %v4989_v2 = vadd.f32 %v4988_v1, %v4987_v20 }
 0x7b7   : > { %v4990_v27 = vrot.slane %v4989_v2, 1 }
 0x7b9   : > { %v4991_v39 = vadd.f32 %v4990_v27, %v4989_v2 }
 0x7bb   : > { %v5010_v37 = vrot.slane %v4991_v39, 7 }
 0x7bd   : > { %v5011_v58 = vsel %vm264_vm1, %v4984_v56, %v5010_v37 }
 0x7be   : > { %v5013_v63 = vadd.f32 %v5011_v58, %v8275_v35 }
 0x7c0   : > { %5014 = vst.msk [vmem:[%s8269_s21] ss:$8 sm:$0x3] %vm7366_vm5, %v5013_v63  ;;  %s5016_s21 = sadd.s32 6, %s7135_s23 }
 0x7c1   : > { %s5017_s24 = sshra.s32 %s5016_s21, 3  ;;  %s5020_s27 = sand.u32 7, %s5016_s21 }
 0x7c2   : > { %s6909_s25 = sshll.u32 %s5017_s24, 4  ;;  %s5046_s28 = scvt.s32.f32 %s5016_s21 }
 0x7c3   : > { %s5023_s26 = sadd.s32 %s6909_s25, %s5020_s27 }
 0x7c4   : > { %s8650_s29 = scalar_lea.vmem %s7094_s22, %s5023_s26 }
 0x7c7   : > { %v8488_v29 = vld [vmem:[%s8482_s19] ss:$8 sm:$0x3] }
 0x7c8   : > { %v8491_v21 = vld [vmem:[%s8485_s20] ss:$8 sm:$0x3]  ;;  %v5049_v35 = vadd.f32 %v8488_v29, %v7150_v4 }
 0x7c9   : > { %v5050_v17 = vadd.f32 %v8491_v21, %v7162_v12 }
 0x7ca   : > { %v5073_v8 = vperm.slane %v5049_v35, 0  ;;  %v5074_v42 = vperm.slane %v5049_v35, 1 }
 0x7cb   : > { %v5096_v28 = vperm.slane %v5050_v17, 0  ;;  %v5097_v43 = vperm.slane %v5050_v17, 1 }
 0x7cc   : > { %v5077_v40 = vsub.f32 %v7152_v5, %v5073_v8  ;;  %v5078_v55 = vsub.f32 %v7152_v5, %v5074_v42  ;;  %v5079_v13 = vsub.f32 %v7154_v6, %v5073_v8  ;;  %v5080_v22 = vsub.f32 %v7154_v6, %v5074_v42 }
 0x7cd   : > { %v5100_v33 = vsub.f32 %v7152_v5, %v5096_v28  ;;  %v5101_v44 = vsub.f32 %v7152_v5, %v5097_v43  ;;  %v5102_v18 = vsub.f32 %v7154_v6, %v5096_v28  ;;  %v5103_v41 = vsub.f32 %v7154_v6, %v5097_v43 }
 0x7ce   : > { %v5081_v15 = vand.u32 2147483647, %v5077_v40  ;;  %v5082_v50 = vand.u32 2147483647, %v5078_v55  ;;  %v5083_v14 = vand.u32 2147483647, %v5079_v13 }
 0x7cf   : > { %v5104_v34 = vand.u32 2147483647, %v5100_v33  ;;  %v5105_v57 = vand.u32 2147483647, %v5101_v44  ;;  %v5106_v60 = vand.u32 2147483647, %v5102_v18 }
 0x7d0   : > { %v5107_v9 = vand.u32 2147483647, %v5103_v41  ;;  %v5085_v62 = vsub.f32 1.0, %v5081_v15  ;;  %v5086_v30 = vsub.f32 1.0, %v5082_v50  ;;  %v5084_v32 = vand.u32 2147483647, %v5080_v22 }
 0x7d1   : > { %v5108_v25 = vsub.f32 1.0, %v5104_v34  ;;  %v5109_v59 = vsub.f32 1.0, %v5105_v57  ;;  %v5110_v49 = vsub.f32 1.0, %v5106_v60  ;;  %v5087_v52 = vsub.f32 1.0, %v5083_v14 }
 0x7d2   : > { %v5089_v24 = vmax.f32 %v5085_v62, 0.0  ;;  %v5090_v45 = vmax.f32 %v5086_v30, 0.0  ;;  %v5111_v26 = vsub.f32 1.0, %v5107_v9  ;;  %v5088_v3 = vsub.f32 1.0, %v5084_v32 }
 0x7d3   : > { %v5112_v46 = vmax.f32 %v5108_v25, 0.0  ;;  %v5113_v51 = vmax.f32 %v5109_v59, 0.0  ;;  %v5091_v48 = vmax.f32 %v5087_v52, 0.0  ;;  %v5114_v54 = vmax.f32 %v5110_v49, 0.0 }
 0x7d4   : > { %v8505_v7 = vpack.c.bf16 %v5090_v45, %v5089_v24  ;;  %v5115_v38 = vmax.f32 %v5111_v26, 0.0  ;;  %v5092_v31 = vmax.f32 %v5088_v3, 0.0 }
 0x7d5   : > { %v5116_v20 = vpack.c.bf16 %v5113_v51, %v5112_v46 }
 0x7d6   : > { %v8508_v0 = vrot.slane %v8505_v7, 3  ;;  %v8513_v1 = vpack.c.bf16 %v5092_v31, %v5091_v48  ;;  %v5117_v27 = vpack.c.bf16 %v5115_v38, %v5114_v54 }
 0x7d7   : > { %v8523_v63 = vunpack.c.l.bf16 %v5116_v20  ;;  %v8529_v40 = vunpack.c.h.bf16 %v5116_v20 }
 0x7d8   : > { %v5132_v36 = vsel %vm357_vm2, %v8505_v7, %v8508_v0  ;;  %v5129_v61 = vsel %vm353_vm3, %v8505_v7, %v8508_v0  ;;  %v8519_v39 = vrot.slane %v8513_v1, 3  ;;  %v8531_v55 = vunpack.c.l.bf16 %v5117_v27 }
 0x7d9   : > { %v5134_v2 = vrot.slane %v5132_v36, 3  ;;  %v8521_v56 = vrot.slane %v5129_v61, 2  ;;  %v8533_v33 = vunpack.c.h.bf16 %v5117_v27 }
 0x7da   : > { %v5145_v35 = vsel %vm357_vm2, %v8513_v1, %v8519_v39 }
 0x7db   : > { %v5155_v37 = vunpack.i.h.s16 %v5134_v2  ;;  %v6864_v58 = vpack.i.b16 %v5134_v2, %v5134_v2  ;;  %v5153_v17 = vunpack.i.h.s16 %v8521_v56  ;;  %v5147_v42 = vrot.slane %v5145_v35, 3 }
 0x7dd   : > { %v5171_v8 = vpack.i.b16 %v5155_v37, %v5155_v37  ;;  %v5192_v28 = vperm.slane %v6864_v58, 0  ;;  %v5193_v43 = vperm.slane %v6864_v58, 1  ;;  %v8535_v44 = vpack.i.b16 %v5153_v17, %v5153_v17 }
 0x7de   : > { %v5163_v15 = vunpack.i.h.s16 %v5147_v42  ;;  %v6868_v57 = vpack.i.b16 %v5147_v42, %v5147_v42 }
 0x7df   : > { %v5194_v18 = vperm.slane %v5171_v8, 0  ;;  %v5195_v41 = vperm.slane %v5171_v8, 1  ;;  %v5261_v50 = vpack.i.b16 %v5192_v28, %v5192_v28  ;;  %v5265_v34 = vpack.i.b16 %v5193_v43, %v5193_v43 }
 0x7e0   : > { %v5190_v60 = vperm.slane %v8535_v44, 0  ;;  %v5191_v9 = vperm.slane %v8535_v44, 1  ;;  %v5179_v30 = vpack.i.b16 %v5163_v15, %v5163_v15  ;;  %v5208_v59 = vperm.slane %v6868_v57, 0 }
 0x7e1   : > { %v5269_v13 = vpack.i.b16 %v5194_v18, %v5194_v18  ;;  %v5273_v62 = vpack.i.b16 %v5195_v41, %v5195_v41  ;;  %v5263_v25 = vperm.slane %v5261_v50, 0  ;;  %v5267_v22 = vperm.slane %v5265_v34, 0 }
 0x7e2   : > { %v5209_v49 = vperm.slane %v6868_v57, 1  ;;  %v8539_v14 = vpack.i.b16 %v5190_v60, %v5190_v60  ;;  %v5210_v26 = vperm.slane %v5179_v30, 0  ;;  %v5211_v32 = vperm.slane %v5179_v30, 1 }
 0x7e3   : > { %v5271_v24 = vperm.slane %v5269_v13, 0  ;;  %v5275_v45 = vperm.slane %v5273_v62, 0  ;;  %v5352_v52 = vunpack.c.l.bf16 %v5263_v25  ;;  %v5353_v46 = vunpack.c.l.bf16 %v5267_v22 }
 0x7e4   : > { %v5325_v51 = vpack.i.b16 %v5208_v59, %v5208_v59  ;;  %v5329_v3 = vpack.i.b16 %v5209_v49, %v5209_v49  ;;  %v5333_v38 = vpack.i.b16 %v5210_v26, %v5210_v26  ;;  %v5337_v31 = vpack.i.b16 %v5211_v32, %v5211_v32 }
 0x7e5   : > { %v5354_v48 = vunpack.c.l.bf16 %v5271_v24  ;;  %v5355_v54 = vunpack.c.l.bf16 %v5275_v45  ;;  %v5400_v20 = vmul.f32 %v8523_v63, %v5352_v52  ;;  %v5401_v36 = vmul.f32 %v8529_v40, %v5353_v46 }
 0x7e6   : > { %v5402_v2 = vmul.f32 %v8531_v55, %v5352_v52  ;;  %v5403_v61 = vmul.f32 %v8533_v33, %v5353_v46  ;;  %v5335_v17 = vperm.slane %v5333_v38, 0  ;;  %v5339_v8 = vperm.slane %v5337_v31, 0 }
 0x7e7   : > { %v5404_v27 = vmul.f32 %v8523_v63, %v5354_v48  ;;  %v5405_v37 = vmul.f32 %v8529_v40, %v5355_v54  ;;  %v5406_v58 = vmul.f32 %v8531_v55, %v5354_v48  ;;  %v5407_v35 = vmul.f32 %v8533_v33, %v5355_v54 }
 0x7e8   : > { %v5452_v42 = vpack.c.bf16 %v5401_v36, %v5400_v20  ;;  %v5453_v28 = vpack.c.bf16 %v5403_v61, %v5402_v2  ;;  %v5327_v41 = vperm.slane %v5325_v51, 0  ;;  %v5331_v15 = vperm.slane %v5329_v3, 0 }
 0x7e9   : > { %v5454_v43 = vpack.c.bf16 %v5405_v37, %v5404_v27  ;;  %v5455_v18 = vpack.c.bf16 %v5407_v35, %v5406_v58  ;;  %v5370_v50 = vunpack.c.l.bf16 %v5335_v17  ;;  %v5371_v34 = vunpack.c.l.bf16 %v5339_v8 }
 0x7ea   : > { %v5528_v57 = vunpack.c.l.b16 %v5452_v42  ;;  %v5530_v60 = vunpack.c.l.b16 %v5453_v28  ;;  %v5368_v52 = vunpack.c.l.bf16 %v5327_v41  ;;  %v5369_v3 = vunpack.c.l.bf16 %v5331_v15 }
 0x7eb   : > { %v5532_v13 = vunpack.c.l.b16 %v5454_v43  ;;  %v5534_v62 = vunpack.c.l.b16 %v5455_v18  ;;  %v5533_v30 = vunpack.c.h.b16 %v5454_v43  ;;  %v5535_v25 = vunpack.c.h.b16 %v5455_v18 }
 0x7ec   : > { %v5436_v22 = vmul.f32 %v8523_v63, %v5370_v50  ;;  %v5437_v59 = vmul.f32 %v8529_v40, %v5371_v34  ;;  %v5438_v49 = vmul.f32 %v8531_v55, %v5370_v50  ;;  %v5439_v24 = vmul.f32 %v8533_v33, %v5371_v34 }
 0x7ed   : > { %v5582_v45 = vpack.c.b16 %v5534_v62, %v5532_v13  ;;  %v5583_v26 = vpack.c.b16 %v5535_v25, %v5533_v30  ;;  %v5580_v32 = vpack.c.b16 %v5530_v60, %v5528_v57  ;;  %v5529_v48 = vunpack.c.h.b16 %v5452_v42 }
 0x7ee   : > { %v5470_v46 = vpack.c.bf16 %v5437_v59, %v5436_v22  ;;  %v5471_v51 = vpack.c.bf16 %v5439_v24, %v5438_v49  ;;  %v5432_v54 = vmul.f32 %v8523_v63, %v5368_v52  ;;  %v5434_v38 = vmul.f32 %v8531_v55, %v5368_v52 }
 0x7ef   : > { %5632 = vmatpush.bf16.msra.mxu0 %v5582_v45  ;;  %5680 = vmatpush.bf16.msra.mxu2 %v5583_v26  ;;  %v5531_v31 = vunpack.c.h.b16 %v5453_v28  ;;  %v5255_v20 = vperm.slane %v8539_v14, 0  ;;  %v5433_v37 = vmul.f32 %v8529_v40, %v5369_v3  ;;  %v5435_v58 = vmul.f32 %v8533_v33, %v5369_v3 }
 0x7f0   : > { %v5564_v36 = vunpack.c.l.b16 %v5470_v46  ;;  %v5566_v2 = vunpack.c.l.b16 %v5471_v51  ;;  %v5565_v61 = vunpack.c.h.b16 %v5470_v46  ;;  %v5567_v27 = vunpack.c.h.b16 %v5471_v51 }
 0x7f1   : > { %v5581_v35 = vpack.c.b16 %v5531_v31, %v5529_v48  ;;  %v5257_v17 = vpack.i.b16 %v5191_v9, %v5191_v9  ;;  %v5350_v43 = vunpack.c.l.bf16 %v5255_v20  ;;  %v5142_v14 = vsel %vm353_vm3, %v8513_v1, %v8519_v39 }
 0x7f2   : > { %v5598_v8 = vpack.c.b16 %v5566_v2, %v5564_v36  ;;  %v5599_v42 = vpack.c.b16 %v5567_v27, %v5565_v61  ;;  %v5468_v28 = vpack.c.bf16 %v5433_v37, %v5432_v54  ;;  %v5469_v18 = vpack.c.bf16 %v5435_v58, %v5434_v38 }
 0x7f3   : > { %5633 = vmatpush.bf16.msra.mxu0 %v5580_v32  ;;  %5681 = vmatpush.bf16.msra.mxu2 %v5581_v35  ;;  %v5259_v41 = vperm.slane %v5257_v17, 0  ;;  %v5144_v15 = vrot.slane %v5142_v14, 2  ;;  %v5396_v50 = vmul.f32 %v8523_v63, %v5350_v43  ;;  %v5398_v44 = vmul.f32 %v8531_v55, %v5350_v43 }
 0x7f4   : > { %5656 = vmatpush.bf16.msra.mxu1 %v5598_v8  ;;  %5704 = vmatpush.bf16.msra.mxu3 %v5599_v42  ;;  %v6863_v9 = vpack.i.b16 %v8521_v56, %v8521_v56  ;;  %v5560_v34 = vunpack.c.l.b16 %v5468_v28  ;;  %v5562_v57 = vunpack.c.l.b16 %v5469_v18  ;;  %v5561_v60 = vunpack.c.h.b16 %v5468_v28 }
 0x7f5   : > { %v5563_v13 = vunpack.c.h.b16 %v5469_v18  ;;  %v5351_v62 = vunpack.c.l.bf16 %v5259_v41  ;;  %v5161_v30 = vunpack.i.h.s16 %v5144_v15  ;;  %v6867_v24 = vpack.i.b16 %v5144_v15, %v5144_v15 }
 0x7f6   : > { %v5188_v25 = vperm.slane %v6863_v9, 0  ;;  %v5189_v22 = vperm.slane %v6863_v9, 1  ;;  %v5596_v59 = vpack.c.b16 %v5562_v57, %v5560_v34  ;;  %v5126_v45 = vsel %vm349_vm4, %v8505_v7, %v8508_v0 }
 0x7f7   : > { %v5597_v49 = vpack.c.b16 %v5563_v13, %v5561_v60  ;;  %v5397_v26 = vmul.f32 %v8529_v40, %v5351_v62  ;;  %v5399_v32 = vmul.f32 %v8533_v33, %v5351_v62  ;;  %v5177_v56 = vpack.i.b16 %v5161_v30, %v5161_v30 }
 0x7f8   : > { %v5245_v52 = vpack.i.b16 %v5188_v25, %v5188_v25  ;;  %5657 = vmatpush.bf16.msra.mxu1 %v5596_v59  ;;  %v5249_v46 = vpack.i.b16 %v5189_v22, %v5189_v22  ;;  %v5204_v51 = vperm.slane %v6867_v24, 0  ;;  %v5205_v3 = vperm.slane %v6867_v24, 1 }
 0x7f9   : > { %5705 = vmatpush.bf16.msra.mxu3 %v5597_v49  ;;  %v8573_v48 = vrot.slane %v5126_v45, 1  ;;  %v5450_v54 = vpack.c.bf16 %v5397_v26, %v5396_v50  ;;  %v5451_v38 = vpack.c.bf16 %v5399_v32, %v5398_v44  ;;  %v5206_v31 = vperm.slane %v5177_v56, 0 }
 0x7fa   : > { %v5207_v20 = vperm.slane %v5177_v56, 1  ;;  %v5247_v36 = vperm.slane %v5245_v52, 0  ;;  %v5251_v2 = vperm.slane %v5249_v46, 0  ;;  %v5309_v61 = vpack.i.b16 %v5204_v51, %v5204_v51 }
 0x7fb   : > { %v5313_v27 = vpack.i.b16 %v5205_v3, %v5205_v3  ;;  %v5524_v37 = vunpack.c.l.b16 %v5450_v54  ;;  %v5526_v58 = vunpack.c.l.b16 %v5451_v38  ;;  %v5317_v35 = vpack.i.b16 %v5206_v31, %v5206_v31 }
 0x7fc   : > { %v5321_v17 = vpack.i.b16 %v5207_v20, %v5207_v20  ;;  %v5525_v8 = vunpack.c.h.b16 %v5450_v54  ;;  %v5527_v42 = vunpack.c.h.b16 %v5451_v38  ;;  %v5348_v43 = vunpack.c.l.bf16 %v5247_v36 }
 0x7fd   : > { %v5349_v14 = vunpack.c.l.bf16 %v5251_v2  ;;  %v5578_v28 = vpack.c.b16 %v5526_v58, %v5524_v37  ;;  %v5319_v18 = vperm.slane %v5317_v35, 0  ;;  %v5311_v15 = vperm.slane %v5309_v61, 0 }
 0x7fe   : > { %v5323_v41 = vperm.slane %v5321_v17, 0  ;;  %v5579_v50 = vpack.c.b16 %v5527_v42, %v5525_v8  ;;  %v5392_v44 = vmul.f32 %v8523_v63, %v5348_v43  ;;  %v5394_v34 = vmul.f32 %v8531_v55, %v5348_v43 }
 0x7ff   : > { %v5393_v9 = vmul.f32 %v8529_v40, %v5349_v14  ;;  %5634 = vmatpush.bf16.msra.mxu0 %v5578_v28  ;;  %v5366_v57 = vunpack.c.l.bf16 %v5319_v18  ;;  %v5395_v13 = vmul.f32 %v8533_v33, %v5349_v14  ;;  %v5315_v62 = vperm.slane %v5313_v27, 0 }
 0x800   : > { %v5367_v60 = vunpack.c.l.bf16 %v5323_v41  ;;  %5682 = vmatpush.bf16.msra.mxu2 %v5579_v50  ;;  %v5364_v25 = vunpack.c.l.bf16 %v5311_v15  ;;  %v5151_v22 = vunpack.i.h.s16 %v8573_v48  ;;  %v5139_v59 = vsel %vm349_vm4, %v8513_v1, %v8519_v39 }
 0x801   : > { %v5448_v30 = vpack.c.bf16 %v5393_v9, %v5392_v44  ;;  %v5428_v49 = vmul.f32 %v8523_v63, %v5366_v57  ;;  %v5430_v45 = vmul.f32 %v8531_v55, %v5366_v57  ;;  %v5449_v32 = vpack.c.bf16 %v5395_v13, %v5394_v34 }
 0x802   : > { %v5429_v24 = vmul.f32 %v8529_v40, %v5367_v60  ;;  %v5431_v26 = vmul.f32 %v8533_v33, %v5367_v60  ;;  %v5365_v52 = vunpack.c.l.bf16 %v5315_v62  ;;  %v5424_v46 = vmul.f32 %v8523_v63, %v5364_v25 }
 0x803   : > { %v5520_v56 = vunpack.c.l.b16 %v5448_v30  ;;  %v5426_v54 = vmul.f32 %v8531_v55, %v5364_v25  ;;  %v5521_v38 = vunpack.c.h.b16 %v5448_v30  ;;  %v5522_v31 = vunpack.c.l.b16 %v5449_v32 }
 0x804   : > { %v5466_v51 = vpack.c.bf16 %v5429_v24, %v5428_v49  ;;  %v5467_v3 = vpack.c.bf16 %v5431_v26, %v5430_v45  ;;  %v5425_v20 = vmul.f32 %v8529_v40, %v5365_v52  ;;  %v5427_v36 = vmul.f32 %v8533_v33, %v5365_v52 }
 0x805   : > { %v5523_v2 = vunpack.c.h.b16 %v5449_v32  ;;  %v5576_v35 = vpack.c.b16 %v5522_v31, %v5520_v56  ;;  %v5167_v28 = vpack.i.b16 %v5151_v22, %v5151_v22  ;;  %v5141_v18 = vrot.slane %v5139_v59, 1 }
 0x806   : > { %v5556_v61 = vunpack.c.l.b16 %v5466_v51  ;;  %v5558_v27 = vunpack.c.l.b16 %v5467_v3  ;;  %v5557_v37 = vunpack.c.h.b16 %v5466_v51  ;;  %v5559_v58 = vunpack.c.h.b16 %v5467_v3 }
 0x807   : > { %v5464_v17 = vpack.c.bf16 %v5425_v20, %v5424_v46  ;;  %v5465_v8 = vpack.c.bf16 %v5427_v36, %v5426_v54  ;;  %v5577_v42 = vpack.c.b16 %v5523_v2, %v5521_v38  ;;  %5635 = vmatpush.bf16.msra.mxu0 %v5576_v35  ;;  %v5186_v9 = vperm.slane %v5167_v28, 0 }
 0x808   : > { %v5594_v43 = vpack.c.b16 %v5558_v27, %v5556_v61  ;;  %v5595_v14 = vpack.c.b16 %v5559_v58, %v5557_v37  ;;  %v5187_v34 = vperm.slane %v5167_v28, 1  ;;  %v5159_v57 = vunpack.i.h.s16 %v5141_v18 }
 0x809   : > { %v5552_v41 = vunpack.c.l.b16 %v5464_v17  ;;  %v5554_v15 = vunpack.c.l.b16 %v5465_v8  ;;  %5683 = vmatpush.bf16.msra.mxu2 %v5577_v42  ;;  %v5553_v50 = vunpack.c.h.b16 %v5464_v17  ;;  %v5555_v44 = vunpack.c.h.b16 %v5465_v8 }
 0x80a   : > { %5658 = vmatpush.bf16.msra.mxu1 %v5594_v43  ;;  %5706 = vmatpush.bf16.msra.mxu3 %v5595_v14  ;;  %v6862_v60 = vpack.i.b16 %v8573_v48, %v8573_v48  ;;  %v6866_v30 = vpack.i.b16 %v5141_v18, %v5141_v18  ;;  %v8596_v25 = vsel %vm264_vm1, %v8505_v7, %v8508_v0 }
 0x80b   : > { %v5592_v13 = vpack.c.b16 %v5554_v15, %v5552_v41  ;;  %v5593_v62 = vpack.c.b16 %v5555_v44, %v5553_v50  ;;  %v5237_v22 = vpack.i.b16 %v5186_v9, %v5186_v9  ;;  %v5241_v59 = vpack.i.b16 %v5187_v34, %v5187_v34 }
 0x80c   : > { %v5175_v49 = vpack.i.b16 %v5159_v57, %v5159_v57  ;;  %v5184_v24 = vperm.slane %v6862_v60, 0  ;;  %v5185_v45 = vperm.slane %v6862_v60, 1  ;;  %v5200_v26 = vperm.slane %v6866_v30, 0 }
 0x80d   : > { %v5201_v32 = vperm.slane %v6866_v30, 1  ;;  %v5239_v56 = vperm.slane %v5237_v22, 0  ;;  %v5243_v52 = vperm.slane %v5241_v59, 0 }
 0x80e   : > { %5659 = vmatpush.bf16.msra.mxu1 %v5592_v13  ;;  %5707 = vmatpush.bf16.msra.mxu3 %v5593_v62  ;;  %v5202_v48 = vperm.slane %v5175_v49, 0  ;;  %v5203_v46 = vperm.slane %v5175_v49, 1  ;;  %v5229_v51 = vpack.i.b16 %v5184_v24, %v5184_v24  ;;  %v5233_v3 = vpack.i.b16 %v5185_v45, %v5185_v45 }
 0x80f   : > { %v5293_v54 = vpack.i.b16 %v5200_v26, %v5200_v26  ;;  %v5297_v38 = vpack.i.b16 %v5201_v32, %v5201_v32  ;;  %v5346_v31 = vunpack.c.l.bf16 %v5239_v56  ;;  %v5347_v7 = vunpack.c.l.bf16 %v5243_v52 }
 0x810   : > { %v5301_v0 = vpack.i.b16 %v5202_v48, %v5202_v48  ;;  %v5305_v20 = vpack.i.b16 %v5203_v46, %v5203_v46  ;;  %v5231_v36 = vperm.slane %v5229_v51, 0  ;;  %v5235_v2 = vperm.slane %v5233_v3, 0 }
 0x811   : > { %v5295_v61 = vperm.slane %v5293_v54, 0  ;;  %v5299_v27 = vperm.slane %v5297_v38, 0  ;;  %v5388_v37 = vmul.f32 %v8523_v63, %v5346_v31  ;;  %v5389_v58 = vmul.f32 %v8529_v40, %v5347_v7 }
 0x812   : > { %v5390_v35 = vmul.f32 %v8531_v55, %v5346_v31  ;;  %v5391_v17 = vmul.f32 %v8533_v33, %v5347_v7  ;;  %v5303_v8 = vperm.slane %v5301_v0, 0  ;;  %v5307_v42 = vperm.slane %v5305_v20, 0 }
 0x813   : > { %v5344_v43 = vunpack.c.l.bf16 %v5231_v36  ;;  %v5345_v14 = vunpack.c.l.bf16 %v5235_v2  ;;  %v5446_v28 = vpack.c.bf16 %v5389_v58, %v5388_v37  ;;  %v5360_v41 = vunpack.c.l.bf16 %v5295_v61 }
 0x814   : > { %v5447_v18 = vpack.c.bf16 %v5391_v17, %v5390_v35  ;;  %v5361_v15 = vunpack.c.l.bf16 %v5299_v27  ;;  %v5362_v50 = vunpack.c.l.bf16 %v5303_v8  ;;  %v5363_v44 = vunpack.c.l.bf16 %v5307_v42 }
 0x815   : > { %v5384_v9 = vmul.f32 %v8523_v63, %v5344_v43  ;;  %v5385_v34 = vmul.f32 %v8529_v40, %v5345_v14  ;;  %v5516_v57 = vunpack.c.l.b16 %v5446_v28  ;;  %v5517_v13 = vunpack.c.h.b16 %v5446_v28 }
 0x816   : > { %v5518_v60 = vunpack.c.l.b16 %v5447_v18  ;;  %v5519_v62 = vunpack.c.h.b16 %v5447_v18  ;;  %v5420_v30 = vmul.f32 %v8523_v63, %v5362_v50  ;;  %v5421_v22 = vmul.f32 %v8529_v40, %v5363_v44 }
 0x817   : > { %v5422_v59 = vmul.f32 %v8531_v55, %v5362_v50  ;;  %v5423_v49 = vmul.f32 %v8533_v33, %v5363_v44  ;;  %v5386_v26 = vmul.f32 %v8531_v55, %v5344_v43  ;;  %v5387_v32 = vmul.f32 %v8533_v33, %v5345_v14 }
 0x818   : > { %v5574_v24 = vpack.c.b16 %v5518_v60, %v5516_v57  ;;  %v5575_v45 = vpack.c.b16 %v5519_v62, %v5517_v13  ;;  %v5462_v56 = vpack.c.bf16 %v5421_v22, %v5420_v30  ;;  %v5444_v48 = vpack.c.bf16 %v5385_v34, %v5384_v9 }
 0x819   : > { %v5463_v52 = vpack.c.bf16 %v5423_v49, %v5422_v59  ;;  %v5416_v46 = vmul.f32 %v8523_v63, %v5360_v41  ;;  %v5445_v51 = vpack.c.bf16 %v5387_v32, %v5386_v26  ;;  %v5417_v3 = vmul.f32 %v8529_v40, %v5361_v15 }
 0x81a   : > { %5636 = vmatpush.bf16.msra.mxu0 %v5574_v24  ;;  %5684 = vmatpush.bf16.msra.mxu2 %v5575_v45  ;;  %v5418_v54 = vmul.f32 %v8531_v55, %v5360_v41  ;;  %v5149_v38 = vunpack.i.h.s16 %v8596_v25  ;;  %v5548_v31 = vunpack.c.l.b16 %v5462_v56  ;;  %v5549_v0 = vunpack.c.h.b16 %v5462_v56 }
 0x81b   : > { %v5550_v7 = vunpack.c.l.b16 %v5463_v52  ;;  %v5551_v20 = vunpack.c.h.b16 %v5463_v52  ;;  %v5512_v36 = vunpack.c.l.b16 %v5444_v48  ;;  %v5514_v2 = vunpack.c.l.b16 %v5445_v51 }
 0x81c   : > { %v5419_v61 = vmul.f32 %v8533_v33, %v5361_v15  ;;  %v5460_v27 = vpack.c.bf16 %v5417_v3, %v5416_v46  ;;  %v5513_v35 = vunpack.c.h.b16 %v5444_v48  ;;  %v5515_v17 = vunpack.c.h.b16 %v5445_v51 }
 0x81d   : > { %v5590_v37 = vpack.c.b16 %v5550_v7, %v5548_v31  ;;  %v5591_v58 = vpack.c.b16 %v5551_v20, %v5549_v0  ;;  %v5572_v8 = vpack.c.b16 %v5514_v2, %v5512_v36  ;;  %v5165_v18 = vpack.i.b16 %v5149_v38, %v5149_v38 }
 0x81e   : > { %v5461_v42 = vpack.c.bf16 %v5419_v61, %v5418_v54  ;;  %v5544_v43 = vunpack.c.l.b16 %v5460_v27  ;;  %v5545_v14 = vunpack.c.h.b16 %v5460_v27  ;;  %v5573_v28 = vpack.c.b16 %v5515_v17, %v5513_v35 }
 0x81f   : > { %5660 = vmatpush.bf16.msra.mxu1 %v5590_v37  ;;  %5708 = vmatpush.bf16.msra.mxu3 %v5591_v58  ;;  %v5137_v41 = vsel %vm264_vm1, %v8513_v1, %v8519_v39  ;;  %v6861_v9 = vpack.i.b16 %v8596_v25, %v8596_v25  ;;  %v5182_v34 = vperm.slane %v5165_v18, 0  ;;  %v5183_v57 = vperm.slane %v5165_v18, 1 }
 0x820   : > { %5637 = vmatpush.bf16.msra.mxu0 %v5572_v8  ;;  %v5546_v50 = vunpack.c.l.b16 %v5461_v42  ;;  %v5547_v15 = vunpack.c.h.b16 %v5461_v42  ;;  %v5157_v44 = vunpack.i.h.s16 %v5137_v41  ;;  %5685 = vmatpush.bf16.msra.mxu2 %v5573_v28  ;;  %v6865_v60 = vpack.i.b16 %v5137_v41, %v5137_v41 }
 0x821   : > { %v5180_v22 = vperm.slane %v6861_v9, 0  ;;  %v5221_v59 = vpack.i.b16 %v5182_v34, %v5182_v34  ;;  %v5225_v49 = vpack.i.b16 %v5183_v57, %v5183_v57  ;;  %v5181_v24 = vperm.slane %v6861_v9, 1 }
 0x822   : > { %v5588_v13 = vpack.c.b16 %v5546_v50, %v5544_v43  ;;  %v5589_v62 = vpack.c.b16 %v5547_v15, %v5545_v14  ;;  %v5173_v30 = vpack.i.b16 %v5157_v44, %v5157_v44  ;;  %v5196_v45 = vperm.slane %v6865_v60, 0 }
 0x823   : > { %v5213_v26 = vpack.i.b16 %v5180_v22, %v5180_v22  ;;  %v5197_v32 = vperm.slane %v6865_v60, 1  ;;  %v5223_v56 = vperm.slane %v5221_v59, 0  ;;  %v5227_v25 = vperm.slane %v5225_v49, 0 }
 0x824   : > { %5661 = vmatpush.bf16.msra.mxu1 %v5588_v13  ;;  %5709 = vmatpush.bf16.msra.mxu3 %v5589_v62  ;;  %v5198_v1 = vperm.slane %v5173_v30, 0  ;;  %v5199_v39 = vperm.slane %v5173_v30, 1  ;;  %v5217_v52 = vpack.i.b16 %v5181_v24, %v5181_v24  ;;  %v5277_v48 = vpack.i.b16 %v5196_v45, %v5196_v45 }
 0x825   : > { %v5215_v3 = vperm.slane %v5213_v26, 0  ;;  %v5281_v54 = vpack.i.b16 %v5197_v32, %v5197_v32  ;;  %v5342_v38 = vunpack.c.l.bf16 %v5223_v56  ;;  %v5343_v31 = vunpack.c.l.bf16 %v5227_v25 }
 0x826   : > { %v5285_v46 = vpack.i.b16 %v5198_v1, %v5198_v1  ;;  %v5289_v51 = vpack.i.b16 %v5199_v39, %v5199_v39  ;;  %v5219_v7 = vperm.slane %v5217_v52, 0  ;;  %v5279_v0 = vperm.slane %v5277_v48, 0 }
 0x827   : > { %v5340_v2 = vunpack.c.l.bf16 %v5215_v3  ;;  %v5283_v61 = vperm.slane %v5281_v54, 0  ;;  %v5380_v27 = vmul.f32 %v8523_v63, %v5342_v38  ;;  %v5381_v37 = vmul.f32 %v8529_v40, %v5343_v31 }
 0x828   : > { %v5287_v20 = vperm.slane %v5285_v46, 0  ;;  %v5291_v36 = vperm.slane %v5289_v51, 0  ;;  %v5382_v58 = vmul.f32 %v8531_v55, %v5342_v38  ;;  %v5383_v35 = vmul.f32 %v8533_v33, %v5343_v31 }
 0x829   : > { %v5341_v42 = vunpack.c.l.bf16 %v5219_v7  ;;  %v5376_v43 = vmul.f32 %v8523_v63, %v5340_v2  ;;  %v5442_v14 = vpack.c.bf16 %v5381_v37, %v5380_v27  ;;  %v5378_v18 = vmul.f32 %v8531_v55, %v5340_v2 }
 0x82a   : > { %v5358_v17 = vunpack.c.l.bf16 %v5287_v20  ;;  %v5359_v8 = vunpack.c.l.bf16 %v5291_v36  ;;  %v5443_v28 = vpack.c.bf16 %v5383_v35, %v5382_v58  ;;  %v5356_v41 = vunpack.c.l.bf16 %v5279_v0 }
 0x82b   : > { %v5508_v34 = vunpack.c.l.b16 %v5442_v14  ;;  %v5509_v60 = vunpack.c.h.b16 %v5442_v14  ;;  %v5377_v22 = vmul.f32 %v8529_v40, %v5341_v42  ;;  %v5379_v59 = vmul.f32 %v8533_v33, %v5341_v42 }
 0x82c   : > { %v5412_v50 = vmul.f32 %v8523_v63, %v5358_v17  ;;  %v5413_v15 = vmul.f32 %v8529_v40, %v5359_v8  ;;  %v5414_v44 = vmul.f32 %v8531_v55, %v5358_v17  ;;  %v5415_v9 = vmul.f32 %v8533_v33, %v5359_v8 }
 0x82d   : > { %v5510_v57 = vunpack.c.l.b16 %v5443_v28  ;;  %v5511_v13 = vunpack.c.h.b16 %v5443_v28  ;;  %v5357_v45 = vunpack.c.l.bf16 %v5283_v61  ;;  %v5408_v1 = vmul.f32 %v8523_v63, %v5356_v41 }
 0x82e   : > { %v5458_v62 = vpack.c.bf16 %v5413_v15, %v5412_v50  ;;  %v5459_v30 = vpack.c.bf16 %v5415_v9, %v5414_v44  ;;  %v5440_v25 = vpack.c.bf16 %v5377_v22, %v5376_v43  ;;  %v5441_v52 = vpack.c.bf16 %v5379_v59, %v5378_v18 }
 0x82f   : > { %v5570_v49 = vpack.c.b16 %v5510_v57, %v5508_v34  ;;  %v5571_v24 = vpack.c.b16 %v5511_v13, %v5509_v60  ;;  %v5409_v48 = vmul.f32 %v8529_v40, %v5357_v45  ;;  %v5410_v3 = vmul.f32 %v8531_v55, %v5356_v41 }
 0x830   : > { %v5540_v39 = vunpack.c.l.b16 %v5458_v62  ;;  %v5542_v26 = vunpack.c.l.b16 %v5459_v30  ;;  %v5541_v32 = vunpack.c.h.b16 %v5458_v62  ;;  %v5543_v56 = vunpack.c.h.b16 %v5459_v30 }
 0x831   : > { %5638 = vmatpush.bf16.msra.mxu0 %v5570_v49  ;;  %5686 = vmatpush.bf16.msra.mxu2 %v5571_v24  ;;  %v5411_v54 = vmul.f32 %v8533_v33, %v5357_v45  ;;  %v5504_v38 = vunpack.c.l.b16 %v5440_v25  ;;  %v5506_v31 = vunpack.c.l.b16 %v5441_v52  ;;  %v5456_v7 = vpack.c.bf16 %v5409_v48, %v5408_v1  ;;  %v8653_v33 = vld [vmem:[%s8650_s29] ss:$8 sm:$0x3] }
 0x832   : > { %v5586_v46 = vpack.c.b16 %v5542_v26, %v5540_v39  ;;  %v5587_v51 = vpack.c.b16 %v5543_v56, %v5541_v32  ;;  %v5505_v63 = vunpack.c.h.b16 %v5440_v25  ;;  %v5507_v20 = vunpack.c.h.b16 %v5441_v52 }
 0x833   : > { %v5457_v0 = vpack.c.bf16 %v5411_v54, %v5410_v3  ;;  %v5568_v36 = vpack.c.b16 %v5506_v31, %v5504_v38  ;;  %v5536_v2 = vunpack.c.l.b16 %v5456_v7  ;;  %v5537_v61 = vunpack.c.h.b16 %v5456_v7 }
 0x834   : > { %5662 = vmatpush.bf16.msra.mxu1 %v5586_v46  ;;  %5710 = vmatpush.bf16.msra.mxu3 %v5587_v51  ;;  %v5569_v37 = vpack.c.b16 %v5507_v20, %v5505_v63  ;;  %v5047_v35 = vstv %s5046_s28 }
 0x835   : > { %v5538_v27 = vunpack.c.l.b16 %v5457_v0  ;;  %v5539_v40 = vunpack.c.h.b16 %v5457_v0  ;;  %5639 = vmatpush.bf16.msra.mxu0 %v5568_v36  ;;  %v5048_v17 = vadd.f32 %v5047_v35, %v8653_v33 }
 0x836   : > { %5687 = vmatpush.bf16.msra.mxu2 %v5569_v37 }
 0x837   : > { %v5584_v58 = vpack.c.b16 %v5538_v27, %v5536_v2  ;;  %v5585_v55 = vpack.c.b16 %v5539_v40, %v5537_v61  ;;  %v5052_v8 = vperm.slane %v5048_v17, 0  ;;  %v5053_v28 = vperm.slane %v5048_v17, 1 }
 0x838   : > { %5640 = vmatmul.bf16.vlgmr.msra.gmra.mxu0 %v7310_v47 }
 0x839   : > { %5663 = vmatpush.bf16.msra.mxu1 %v5584_v58  ;;  %5711 = vmatpush.bf16.msra.mxu3 %v5585_v55  ;;  %v5056_v42 = vsub.f32 %v7152_v5, %v5052_v8  ;;  %v5058_v43 = vsub.f32 %v7154_v6, %v5052_v8  ;;  %v5057_v15 = vsub.f32 %v7152_v5, %v5053_v28 }
 0x83a   : > { %5688 = vmatmul.bf16.vlgmr.msra.gmra.mxu2 %v7310_v47  ;;  %v5059_v44 = vsub.f32 %v7154_v6, %v5053_v28 }
 0x83b   : > { %v5060_v41 = vand.u32 2147483647, %v5056_v42  ;;  %v5062_v50 = vand.u32 2147483647, %v5058_v43  ;;  %v5061_v30 = vand.u32 2147483647, %v5057_v15 }
 0x83c   : > { %5664 = vmatmul.bf16.vlgmr.msra.gmra.mxu1 %v7316_v10  ;;  %5712 = vmatmul.bf16.vlgmr.msra.gmra.mxu3 %v7316_v10  ;;  %v5063_v22 = vand.u32 2147483647, %v5059_v44 }
 0x83d   : > { %v5064_v34 = vsub.f32 1.0, %v5060_v41  ;;  %v5066_v57 = vsub.f32 1.0, %v5062_v50  ;;  %v5065_v39 = vsub.f32 1.0, %v5061_v30 }
 0x83e   : > { %v5067_v32 = vsub.f32 1.0, %v5063_v22 }
 0x83f   : > { %v8660_v49 = vmax.f32 %v5064_v34, 0.0  ;;  %v8662_v24 = vmax.f32 %v5066_v57, 0.0  ;;  %v8666_v51 = vmax.f32 %v5065_v39, 0.0 }
 0x840   : > { %v8668_v54 = vmax.f32 %v5067_v32, 0.0 }
 0x848   : > { %5645 = vmatmul.bf16.gmra.mxu0 %v7320_v11 }
 0x84a   : > { %5693 = vmatmul.bf16.gmra.mxu2 %v7320_v11 }
 0x84c   : > { %5669 = vmatmul.bf16.gmra.mxu1 %v7324_v16  ;;  %5717 = vmatmul.bf16.gmra.mxu3 %v7324_v16 }
 0x858   : > { %5650 = vmatmul.bf16.gmra.mxu0 %v7328_v19 }
 0x85a   : > { %5698 = vmatmul.bf16.gmra.mxu2 %v7328_v19 }
 0x85c   : > { %5674 = vmatmul.bf16.gmra.mxu1 %v7332_v23  ;;  %5722 = vmatmul.bf16.gmra.mxu3 %v7332_v23 }
 0x8b5   : > { %v5641_v14 = vpop.f32.mrf.mxu0 }
 0x8b9   : > { %v5665_v18 = vpop.f32.mrf.mxu1 }
 0x8ba   : > { %v5666_v62 = vadd.f32 %v5665_v18, %v5641_v14 }
 0x8bc   : > { %v5728_v1 = vmul.f32 %v5666_v62, %v8660_v49 }
 0x8bd   : > { %v5689_v9 = vpop.f32.mrf.mxu2  ;;  %v5643_v13 = vpop.f32.mrf.mxu0 }
 0x8bf   : > { %v5713_v60 = vpop.f32.mrf.mxu3 }
 0x8c0   : > { %v5714_v25 = vadd.f32 %v5713_v60, %v5689_v9 }
 0x8c1   : > { %v5667_v59 = vpop.f32.mrf.mxu1 }
 0x8c2   : > { %v5668_v45 = vadd.f32 %v5667_v59, %v5643_v13  ;;  %v5729_v7 = vmul.f32 %v5714_v25, %v8666_v51 }
 0x8c4   : > { %v5730_v26 = vmul.f32 %v5668_v45, %v8662_v24 }
 0x8c5   : > { %v5691_v56 = vpop.f32.mrf.mxu2  ;;  %v5646_v46 = vpop.f32.mrf.mxu0 }
 0x8c6   : > { %v5740_v52 = vadd.f32 %v5730_v26, %v5728_v1 }
 0x8c7   : > { %v5715_v48 = vpop.f32.mrf.mxu3 }
 0x8c8   : > { %v5741_v3 = vrot.slane %v5740_v52, 4  ;;  %v5716_v38 = vadd.f32 %v5715_v48, %v5691_v56 }
 0x8c9   : > { %v5670_v31 = vpop.f32.mrf.mxu1 }
 0x8ca   : > { %v5742_v63 = vadd.f32 %v5741_v3, %v5740_v52  ;;  %v5731_v0 = vmul.f32 %v5716_v38, %v8668_v54  ;;  %v5671_v58 = vadd.f32 %v5670_v31, %v5646_v46 }
 0x8cc   : > { %v5747_v20 = vadd.f32 %v5731_v0, %v5729_v7  ;;  %v5743_v36 = vrot.slane %v5742_v63, 2  ;;  %v5732_v43 = vmul.f32 %v5671_v58, %v8660_v49 }
 0x8cd   : > { %v5694_v2 = vpop.f32.mrf.mxu2  ;;  %v5648_v37 = vpop.f32.mrf.mxu0 }
 0x8ce   : > { %v5748_v61 = vrot.slane %v5747_v20, 4  ;;  %v5744_v55 = vadd.f32 %v5743_v36, %v5742_v63 }
 0x8cf   : > { %v5718_v27 = vpop.f32.mrf.mxu3 }
 0x8d0   : > { %v5749_v40 = vadd.f32 %v5748_v61, %v5747_v20  ;;  %v5745_v28 = vrot.slane %v5744_v55, 1  ;;  %v5719_v50 = vadd.f32 %v5718_v27, %v5694_v2 }
 0x8d1   : > { %v5672_v35 = vpop.f32.mrf.mxu1 }
 0x8d2   : > { %v5750_v17 = vrot.slane %v5749_v40, 2  ;;  %v5673_v8 = vadd.f32 %v5672_v35, %v5648_v37  ;;  %v5746_v13 = vadd.f32 %v5745_v28, %v5744_v55  ;;  %v5733_v22 = vmul.f32 %v5719_v50, %v8666_v51 }
 0x8d4   : > { %v5751_v42 = vadd.f32 %v5750_v17, %v5749_v40  ;;  %v5734_v14 = vmul.f32 %v5673_v8, %v8662_v24 }
 0x8d5   : > { %v5696_v18 = vpop.f32.mrf.mxu2  ;;  %v5651_v9 = vpop.f32.mrf.mxu0 }
 0x8d6   : > { %v5752_v41 = vrot.slane %v5751_v42, 1  ;;  %v5754_v15 = vadd.f32 %v5734_v14, %v5732_v43 }
 0x8d7   : > { %v5720_v44 = vpop.f32.mrf.mxu3 }
 0x8d8   : > { %v5753_v34 = vadd.f32 %v5752_v41, %v5751_v42  ;;  %v5755_v57 = vrot.slane %v5754_v15, 4  ;;  %v5721_v60 = vadd.f32 %v5720_v44, %v5696_v18 }
 0x8d9   : > { %v5675_v62 = vpop.f32.mrf.mxu1 }
 0x8da   : > { %v5784_v30 = vrot.slane %v5753_v34, 7  ;;  %v5756_v59 = vadd.f32 %v5755_v57, %v5754_v15  ;;  %v5735_v45 = vmul.f32 %v5721_v60, %v8668_v54  ;;  %v5676_v3 = vadd.f32 %v5675_v62, %v5651_v9 }
 0x8dc   : > { %v5785_v1 = vsel %vm264_vm1, %v5746_v13, %v5784_v30  ;;  %v5761_v39 = vadd.f32 %v5735_v45, %v5733_v22  ;;  %v5757_v32 = vrot.slane %v5756_v59, 2  ;;  %v5736_v20 = vmul.f32 %v5676_v3, %v8660_v49 }
 0x8dd   : > { %v5787_v26 = vadd.f32 %v5785_v1, %v8653_v33  ;;  %v5699_v56 = vpop.f32.mrf.mxu2  ;;  %v5653_v48 = vpop.f32.mrf.mxu0 }
 0x8de   : > { %v5762_v25 = vrot.slane %v5761_v39, 4  ;;  %v5758_v38 = vadd.f32 %v5757_v32, %v5756_v59 }
 0x8df   : > { %5788 = vst.msk [vmem:[%s8650_s29] ss:$8 sm:$0x3] %vm7366_vm5, %v5787_v26  ;;  %v5723_v52 = vpop.f32.mrf.mxu3 }
 0x8e0   : > { %v5763_v46 = vadd.f32 %v5762_v25, %v5761_v39  ;;  %v5759_v33 = vrot.slane %v5758_v38, 1  ;;  %v5724_v27 = vadd.f32 %v5723_v52, %v5699_v56 }
 0x8e1   : > { %v5677_v31 = vpop.f32.mrf.mxu1 }
 0x8e2   : > { %v5764_v7 = vrot.slane %v5763_v46, 2  ;;  %v5678_v63 = vadd.f32 %v5677_v31, %v5653_v48  ;;  %v5760_v17 = vadd.f32 %v5759_v33, %v5758_v38  ;;  %v5737_v42 = vmul.f32 %v5724_v27, %v8666_v51 }
 0x8e4   : > { %v5765_v0 = vadd.f32 %v5764_v7, %v5763_v46  ;;  %v5738_v36 = vmul.f32 %v5678_v63, %v8662_v24 }
 0x8e5   : > { %v5701_v2 = vpop.f32.mrf.mxu2 }
 0x8e6   : > { %v5766_v61 = vrot.slane %v5765_v0, 1  ;;  %v5768_v37 = vadd.f32 %v5738_v36, %v5736_v20 }
 0x8e7   : > { %v5725_v40 = vpop.f32.mrf.mxu3 }
 0x8e8   : > { %v5767_v58 = vadd.f32 %v5766_v61, %v5765_v0  ;;  %v5769_v55 = vrot.slane %v5768_v37, 4  ;;  %v5726_v35 = vadd.f32 %v5725_v40, %v5701_v2 }
 0x8ea   : > { %v5792_v8 = vrot.slane %v5767_v58, 7  ;;  %v5770_v43 = vadd.f32 %v5769_v55, %v5768_v37  ;;  %v5739_v49 = vmul.f32 %v5726_v35, %v8668_v54 }
 0x8ec   : > { %v5793_v24 = vsel %vm264_vm1, %v5760_v17, %v5792_v8  ;;  %v5775_v14 = vadd.f32 %v5739_v49, %v5737_v42  ;;  %v5771_v18 = vrot.slane %v5770_v43, 2 }
 0x8ed   : > { %v5795_v28 = vadd.f32 %v5793_v24, %v8488_v29 }
 0x8ee   : > { %v5776_v41 = vrot.slane %v5775_v14, 4  ;;  %v5772_v15 = vadd.f32 %v5771_v18, %v5770_v43 }
 0x8ef   : > { %5796 = vst.msk [vmem:[%s8482_s19] ss:$8 sm:$0x3] %vm7366_vm5, %v5795_v28  ;;  %s8701_s19 = scalar_lea.vmem %s7094_s22, %s5833_s17 }
 0x8f0   : > { %v5777_v50 = vadd.f32 %v5776_v41, %v5775_v14  ;;  %v5773_v51 = vrot.slane %v5772_v15, 1 }
 0x8f2   : > { %v5778_v44 = vrot.slane %v5777_v50, 2  ;;  %v5774_v57 = vadd.f32 %v5773_v51, %v5772_v15 }
 0x8f4   : > { %v5779_v9 = vadd.f32 %v5778_v44, %v5777_v50 }
 0x8f6   : > { %v5780_v34 = vrot.slane %v5779_v9, 1 }
 0x8f8   : > { %v5781_v54 = vadd.f32 %v5780_v34, %v5779_v9 }
 0x8fa   : > { %v5800_v29 = vrot.slane %v5781_v54, 7 }
 0x8fc   : > { %v5801_v60 = vsel %vm264_vm1, %v5774_v57, %v5800_v29 }
 0x8fd   : > { %v5803_v13 = vadd.f32 %v5801_v60, %v8491_v21 }
 0x8ff   : > { %5804 = vst.msk [vmem:[%s8485_s20] ss:$8 sm:$0x3] %vm7366_vm5, %v5803_v13  ;;  %s5806_s20 = sadd.s32 7, %s7135_s23 }
 0x900   : > { %s5807_s21 = sshra.s32 %s5806_s20, 3  ;;  %s5810_s24 = sand.u32 7, %s5806_s20 }
 0x901   : > { %s6912_s27 = sshll.u32 %s5807_s21, 4  ;;  %s5836_s26 = scvt.s32.f32 %s5806_s20 }
 0x902   : > { %s5813_s25 = sadd.s32 %s6912_s27, %s5810_s24 }
 0x903   : > { %s8866_s28 = scalar_lea.vmem %s7094_s22, %s5813_s25 }
 0x906   : > { %v8704_v62 = vld [vmem:[%s8698_s18] ss:$8 sm:$0x3] }
 0x907   : > { %v8707_v30 = vld [vmem:[%s8701_s19] ss:$8 sm:$0x3]  ;;  %v5839_v21 = vadd.f32 %v8704_v62, %v7150_v4 }
 0x908   : > { %v5840_v22 = vadd.f32 %v8707_v30, %v7162_v12 }
 0x909   : > { %v5863_v59 = vperm.slane %v5839_v21, 0  ;;  %v5864_v45 = vperm.slane %v5839_v21, 1 }
 0x90a   : > { %v5886_v1 = vperm.slane %v5840_v22, 0  ;;  %v5887_v39 = vperm.slane %v5840_v22, 1 }
 0x90b   : > { %v5867_v26 = vsub.f32 %v7152_v5, %v5863_v59  ;;  %v5868_v32 = vsub.f32 %v7152_v5, %v5864_v45  ;;  %v5869_v7 = vsub.f32 %v7154_v6, %v5863_v59  ;;  %v5870_v36 = vsub.f32 %v7154_v6, %v5864_v45 }
 0x90c   : > { %v5890_v56 = vsub.f32 %v7152_v5, %v5886_v1  ;;  %v5891_v25 = vsub.f32 %v7152_v5, %v5887_v39  ;;  %v5892_v52 = vsub.f32 %v7154_v6, %v5886_v1  ;;  %v5893_v48 = vsub.f32 %v7154_v6, %v5887_v39 }
 0x90d   : > { %v5871_v4 = vand.u32 2147483647, %v5867_v26  ;;  %v5872_v46 = vand.u32 2147483647, %v5868_v32  ;;  %v5873_v61 = vand.u32 2147483647, %v5869_v7 }
 0x90e   : > { %v5894_v3 = vand.u32 2147483647, %v5890_v56  ;;  %v5895_v12 = vand.u32 2147483647, %v5891_v25  ;;  %v5896_v38 = vand.u32 2147483647, %v5892_v52 }
 0x90f   : > { %v5897_v31 = vand.u32 2147483647, %v5893_v48  ;;  %v5875_v63 = vsub.f32 1.0, %v5871_v4  ;;  %v5876_v0 = vsub.f32 1.0, %v5872_v46  ;;  %v5874_v58 = vand.u32 2147483647, %v5870_v36 }
 0x910   : > { %v5898_v20 = vsub.f32 1.0, %v5894_v3  ;;  %v5899_v33 = vsub.f32 1.0, %v5895_v12  ;;  %v5900_v2 = vsub.f32 1.0, %v5896_v38  ;;  %v5877_v55 = vsub.f32 1.0, %v5873_v61 }
 0x911   : > { %v5879_v27 = vmax.f32 %v5875_v63, 0.0  ;;  %v5880_v37 = vmax.f32 %v5876_v0, 0.0  ;;  %v5901_v40 = vsub.f32 1.0, %v5897_v31  ;;  %v5878_v42 = vsub.f32 1.0, %v5874_v58 }
 0x912   : > { %v5902_v17 = vmax.f32 %v5898_v20, 0.0  ;;  %v5903_v8 = vmax.f32 %v5899_v33, 0.0  ;;  %v5881_v43 = vmax.f32 %v5877_v55, 0.0  ;;  %v5904_v49 = vmax.f32 %v5900_v2, 0.0 }
 0x913   : > { %v8721_v35 = vpack.c.bf16 %v5880_v37, %v5879_v27  ;;  %v5905_v24 = vmax.f32 %v5901_v40, 0.0  ;;  %v5882_v28 = vmax.f32 %v5878_v42, 0.0 }
 0x914   : > { %v5906_v18 = vpack.c.bf16 %v5903_v8, %v5902_v17 }
 0x915   : > { %v8724_v14 = vrot.slane %v8721_v35, 3  ;;  %v8729_v50 = vpack.c.bf16 %v5882_v28, %v5881_v43  ;;  %v5907_v9 = vpack.c.bf16 %v5905_v24, %v5904_v49 }
 0x916   : > { %v8739_v29 = vunpack.c.l.bf16 %v5906_v18  ;;  %v8745_v1 = vunpack.c.h.bf16 %v5906_v18 }
 0x917   : > { %v5922_v41 = vsel %vm357_vm2, %v8721_v35, %v8724_v14  ;;  %v5919_v44 = vsel %vm353_vm3, %v8721_v35, %v8724_v14  ;;  %v8735_v51 = vrot.slane %v8729_v50, 3  ;;  %v8747_v39 = vunpack.c.l.bf16 %v5907_v9 }
 0x918   : > { %v5924_v15 = vrot.slane %v5922_v41, 3  ;;  %v8737_v34 = vrot.slane %v5919_v44, 2  ;;  %v8749_v26 = vunpack.c.h.bf16 %v5907_v9 }
 0x919   : > { %v5935_v60 = vsel %vm357_vm2, %v8729_v50, %v8735_v51 }
 0x91a   : > { %v5945_v54 = vunpack.i.h.s16 %v5924_v15  ;;  %v6878_v57 = vpack.i.b16 %v5924_v15, %v5924_v15  ;;  %v5943_v13 = vunpack.i.h.s16 %v8737_v34  ;;  %v5937_v22 = vrot.slane %v5935_v60, 3 }
 0x91c   : > { %v5961_v21 = vpack.i.b16 %v5945_v54, %v5945_v54  ;;  %v5982_v59 = vperm.slane %v6878_v57, 0  ;;  %v5983_v45 = vperm.slane %v6878_v57, 1  ;;  %v8751_v32 = vpack.i.b16 %v5943_v13, %v5943_v13 }
 0x91d   : > { %v5953_v52 = vunpack.i.h.s16 %v5937_v22  ;;  %v6882_v46 = vpack.i.b16 %v5937_v22, %v5937_v22 }
 0x91e   : > { %v5984_v56 = vperm.slane %v5961_v21, 0  ;;  %v5985_v25 = vperm.slane %v5961_v21, 1  ;;  %v6051_v48 = vpack.i.b16 %v5982_v59, %v5982_v59  ;;  %v6055_v4 = vpack.i.b16 %v5983_v45, %v5983_v45 }
 0x91f   : > { %v5980_v3 = vperm.slane %v8751_v32, 0  ;;  %v5981_v12 = vperm.slane %v8751_v32, 1  ;;  %v5969_v7 = vpack.i.b16 %v5953_v52, %v5953_v52  ;;  %v5998_v20 = vperm.slane %v6882_v46, 0 }
 0x920   : > { %v6059_v38 = vpack.i.b16 %v5984_v56, %v5984_v56  ;;  %v6063_v31 = vpack.i.b16 %v5985_v25, %v5985_v25  ;;  %v6053_v63 = vperm.slane %v6051_v48, 0  ;;  %v6057_v0 = vperm.slane %v6055_v4, 0 }
 0x921   : > { %v5999_v36 = vperm.slane %v6882_v46, 1  ;;  %v8755_v33 = vpack.i.b16 %v5980_v3, %v5980_v3  ;;  %v6000_v27 = vperm.slane %v5969_v7, 0  ;;  %v6001_v37 = vperm.slane %v5969_v7, 1 }
 0x922   : > { %v6061_v2 = vperm.slane %v6059_v38, 0  ;;  %v6065_v61 = vperm.slane %v6063_v31, 0  ;;  %v6142_v40 = vunpack.c.l.bf16 %v6053_v63  ;;  %v6143_v58 = vunpack.c.l.bf16 %v6057_v0 }
 0x923   : > { %v6115_v55 = vpack.i.b16 %v5998_v20, %v5998_v20  ;;  %v6119_v17 = vpack.i.b16 %v5999_v36, %v5999_v36  ;;  %v6123_v43 = vpack.i.b16 %v6000_v27, %v6000_v27  ;;  %v6127_v49 = vpack.i.b16 %v6001_v37, %v6001_v37 }
 0x924   : > { %v6144_v8 = vunpack.c.l.bf16 %v6061_v2  ;;  %v6145_v42 = vunpack.c.l.bf16 %v6065_v61  ;;  %v6190_v24 = vmul.f32 %v8739_v29, %v6142_v40  ;;  %v6191_v28 = vmul.f32 %v8745_v1, %v6143_v58 }
 0x925   : > { %v6192_v18 = vmul.f32 %v8747_v39, %v6142_v40  ;;  %v6193_v41 = vmul.f32 %v8749_v26, %v6143_v58  ;;  %v6125_v57 = vperm.slane %v6123_v43, 0  ;;  %v6129_v60 = vperm.slane %v6127_v49, 0 }
 0x926   : > { %v6194_v15 = vmul.f32 %v8739_v29, %v6144_v8  ;;  %v6195_v44 = vmul.f32 %v8745_v1, %v6145_v42  ;;  %v6196_v9 = vmul.f32 %v8747_v39, %v6144_v8  ;;  %v6197_v54 = vmul.f32 %v8749_v26, %v6145_v42 }
 0x927   : > { %v6242_v13 = vpack.c.bf16 %v6191_v28, %v6190_v24  ;;  %v6243_v21 = vpack.c.bf16 %v6193_v41, %v6192_v18  ;;  %v6117_v45 = vperm.slane %v6115_v55, 0  ;;  %v6121_v56 = vperm.slane %v6119_v17, 0 }
 0x928   : > { %v6244_v22 = vpack.c.bf16 %v6195_v44, %v6194_v15  ;;  %v6245_v59 = vpack.c.bf16 %v6197_v54, %v6196_v9  ;;  %v6160_v25 = vunpack.c.l.bf16 %v6125_v57  ;;  %v6161_v52 = vunpack.c.l.bf16 %v6129_v60 }
 0x929   : > { %v6318_v48 = vunpack.c.l.b16 %v6242_v13  ;;  %v6320_v4 = vunpack.c.l.b16 %v6243_v21  ;;  %v6158_v27 = vunpack.c.l.bf16 %v6117_v45  ;;  %v6159_v58 = vunpack.c.l.bf16 %v6121_v56 }
 0x92a   : > { %v6322_v46 = vunpack.c.l.b16 %v6244_v22  ;;  %v6324_v3 = vunpack.c.l.b16 %v6245_v59  ;;  %v6323_v38 = vunpack.c.h.b16 %v6244_v22  ;;  %v6325_v31 = vunpack.c.h.b16 %v6245_v59 }
 0x92b   : > { %v6226_v7 = vmul.f32 %v8739_v29, %v6160_v25  ;;  %v6227_v63 = vmul.f32 %v8745_v1, %v6161_v52  ;;  %v6228_v0 = vmul.f32 %v8747_v39, %v6160_v25  ;;  %v6229_v20 = vmul.f32 %v8749_v26, %v6161_v52 }
 0x92c   : > { %v6372_v36 = vpack.c.b16 %v6324_v3, %v6322_v46  ;;  %v6373_v2 = vpack.c.b16 %v6325_v31, %v6323_v38  ;;  %v6370_v61 = vpack.c.b16 %v6320_v4, %v6318_v48  ;;  %v6319_v55 = vunpack.c.h.b16 %v6242_v13 }
 0x92d   : > { %v6260_v37 = vpack.c.bf16 %v6227_v63, %v6226_v7  ;;  %v6261_v40 = vpack.c.bf16 %v6229_v20, %v6228_v0  ;;  %v6222_v17 = vmul.f32 %v8739_v29, %v6158_v27  ;;  %v6224_v8 = vmul.f32 %v8747_v39, %v6158_v27 }
 0x92e   : > { %6422 = vmatpush.bf16.msrb.mxu0 %v6372_v36  ;;  %6470 = vmatpush.bf16.msrb.mxu2 %v6373_v2  ;;  %v6321_v42 = vunpack.c.h.b16 %v6243_v21  ;;  %v6045_v43 = vperm.slane %v8755_v33, 0  ;;  %v6223_v41 = vmul.f32 %v8745_v1, %v6159_v58  ;;  %v6225_v15 = vmul.f32 %v8749_v26, %v6159_v58 }
 0x92f   : > { %v6354_v49 = vunpack.c.l.b16 %v6260_v37  ;;  %v6356_v24 = vunpack.c.l.b16 %v6261_v40  ;;  %v6355_v28 = vunpack.c.h.b16 %v6260_v37  ;;  %v6357_v18 = vunpack.c.h.b16 %v6261_v40 }
 0x930   : > { %v6371_v44 = vpack.c.b16 %v6321_v42, %v6319_v55  ;;  %v6047_v9 = vpack.i.b16 %v5981_v12, %v5981_v12  ;;  %v6140_v60 = vunpack.c.l.bf16 %v6045_v43  ;;  %v5932_v33 = vsel %vm353_vm3, %v8729_v50, %v8735_v51 }
 0x931   : > { %v6388_v54 = vpack.c.b16 %v6356_v24, %v6354_v49  ;;  %v6389_v57 = vpack.c.b16 %v6357_v18, %v6355_v28  ;;  %v6258_v13 = vpack.c.bf16 %v6223_v41, %v6222_v17  ;;  %v6259_v21 = vpack.c.bf16 %v6225_v15, %v6224_v8 }
 0x932   : > { %6423 = vmatpush.bf16.msrb.mxu0 %v6370_v61  ;;  %6471 = vmatpush.bf16.msrb.mxu2 %v6371_v44  ;;  %v6049_v22 = vperm.slane %v6047_v9, 0  ;;  %v5934_v59 = vrot.slane %v5932_v33, 2  ;;  %v6186_v45 = vmul.f32 %v8739_v29, %v6140_v60  ;;  %v6188_v32 = vmul.f32 %v8747_v39, %v6140_v60 }
 0x933   : > { %6446 = vmatpush.bf16.msrb.mxu1 %v6388_v54  ;;  %6494 = vmatpush.bf16.msrb.mxu3 %v6389_v57  ;;  %v6877_v12 = vpack.i.b16 %v8737_v34, %v8737_v34  ;;  %v6350_v56 = vunpack.c.l.b16 %v6258_v13  ;;  %v6352_v25 = vunpack.c.l.b16 %v6259_v21  ;;  %v6351_v52 = vunpack.c.h.b16 %v6258_v13 }
 0x934   : > { %v6353_v48 = vunpack.c.h.b16 %v6259_v21  ;;  %v6141_v4 = vunpack.c.l.bf16 %v6049_v22  ;;  %v5951_v46 = vunpack.i.h.s16 %v5934_v59  ;;  %v6881_v63 = vpack.i.b16 %v5934_v59, %v5934_v59 }
 0x935   : > { %v5978_v3 = vperm.slane %v6877_v12, 0  ;;  %v5979_v38 = vperm.slane %v6877_v12, 1  ;;  %v6386_v31 = vpack.c.b16 %v6352_v25, %v6350_v56  ;;  %v5916_v0 = vsel %vm349_vm4, %v8721_v35, %v8724_v14 }
 0x936   : > { %v6387_v7 = vpack.c.b16 %v6353_v48, %v6351_v52  ;;  %v6187_v20 = vmul.f32 %v8745_v1, %v6141_v4  ;;  %v6189_v36 = vmul.f32 %v8749_v26, %v6141_v4  ;;  %v5967_v34 = vpack.i.b16 %v5951_v46, %v5951_v46 }
 0x937   : > { %v6035_v2 = vpack.i.b16 %v5978_v3, %v5978_v3  ;;  %6447 = vmatpush.bf16.msrb.mxu1 %v6386_v31  ;;  %v6039_v61 = vpack.i.b16 %v5979_v38, %v5979_v38  ;;  %v5994_v27 = vperm.slane %v6881_v63, 0  ;;  %v5995_v37 = vperm.slane %v6881_v63, 1 }
 0x938   : > { %6495 = vmatpush.bf16.msrb.mxu3 %v6387_v7  ;;  %v8789_v40 = vrot.slane %v5916_v0, 1  ;;  %v6240_v58 = vpack.c.bf16 %v6187_v20, %v6186_v45  ;;  %v6241_v55 = vpack.c.bf16 %v6189_v36, %v6188_v32  ;;  %v5996_v17 = vperm.slane %v5967_v34, 0 }
 0x939   : > { %v5997_v8 = vperm.slane %v5967_v34, 1  ;;  %v6037_v42 = vperm.slane %v6035_v2, 0  ;;  %v6041_v43 = vperm.slane %v6039_v61, 0  ;;  %v6099_v49 = vpack.i.b16 %v5994_v27, %v5994_v27 }
 0x93a   : > { %v6103_v24 = vpack.i.b16 %v5995_v37, %v5995_v37  ;;  %v6314_v28 = vunpack.c.l.b16 %v6240_v58  ;;  %v6316_v18 = vunpack.c.l.b16 %v6241_v55  ;;  %v6107_v41 = vpack.i.b16 %v5996_v17, %v5996_v17 }
 0x93b   : > { %v6111_v15 = vpack.i.b16 %v5997_v8, %v5997_v8  ;;  %v6315_v44 = vunpack.c.h.b16 %v6240_v58  ;;  %v6317_v9 = vunpack.c.h.b16 %v6241_v55  ;;  %v6138_v54 = vunpack.c.l.bf16 %v6037_v42 }
 0x93c   : > { %v6139_v57 = vunpack.c.l.bf16 %v6041_v43  ;;  %v6368_v60 = vpack.c.b16 %v6316_v18, %v6314_v28  ;;  %v6109_v33 = vperm.slane %v6107_v41, 0  ;;  %v6101_v21 = vperm.slane %v6099_v49, 0 }
 0x93d   : > { %v6113_v13 = vperm.slane %v6111_v15, 0  ;;  %v6369_v22 = vpack.c.b16 %v6317_v9, %v6315_v44  ;;  %v6182_v59 = vmul.f32 %v8739_v29, %v6138_v54  ;;  %v6184_v32 = vmul.f32 %v8747_v39, %v6138_v54 }
 0x93e   : > { %v6183_v45 = vmul.f32 %v8745_v1, %v6139_v57  ;;  %6424 = vmatpush.bf16.msrb.mxu0 %v6368_v60  ;;  %v6156_v12 = vunpack.c.l.bf16 %v6109_v33  ;;  %v6185_v25 = vmul.f32 %v8749_v26, %v6139_v57  ;;  %v6105_v52 = vperm.slane %v6103_v24, 0 }
 0x93f   : > { %v6157_v56 = vunpack.c.l.bf16 %v6113_v13  ;;  %6472 = vmatpush.bf16.msrb.mxu2 %v6369_v22  ;;  %v6154_v4 = vunpack.c.l.bf16 %v6101_v21  ;;  %v5941_v46 = vunpack.i.h.s16 %v8789_v40  ;;  %v5929_v3 = vsel %vm349_vm4, %v8729_v50, %v8735_v51 }
 0x940   : > { %v6238_v48 = vpack.c.bf16 %v6183_v45, %v6182_v59  ;;  %v6218_v38 = vmul.f32 %v8739_v29, %v6156_v12  ;;  %v6220_v7 = vmul.f32 %v8747_v39, %v6156_v12  ;;  %v6239_v0 = vpack.c.bf16 %v6185_v25, %v6184_v32 }
 0x941   : > { %v6219_v31 = vmul.f32 %v8745_v1, %v6157_v56  ;;  %v6221_v63 = vmul.f32 %v8749_v26, %v6157_v56  ;;  %v6155_v36 = vunpack.c.l.bf16 %v6105_v52  ;;  %v6214_v34 = vmul.f32 %v8739_v29, %v6154_v4 }
 0x942   : > { %v6310_v20 = vunpack.c.l.b16 %v6238_v48  ;;  %v6216_v27 = vmul.f32 %v8747_v39, %v6154_v4  ;;  %v6311_v37 = vunpack.c.h.b16 %v6238_v48  ;;  %v6312_v58 = vunpack.c.l.b16 %v6239_v0 }
 0x943   : > { %v6256_v2 = vpack.c.bf16 %v6219_v31, %v6218_v38  ;;  %v6257_v61 = vpack.c.bf16 %v6221_v63, %v6220_v7  ;;  %v6215_v55 = vmul.f32 %v8745_v1, %v6155_v36  ;;  %v6217_v17 = vmul.f32 %v8749_v26, %v6155_v36 }
 0x944   : > { %v6313_v8 = vunpack.c.h.b16 %v6239_v0  ;;  %v6366_v28 = vpack.c.b16 %v6312_v58, %v6310_v20  ;;  %v5957_v54 = vpack.i.b16 %v5941_v46, %v5941_v46  ;;  %v5931_v57 = vrot.slane %v5929_v3, 1 }
 0x945   : > { %v6346_v42 = vunpack.c.l.b16 %v6256_v2  ;;  %v6348_v43 = vunpack.c.l.b16 %v6257_v61  ;;  %v6347_v49 = vunpack.c.h.b16 %v6256_v2  ;;  %v6349_v24 = vunpack.c.h.b16 %v6257_v61 }
 0x946   : > { %v6254_v18 = vpack.c.bf16 %v6215_v55, %v6214_v34  ;;  %v6255_v41 = vpack.c.bf16 %v6217_v17, %v6216_v27  ;;  %v6367_v15 = vpack.c.b16 %v6313_v8, %v6311_v37  ;;  %6425 = vmatpush.bf16.msrb.mxu0 %v6366_v28  ;;  %v5976_v22 = vperm.slane %v5957_v54, 0 }
 0x947   : > { %v6384_v44 = vpack.c.b16 %v6348_v43, %v6346_v42  ;;  %v6385_v9 = vpack.c.b16 %v6349_v24, %v6347_v49  ;;  %v5977_v59 = vperm.slane %v5957_v54, 1  ;;  %v5949_v45 = vunpack.i.h.s16 %v5931_v57 }
 0x948   : > { %v6342_v60 = vunpack.c.l.b16 %v6254_v18  ;;  %v6344_v33 = vunpack.c.l.b16 %v6255_v41  ;;  %6473 = vmatpush.bf16.msrb.mxu2 %v6367_v15  ;;  %v6343_v13 = vunpack.c.h.b16 %v6254_v18  ;;  %v6345_v21 = vunpack.c.h.b16 %v6255_v41 }
 0x949   : > { %6448 = vmatpush.bf16.msrb.mxu1 %v6384_v44  ;;  %6496 = vmatpush.bf16.msrb.mxu3 %v6385_v9  ;;  %v6876_v32 = vpack.i.b16 %v8789_v40, %v8789_v40  ;;  %v6880_v25 = vpack.i.b16 %v5931_v57, %v5931_v57  ;;  %v8812_v52 = vsel %vm264_vm1, %v8721_v35, %v8724_v14 }
 0x94a   : > { %v6382_v12 = vpack.c.b16 %v6344_v33, %v6342_v60  ;;  %v6383_v56 = vpack.c.b16 %v6345_v21, %v6343_v13  ;;  %v6027_v48 = vpack.i.b16 %v5976_v22, %v5976_v22  ;;  %v6031_v4 = vpack.i.b16 %v5977_v59, %v5977_v59 }
 0x94b   : > { %v5965_v46 = vpack.i.b16 %v5949_v45, %v5949_v45  ;;  %v5974_v3 = vperm.slane %v6876_v32, 0  ;;  %v5975_v38 = vperm.slane %v6876_v32, 1  ;;  %v5990_v31 = vperm.slane %v6880_v25, 0 }
 0x94c   : > { %v5991_v7 = vperm.slane %v6880_v25, 1  ;;  %v6029_v63 = vperm.slane %v6027_v48, 0  ;;  %v6033_v0 = vperm.slane %v6031_v4, 0 }
 0x94d   : > { %6449 = vmatpush.bf16.msrb.mxu1 %v6382_v12  ;;  %6497 = vmatpush.bf16.msrb.mxu3 %v6383_v56  ;;  %v5992_v40 = vperm.slane %v5965_v46, 0  ;;  %v5993_v20 = vperm.slane %v5965_v46, 1  ;;  %v6019_v36 = vpack.i.b16 %v5974_v3, %v5974_v3  ;;  %v6023_v34 = vpack.i.b16 %v5975_v38, %v5975_v38 }
 0x94e   : > { %v6083_v2 = vpack.i.b16 %v5990_v31, %v5990_v31  ;;  %v6087_v61 = vpack.i.b16 %v5991_v7, %v5991_v7  ;;  %v6136_v27 = vunpack.c.l.bf16 %v6029_v63  ;;  %v6137_v35 = vunpack.c.l.bf16 %v6033_v0 }
 0x94f   : > { %v6091_v14 = vpack.i.b16 %v5992_v40, %v5992_v40  ;;  %v6095_v37 = vpack.i.b16 %v5993_v20, %v5993_v20  ;;  %v6021_v58 = vperm.slane %v6019_v36, 0  ;;  %v6025_v55 = vperm.slane %v6023_v34, 0 }
 0x950   : > { %v6085_v17 = vperm.slane %v6083_v2, 0  ;;  %v6089_v8 = vperm.slane %v6087_v61, 0  ;;  %v6178_v42 = vmul.f32 %v8739_v29, %v6136_v27  ;;  %v6179_v43 = vmul.f32 %v8745_v1, %v6137_v35 }
 0x951   : > { %v6180_v49 = vmul.f32 %v8747_v39, %v6136_v27  ;;  %v6181_v24 = vmul.f32 %v8749_v26, %v6137_v35  ;;  %v6093_v28 = vperm.slane %v6091_v14, 0  ;;  %v6097_v18 = vperm.slane %v6095_v37, 0 }
 0x952   : > { %v6134_v41 = vunpack.c.l.bf16 %v6021_v58  ;;  %v6135_v15 = vunpack.c.l.bf16 %v6025_v55  ;;  %v6236_v44 = vpack.c.bf16 %v6179_v43, %v6178_v42  ;;  %v6150_v54 = vunpack.c.l.bf16 %v6085_v17 }
 0x953   : > { %v6237_v9 = vpack.c.bf16 %v6181_v24, %v6180_v49  ;;  %v6151_v57 = vunpack.c.l.bf16 %v6089_v8  ;;  %v6152_v60 = vunpack.c.l.bf16 %v6093_v28  ;;  %v6153_v33 = vunpack.c.l.bf16 %v6097_v18 }
 0x954   : > { %v6174_v13 = vmul.f32 %v8739_v29, %v6134_v41  ;;  %v6175_v21 = vmul.f32 %v8745_v1, %v6135_v15  ;;  %v6306_v22 = vunpack.c.l.b16 %v6236_v44  ;;  %v6307_v45 = vunpack.c.h.b16 %v6236_v44 }
 0x955   : > { %v6308_v59 = vunpack.c.l.b16 %v6237_v9  ;;  %v6309_v32 = vunpack.c.h.b16 %v6237_v9  ;;  %v6210_v12 = vmul.f32 %v8739_v29, %v6152_v60  ;;  %v6211_v56 = vmul.f32 %v8745_v1, %v6153_v33 }
 0x956   : > { %v6212_v25 = vmul.f32 %v8747_v39, %v6152_v60  ;;  %v6213_v48 = vmul.f32 %v8749_v26, %v6153_v33  ;;  %v6176_v3 = vmul.f32 %v8747_v39, %v6134_v41  ;;  %v6177_v38 = vmul.f32 %v8749_v26, %v6135_v15 }
 0x957   : > { %v6364_v4 = vpack.c.b16 %v6308_v59, %v6306_v22  ;;  %v6365_v46 = vpack.c.b16 %v6309_v32, %v6307_v45  ;;  %v6252_v31 = vpack.c.bf16 %v6211_v56, %v6210_v12  ;;  %v6234_v63 = vpack.c.bf16 %v6175_v21, %v6174_v13 }
 0x958   : > { %v6253_v7 = vpack.c.bf16 %v6213_v48, %v6212_v25  ;;  %v6206_v0 = vmul.f32 %v8739_v29, %v6150_v54  ;;  %v6235_v40 = vpack.c.bf16 %v6177_v38, %v6176_v3  ;;  %v6207_v20 = vmul.f32 %v8745_v1, %v6151_v57 }
 0x959   : > { %6426 = vmatpush.bf16.msrb.mxu0 %v6364_v4  ;;  %6474 = vmatpush.bf16.msrb.mxu2 %v6365_v46  ;;  %v6208_v36 = vmul.f32 %v8747_v39, %v6150_v54  ;;  %v5939_v34 = vunpack.i.h.s16 %v8812_v52  ;;  %v6338_v2 = vunpack.c.l.b16 %v6252_v31  ;;  %v6339_v27 = vunpack.c.h.b16 %v6252_v31 }
 0x95a   : > { %v6340_v61 = vunpack.c.l.b16 %v6253_v7  ;;  %v6341_v35 = vunpack.c.h.b16 %v6253_v7  ;;  %v6302_v14 = vunpack.c.l.b16 %v6234_v63  ;;  %v6304_v37 = vunpack.c.l.b16 %v6235_v40 }
 0x95b   : > { %v6209_v58 = vmul.f32 %v8749_v26, %v6151_v57  ;;  %v6250_v55 = vpack.c.bf16 %v6207_v20, %v6206_v0  ;;  %v6303_v42 = vunpack.c.h.b16 %v6234_v63  ;;  %v6305_v43 = vunpack.c.h.b16 %v6235_v40 }
 0x95c   : > { %v6380_v17 = vpack.c.b16 %v6340_v61, %v6338_v2  ;;  %v6381_v8 = vpack.c.b16 %v6341_v35, %v6339_v27  ;;  %v6362_v49 = vpack.c.b16 %v6304_v37, %v6302_v14  ;;  %v5955_v15 = vpack.i.b16 %v5939_v34, %v5939_v34 }
 0x95d   : > { %v6251_v24 = vpack.c.bf16 %v6209_v58, %v6208_v36  ;;  %v6334_v28 = vunpack.c.l.b16 %v6250_v55  ;;  %v6335_v18 = vunpack.c.h.b16 %v6250_v55  ;;  %v6363_v41 = vpack.c.b16 %v6305_v43, %v6303_v42 }
 0x95e   : > { %6450 = vmatpush.bf16.msrb.mxu1 %v6380_v17  ;;  %6498 = vmatpush.bf16.msrb.mxu3 %v6381_v8  ;;  %v5927_v44 = vsel %vm264_vm1, %v8729_v50, %v8735_v51  ;;  %v6875_v60 = vpack.i.b16 %v8812_v52, %v8812_v52  ;;  %v5972_v33 = vperm.slane %v5955_v15, 0  ;;  %v5973_v13 = vperm.slane %v5955_v15, 1 }
 0x95f   : > { %6427 = vmatpush.bf16.msrb.mxu0 %v6362_v49  ;;  %v6336_v9 = vunpack.c.l.b16 %v6251_v24  ;;  %v6337_v54 = vunpack.c.h.b16 %v6251_v24  ;;  %v5947_v57 = vunpack.i.h.s16 %v5927_v44  ;;  %6475 = vmatpush.bf16.msrb.mxu2 %v6363_v41  ;;  %v6879_v21 = vpack.i.b16 %v5927_v44, %v5927_v44 }
 0x960   : > { %v5970_v32 = vperm.slane %v6875_v60, 0  ;;  %v6011_v12 = vpack.i.b16 %v5972_v33, %v5972_v33  ;;  %v6015_v56 = vpack.i.b16 %v5973_v13, %v5973_v13  ;;  %v5971_v25 = vperm.slane %v6875_v60, 1 }
 0x961   : > { %v6378_v22 = vpack.c.b16 %v6336_v9, %v6334_v28  ;;  %v6379_v59 = vpack.c.b16 %v6337_v54, %v6335_v18  ;;  %v5963_v45 = vpack.i.b16 %v5947_v57, %v5947_v57  ;;  %v5986_v48 = vperm.slane %v6879_v21, 0 }
 0x962   : > { %v6003_v4 = vpack.i.b16 %v5970_v32, %v5970_v32  ;;  %v5987_v46 = vperm.slane %v6879_v21, 1  ;;  %v6013_v3 = vperm.slane %v6011_v12, 0  ;;  %v6017_v52 = vperm.slane %v6015_v56, 0 }
 0x963   : > { %6451 = vmatpush.bf16.msrb.mxu1 %v6378_v22  ;;  %6499 = vmatpush.bf16.msrb.mxu3 %v6379_v59  ;;  %v5988_v50 = vperm.slane %v5963_v45, 0  ;;  %v5989_v51 = vperm.slane %v5963_v45, 1  ;;  %v6007_v38 = vpack.i.b16 %v5971_v25, %v5971_v25  ;;  %v6067_v31 = vpack.i.b16 %v5986_v48, %v5986_v48 }
 0x964   : > { %v6005_v0 = vperm.slane %v6003_v4, 0  ;;  %v6071_v40 = vpack.i.b16 %v5987_v46, %v5987_v46  ;;  %v6132_v20 = vunpack.c.l.bf16 %v6013_v3  ;;  %v6133_v36 = vunpack.c.l.bf16 %v6017_v52 }
 0x965   : > { %v6075_v7 = vpack.i.b16 %v5988_v50, %v5988_v50  ;;  %v6079_v63 = vpack.i.b16 %v5989_v51, %v5989_v51  ;;  %v6009_v34 = vperm.slane %v6007_v38, 0  ;;  %v6069_v2 = vperm.slane %v6067_v31, 0 }
 0x966   : > { %v6130_v35 = vunpack.c.l.bf16 %v6005_v0  ;;  %v6073_v14 = vperm.slane %v6071_v40, 0  ;;  %v6170_v37 = vmul.f32 %v8739_v29, %v6132_v20  ;;  %v6171_v58 = vmul.f32 %v8745_v1, %v6133_v36 }
 0x967   : > { %v6077_v61 = vperm.slane %v6075_v7, 0  ;;  %v6081_v27 = vperm.slane %v6079_v63, 0  ;;  %v6172_v55 = vmul.f32 %v8747_v39, %v6132_v20  ;;  %v6173_v17 = vmul.f32 %v8749_v26, %v6133_v36 }
 0x968   : > { %v6131_v43 = vunpack.c.l.bf16 %v6009_v34  ;;  %v6166_v49 = vmul.f32 %v8739_v29, %v6130_v35  ;;  %v6232_v24 = vpack.c.bf16 %v6171_v58, %v6170_v37  ;;  %v6168_v18 = vmul.f32 %v8747_v39, %v6130_v35 }
 0x969   : > { %v6148_v8 = vunpack.c.l.bf16 %v6077_v61  ;;  %v6149_v42 = vunpack.c.l.bf16 %v6081_v27  ;;  %v6233_v28 = vpack.c.bf16 %v6173_v17, %v6172_v55  ;;  %v6146_v41 = vunpack.c.l.bf16 %v6069_v2 }
 0x96a   : > { %v6298_v57 = vunpack.c.l.b16 %v6232_v24  ;;  %v6299_v33 = vunpack.c.h.b16 %v6232_v24  ;;  %v6167_v59 = vmul.f32 %v8745_v1, %v6131_v43  ;;  %v6169_v45 = vmul.f32 %v8749_v26, %v6131_v43 }
 0x96b   : > { %v6202_v15 = vmul.f32 %v8739_v29, %v6148_v8  ;;  %v6203_v44 = vmul.f32 %v8745_v1, %v6149_v42  ;;  %v6204_v9 = vmul.f32 %v8747_v39, %v6148_v8  ;;  %v6205_v54 = vmul.f32 %v8749_v26, %v6149_v42 }
 0x96c   : > { %v6300_v60 = vunpack.c.l.b16 %v6233_v28  ;;  %v6301_v13 = vunpack.c.h.b16 %v6233_v28  ;;  %v6147_v56 = vunpack.c.l.bf16 %v6073_v14  ;;  %v6198_v25 = vmul.f32 %v8739_v29, %v6146_v41 }
 0x96d   : > { %v6248_v21 = vpack.c.bf16 %v6203_v44, %v6202_v15  ;;  %v6249_v22 = vpack.c.bf16 %v6205_v54, %v6204_v9  ;;  %v6230_v46 = vpack.c.bf16 %v6167_v59, %v6166_v49  ;;  %v6231_v3 = vpack.c.bf16 %v6169_v45, %v6168_v18 }
 0x96e   : > { %v6360_v32 = vpack.c.b16 %v6300_v60, %v6298_v57  ;;  %v6361_v12 = vpack.c.b16 %v6301_v13, %v6299_v33  ;;  %v6199_v52 = vmul.f32 %v8745_v1, %v6147_v56  ;;  %v6200_v7 = vmul.f32 %v8747_v39, %v6146_v41 }
 0x96f   : > { %v6330_v48 = vunpack.c.l.b16 %v6248_v21  ;;  %v6332_v50 = vunpack.c.l.b16 %v6249_v22  ;;  %v6331_v51 = vunpack.c.h.b16 %v6248_v21  ;;  %v6333_v4 = vunpack.c.h.b16 %v6249_v22 }
 0x970   : > { %6428 = vmatpush.bf16.msrb.mxu0 %v6360_v32  ;;  %6476 = vmatpush.bf16.msrb.mxu2 %v6361_v12  ;;  %v6201_v63 = vmul.f32 %v8749_v26, %v6147_v56  ;;  %v6294_v0 = vunpack.c.l.b16 %v6230_v46  ;;  %v6296_v40 = vunpack.c.l.b16 %v6231_v3  ;;  %v6246_v20 = vpack.c.bf16 %v6199_v52, %v6198_v25 }
 0x971   : > { %v6376_v38 = vpack.c.b16 %v6332_v50, %v6330_v48  ;;  %v6377_v31 = vpack.c.b16 %v6333_v4, %v6331_v51  ;;  %v6295_v29 = vunpack.c.h.b16 %v6230_v46  ;;  %v6297_v34 = vunpack.c.h.b16 %v6231_v3 }
 0x972   : > { %v6247_v36 = vpack.c.bf16 %v6201_v63, %v6200_v7  ;;  %v6358_v2 = vpack.c.b16 %v6296_v40, %v6294_v0  ;;  %v6326_v61 = vunpack.c.l.b16 %v6246_v20  ;;  %v6327_v27 = vunpack.c.h.b16 %v6246_v20 }
 0x973   : > { %6452 = vmatpush.bf16.msrb.mxu1 %v6376_v38  ;;  %6500 = vmatpush.bf16.msrb.mxu3 %v6377_v31  ;;  %v6359_v14 = vpack.c.b16 %v6297_v34, %v6295_v29 }
 0x974   : > { %v6328_v35 = vunpack.c.l.b16 %v6247_v36  ;;  %v6329_v1 = vunpack.c.h.b16 %v6247_v36  ;;  %6429 = vmatpush.bf16.msrb.mxu0 %v6358_v2 }
 0x975   : > { %6477 = vmatpush.bf16.msrb.mxu2 %v6359_v14 }
 0x976   : > { %v6374_v37 = vpack.c.b16 %v6328_v35, %v6326_v61  ;;  %v6375_v39 = vpack.c.b16 %v6329_v1, %v6327_v27 }
 0x977   : > { %6430 = vmatmul.bf16.vlgmr.msrb.gmra.mxu0 %v7310_v47 }
 0x978   : > { %6453 = vmatpush.bf16.msrb.mxu1 %v6374_v37  ;;  %6501 = vmatpush.bf16.msrb.mxu3 %v6375_v39 }
 0x979   : > { %6478 = vmatmul.bf16.vlgmr.msrb.gmra.mxu2 %v7310_v47  ;;  %v8869_v47 = vld [vmem:[%s8866_s28] ss:$8 sm:$0x3] }
 0x97b   : > { %6454 = vmatmul.bf16.vlgmr.msrb.gmra.mxu1 %v7316_v10  ;;  %6502 = vmatmul.bf16.vlgmr.msrb.gmra.mxu3 %v7316_v10  ;;  %v5837_v10 = vstv %s5836_s26 }
 0x987   : > { %6435 = vmatmul.bf16.gmra.mxu0 %v7320_v11 }
 0x989   : > { %6483 = vmatmul.bf16.gmra.mxu2 %v7320_v11  ;;  %v5838_v11 = vadd.f32 %v5837_v10, %v8869_v47 }
 0x98b   : > { %6459 = vmatmul.bf16.gmra.mxu1 %v7324_v16  ;;  %6507 = vmatmul.bf16.gmra.mxu3 %v7324_v16  ;;  %v5842_v16 = vperm.slane %v5838_v11, 0  ;;  %v5843_v58 = vperm.slane %v5838_v11, 1 }
 0x98d   : > { %v5848_v26 = vsub.f32 %v7154_v6, %v5842_v16  ;;  %v5847_v42 = vsub.f32 %v7152_v5, %v5843_v58  ;;  %v5849_v43 = vsub.f32 %v7154_v6, %v5843_v58 }
 0x98f   : > { %v5852_v8 = vand.u32 2147483647, %v5848_v26  ;;  %v5851_v44 = vand.u32 2147483647, %v5847_v42  ;;  %v5853_v9 = vand.u32 2147483647, %v5849_v43 }
 0x991   : > { %v5856_v28 = vsub.f32 1.0, %v5852_v8  ;;  %v5855_v21 = vsub.f32 1.0, %v5851_v44  ;;  %v5857_v6 = vsub.f32 1.0, %v5853_v9 }
 0x993   : > { %v8878_v60 = vmax.f32 %v5856_v28, 0.0  ;;  %v8882_v56 = vmax.f32 %v5855_v21, 0.0  ;;  %v8884_v48 = vmax.f32 %v5857_v6, 0.0 }
 0x997   : > { %6440 = vmatmul.bf16.gmra.mxu0 %v7328_v19 }
 0x999   : > { %6488 = vmatmul.bf16.gmra.mxu2 %v7328_v19  ;;  %v5846_v19 = vsub.f32 %v7152_v5, %v5842_v16 }
 0x99b   : > { %6464 = vmatmul.bf16.gmra.mxu1 %v7332_v23  ;;  %6512 = vmatmul.bf16.gmra.mxu3 %v7332_v23  ;;  %v5850_v17 = vand.u32 2147483647, %v5846_v19 }
 0x99d   : > { %v5854_v24 = vsub.f32 1.0, %v5850_v17 }
 0x99f   : > { %v8876_v57 = vmax.f32 %v5854_v24, 0.0 }
 0x9f4   : > { %v6431_v23 = vpop.f32.mrf.mxu0 }
 0x9f8   : > { %v6455_v55 = vpop.f32.mrf.mxu1 }
 0x9f9   : > { %v6456_v15 = vadd.f32 %v6455_v55, %v6431_v23 }
 0x9fb   : > { %v6518_v13 = vmul.f32 %v6456_v15, %v8876_v57 }
 0x9fc   : > { %v6479_v49 = vpop.f32.mrf.mxu2  ;;  %v6433_v41 = vpop.f32.mrf.mxu0 }
 0x9fe   : > { %v6503_v18 = vpop.f32.mrf.mxu3 }
 0x9ff   : > { %v6504_v59 = vadd.f32 %v6503_v18, %v6479_v49 }
 0xa00   : > { %v6457_v54 = vpop.f32.mrf.mxu1 }
 0xa01   : > { %v6458_v33 = vadd.f32 %v6457_v54, %v6433_v41  ;;  %v6519_v4 = vmul.f32 %v6504_v59, %v8882_v56 }
 0xa03   : > { %v6520_v5 = vmul.f32 %v6458_v33, %v8878_v60 }
 0xa04   : > { %v6481_v22 = vpop.f32.mrf.mxu2  ;;  %v6436_v12 = vpop.f32.mrf.mxu0 }
 0xa05   : > { %v6530_v45 = vadd.f32 %v6520_v5, %v6518_v13 }
 0xa06   : > { %v6505_v32 = vpop.f32.mrf.mxu3 }
 0xa07   : > { %v6531_v25 = vrot.slane %v6530_v45, 4  ;;  %v6506_v50 = vadd.f32 %v6505_v32, %v6481_v22 }
 0xa08   : > { %v6460_v51 = vpop.f32.mrf.mxu1 }
 0xa09   : > { %v6532_v46 = vadd.f32 %v6531_v25, %v6530_v45  ;;  %v6521_v3 = vmul.f32 %v6506_v50, %v8884_v48  ;;  %v6461_v20 = vadd.f32 %v6460_v51, %v6436_v12 }
 0xa0b   : > { %v6537_v52 = vadd.f32 %v6521_v3, %v6519_v4  ;;  %v6533_v38 = vrot.slane %v6532_v46, 2  ;;  %v6522_v27 = vmul.f32 %v6461_v20, %v8876_v57 }
 0xa0c   : > { %v6484_v31 = vpop.f32.mrf.mxu2  ;;  %v6438_v0 = vpop.f32.mrf.mxu0 }
 0xa0d   : > { %v6538_v7 = vrot.slane %v6537_v52, 4  ;;  %v6534_v29 = vadd.f32 %v6533_v38, %v6532_v46 }
 0xa0e   : > { %v6508_v63 = vpop.f32.mrf.mxu3 }
 0xa0f   : > { %v6539_v40 = vadd.f32 %v6538_v7, %v6537_v52  ;;  %v6535_v14 = vrot.slane %v6534_v29, 1  ;;  %v6509_v39 = vadd.f32 %v6508_v63, %v6484_v31 }
 0xa10   : > { %v6462_v36 = vpop.f32.mrf.mxu1 }
 0xa11   : > { %v6540_v34 = vrot.slane %v6539_v40, 2  ;;  %v6463_v2 = vadd.f32 %v6462_v36, %v6438_v0  ;;  %v6536_v58 = vadd.f32 %v6535_v14, %v6534_v29  ;;  %v6523_v8 = vmul.f32 %v6509_v39, %v8882_v56 }
 0xa13   : > { %v6541_v61 = vadd.f32 %v6540_v34, %v6539_v40  ;;  %v6524_v35 = vmul.f32 %v6463_v2, %v8878_v60 }
 0xa14   : > { %v6486_v1 = vpop.f32.mrf.mxu2  ;;  %v6441_v16 = vpop.f32.mrf.mxu0 }
 0xa15   : > { %v6542_v37 = vrot.slane %v6541_v61, 1  ;;  %v6544_v10 = vadd.f32 %v6524_v35, %v6522_v27 }
 0xa16   : > { %v6510_v11 = vpop.f32.mrf.mxu3 }
 0xa17   : > { %v6543_v19 = vadd.f32 %v6542_v37, %v6541_v61  ;;  %v6545_v26 = vrot.slane %v6544_v10, 4  ;;  %v6511_v23 = vadd.f32 %v6510_v11, %v6486_v1 }
 0xa18   : > { %v6465_v55 = vpop.f32.mrf.mxu1 }
 0xa19   : > { %v6574_v17 = vrot.slane %v6543_v19, 7  ;;  %v6546_v42 = vadd.f32 %v6545_v26, %v6544_v10  ;;  %v6525_v43 = vmul.f32 %v6511_v23, %v8884_v48  ;;  %v6466_v33 = vadd.f32 %v6465_v55, %v6441_v16 }
 0xa1b   : > { %v6575_v49 = vsel %vm264_vm1, %v6536_v58, %v6574_v17  ;;  %v6551_v24 = vadd.f32 %v6525_v43, %v6523_v8  ;;  %v6547_v18 = vrot.slane %v6546_v42, 2  ;;  %v6526_v59 = vmul.f32 %v6466_v33, %v8876_v57 }
 0xa1c   : > { %v6577_v28 = vadd.f32 %v6575_v49, %v8869_v47  ;;  %v6489_v41 = vpop.f32.mrf.mxu2  ;;  %v6443_v9 = vpop.f32.mrf.mxu0 }
 0xa1d   : > { %v6552_v15 = vrot.slane %v6551_v24, 4  ;;  %v6548_v13 = vadd.f32 %v6547_v18, %v6546_v42 }
 0xa1e   : > { %6578 = vst.msk [vmem:[%s8866_s28] ss:$8 sm:$0x3] %vm7366_vm5, %v6577_v28  ;;  %v6513_v44 = vpop.f32.mrf.mxu3 }
 0xa1f   : > { %v6553_v54 = vadd.f32 %v6552_v15, %v6551_v24  ;;  %v6549_v47 = vrot.slane %v6548_v13, 1  ;;  %v6514_v25 = vadd.f32 %v6513_v44, %v6489_v41 }
 0xa20   : > { %v6467_v21 = vpop.f32.mrf.mxu1 }
 0xa21   : > { %v6554_v5 = vrot.slane %v6553_v54, 2  ;;  %v6468_v6 = vadd.f32 %v6467_v21, %v6443_v9  ;;  %v6550_v52 = vadd.f32 %v6549_v47, %v6548_v13  ;;  %v6527_v31 = vmul.f32 %v6514_v25, %v8882_v56 }
 0xa23   : > { %v6555_v22 = vadd.f32 %v6554_v5, %v6553_v54  ;;  %v6528_v45 = vmul.f32 %v6468_v6, %v8878_v60 }
 0xa24   : > { %v6491_v32 = vpop.f32.mrf.mxu2 }
 0xa25   : > { %v6556_v12 = vrot.slane %v6555_v22, 1  ;;  %v6558_v50 = vadd.f32 %v6528_v45, %v6526_v59 }
 0xa26   : > { %v6515_v51 = vpop.f32.mrf.mxu3 }
 0xa27   : > { %v6557_v4 = vadd.f32 %v6556_v12, %v6555_v22  ;;  %v6559_v46 = vrot.slane %v6558_v50, 4  ;;  %v6516_v3 = vadd.f32 %v6515_v51, %v6491_v32 }
 0xa29   : > { %v6582_v38 = vrot.slane %v6557_v4, 7  ;;  %v6560_v7 = vadd.f32 %v6559_v46, %v6558_v50  ;;  %v6529_v63 = vmul.f32 %v6516_v3, %v8884_v48 }
 0xa2b   : > { %v6583_v57 = vsel %vm264_vm1, %v6550_v52, %v6582_v38  ;;  %v6565_v60 = vadd.f32 %v6529_v63, %v6527_v31  ;;  %v6561_v40 = vrot.slane %v6560_v7, 2 }
 0xa2c   : > { %v6585_v0 = vadd.f32 %v6583_v57, %v8704_v62 }
 0xa2d   : > { %v6566_v20 = vrot.slane %v6565_v60, 4  ;;  %v6562_v36 = vadd.f32 %v6561_v40, %v6560_v7 }
 0xa2e   : > { %6586 = vst.msk [vmem:[%s8698_s18] ss:$8 sm:$0x3] %vm7366_vm5, %v6585_v0 }
 0xa2f   : > { %v6567_v29 = vadd.f32 %v6566_v20, %v6565_v60  ;;  %v6563_v61 = vrot.slane %v6562_v36, 1 }
 0xa31   : > { %v6568_v34 = vrot.slane %v6567_v29, 2  ;;  %v6564_v35 = vadd.f32 %v6563_v61, %v6562_v36 }
 0xa33   : > { %v6569_v2 = vadd.f32 %v6568_v34, %v6567_v29 }
 0xa35   : > { %v6570_v56 = vrot.slane %v6569_v2, 1 }
 0xa37   : > { %v6571_v27 = vadd.f32 %v6570_v56, %v6569_v2 }
 0xa39   : > { %v6590_v48 = vrot.slane %v6571_v27, 7 }
 0xa3b   : > { %v6591_v14 = vsel %vm264_vm1, %v6564_v35, %v6590_v48 }
 0xa3c   : > { %v6593_v1 = vadd.f32 %v6591_v14, %v8707_v30 }
 0xa3e   : > { %6594 = vst.msk [vmem:[%s8701_s19] ss:$8 sm:$0x3] %vm7366_vm5, %v6593_v1 }
 0xa3f PF: > { %s11_s12 = sadd.s32 1, %s7029_s12   ;;  %s8936_s6 = smov %s7017_s9 }
 0xa40   : > { %p8_p9 = scmp.ge.s32.totalorder %s11_s12, 30   ;;  %s8937_s7 = smov %s7021_s10 }
 0xa41   : > { %s8938_s8 = smov %s7025_s11  ;;  %s8939_s9 = smov %s8943_s13 }
 0xa42   : > { %s8940_s10 = smov %s8947_s14  ;;  %s8941_s11 = smov %s8951_s15 }
 0xa43   :  { %10 = sbr.rel (!%p8_p9) target bundleno = 4 (0x4), region = 86 }

</bundles_post_ra>
